<compile_context>
chip_gen: v7x
topology: tpu7x:2x2x1
jax: 0.10.0
libtpu: 0.0.40
codegen_flags: <defaults>
</compile_context>

<pallas_src>
import math
from functools import partial

import jax
import jax.numpy as jnp
from jax import lax
from jax.experimental import pallas as pl
from jax.experimental.pallas import tpu as pltpu

_VMEM_LIMIT = 48 * 1024 * 1024


# -----------------------------------------------------------------------------
# In-kernel fused conv3x3('same') + folded-BN bias + ReLU + MaxPool2x2 ("wide")
# -----------------------------------------------------------------------------
def _conv_pool_wide(x_ref, w_ref, bias, *, S, Wh, L):
    """Pooled+ReLU feature map in the "wide" layout, shape (L, TNc) f32.

    x_ref:  (4*S, Cin) bf16 -- 2x2 space-to-depth parity planes of the zero-padded input.
            Plane pp = row_parity*2 + col_parity occupies rows [pp*S, (pp+1)*S), each
            flattened row-major over (Hh, Wh), Hh = Ho+2, Wh = Wo+1.
    w_ref:  (9, Cin, TNc) bf16 -- BN-scale-folded taps, tap index = dy*3 + dx.
    bias:   (1, TNc) f32 -- folded BN bias.
    Output rows j = ho*Wh + q; columns q < Wo valid, q == Wo junk (masked by callers).

    Taps are the OUTER loop so each RHS tile is loaded/pushed into the MXU once and
    streamed against the 4 pooling-phase LHS slices (4 f32 accumulators kept live).
    """
    accs = [None, None, None, None]
    for dy in range(3):
        for dx in range(3):
            w_tap = w_ref[dy * 3 + dx]                       # (Cin, TNc), one load per tap
            for py in range(2):                              # 2x2 pool phase (row)
                for px in range(2):                          # 2x2 pool phase (col)
                    rr, cc = py + dy, px + dx
                    pp = (rr & 1) * 2 + (cc & 1)             # parity plane
                    base = pp * S + (rr // 2) * Wh + (cc // 2)  # static offset
                    lhs = x_ref[pl.ds(base, L), :]           # (L, Cin) bf16, contiguous
                    part = jnp.dot(lhs, w_tap, preferred_element_type=jnp.float32)
                    ph = py * 2 + px
                    accs[ph] = part if accs[ph] is None else accs[ph] + part
    m = None
    for ph in range(4):
        y = accs[ph] + bias                                  # folded BN bias
        m = y if m is None else jnp.maximum(m, y)            # 2x2 max-pool
    return jnp.maximum(m, 0.0)                               # ReLU


def conv_block_kernel(x_ref, w_ref, b_ref, o_ref, *, S, Wh, L, Wo):
    feat = _conv_pool_wide(x_ref, w_ref, b_ref[...], S=S, Wh=Wh, L=L)
    # Zero the junk column (q == Wo) so it can serve as the next block's right zero-pad.
    q = lax.broadcasted_iota(jnp.int32, (L, 1), 0) % Wh
    feat = jnp.where(q < Wo, feat, 0.0)
    o_ref[...] = feat.astype(o_ref.dtype)


def conv_block1_kernel(x_ref, w_ref, b_ref, o_ref):
    """Block 1 (Cin=3): taps folded into a 32-deep contraction, one matmul per pool phase.

    x_ref: (4, L0, 32) bf16 -- per-phase im2col planes (27 tap*channel cols padded to 32).
    w_ref: (32, Cout) bf16; b_ref: (1, Cout) f32; o_ref: (L0, Cout).
    """
    w = w_ref[...]
    bias = b_ref[...]
    m = None
    for ph in range(4):
        y = jnp.dot(x_ref[ph], w, preferred_element_type=jnp.float32) + bias
        m = y if m is None else jnp.maximum(m, y)
    o_ref[...] = jnp.maximum(m, 0.0).astype(o_ref.dtype)


def conv_block_head_kernel(x_ref, w_ref, b_ref, fcw_ref, o_ref, *, S, Wh, L, Wo, inv_hw):
    """Last conv block fused with AdaptiveAvgPool2d(1) + Flatten + Dropout(eval) + Linear.

    Emits an independent FC partial per (Cout-tile, image) grid step (summed in XLA);
    the tiny FC contraction runs on the VPU instead of a wasted 1-row MXU push.
    """
    feat = _conv_pool_wide(x_ref, w_ref, b_ref[...], S=S, Wh=Wh, L=L)   # (L, TNc) f32
    q = lax.broadcasted_iota(jnp.int32, (L, 1), 0) % Wh
    valid = (q < Wo).astype(jnp.float32)
    pooled = jnp.sum(feat * valid, axis=0, keepdims=True) * inv_hw      # (1, TNc)
    # Dropout(p=0.5) is the identity at inference (model.eval()).
    # TODO(synk): training-mode stochastic dropout mask not implemented.
    part = jnp.sum(pooled * fcw_ref[...], axis=1)                        # (NC,) on VPU
    o_ref[...] = part.reshape(o_ref.shape)


# -----------------------------------------------------------------------------
# Wrapper-side layout glue (single fusible pad + space-to-depth per block)
# -----------------------------------------------------------------------------
def _space_to_depth_planes(x_nhwc):
    """NHWC (even H, W) -> parity planes (N, 4*S, C) of the zero-padded input + geometry."""
    N, H, W, C = x_nhwc.shape
    assert H % 2 == 0 and W % 2 == 0, "even spatial dims required"
    Ho, Wo = H // 2, W // 2
    Hh, Wh = Ho + 2, Wo + 1
    xp = jnp.pad(x_nhwc, ((0, 0), (1, 3), (1, 1), (0, 0)))              # (N, 2*Hh, 2*Wh, C)
    planes = (xp.reshape(N, Hh, 2, Wh, 2, C)
                .transpose(0, 2, 4, 1, 3, 5)
                .reshape(N, 4 * Hh * Wh, C))
    return planes, (Hh, Wh, Ho, Wo)


def _planes_from_wide(y_wide, Ho_prev, Wo_prev):
    """Wide (N, Ho_prev*(Wo_prev+1), C) output (junk col pre-zeroed) -> next block's planes.

    The zeroed junk column doubles as the right 'same'-padding column, so no slice pass
    is needed -- only a pad + one space-to-depth copy (single XLA fusion).
    """
    N, L, C = y_wide.shape
    Wh_prev = Wo_prev + 1
    assert L == Ho_prev * Wh_prev
    assert Ho_prev % 2 == 0 and Wo_prev % 2 == 0, "even spatial dims required"
    Ho, Wo = Ho_prev // 2, Wo_prev // 2
    Hh, Wh = Ho + 2, Wo + 1
    y4 = y_wide.reshape(N, Ho_prev, Wh_prev, C)
    yp = jnp.pad(y4, ((0, 0), (1, 3), (1, 0), (0, 0)))                  # (N, 2*Hh, 2*Wh, C)
    planes = (yp.reshape(N, Hh, 2, Wh, 2, C)
                .transpose(0, 2, 4, 1, 3, 5)
                .reshape(N, 4 * Hh * Wh, C))
    return planes, (Hh, Wh, Ho, Wo)


# -----------------------------------------------------------------------------
# pallas_call wrappers
# -----------------------------------------------------------------------------
def conv_block1(x_nhwc, w, bn_scale, bn_bias):
    """Block 1: conv3x3(Cin=3) -> folded BN -> ReLU -> MaxPool2x2, taps folded to depth 32."""
    N, H, W, Cin = x_nhwc.shape
    assert Cin == 3 and H % 2 == 0 and W % 2 == 0
    Cout = w.shape[-1]
    Ho, Wo = H // 2, W // 2
    L0 = Ho * Wo
    Kp = 32                                                   # 27 tap*channel cols -> 32
    xp = jnp.pad(x_nhwc, ((0, 0), (1, 1), (1, 1), (0, 0)))
    cols = [xp[:, dy:dy + H, dx:dx + W, :] for dy in range(3) for dx in range(3)]
    y = jnp.concatenate(cols, axis=-1)                        # (N, H, W, 27) mini-im2col
    y = jnp.pad(y, ((0, 0), (0, 0), (0, 0), (0, Kp - 27)))
    planes = (y.reshape(N, Ho, 2, Wo, 2, Kp)
                .transpose(0, 2, 4, 1, 3, 5)
                .reshape(N, 4, L0, Kp)).astype(jnp.bfloat16)  # per-pool-phase planes
    wf = (w * bn_scale).reshape(9 * 3, Cout)
    wf = jnp.pad(wf, ((0, Kp - 27), (0, 0))).astype(jnp.bfloat16)       # (32, Cout)
    bf = bn_bias.reshape(1, Cout).astype(jnp.float32)

    out = pl.pallas_call(
        conv_block1_kernel,
        out_shape=jax.ShapeDtypeStruct((N, L0, Cout), jnp.bfloat16),
        grid=(N,),
        in_specs=[
            pl.BlockSpec((None, 4, L0, Kp), lambda n: (n, 0, 0, 0)),
            pl.BlockSpec((Kp, Cout), lambda n: (0, 0)),
            pl.BlockSpec((1, Cout), lambda n: (0, 0)),
        ],
        out_specs=pl.BlockSpec((None, L0, Cout), lambda n: (n, 0, 0)),
        compiler_params=pltpu.CompilerParams(
            dimension_semantics=("parallel",),
            vmem_limit_bytes=_VMEM_LIMIT,
        ),
    )(planes, wf, bf)
    return out.reshape(N, Ho, Wo, Cout)                       # compact NHWC, bf16


def conv_block(planes, geom, w, bn_scale, bn_bias, *, cout_tile=256, weight_stationary=False):
    """conv3x3(same, bias=False) -> BN(eval, folded) -> ReLU -> MaxPool2x2 (wide output)."""
    Hh, Wh, Ho, Wo = geom
    N, _, Cin = planes.shape
    Cout = w.shape[-1]
    S, L = Hh * Wh, Ho * Wh
    wf = (w * bn_scale).reshape(9, Cin, Cout).astype(jnp.bfloat16)      # fold BN scale
    bf = bn_bias.reshape(1, Cout).astype(jnp.float32)
    tn = min(Cout, cout_tile)
    assert Cout % tn == 0 and tn >= min(Cout, 128)
    nj = Cout // tn

    if weight_stationary:
        # Deep blocks: Cout-tile axis OUTER so each weight tile is DMA'd once (not N times).
        grid = (nj, N)
        x_map = lambda j, n: (n, 0, 0)
        w_map = lambda j, n: (0, 0, j)
        b_map = lambda j, n: (0, j)
        o_map = lambda j, n: (n, 0, j)
    else:
        # Early blocks: activations dominate; batch axis outer.
        grid = (N, nj)
        x_map = lambda n, j: (n, 0, 0)
        w_map = lambda n, j: (0, 0, j)
        b_map = lambda n, j: (0, j)
        o_map = lambda n, j: (n, 0, j)

    out_wide = pl.pallas_call(
        partial(conv_block_kernel, S=S, Wh=Wh, L=L, Wo=Wo),
        out_shape=jax.ShapeDtypeStruct((N, L, Cout), jnp.bfloat16),
        grid=grid,
        in_specs=[
            pl.BlockSpec((None, 4 * S, Cin), x_map),
            pl.BlockSpec((9, Cin, tn), w_map),
            pl.BlockSpec((1, tn), b_map),
        ],
        out_specs=pl.BlockSpec((None, L, tn), o_map),
        compiler_params=pltpu.CompilerParams(
            dimension_semantics=("parallel", "parallel"),
            vmem_limit_bytes=_VMEM_LIMIT,
        ),
    )(planes, wf, bf)
    return out_wide                                            # (N, L, Cout), junk col zeroed


def conv_block_with_head(planes, geom, w, bn_scale, bn_bias, fc_w, fc_b, *, cout_tile=256):
    """Last conv block + AdaptiveAvgPool2d(1) + Flatten + Dropout(eval) + Linear, fused."""
    Hh, Wh, Ho, Wo = geom
    N, _, Cin = planes.shape
    Cout = w.shape[-1]
    NC = fc_w.shape[-1]
    S, L = Hh * Wh, Ho * Wh
    wf = (w * bn_scale).reshape(9, Cin, Cout).astype(jnp.bfloat16)
    bf = bn_bias.reshape(1, Cout).astype(jnp.float32)
    fcw_t = jnp.transpose(fc_w).astype(jnp.float32)            # (NC, Cout)
    tn = min(Cout, cout_tile)
    assert Cout % tn == 0
    nj = Cout // tn

    partials = pl.pallas_call(
        partial(conv_block_head_kernel, S=S, Wh=Wh, L=L, Wo=Wo, inv_hw=1.0 / float(Ho * Wo)),
        out_shape=jax.ShapeDtypeStruct((nj, N, 1, NC), jnp.float32),
        grid=(nj, N),   # weight tile resident across inner batch axis; both axes parallel
        in_specs=[
            pl.BlockSpec((None, 4 * S, Cin), lambda j, n: (n, 0, 0)),
            pl.BlockSpec((9, Cin, tn), lambda j, n: (0, 0, j)),
            pl.BlockSpec((1, tn), lambda j, n: (0, j)),
            pl.BlockSpec((NC, tn), lambda j, n: (0, j)),
        ],
        out_specs=pl.BlockSpec((1, None, 1, NC), lambda j, n: (j, n, 0, 0)),
        compiler_params=pltpu.CompilerParams(
            dimension_semantics=("parallel", "parallel"),
            vmem_limit_bytes=_VMEM_LIMIT,
        ),
    )(planes, wf, bf, fcw_t)
    # Sum per-Cout-tile FC partials (tiny) and add the FC bias once.
    return partials.sum(axis=0).reshape(N, NC) + fc_b.reshape(1, NC)


def custom_cnn_forward(x_nchw, params):
    N, C, H, W = x_nchw.shape
    assert H % 16 == 0 and W % 16 == 0, "spatial dims must be multiples of 16"
    x = jnp.transpose(x_nchw, (0, 2, 3, 1)).astype(jnp.bfloat16)         # NCHW -> NHWC
    (w1, s1, b1), (w2, s2, b2), (w3, s3, b3), (w4, s4, b4) = params["blocks"]

    y1 = conv_block1(x, w1, s1, b1)                                       # (N, H/2, W/2, 64)
    p2, g2 = _space_to_depth_planes(y1)
    yw2 = conv_block(p2, g2, w2, s2, b2, weight_stationary=False)         # activations dominate
    p3, g3 = _planes_from_wide(yw2, g2[2], g2[3])
    yw3 = conv_block(p3, g3, w3, s3, b3, weight_stationary=True)          # weights dominate
    p4, g4 = _planes_from_wide(yw3, g3[2], g3[3])
    return conv_block_with_head(p4, g4, w4, s4, b4, params["fc_w"], params["fc_b"])


# -----------------------------------------------------------------------------
# Deterministic parameter init (mirrors CustomCNN._initialize_weights, eval-mode BN)
# -----------------------------------------------------------------------------
def init_params(key, num_classes=1):
    chans = [3, 64, 128, 256, 512]
    eps = 1e-5
    blocks = []
    for i in range(4):
        key, k = jax.random.split(key)
        cin, cout = chans[i], chans[i + 1]
        std = math.sqrt(2.0 / (cout * 3 * 3))  # kaiming_normal_, fan_out, relu
        w = jax.random.normal(k, (3, 3, cin, cout), jnp.float32) * std    # HWIO
        # BN at init, eval mode: gamma=1, beta=0, running_mean=0, running_var=1
        scale = jnp.full((cout,), 1.0 / math.sqrt(1.0 + eps), jnp.float32)
        bias = jnp.zeros((cout,), jnp.float32)
        blocks.append((w, scale, bias))
    key, k = jax.random.split(key)
    fc_w = jax.random.normal(k, (512, num_classes), jnp.float32) * 0.01
    fc_b = jnp.zeros((num_classes,), jnp.float32)
    return {"blocks": blocks, "fc_w": fc_w, "fc_b": fc_b}


# -----------------------------------------------------------------------------
# Pure-JAX reference (same bf16 operand casts, f32 accumulation) for correctness
# -----------------------------------------------------------------------------
def reference_forward(x_nchw, params):
    x = jnp.transpose(x_nchw, (0, 2, 3, 1)).astype(jnp.bfloat16)
    y = None
    for (w, scale, bias) in params["blocks"]:
        wf = (w * scale).astype(jnp.bfloat16)
        y = lax.conv_general_dilated(
            x, wf, window_strides=(1, 1), padding="SAME",
            dimension_numbers=("NHWC", "HWIO", "NHWC"),
            preferred_element_type=jnp.float32,
        )
        y = jnp.maximum(y + bias, 0.0)
        y = lax.reduce_window(y, -jnp.inf, lax.max, (1, 2, 2, 1), (1, 2, 2, 1), "VALID")
        x = y.astype(jnp.bfloat16)
    pooled = jnp.mean(y, axis=(1, 2))
    return pooled @ params["fc_w"] + params["fc_b"]


# -----------------------------------------------------------------------------
if __name__ == "__main__":
    key = jax.random.PRNGKey(0)
    kx, kp = jax.random.split(key)
    # Small input consistent with the module: NCHW, 3 input channels, 16x16 spatial.
    x = jax.random.normal(kx, (2, 3, 16, 16), jnp.float32)
    params = init_params(kp, num_classes=1)

    out = jax.block_until_ready(jax.jit(custom_cnn_forward)(x, params))
    ref = jax.block_until_ready(reference_forward(x, params))

    assert out.shape == (2, 1), out.shape
    assert jnp.allclose(out, ref, atol=2e-2, rtol=2e-2), (out, ref)

    print("KERNEL_OK")
</pallas_src>

<mosaic_0001>
module attributes {stable_mosaic.version = 11 : i64} {
  func.func @conv_block1_kernel(%arg0: i32, %arg1: memref<1x4x64x32xbf16, #tpu.memory_space<vmem>>, %arg2: memref<32x64xbf16, #tpu.memory_space<vmem>>, %arg3: memref<1x64xf32, #tpu.memory_space<vmem>>, %arg4: memref<1x64x64xbf16, #tpu.memory_space<vmem>>) attributes {dimension_semantics = [#tpu.dimension_semantics<parallel>], iteration_bounds = array<i64: 2>, scalar_prefetch = 0 : i64, scratch_operands = 0 : i64, tpu.core_type = #tpu.core_type<tc>, window_params = [{transform_indices = @transform_0, window_bounds = array<i64: 1, 4, 64, 32>}, {pipeline_mode = #tpu.pipeline_mode<synchronous>, transform_indices = @transform_1, window_bounds = array<i64: 32, 64>}, {pipeline_mode = #tpu.pipeline_mode<synchronous>, transform_indices = @transform_2, window_bounds = array<i64: 1, 64>}, {transform_indices = @transform_3, window_bounds = array<i64: 1, 64, 64>}]} {
    %c0 = arith.constant 0 : index
    %c0_0 = arith.constant 0 : index
    %0 = vector.load %arg2[%c0, %c0_0] : memref<32x64xbf16, #tpu.memory_space<vmem>>, vector<32x64xbf16>
    %c0_1 = arith.constant 0 : index
    %c0_2 = arith.constant 0 : index
    %1 = vector.load %arg3[%c0_1, %c0_2] : memref<1x64xf32, #tpu.memory_space<vmem>>, vector<1x64xf32>
    %c0_3 = arith.constant 0 : index
    %c0_4 = arith.constant 0 : index
    %c0_5 = arith.constant 0 : index
    %c0_6 = arith.constant 0 : index
    %2 = vector.load %arg1[%c0_3, %c0_4, %c0_5, %c0_6] : memref<1x4x64x32xbf16, #tpu.memory_space<vmem>>, vector<1x1x64x32xbf16>
    %3 = vector.shape_cast %2 : vector<1x1x64x32xbf16> to vector<64x32xbf16>
    %cst = arith.constant dense<0.000000e+00> : vector<64x64xf32>
    %4 = tpu.matmul %3, %0, %cst {dimension_numbers = #tpu.dot_dimension_numbers<[1], [0], [0], [1], [0, 0, 1, 1], [], []>} : vector<64x32xbf16>, vector<32x64xbf16>, vector<64x64xf32> -> vector<64x64xf32>
    %5 = vector.broadcast %1 : vector<1x64xf32> to vector<64x64xf32>
    %6 = arith.addf %4, %5 : vector<64x64xf32>
    %c0_7 = arith.constant 0 : index
    %c1 = arith.constant 1 : index
    %c0_8 = arith.constant 0 : index
    %c0_9 = arith.constant 0 : index
    %7 = vector.load %arg1[%c0_7, %c1, %c0_8, %c0_9] : memref<1x4x64x32xbf16, #tpu.memory_space<vmem>>, vector<1x1x64x32xbf16>
    %8 = vector.shape_cast %7 : vector<1x1x64x32xbf16> to vector<64x32xbf16>
    %cst_10 = arith.constant dense<0.000000e+00> : vector<64x64xf32>
    %9 = tpu.matmul %8, %0, %cst_10 {dimension_numbers = #tpu.dot_dimension_numbers<[1], [0], [0], [1], [0, 0, 1, 1], [], []>} : vector<64x32xbf16>, vector<32x64xbf16>, vector<64x64xf32> -> vector<64x64xf32>
    %10 = vector.broadcast %1 : vector<1x64xf32> to vector<64x64xf32>
    %11 = arith.addf %9, %10 : vector<64x64xf32>
    %12 = arith.maximumf %6, %11 : vector<64x64xf32>
    %c0_11 = arith.constant 0 : index
    %c2 = arith.constant 2 : index
    %c0_12 = arith.constant 0 : index
    %c0_13 = arith.constant 0 : index
    %13 = vector.load %arg1[%c0_11, %c2, %c0_12, %c0_13] : memref<1x4x64x32xbf16, #tpu.memory_space<vmem>>, vector<1x1x64x32xbf16>
    %14 = vector.shape_cast %13 : vector<1x1x64x32xbf16> to vector<64x32xbf16>
    %cst_14 = arith.constant dense<0.000000e+00> : vector<64x64xf32>
    %15 = tpu.matmul %14, %0, %cst_14 {dimension_numbers = #tpu.dot_dimension_numbers<[1], [0], [0], [1], [0, 0, 1, 1], [], []>} : vector<64x32xbf16>, vector<32x64xbf16>, vector<64x64xf32> -> vector<64x64xf32>
    %16 = vector.broadcast %1 : vector<1x64xf32> to vector<64x64xf32>
    %17 = arith.addf %15, %16 : vector<64x64xf32>
    %18 = arith.maximumf %12, %17 : vector<64x64xf32>
    %c0_15 = arith.constant 0 : index
    %c3 = arith.constant 3 : index
    %c0_16 = arith.constant 0 : index
    %c0_17 = arith.constant 0 : index
    %19 = vector.load %arg1[%c0_15, %c3, %c0_16, %c0_17] : memref<1x4x64x32xbf16, #tpu.memory_space<vmem>>, vector<1x1x64x32xbf16>
    %20 = vector.shape_cast %19 : vector<1x1x64x32xbf16> to vector<64x32xbf16>
    %cst_18 = arith.constant dense<0.000000e+00> : vector<64x64xf32>
    %21 = tpu.matmul %20, %0, %cst_18 {dimension_numbers = #tpu.dot_dimension_numbers<[1], [0], [0], [1], [0, 0, 1, 1], [], []>} : vector<64x32xbf16>, vector<32x64xbf16>, vector<64x64xf32> -> vector<64x64xf32>
    %22 = vector.broadcast %1 : vector<1x64xf32> to vector<64x64xf32>
    %23 = arith.addf %21, %22 : vector<64x64xf32>
    %24 = arith.maximumf %18, %23 : vector<64x64xf32>
    %cst_19 = arith.constant 0.000000e+00 : f32
    %25 = vector.broadcast %cst_19 : f32 to vector<64x64xf32>
    %26 = arith.maximumf %24, %25 : vector<64x64xf32>
    %27 = arith.truncf %26 : vector<64x64xf32> to vector<64x64xbf16>
    %c0_20 = arith.constant 0 : index
    %c0_21 = arith.constant 0 : index
    %c0_22 = arith.constant 0 : index
    %28 = vector.load %arg4[%c0_20, %c0_21, %c0_22] : memref<1x64x64xbf16, #tpu.memory_space<vmem>>, vector<1x64x64xbf16>
    %29 = vector.shape_cast %28 : vector<1x64x64xbf16> to vector<64x64xbf16>
    %30 = vector.shape_cast %27 : vector<64x64xbf16> to vector<1x64x64xbf16>
    tpu.vector_store %arg4[%c0_20, %c0_21, %c0_22], %30 {strides = array<i32>} : memref<1x64x64xbf16, #tpu.memory_space<vmem>>, vector<1x64x64xbf16>,
    return
  }
  func.func @transform_0(%arg0: i32) -> (i32, i32, i32, i32) {
    %c0_i32 = arith.constant 0 : i32
    %c0_i32_0 = arith.constant 0 : i32
    %c0_i32_1 = arith.constant 0 : i32
    %c0_i32_2 = arith.constant 0 : i32
    return %arg0, %c0_i32, %c0_i32_0, %c0_i32_1 : i32, i32, i32, i32
  }
  func.func @transform_1(%arg0: i32) -> (i32, i32) {
    %c0_i32 = arith.constant 0 : i32
    %c0_i32_0 = arith.constant 0 : i32
    %c0_i32_1 = arith.constant 0 : i32
    return %c0_i32, %c0_i32_0 : i32, i32
  }
  func.func @transform_2(%arg0: i32) -> (i32, i32) {
    %c0_i32 = arith.constant 0 : i32
    %c0_i32_0 = arith.constant 0 : i32
    %c0_i32_1 = arith.constant 0 : i32
    return %c0_i32, %c0_i32_0 : i32, i32
  }
  func.func @transform_3(%arg0: i32) -> (i32, i32, i32) {
    %c0_i32 = arith.constant 0 : i32
    %c0_i32_0 = arith.constant 0 : i32
    %c0_i32_1 = arith.constant 0 : i32
    return %arg0, %c0_i32, %c0_i32_0 : i32, i32, i32
  }
}

module attributes {stable_mosaic.version = 11 : i64} {
  func.func @conv_block_kernel(%arg0: i32, %arg1: i32, %arg2: memref<1x120x64xbf16, #tpu.memory_space<vmem>>, %arg3: memref<9x64x128xbf16, #tpu.memory_space<vmem>>, %arg4: memref<1x128xf32, #tpu.memory_space<vmem>>, %arg5: memref<1x20x128xbf16, #tpu.memory_space<vmem>>) attributes {dimension_semantics = [#tpu.dimension_semantics<parallel>, #tpu.dimension_semantics<parallel>], iteration_bounds = array<i64: 2, 1>, scalar_prefetch = 0 : i64, scratch_operands = 0 : i64, tpu.core_type = #tpu.core_type<tc>, window_params = [{transform_indices = @transform_0, window_bounds = array<i64: 1, 120, 64>}, {transform_indices = @transform_1, window_bounds = array<i64: 9, 64, 128>}, {transform_indices = @transform_2, window_bounds = array<i64: 1, 128>}, {transform_indices = @transform_3, window_bounds = array<i64: 1, 20, 128>}]} {
    %c0 = arith.constant 0 : index
    %c0_0 = arith.constant 0 : index
    %0 = vector.load %arg4[%c0, %c0_0] : memref<1x128xf32, #tpu.memory_space<vmem>>, vector<1x128xf32>
    %c0_1 = arith.constant 0 : index
    %c0_2 = arith.constant 0 : index
    %c0_3 = arith.constant 0 : index
    %1 = vector.load %arg3[%c0_1, %c0_2, %c0_3] : memref<9x64x128xbf16, #tpu.memory_space<vmem>>, vector<1x64x128xbf16>
    %2 = vector.shape_cast %1 : vector<1x64x128xbf16> to vector<64x128xbf16>
    %c0_4 = arith.constant 0 : index
    %c0_5 = arith.constant 0 : index
    %c0_6 = arith.constant 0 : index
    %3 = vector.load %arg2[%c0_4, %c0_5, %c0_6] : memref<1x120x64xbf16, #tpu.memory_space<vmem>>, vector<1x20x64xbf16>
    %4 = vector.shape_cast %3 : vector<1x20x64xbf16> to vector<20x64xbf16>
    %cst = arith.constant dense<0.000000e+00> : vector<20x128xf32>
    %5 = tpu.matmul %4, %2, %cst {dimension_numbers = #tpu.dot_dimension_numbers<[1], [0], [0], [1], [0, 0, 1, 1], [], []>} : vector<20x64xbf16>, vector<64x128xbf16>, vector<20x128xf32> -> vector<20x128xf32>
    %c0_7 = arith.constant 0 : index
    %c30 = arith.constant 30 : index
    %c0_8 = arith.constant 0 : index
    %6 = vector.load %arg2[%c0_7, %c30, %c0_8] : memref<1x120x64xbf16, #tpu.memory_space<vmem>>, vector<1x20x64xbf16>
    %7 = vector.shape_cast %6 : vector<1x20x64xbf16> to vector<20x64xbf16>
    %cst_9 = arith.constant dense<0.000000e+00> : vector<20x128xf32>
    %8 = tpu.matmul %7, %2, %cst_9 {dimension_numbers = #tpu.dot_dimension_numbers<[1], [0], [0], [1], [0, 0, 1, 1], [], []>} : vector<20x64xbf16>, vector<64x128xbf16>, vector<20x128xf32> -> vector<20x128xf32>
    %c0_10 = arith.constant 0 : index
    %c60 = arith.constant 60 : index
    %c0_11 = arith.constant 0 : index
    %9 = vector.load %arg2[%c0_10, %c60, %c0_11] : memref<1x120x64xbf16, #tpu.memory_space<vmem>>, vector<1x20x64xbf16>
    %10 = vector.shape_cast %9 : vector<1x20x64xbf16> to vector<20x64xbf16>
    %cst_12 = arith.constant dense<0.000000e+00> : vector<20x128xf32>
    %11 = tpu.matmul %10, %2, %cst_12 {dimension_numbers = #tpu.dot_dimension_numbers<[1], [0], [0], [1], [0, 0, 1, 1], [], []>} : vector<20x64xbf16>, vector<64x128xbf16>, vector<20x128xf32> -> vector<20x128xf32>
    %c0_13 = arith.constant 0 : index
    %c90 = arith.constant 90 : index
    %c0_14 = arith.constant 0 : index
    %12 = vector.load %arg2[%c0_13, %c90, %c0_14] : memref<1x120x64xbf16, #tpu.memory_space<vmem>>, vector<1x20x64xbf16>
    %13 = vector.shape_cast %12 : vector<1x20x64xbf16> to vector<20x64xbf16>
    %cst_15 = arith.constant dense<0.000000e+00> : vector<20x128xf32>
    %14 = tpu.matmul %13, %2, %cst_15 {dimension_numbers = #tpu.dot_dimension_numbers<[1], [0], [0], [1], [0, 0, 1, 1], [], []>} : vector<20x64xbf16>, vector<64x128xbf16>, vector<20x128xf32> -> vector<20x128xf32>
    %c1 = arith.constant 1 : index
    %c0_16 = arith.constant 0 : index
    %c0_17 = arith.constant 0 : index
    %15 = vector.load %arg3[%c1, %c0_16, %c0_17] : memref<9x64x128xbf16, #tpu.memory_space<vmem>>, vector<1x64x128xbf16>
    %16 = vector.shape_cast %15 : vector<1x64x128xbf16> to vector<64x128xbf16>
    %c0_18 = arith.constant 0 : index
    %c30_19 = arith.constant 30 : index
    %c0_20 = arith.constant 0 : index
    %17 = vector.load %arg2[%c0_18, %c30_19, %c0_20] : memref<1x120x64xbf16, #tpu.memory_space<vmem>>, vector<1x20x64xbf16>
    %18 = vector.shape_cast %17 : vector<1x20x64xbf16> to vector<20x64xbf16>
    %cst_21 = arith.constant dense<0.000000e+00> : vector<20x128xf32>
    %19 = tpu.matmul %18, %16, %cst_21 {dimension_numbers = #tpu.dot_dimension_numbers<[1], [0], [0], [1], [0, 0, 1, 1], [], []>} : vector<20x64xbf16>, vector<64x128xbf16>, vector<20x128xf32> -> vector<20x128xf32>
    %20 = arith.addf %5, %19 : vector<20x128xf32>
    %c0_22 = arith.constant 0 : index
    %c1_23 = arith.constant 1 : index
    %c0_24 = arith.constant 0 : index
    %21 = vector.load %arg2[%c0_22, %c1_23, %c0_24] : memref<1x120x64xbf16, #tpu.memory_space<vmem>>, vector<1x20x64xbf16>
    %22 = vector.shape_cast %21 : vector<1x20x64xbf16> to vector<20x64xbf16>
    %cst_25 = arith.constant dense<0.000000e+00> : vector<20x128xf32>
    %23 = tpu.matmul %22, %16, %cst_25 {dimension_numbers = #tpu.dot_dimension_numbers<[1], [0], [0], [1], [0, 0, 1, 1], [], []>} : vector<20x64xbf16>, vector<64x128xbf16>, vector<20x128xf32> -> vector<20x128xf32>
    %24 = arith.addf %8, %23 : vector<20x128xf32>
    %c0_26 = arith.constant 0 : index
    %c90_27 = arith.constant 90 : index
    %c0_28 = arith.constant 0 : index
    %25 = vector.load %arg2[%c0_26, %c90_27, %c0_28] : memref<1x120x64xbf16, #tpu.memory_space<vmem>>, vector<1x20x64xbf16>
    %26 = vector.shape_cast %25 : vector<1x20x64xbf16> to vector<20x64xbf16>
    %cst_29 = arith.constant dense<0.000000e+00> : vector<20x128xf32>
    %27 = tpu.matmul %26, %16, %cst_29 {dimension_numbers = #tpu.dot_dimension_numbers<[1], [0], [0], [1], [0, 0, 1, 1], [], []>} : vector<20x64xbf16>, vector<64x128xbf16>, vector<20x128xf32> -> vector<20x128xf32>
    %28 = arith.addf %11, %27 : vector<20x128xf32>
    %c0_30 = arith.constant 0 : index
    %c61 = arith.constant 61 : index
    %c0_31 = arith.constant 0 : index
    %29 = vector.load %arg2[%c0_30, %c61, %c0_31] : memref<1x120x64xbf16, #tpu.memory_space<vmem>>, vector<1x20x64xbf16>
    %30 = vector.shape_cast %29 : vector<1x20x64xbf16> to vector<20x64xbf16>
    %cst_32 = arith.constant dense<0.000000e+00> : vector<20x128xf32>
    %31 = tpu.matmul %30, %16, %cst_32 {dimension_numbers = #tpu.dot_dimension_numbers<[1], [0], [0], [1], [0, 0, 1, 1], [], []>} : vector<20x64xbf16>, vector<64x128xbf16>, vector<20x128xf32> -> vector<20x128xf32>
    %32 = arith.addf %14, %31 : vector<20x128xf32>
    %c2 = arith.constant 2 : index
    %c0_33 = arith.constant 0 : index
    %c0_34 = arith.constant 0 : index
    %33 = vector.load %arg3[%c2, %c0_33, %c0_34] : memref<9x64x128xbf16, #tpu.memory_space<vmem>>, vector<1x64x128xbf16>
    %34 = vector.shape_cast %33 : vector<1x64x128xbf16> to vector<64x128xbf16>
    %c0_35 = arith.constant 0 : index
    %c1_36 = arith.constant 1 : index
    %c0_37 = arith.constant 0 : index
    %35 = vector.load %arg2[%c0_35, %c1_36, %c0_37] : memref<1x120x64xbf16, #tpu.memory_space<vmem>>, vector<1x20x64xbf16>
    %36 = vector.shape_cast %35 : vector<1x20x64xbf16> to vector<20x64xbf16>
    %cst_38 = arith.constant dense<0.000000e+00> : vector<20x128xf32>
    %37 = tpu.matmul %36, %34, %cst_38 {dimension_numbers = #tpu.dot_dimension_numbers<[1], [0], [0], [1], [0, 0, 1, 1], [], []>} : vector<20x64xbf16>, vector<64x128xbf16>, vector<20x128xf32> -> vector<20x128xf32>
    %38 = arith.addf %20, %37 : vector<20x128xf32>
    %c0_39 = arith.constant 0 : index
    %c31 = arith.constant 31 : index
    %c0_40 = arith.constant 0 : index
    %39 = vector.load %arg2[%c0_39, %c31, %c0_40] : memref<1x120x64xbf16, #tpu.memory_space<vmem>>, vector<1x20x64xbf16>
    %40 = vector.shape_cast %39 : vector<1x20x64xbf16> to vector<20x64xbf16>
    %cst_41 = arith.constant dense<0.000000e+00> : vector<20x128xf32>
    %41 = tpu.matmul %40, %34, %cst_41 {dimension_numbers = #tpu.dot_dimension_numbers<[1], [0], [0], [1], [0, 0, 1, 1], [], []>} : vector<20x64xbf16>, vector<64x128xbf16>, vector<20x128xf32> -> vector<20x128xf32>
    %42 = arith.addf %24, %41 : vector<20x128xf32>
    %c0_42 = arith.constant 0 : index
    %c61_43 = arith.constant 61 : index
    %c0_44 = arith.constant 0 : index
    %43 = vector.load %arg2[%c0_42, %c61_43, %c0_44] : memref<1x120x64xbf16, #tpu.memory_space<vmem>>, vector<1x20x64xbf16>
    %44 = vector.shape_cast %43 : vector<1x20x64xbf16> to vector<20x64xbf16>
    %cst_45 = arith.constant dense<0.000000e+00> : vector<20x128xf32>
    %45 = tpu.matmul %44, %34, %cst_45 {dimension_numbers = #tpu.dot_dimension_numbers<[1], [0], [0], [1], [0, 0, 1, 1], [], []>} : vector<20x64xbf16>, vector<64x128xbf16>, vector<20x128xf32> -> vector<20x128xf32>
    %46 = arith.addf %28, %45 : vector<20x128xf32>
    %c0_46 = arith.constant 0 : index
    %c91 = arith.constant 91 : index
    %c0_47 = arith.constant 0 : index
    %47 = vector.load %arg2[%c0_46, %c91, %c0_47] : memref<1x120x64xbf16, #tpu.memory_space<vmem>>, vector<1x20x64xbf16>
    %48 = vector.shape_cast %47 : vector<1x20x64xbf16> to vector<20x64xbf16>
    %cst_48 = arith.constant dense<0.000000e+00> : vector<20x128xf32>
    %49 = tpu.matmul %48, %34, %cst_48 {dimension_numbers = #tpu.dot_dimension_numbers<[1], [0], [0], [1], [0, 0, 1, 1], [], []>} : vector<20x64xbf16>, vector<64x128xbf16>, vector<20x128xf32> -> vector<20x128xf32>
    %50 = arith.addf %32, %49 : vector<20x128xf32>
    %c3 = arith.constant 3 : index
    %c0_49 = arith.constant 0 : index
    %c0_50 = arith.constant 0 : index
    %51 = vector.load %arg3[%c3, %c0_49, %c0_50] : memref<9x64x128xbf16, #tpu.memory_space<vmem>>, vector<1x64x128xbf16>
    %52 = vector.shape_cast %51 : vector<1x64x128xbf16> to vector<64x128xbf16>
    %c0_51 = arith.constant 0 : index
    %c60_52 = arith.constant 60 : index
    %c0_53 = arith.constant 0 : index
    %53 = vector.load %arg2[%c0_51, %c60_52, %c0_53] : memref<1x120x64xbf16, #tpu.memory_space<vmem>>, vector<1x20x64xbf16>
    %54 = vector.shape_cast %53 : vector<1x20x64xbf16> to vector<20x64xbf16>
    %cst_54 = arith.constant dense<0.000000e+00> : vector<20x128xf32>
    %55 = tpu.matmul %54, %52, %cst_54 {dimension_numbers = #tpu.dot_dimension_numbers<[1], [0], [0], [1], [0, 0, 1, 1], [], []>} : vector<20x64xbf16>, vector<64x128xbf16>, vector<20x128xf32> -> vector<20x128xf32>
    %56 = arith.addf %38, %55 : vector<20x128xf32>
    %c0_55 = arith.constant 0 : index
    %c90_56 = arith.constant 90 : index
    %c0_57 = arith.constant 0 : index
    %57 = vector.load %arg2[%c0_55, %c90_56, %c0_57] : memref<1x120x64xbf16, #tpu.memory_space<vmem>>, vector<1x20x64xbf16>
    %58 = vector.shape_cast %57 : vector<1x20x64xbf16> to vector<20x64xbf16>
    %cst_58 = arith.constant dense<0.000000e+00> : vector<20x128xf32>
    %59 = tpu.matmul %58, %52, %cst_58 {dimension_numbers = #tpu.dot_dimension_numbers<[1], [0], [0], [1], [0, 0, 1, 1], [], []>} : vector<20x64xbf16>, vector<64x128xbf16>, vector<20x128xf32> -> vector<20x128xf32>
    %60 = arith.addf %42, %59 : vector<20x128xf32>
    %c0_59 = arith.constant 0 : index
    %c5 = arith.constant 5 : index
    %c0_60 = arith.constant 0 : index
    %61 = vector.load %arg2[%c0_59, %c5, %c0_60] : memref<1x120x64xbf16, #tpu.memory_space<vmem>>, vector<1x20x64xbf16>
    %62 = vector.shape_cast %61 : vector<1x20x64xbf16> to vector<20x64xbf16>
    %cst_61 = arith.constant dense<0.000000e+00> : vector<20x128xf32>
    %63 = tpu.matmul %62, %52, %cst_61 {dimension_numbers = #tpu.dot_dimension_numbers<[1], [0], [0], [1], [0, 0, 1, 1], [], []>} : vector<20x64xbf16>, vector<64x128xbf16>, vector<20x128xf32> -> vector<20x128xf32>
    %64 = arith.addf %46, %63 : vector<20x128xf32>
    %c0_62 = arith.constant 0 : index
    %c35 = arith.constant 35 : index
    %c0_63 = arith.constant 0 : index
    %65 = vector.load %arg2[%c0_62, %c35, %c0_63] : memref<1x120x64xbf16, #tpu.memory_space<vmem>>, vector<1x20x64xbf16>
    %66 = vector.shape_cast %65 : vector<1x20x64xbf16> to vector<20x64xbf16>
    %cst_64 = arith.constant dense<0.000000e+00> : vector<20x128xf32>
    %67 = tpu.matmul %66, %52, %cst_64 {dimension_numbers = #tpu.dot_dimension_numbers<[1], [0], [0], [1], [0, 0, 1, 1], [], []>} : vector<20x64xbf16>, vector<64x128xbf16>, vector<20x128xf32> -> vector<20x128xf32>
    %68 = arith.addf %50, %67 : vector<20x128xf32>
    %c4 = arith.constant 4 : index
    %c0_65 = arith.constant 0 : index
    %c0_66 = arith.constant 0 : index
    %69 = vector.load %arg3[%c4, %c0_65, %c0_66] : memref<9x64x128xbf16, #tpu.memory_space<vmem>>, vector<1x64x128xbf16>
    %70 = vector.shape_cast %69 : vector<1x64x128xbf16> to vector<64x128xbf16>
    %c0_67 = arith.constant 0 : index
    %c90_68 = arith.constant 90 : index
    %c0_69 = arith.constant 0 : index
    %71 = vector.load %arg2[%c0_67, %c90_68, %c0_69] : memref<1x120x64xbf16, #tpu.memory_space<vmem>>, vector<1x20x64xbf16>
    %72 = vector.shape_cast %71 : vector<1x20x64xbf16> to vector<20x64xbf16>
    %cst_70 = arith.constant dense<0.000000e+00> : vector<20x128xf32>
    %73 = tpu.matmul %72, %70, %cst_70 {dimension_numbers = #tpu.dot_dimension_numbers<[1], [0], [0], [1], [0, 0, 1, 1], [], []>} : vector<20x64xbf16>, vector<64x128xbf16>, vector<20x128xf32> -> vector<20x128xf32>
    %74 = arith.addf %56, %73 : vector<20x128xf32>
    %c0_71 = arith.constant 0 : index
    %c61_72 = arith.constant 61 : index
    %c0_73 = arith.constant 0 : index
    %75 = vector.load %arg2[%c0_71, %c61_72, %c0_73] : memref<1x120x64xbf16, #tpu.memory_space<vmem>>, vector<1x20x64xbf16>
    %76 = vector.shape_cast %75 : vector<1x20x64xbf16> to vector<20x64xbf16>
    %cst_74 = arith.constant dense<0.000000e+00> : vector<20x128xf32>
    %77 = tpu.matmul %76, %70, %cst_74 {dimension_numbers = #tpu.dot_dimension_numbers<[1], [0], [0], [1], [0, 0, 1, 1], [], []>} : vector<20x64xbf16>, vector<64x128xbf16>, vector<20x128xf32> -> vector<20x128xf32>
    %78 = arith.addf %60, %77 : vector<20x128xf32>
    %c0_75 = arith.constant 0 : index
    %c35_76 = arith.constant 35 : index
    %c0_77 = arith.constant 0 : index
    %79 = vector.load %arg2[%c0_75, %c35_76, %c0_77] : memref<1x120x64xbf16, #tpu.memory_space<vmem>>, vector<1x20x64xbf16>
    %80 = vector.shape_cast %79 : vector<1x20x64xbf16> to vector<20x64xbf16>
    %cst_78 = arith.constant dense<0.000000e+00> : vector<20x128xf32>
    %81 = tpu.matmul %80, %70, %cst_78 {dimension_numbers = #tpu.dot_dimension_numbers<[1], [0], [0], [1], [0, 0, 1, 1], [], []>} : vector<20x64xbf16>, vector<64x128xbf16>, vector<20x128xf32> -> vector<20x128xf32>
    %82 = arith.addf %64, %81 : vector<20x128xf32>
    %c0_79 = arith.constant 0 : index
    %c6 = arith.constant 6 : index
    %c0_80 = arith.constant 0 : index
    %83 = vector.load %arg2[%c0_79, %c6, %c0_80] : memref<1x120x64xbf16, #tpu.memory_space<vmem>>, vector<1x20x64xbf16>
    %84 = vector.shape_cast %83 : vector<1x20x64xbf16> to vector<20x64xbf16>
    %cst_81 = arith.constant dense<0.000000e+00> : vector<20x128xf32>
    %85 = tpu.matmul %84, %70, %cst_81 {dimension_numbers = #tpu.dot_dimension_numbers<[1], [0], [0], [1], [0, 0, 1, 1], [], []>} : vector<20x64xbf16>, vector<64x128xbf16>, vector<20x128xf32> -> vector<20x128xf32>
    %86 = arith.addf %68, %85 : vector<20x128xf32>
    %c5_82 = arith.constant 5 : index
    %c0_83 = arith.constant 0 : index
    %c0_84 = arith.constant 0 : index
    %87 = vector.load %arg3[%c5_82, %c0_83, %c0_84] : memref<9x64x128xbf16, #tpu.memory_space<vmem>>, vector<1x64x128xbf16>
    %88 = vector.shape_cast %87 : vector<1x64x128xbf16> to vector<64x128xbf16>
    %c0_85 = arith.constant 0 : index
    %c61_86 = arith.constant 61 : index
    %c0_87 = arith.constant 0 : index
    %89 = vector.load %arg2[%c0_85, %c61_86, %c0_87] : memref<1x120x64xbf16, #tpu.memory_space<vmem>>, vector<1x20x64xbf16>
    %90 = vector.shape_cast %89 : vector<1x20x64xbf16> to vector<20x64xbf16>
    %cst_88 = arith.constant dense<0.000000e+00> : vector<20x128xf32>
    %91 = tpu.matmul %90, %88, %cst_88 {dimension_numbers = #tpu.dot_dimension_numbers<[1], [0], [0], [1], [0, 0, 1, 1], [], []>} : vector<20x64xbf16>, vector<64x128xbf16>, vector<20x128xf32> -> vector<20x128xf32>
    %92 = arith.addf %74, %91 : vector<20x128xf32>
    %c0_89 = arith.constant 0 : index
    %c91_90 = arith.constant 91 : index
    %c0_91 = arith.constant 0 : index
    %93 = vector.load %arg2[%c0_89, %c91_90, %c0_91] : memref<1x120x64xbf16, #tpu.memory_space<vmem>>, vector<1x20x64xbf16>
    %94 = vector.shape_cast %93 : vector<1x20x64xbf16> to vector<20x64xbf16>
    %cst_92 = arith.constant dense<0.000000e+00> : vector<20x128xf32>
    %95 = tpu.matmul %94, %88, %cst_92 {dimension_numbers = #tpu.dot_dimension_numbers<[1], [0], [0], [1], [0, 0, 1, 1], [], []>} : vector<20x64xbf16>, vector<64x128xbf16>, vector<20x128xf32> -> vector<20x128xf32>
    %96 = arith.addf %78, %95 : vector<20x128xf32>
    %c0_93 = arith.constant 0 : index
    %c6_94 = arith.constant 6 : index
    %c0_95 = arith.constant 0 : index
    %97 = vector.load %arg2[%c0_93, %c6_94, %c0_95] : memref<1x120x64xbf16, #tpu.memory_space<vmem>>, vector<1x20x64xbf16>
    %98 = vector.shape_cast %97 : vector<1x20x64xbf16> to vector<20x64xbf16>
    %cst_96 = arith.constant dense<0.000000e+00> : vector<20x128xf32>
    %99 = tpu.matmul %98, %88, %cst_96 {dimension_numbers = #tpu.dot_dimension_numbers<[1], [0], [0], [1], [0, 0, 1, 1], [], []>} : vector<20x64xbf16>, vector<64x128xbf16>, vector<20x128xf32> -> vector<20x128xf32>
    %100 = arith.addf %82, %99 : vector<20x128xf32>
    %c0_97 = arith.constant 0 : index
    %c36 = arith.constant 36 : index
    %c0_98 = arith.constant 0 : index
    %101 = vector.load %arg2[%c0_97, %c36, %c0_98] : memref<1x120x64xbf16, #tpu.memory_space<vmem>>, vector<1x20x64xbf16>
    %102 = vector.shape_cast %101 : vector<1x20x64xbf16> to vector<20x64xbf16>
    %cst_99 = arith.constant dense<0.000000e+00> : vector<20x128xf32>
    %103 = tpu.matmul %102, %88, %cst_99 {dimension_numbers = #tpu.dot_dimension_numbers<[1], [0], [0], [1], [0, 0, 1, 1], [], []>} : vector<20x64xbf16>, vector<64x128xbf16>, vector<20x128xf32> -> vector<20x128xf32>
    %104 = arith.addf %86, %103 : vector<20x128xf32>
    %c6_100 = arith.constant 6 : index
    %c0_101 = arith.constant 0 : index
    %c0_102 = arith.constant 0 : index
    %105 = vector.load %arg3[%c6_100, %c0_101, %c0_102] : memref<9x64x128xbf16, #tpu.memory_space<vmem>>, vector<1x64x128xbf16>
    %106 = vector.shape_cast %105 : vector<1x64x128xbf16> to vector<64x128xbf16>
    %c0_103 = arith.constant 0 : index
    %c5_104 = arith.constant 5 : index
    %c0_105 = arith.constant 0 : index
    %107 = vector.load %arg2[%c0_103, %c5_104, %c0_105] : memref<1x120x64xbf16, #tpu.memory_space<vmem>>, vector<1x20x64xbf16>
    %108 = vector.shape_cast %107 : vector<1x20x64xbf16> to vector<20x64xbf16>
    %cst_106 = arith.constant dense<0.000000e+00> : vector<20x128xf32>
    %109 = tpu.matmul %108, %106, %cst_106 {dimension_numbers = #tpu.dot_dimension_numbers<[1], [0], [0], [1], [0, 0, 1, 1], [], []>} : vector<20x64xbf16>, vector<64x128xbf16>, vector<20x128xf32> -> vector<20x128xf32>
    %110 = arith.addf %92, %109 : vector<20x128xf32>
    %c0_107 = arith.constant 0 : index
    %c35_108 = arith.constant 35 : index
    %c0_109 = arith.constant 0 : index
    %111 = vector.load %arg2[%c0_107, %c35_108, %c0_109] : memref<1x120x64xbf16, #tpu.memory_space<vmem>>, vector<1x20x64xbf16>
    %112 = vector.shape_cast %111 : vector<1x20x64xbf16> to vector<20x64xbf16>
    %cst_110 = arith.constant dense<0.000000e+00> : vector<20x128xf32>
    %113 = tpu.matmul %112, %106, %cst_110 {dimension_numbers = #tpu.dot_dimension_numbers<[1], [0], [0], [1], [0, 0, 1, 1], [], []>} : vector<20x64xbf16>, vector<64x128xbf16>, vector<20x128xf32> -> vector<20x128xf32>
    %114 = arith.addf %96, %113 : vector<20x128xf32>
    %c0_111 = arith.constant 0 : index
    %c65 = arith.constant 65 : index
    %c0_112 = arith.constant 0 : index
    %115 = vector.load %arg2[%c0_111, %c65, %c0_112] : memref<1x120x64xbf16, #tpu.memory_space<vmem>>, vector<1x20x64xbf16>
    %116 = vector.shape_cast %115 : vector<1x20x64xbf16> to vector<20x64xbf16>
    %cst_113 = arith.constant dense<0.000000e+00> : vector<20x128xf32>
    %117 = tpu.matmul %116, %106, %cst_113 {dimension_numbers = #tpu.dot_dimension_numbers<[1], [0], [0], [1], [0, 0, 1, 1], [], []>} : vector<20x64xbf16>, vector<64x128xbf16>, vector<20x128xf32> -> vector<20x128xf32>
    %118 = arith.addf %100, %117 : vector<20x128xf32>
    %c0_114 = arith.constant 0 : index
    %c95 = arith.constant 95 : index
    %c0_115 = arith.constant 0 : index
    %119 = vector.load %arg2[%c0_114, %c95, %c0_115] : memref<1x120x64xbf16, #tpu.memory_space<vmem>>, vector<1x20x64xbf16>
    %120 = vector.shape_cast %119 : vector<1x20x64xbf16> to vector<20x64xbf16>
    %cst_116 = arith.constant dense<0.000000e+00> : vector<20x128xf32>
    %121 = tpu.matmul %120, %106, %cst_116 {dimension_numbers = #tpu.dot_dimension_numbers<[1], [0], [0], [1], [0, 0, 1, 1], [], []>} : vector<20x64xbf16>, vector<64x128xbf16>, vector<20x128xf32> -> vector<20x128xf32>
    %122 = arith.addf %104, %121 : vector<20x128xf32>
    %c7 = arith.constant 7 : index
    %c0_117 = arith.constant 0 : index
    %c0_118 = arith.constant 0 : index
    %123 = vector.load %arg3[%c7, %c0_117, %c0_118] : memref<9x64x128xbf16, #tpu.memory_space<vmem>>, vector<1x64x128xbf16>
    %124 = vector.shape_cast %123 : vector<1x64x128xbf16> to vector<64x128xbf16>
    %c0_119 = arith.constant 0 : index
    %c35_120 = arith.constant 35 : index
    %c0_121 = arith.constant 0 : index
    %125 = vector.load %arg2[%c0_119, %c35_120, %c0_121] : memref<1x120x64xbf16, #tpu.memory_space<vmem>>, vector<1x20x64xbf16>
    %126 = vector.shape_cast %125 : vector<1x20x64xbf16> to vector<20x64xbf16>
    %cst_122 = arith.constant dense<0.000000e+00> : vector<20x128xf32>
    %127 = tpu.matmul %126, %124, %cst_122 {dimension_numbers = #tpu.dot_dimension_numbers<[1], [0], [0], [1], [0, 0, 1, 1], [], []>} : vector<20x64xbf16>, vector<64x128xbf16>, vector<20x128xf32> -> vector<20x128xf32>
    %128 = arith.addf %110, %127 : vector<20x128xf32>
    %c0_123 = arith.constant 0 : index
    %c6_124 = arith.constant 6 : index
    %c0_125 = arith.constant 0 : index
    %129 = vector.load %arg2[%c0_123, %c6_124, %c0_125] : memref<1x120x64xbf16, #tpu.memory_space<vmem>>, vector<1x20x64xbf16>
    %130 = vector.shape_cast %129 : vector<1x20x64xbf16> to vector<20x64xbf16>
    %cst_126 = arith.constant dense<0.000000e+00> : vector<20x128xf32>
    %131 = tpu.matmul %130, %124, %cst_126 {dimension_numbers = #tpu.dot_dimension_numbers<[1], [0], [0], [1], [0, 0, 1, 1], [], []>} : vector<20x64xbf16>, vector<64x128xbf16>, vector<20x128xf32> -> vector<20x128xf32>
    %132 = arith.addf %114, %131 : vector<20x128xf32>
    %c0_127 = arith.constant 0 : index
    %c95_128 = arith.constant 95 : index
    %c0_129 = arith.constant 0 : index
    %133 = vector.load %arg2[%c0_127, %c95_128, %c0_129] : memref<1x120x64xbf16, #tpu.memory_space<vmem>>, vector<1x20x64xbf16>
    %134 = vector.shape_cast %133 : vector<1x20x64xbf16> to vector<20x64xbf16>
    %cst_130 = arith.constant dense<0.000000e+00> : vector<20x128xf32>
    %135 = tpu.matmul %134, %124, %cst_130 {dimension_numbers = #tpu.dot_dimension_numbers<[1], [0], [0], [1], [0, 0, 1, 1], [], []>} : vector<20x64xbf16>, vector<64x128xbf16>, vector<20x128xf32> -> vector<20x128xf32>
    %136 = arith.addf %118, %135 : vector<20x128xf32>
    %c0_131 = arith.constant 0 : index
    %c66 = arith.constant 66 : index
    %c0_132 = arith.constant 0 : index
    %137 = vector.load %arg2[%c0_131, %c66, %c0_132] : memref<1x120x64xbf16, #tpu.memory_space<vmem>>, vector<1x20x64xbf16>
    %138 = vector.shape_cast %137 : vector<1x20x64xbf16> to vector<20x64xbf16>
    %cst_133 = arith.constant dense<0.000000e+00> : vector<20x128xf32>
    %139 = tpu.matmul %138, %124, %cst_133 {dimension_numbers = #tpu.dot_dimension_numbers<[1], [0], [0], [1], [0, 0, 1, 1], [], []>} : vector<20x64xbf16>, vector<64x128xbf16>, vector<20x128xf32> -> vector<20x128xf32>
    %140 = arith.addf %122, %139 : vector<20x128xf32>
    %c8 = arith.constant 8 : index
    %c0_134 = arith.constant 0 : index
    %c0_135 = arith.constant 0 : index
    %141 = vector.load %arg3[%c8, %c0_134, %c0_135] : memref<9x64x128xbf16, #tpu.memory_space<vmem>>, vector<1x64x128xbf16>
    %142 = vector.shape_cast %141 : vector<1x64x128xbf16> to vector<64x128xbf16>
    %c0_136 = arith.constant 0 : index
    %c6_137 = arith.constant 6 : index
    %c0_138 = arith.constant 0 : index
    %143 = vector.load %arg2[%c0_136, %c6_137, %c0_138] : memref<1x120x64xbf16, #tpu.memory_space<vmem>>, vector<1x20x64xbf16>
    %144 = vector.shape_cast %143 : vector<1x20x64xbf16> to vector<20x64xbf16>
    %cst_139 = arith.constant dense<0.000000e+00> : vector<20x128xf32>
    %145 = tpu.matmul %144, %142, %cst_139 {dimension_numbers = #tpu.dot_dimension_numbers<[1], [0], [0], [1], [0, 0, 1, 1], [], []>} : vector<20x64xbf16>, vector<64x128xbf16>, vector<20x128xf32> -> vector<20x128xf32>
    %146 = arith.addf %128, %145 : vector<20x128xf32>
    %c0_140 = arith.constant 0 : index
    %c36_141 = arith.constant 36 : index
    %c0_142 = arith.constant 0 : index
    %147 = vector.load %arg2[%c0_140, %c36_141, %c0_142] : memref<1x120x64xbf16, #tpu.memory_space<vmem>>, vector<1x20x64xbf16>
    %148 = vector.shape_cast %147 : vector<1x20x64xbf16> to vector<20x64xbf16>
    %cst_143 = arith.constant dense<0.000000e+00> : vector<20x128xf32>
    %149 = tpu.matmul %148, %142, %cst_143 {dimension_numbers = #tpu.dot_dimension_numbers<[1], [0], [0], [1], [0, 0, 1, 1], [], []>} : vector<20x64xbf16>, vector<64x128xbf16>, vector<20x128xf32> -> vector<20x128xf32>
    %150 = arith.addf %132, %149 : vector<20x128xf32>
    %c0_144 = arith.constant 0 : index
    %c66_145 = arith.constant 66 : index
    %c0_146 = arith.constant 0 : index
    %151 = vector.load %arg2[%c0_144, %c66_145, %c0_146] : memref<1x120x64xbf16, #tpu.memory_space<vmem>>, vector<1x20x64xbf16>
    %152 = vector.shape_cast %151 : vector<1x20x64xbf16> to vector<20x64xbf16>
    %cst_147 = arith.constant dense<0.000000e+00> : vector<20x128xf32>
    %153 = tpu.matmul %152, %142, %cst_147 {dimension_numbers = #tpu.dot_dimension_numbers<[1], [0], [0], [1], [0, 0, 1, 1], [], []>} : vector<20x64xbf16>, vector<64x128xbf16>, vector<20x128xf32> -> vector<20x128xf32>
    %154 = arith.addf %136, %153 : vector<20x128xf32>
    %c0_148 = arith.constant 0 : index
    %c96 = arith.constant 96 : index
    %c0_149 = arith.constant 0 : index
    %155 = vector.load %arg2[%c0_148, %c96, %c0_149] : memref<1x120x64xbf16, #tpu.memory_space<vmem>>, vector<1x20x64xbf16>
    %156 = vector.shape_cast %155 : vector<1x20x64xbf16> to vector<20x64xbf16>
    %cst_150 = arith.constant dense<0.000000e+00> : vector<20x128xf32>
    %157 = tpu.matmul %156, %142, %cst_150 {dimension_numbers = #tpu.dot_dimension_numbers<[1], [0], [0], [1], [0, 0, 1, 1], [], []>} : vector<20x64xbf16>, vector<64x128xbf16>, vector<20x128xf32> -> vector<20x128xf32>
    %158 = arith.addf %140, %157 : vector<20x128xf32>
    %159 = vector.broadcast %0 : vector<1x128xf32> to vector<20x128xf32>
    %160 = arith.addf %146, %159 : vector<20x128xf32>
    %161 = vector.broadcast %0 : vector<1x128xf32> to vector<20x128xf32>
    %162 = arith.addf %150, %161 : vector<20x128xf32>
    %163 = arith.maximumf %160, %162 : vector<20x128xf32>
    %164 = vector.broadcast %0 : vector<1x128xf32> to vector<20x128xf32>
    %165 = arith.addf %154, %164 : vector<20x128xf32>
    %166 = arith.maximumf %163, %165 : vector<20x128xf32>
    %167 = vector.broadcast %0 : vector<1x128xf32> to vector<20x128xf32>
    %168 = arith.addf %158, %167 : vector<20x128xf32>
    %169 = arith.maximumf %166, %168 : vector<20x128xf32>
    %cst_151 = arith.constant 0.000000e+00 : f32
    %170 = vector.broadcast %cst_151 : f32 to vector<20x128xf32>
    %171 = arith.maximumf %169, %170 : vector<20x128xf32>
    %172 = tpu.iota {dimensions = array<i32: 0>} : vector<20x1xi32>
    %c5_i32 = arith.constant 5 : i32
    %c0_i32 = arith.constant 0 : i32
    %173 = arith.cmpi eq, %c5_i32, %c0_i32 : i32
    %c1_i32 = arith.constant 1 : i32
    %174 = arith.select %173, %c1_i32, %c5_i32 : i32
    %175 = vector.broadcast %174 : i32 to vector<20x1xi32>
    %176 = arith.remsi %172, %175 : vector<20x1xi32>
    %c0_i32_152 = arith.constant 0 : i32
    %177 = vector.broadcast %c0_i32_152 : i32 to vector<20x1xi32>
    %178 = arith.cmpi ne, %176, %177 : vector<20x1xi32>
    %c0_i32_153 = arith.constant 0 : i32
    %179 = vector.broadcast %c0_i32_153 : i32 to vector<20x1xi32>
    %180 = arith.cmpi slt, %176, %179 : vector<20x1xi32>
    %c0_i32_154 = arith.constant 0 : i32
    %181 = arith.cmpi slt, %174, %c0_i32_154 : i32
    %182 = vector.broadcast %181 : i1 to vector<20x1xi1>
    %183 = vector.broadcast %182 : vector<20x1xi1> to vector<20x1xi1>
    %184 = arith.xori %180, %183 : vector<20x1xi1>
    %185 = arith.andi %184, %178 : vector<20x1xi1>
    %186 = vector.broadcast %174 : i32 to vector<20x1xi32>
    %187 = arith.addi %176, %186 : vector<20x1xi32>
    %188 = arith.select %185, %187, %176 : vector<20x1xi1>, vector<20x1xi32>
    %c4_i32 = arith.constant 4 : i32
    %189 = vector.broadcast %c4_i32 : i32 to vector<20x1xi32>
    %190 = arith.cmpi slt, %188, %189 : vector<20x1xi32>
    %cst_155 = arith.constant 0.000000e+00 : f32
    %191 = vector.shape_cast %190 : vector<20x1xi1> to vector<20x1xi1>
    %192 = vector.broadcast %191 : vector<20x1xi1> to vector<20x128xi1>
    %193 = vector.broadcast %cst_155 : f32 to vector<20x128xf32>
    %194 = arith.select %192, %171, %193 : vector<20x128xi1>, vector<20x128xf32>
    %195 = arith.truncf %194 : vector<20x128xf32> to vector<20x128xbf16>
    %c0_156 = arith.constant 0 : index
    %c0_157 = arith.constant 0 : index
    %c0_158 = arith.constant 0 : index
    %196 = vector.load %arg5[%c0_156, %c0_157, %c0_158] : memref<1x20x128xbf16, #tpu.memory_space<vmem>>, vector<1x20x128xbf16>
    %197 = vector.shape_cast %196 : vector<1x20x128xbf16> to vector<20x128xbf16>
    %198 = vector.shape_cast %195 : vector<20x128xbf16> to vector<1x20x128xbf16>
    tpu.vector_store %arg5[%c0_156, %c0_157, %c0_158], %198 {strides = array<i32>} : memref<1x20x128xbf16, #tpu.memory_space<vmem>>, vector<1x20x128xbf16>,
    return
  }
  func.func @transform_0(%arg0: i32, %arg1: i32) -> (i32, i32, i32) {
    %c0_i32 = arith.constant 0 : i32
    %c0_i32_0 = arith.constant 0 : i32
    %c0_i32_1 = arith.constant 0 : i32
    return %arg0, %c0_i32, %c0_i32_0 : i32, i32, i32
  }
  func.func @transform_1(%arg0: i32, %arg1: i32) -> (i32, i32, i32) {
    %c0_i32 = arith.constant 0 : i32
    %c0_i32_0 = arith.constant 0 : i32
    %c0_i32_1 = arith.constant 0 : i32
    return %c0_i32, %c0_i32_0, %arg1 : i32, i32, i32
  }
  func.func @transform_2(%arg0: i32, %arg1: i32) -> (i32, i32) {
    %c0_i32 = arith.constant 0 : i32
    %c0_i32_0 = arith.constant 0 : i32
    return %c0_i32, %arg1 : i32, i32
  }
  func.func @transform_3(%arg0: i32, %arg1: i32) -> (i32, i32, i32) {
    %c0_i32 = arith.constant 0 : i32
    %c0_i32_0 = arith.constant 0 : i32
    return %arg0, %c0_i32, %arg1 : i32, i32, i32
  }
}

module attributes {stable_mosaic.version = 11 : i64} {
  func.func @conv_block_kernel(%arg0: i32, %arg1: i32, %arg2: memref<1x48x128xbf16, #tpu.memory_space<vmem>>, %arg3: memref<9x128x256xbf16, #tpu.memory_space<vmem>>, %arg4: memref<1x256xf32, #tpu.memory_space<vmem>>, %arg5: memref<1x6x256xbf16, #tpu.memory_space<vmem>>) attributes {dimension_semantics = [#tpu.dimension_semantics<parallel>, #tpu.dimension_semantics<parallel>], iteration_bounds = array<i64: 1, 2>, scalar_prefetch = 0 : i64, scratch_operands = 0 : i64, tpu.core_type = #tpu.core_type<tc>, window_params = [{transform_indices = @transform_0, window_bounds = array<i64: 1, 48, 128>}, {transform_indices = @transform_1, window_bounds = array<i64: 9, 128, 256>}, {transform_indices = @transform_2, window_bounds = array<i64: 1, 256>}, {transform_indices = @transform_3, window_bounds = array<i64: 1, 6, 256>}]} {
    %c0 = arith.constant 0 : index
    %c0_0 = arith.constant 0 : index
    %0 = vector.load %arg4[%c0, %c0_0] : memref<1x256xf32, #tpu.memory_space<vmem>>, vector<1x256xf32>
    %c0_1 = arith.constant 0 : index
    %c0_2 = arith.constant 0 : index
    %c0_3 = arith.constant 0 : index
    %1 = vector.load %arg3[%c0_1, %c0_2, %c0_3] : memref<9x128x256xbf16, #tpu.memory_space<vmem>>, vector<1x128x256xbf16>
    %2 = vector.shape_cast %1 : vector<1x128x256xbf16> to vector<128x256xbf16>
    %c0_4 = arith.constant 0 : index
    %c0_5 = arith.constant 0 : index
    %c0_6 = arith.constant 0 : index
    %3 = vector.load %arg2[%c0_4, %c0_5, %c0_6] : memref<1x48x128xbf16, #tpu.memory_space<vmem>>, vector<1x6x128xbf16>
    %4 = vector.shape_cast %3 : vector<1x6x128xbf16> to vector<6x128xbf16>
    %cst = arith.constant dense<0.000000e+00> : vector<6x256xf32>
    %5 = tpu.matmul %4, %2, %cst {dimension_numbers = #tpu.dot_dimension_numbers<[1], [0], [0], [1], [0, 0, 1, 1], [], []>} : vector<6x128xbf16>, vector<128x256xbf16>, vector<6x256xf32> -> vector<6x256xf32>
    %c0_7 = arith.constant 0 : index
    %c12 = arith.constant 12 : index
    %c0_8 = arith.constant 0 : index
    %6 = vector.load %arg2[%c0_7, %c12, %c0_8] : memref<1x48x128xbf16, #tpu.memory_space<vmem>>, vector<1x6x128xbf16>
    %7 = vector.shape_cast %6 : vector<1x6x128xbf16> to vector<6x128xbf16>
    %cst_9 = arith.constant dense<0.000000e+00> : vector<6x256xf32>
    %8 = tpu.matmul %7, %2, %cst_9 {dimension_numbers = #tpu.dot_dimension_numbers<[1], [0], [0], [1], [0, 0, 1, 1], [], []>} : vector<6x128xbf16>, vector<128x256xbf16>, vector<6x256xf32> -> vector<6x256xf32>
    %c0_10 = arith.constant 0 : index
    %c24 = arith.constant 24 : index
    %c0_11 = arith.constant 0 : index
    %9 = vector.load %arg2[%c0_10, %c24, %c0_11] : memref<1x48x128xbf16, #tpu.memory_space<vmem>>, vector<1x6x128xbf16>
    %10 = vector.shape_cast %9 : vector<1x6x128xbf16> to vector<6x128xbf16>
    %cst_12 = arith.constant dense<0.000000e+00> : vector<6x256xf32>
    %11 = tpu.matmul %10, %2, %cst_12 {dimension_numbers = #tpu.dot_dimension_numbers<[1], [0], [0], [1], [0, 0, 1, 1], [], []>} : vector<6x128xbf16>, vector<128x256xbf16>, vector<6x256xf32> -> vector<6x256xf32>
    %c0_13 = arith.constant 0 : index
    %c36 = arith.constant 36 : index
    %c0_14 = arith.constant 0 : index
    %12 = vector.load %arg2[%c0_13, %c36, %c0_14] : memref<1x48x128xbf16, #tpu.memory_space<vmem>>, vector<1x6x128xbf16>
    %13 = vector.shape_cast %12 : vector<1x6x128xbf16> to vector<6x128xbf16>
    %cst_15 = arith.constant dense<0.000000e+00> : vector<6x256xf32>
    %14 = tpu.matmul %13, %2, %cst_15 {dimension_numbers = #tpu.dot_dimension_numbers<[1], [0], [0], [1], [0, 0, 1, 1], [], []>} : vector<6x128xbf16>, vector<128x256xbf16>, vector<6x256xf32> -> vector<6x256xf32>
    %c1 = arith.constant 1 : index
    %c0_16 = arith.constant 0 : index
    %c0_17 = arith.constant 0 : index
    %15 = vector.load %arg3[%c1, %c0_16, %c0_17] : memref<9x128x256xbf16, #tpu.memory_space<vmem>>, vector<1x128x256xbf16>
    %16 = vector.shape_cast %15 : vector<1x128x256xbf16> to vector<128x256xbf16>
    %c0_18 = arith.constant 0 : index
    %c12_19 = arith.constant 12 : index
    %c0_20 = arith.constant 0 : index
    %17 = vector.load %arg2[%c0_18, %c12_19, %c0_20] : memref<1x48x128xbf16, #tpu.memory_space<vmem>>, vector<1x6x128xbf16>
    %18 = vector.shape_cast %17 : vector<1x6x128xbf16> to vector<6x128xbf16>
    %cst_21 = arith.constant dense<0.000000e+00> : vector<6x256xf32>
    %19 = tpu.matmul %18, %16, %cst_21 {dimension_numbers = #tpu.dot_dimension_numbers<[1], [0], [0], [1], [0, 0, 1, 1], [], []>} : vector<6x128xbf16>, vector<128x256xbf16>, vector<6x256xf32> -> vector<6x256xf32>
    %20 = arith.addf %5, %19 : vector<6x256xf32>
    %c0_22 = arith.constant 0 : index
    %c1_23 = arith.constant 1 : index
    %c0_24 = arith.constant 0 : index
    %21 = vector.load %arg2[%c0_22, %c1_23, %c0_24] : memref<1x48x128xbf16, #tpu.memory_space<vmem>>, vector<1x6x128xbf16>
    %22 = vector.shape_cast %21 : vector<1x6x128xbf16> to vector<6x128xbf16>
    %cst_25 = arith.constant dense<0.000000e+00> : vector<6x256xf32>
    %23 = tpu.matmul %22, %16, %cst_25 {dimension_numbers = #tpu.dot_dimension_numbers<[1], [0], [0], [1], [0, 0, 1, 1], [], []>} : vector<6x128xbf16>, vector<128x256xbf16>, vector<6x256xf32> -> vector<6x256xf32>
    %24 = arith.addf %8, %23 : vector<6x256xf32>
    %c0_26 = arith.constant 0 : index
    %c36_27 = arith.constant 36 : index
    %c0_28 = arith.constant 0 : index
    %25 = vector.load %arg2[%c0_26, %c36_27, %c0_28] : memref<1x48x128xbf16, #tpu.memory_space<vmem>>, vector<1x6x128xbf16>
    %26 = vector.shape_cast %25 : vector<1x6x128xbf16> to vector<6x128xbf16>
    %cst_29 = arith.constant dense<0.000000e+00> : vector<6x256xf32>
    %27 = tpu.matmul %26, %16, %cst_29 {dimension_numbers = #tpu.dot_dimension_numbers<[1], [0], [0], [1], [0, 0, 1, 1], [], []>} : vector<6x128xbf16>, vector<128x256xbf16>, vector<6x256xf32> -> vector<6x256xf32>
    %28 = arith.addf %11, %27 : vector<6x256xf32>
    %c0_30 = arith.constant 0 : index
    %c25 = arith.constant 25 : index
    %c0_31 = arith.constant 0 : index
    %29 = vector.load %arg2[%c0_30, %c25, %c0_31] : memref<1x48x128xbf16, #tpu.memory_space<vmem>>, vector<1x6x128xbf16>
    %30 = vector.shape_cast %29 : vector<1x6x128xbf16> to vector<6x128xbf16>
    %cst_32 = arith.constant dense<0.000000e+00> : vector<6x256xf32>
    %31 = tpu.matmul %30, %16, %cst_32 {dimension_numbers = #tpu.dot_dimension_numbers<[1], [0], [0], [1], [0, 0, 1, 1], [], []>} : vector<6x128xbf16>, vector<128x256xbf16>, vector<6x256xf32> -> vector<6x256xf32>
    %32 = arith.addf %14, %31 : vector<6x256xf32>
    %c2 = arith.constant 2 : index
    %c0_33 = arith.constant 0 : index
    %c0_34 = arith.constant 0 : index
    %33 = vector.load %arg3[%c2, %c0_33, %c0_34] : memref<9x128x256xbf16, #tpu.memory_space<vmem>>, vector<1x128x256xbf16>
    %34 = vector.shape_cast %33 : vector<1x128x256xbf16> to vector<128x256xbf16>
    %c0_35 = arith.constant 0 : index
    %c1_36 = arith.constant 1 : index
    %c0_37 = arith.constant 0 : index
    %35 = vector.load %arg2[%c0_35, %c1_36, %c0_37] : memref<1x48x128xbf16, #tpu.memory_space<vmem>>, vector<1x6x128xbf16>
    %36 = vector.shape_cast %35 : vector<1x6x128xbf16> to vector<6x128xbf16>
    %cst_38 = arith.constant dense<0.000000e+00> : vector<6x256xf32>
    %37 = tpu.matmul %36, %34, %cst_38 {dimension_numbers = #tpu.dot_dimension_numbers<[1], [0], [0], [1], [0, 0, 1, 1], [], []>} : vector<6x128xbf16>, vector<128x256xbf16>, vector<6x256xf32> -> vector<6x256xf32>
    %38 = arith.addf %20, %37 : vector<6x256xf32>
    %c0_39 = arith.constant 0 : index
    %c13 = arith.constant 13 : index
    %c0_40 = arith.constant 0 : index
    %39 = vector.load %arg2[%c0_39, %c13, %c0_40] : memref<1x48x128xbf16, #tpu.memory_space<vmem>>, vector<1x6x128xbf16>
    %40 = vector.shape_cast %39 : vector<1x6x128xbf16> to vector<6x128xbf16>
    %cst_41 = arith.constant dense<0.000000e+00> : vector<6x256xf32>
    %41 = tpu.matmul %40, %34, %cst_41 {dimension_numbers = #tpu.dot_dimension_numbers<[1], [0], [0], [1], [0, 0, 1, 1], [], []>} : vector<6x128xbf16>, vector<128x256xbf16>, vector<6x256xf32> -> vector<6x256xf32>
    %42 = arith.addf %24, %41 : vector<6x256xf32>
    %c0_42 = arith.constant 0 : index
    %c25_43 = arith.constant 25 : index
    %c0_44 = arith.constant 0 : index
    %43 = vector.load %arg2[%c0_42, %c25_43, %c0_44] : memref<1x48x128xbf16, #tpu.memory_space<vmem>>, vector<1x6x128xbf16>
    %44 = vector.shape_cast %43 : vector<1x6x128xbf16> to vector<6x128xbf16>
    %cst_45 = arith.constant dense<0.000000e+00> : vector<6x256xf32>
    %45 = tpu.matmul %44, %34, %cst_45 {dimension_numbers = #tpu.dot_dimension_numbers<[1], [0], [0], [1], [0, 0, 1, 1], [], []>} : vector<6x128xbf16>, vector<128x256xbf16>, vector<6x256xf32> -> vector<6x256xf32>
    %46 = arith.addf %28, %45 : vector<6x256xf32>
    %c0_46 = arith.constant 0 : index
    %c37 = arith.constant 37 : index
    %c0_47 = arith.constant 0 : index
    %47 = vector.load %arg2[%c0_46, %c37, %c0_47] : memref<1x48x128xbf16, #tpu.memory_space<vmem>>, vector<1x6x128xbf16>
    %48 = vector.shape_cast %47 : vector<1x6x128xbf16> to vector<6x128xbf16>
    %cst_48 = arith.constant dense<0.000000e+00> : vector<6x256xf32>
    %49 = tpu.matmul %48, %34, %cst_48 {dimension_numbers = #tpu.dot_dimension_numbers<[1], [0], [0], [1], [0, 0, 1, 1], [], []>} : vector<6x128xbf16>, vector<128x256xbf16>, vector<6x256xf32> -> vector<6x256xf32>
    %50 = arith.addf %32, %49 : vector<6x256xf32>
    %c3 = arith.constant 3 : index
    %c0_49 = arith.constant 0 : index
    %c0_50 = arith.constant 0 : index
    %51 = vector.load %arg3[%c3, %c0_49, %c0_50] : memref<9x128x256xbf16, #tpu.memory_space<vmem>>, vector<1x128x256xbf16>
    %52 = vector.shape_cast %51 : vector<1x128x256xbf16> to vector<128x256xbf16>
    %c0_51 = arith.constant 0 : index
    %c24_52 = arith.constant 24 : index
    %c0_53 = arith.constant 0 : index
    %53 = vector.load %arg2[%c0_51, %c24_52, %c0_53] : memref<1x48x128xbf16, #tpu.memory_space<vmem>>, vector<1x6x128xbf16>
    %54 = vector.shape_cast %53 : vector<1x6x128xbf16> to vector<6x128xbf16>
    %cst_54 = arith.constant dense<0.000000e+00> : vector<6x256xf32>
    %55 = tpu.matmul %54, %52, %cst_54 {dimension_numbers = #tpu.dot_dimension_numbers<[1], [0], [0], [1], [0, 0, 1, 1], [], []>} : vector<6x128xbf16>, vector<128x256xbf16>, vector<6x256xf32> -> vector<6x256xf32>
    %56 = arith.addf %38, %55 : vector<6x256xf32>
    %c0_55 = arith.constant 0 : index
    %c36_56 = arith.constant 36 : index
    %c0_57 = arith.constant 0 : index
    %57 = vector.load %arg2[%c0_55, %c36_56, %c0_57] : memref<1x48x128xbf16, #tpu.memory_space<vmem>>, vector<1x6x128xbf16>
    %58 = vector.shape_cast %57 : vector<1x6x128xbf16> to vector<6x128xbf16>
    %cst_58 = arith.constant dense<0.000000e+00> : vector<6x256xf32>
    %59 = tpu.matmul %58, %52, %cst_58 {dimension_numbers = #tpu.dot_dimension_numbers<[1], [0], [0], [1], [0, 0, 1, 1], [], []>} : vector<6x128xbf16>, vector<128x256xbf16>, vector<6x256xf32> -> vector<6x256xf32>
    %60 = arith.addf %42, %59 : vector<6x256xf32>
    %c0_59 = arith.constant 0 : index
    %c3_60 = arith.constant 3 : index
    %c0_61 = arith.constant 0 : index
    %61 = vector.load %arg2[%c0_59, %c3_60, %c0_61] : memref<1x48x128xbf16, #tpu.memory_space<vmem>>, vector<1x6x128xbf16>
    %62 = vector.shape_cast %61 : vector<1x6x128xbf16> to vector<6x128xbf16>
    %cst_62 = arith.constant dense<0.000000e+00> : vector<6x256xf32>
    %63 = tpu.matmul %62, %52, %cst_62 {dimension_numbers = #tpu.dot_dimension_numbers<[1], [0], [0], [1], [0, 0, 1, 1], [], []>} : vector<6x128xbf16>, vector<128x256xbf16>, vector<6x256xf32> -> vector<6x256xf32>
    %64 = arith.addf %46, %63 : vector<6x256xf32>
    %c0_63 = arith.constant 0 : index
    %c15 = arith.constant 15 : index
    %c0_64 = arith.constant 0 : index
    %65 = vector.load %arg2[%c0_63, %c15, %c0_64] : memref<1x48x128xbf16, #tpu.memory_space<vmem>>, vector<1x6x128xbf16>
    %66 = vector.shape_cast %65 : vector<1x6x128xbf16> to vector<6x128xbf16>
    %cst_65 = arith.constant dense<0.000000e+00> : vector<6x256xf32>
    %67 = tpu.matmul %66, %52, %cst_65 {dimension_numbers = #tpu.dot_dimension_numbers<[1], [0], [0], [1], [0, 0, 1, 1], [], []>} : vector<6x128xbf16>, vector<128x256xbf16>, vector<6x256xf32> -> vector<6x256xf32>
    %68 = arith.addf %50, %67 : vector<6x256xf32>
    %c4 = arith.constant 4 : index
    %c0_66 = arith.constant 0 : index
    %c0_67 = arith.constant 0 : index
    %69 = vector.load %arg3[%c4, %c0_66, %c0_67] : memref<9x128x256xbf16, #tpu.memory_space<vmem>>, vector<1x128x256xbf16>
    %70 = vector.shape_cast %69 : vector<1x128x256xbf16> to vector<128x256xbf16>
    %c0_68 = arith.constant 0 : index
    %c36_69 = arith.constant 36 : index
    %c0_70 = arith.constant 0 : index
    %71 = vector.load %arg2[%c0_68, %c36_69, %c0_70] : memref<1x48x128xbf16, #tpu.memory_space<vmem>>, vector<1x6x128xbf16>
    %72 = vector.shape_cast %71 : vector<1x6x128xbf16> to vector<6x128xbf16>
    %cst_71 = arith.constant dense<0.000000e+00> : vector<6x256xf32>
    %73 = tpu.matmul %72, %70, %cst_71 {dimension_numbers = #tpu.dot_dimension_numbers<[1], [0], [0], [1], [0, 0, 1, 1], [], []>} : vector<6x128xbf16>, vector<128x256xbf16>, vector<6x256xf32> -> vector<6x256xf32>
    %74 = arith.addf %56, %73 : vector<6x256xf32>
    %c0_72 = arith.constant 0 : index
    %c25_73 = arith.constant 25 : index
    %c0_74 = arith.constant 0 : index
    %75 = vector.load %arg2[%c0_72, %c25_73, %c0_74] : memref<1x48x128xbf16, #tpu.memory_space<vmem>>, vector<1x6x128xbf16>
    %76 = vector.shape_cast %75 : vector<1x6x128xbf16> to vector<6x128xbf16>
    %cst_75 = arith.constant dense<0.000000e+00> : vector<6x256xf32>
    %77 = tpu.matmul %76, %70, %cst_75 {dimension_numbers = #tpu.dot_dimension_numbers<[1], [0], [0], [1], [0, 0, 1, 1], [], []>} : vector<6x128xbf16>, vector<128x256xbf16>, vector<6x256xf32> -> vector<6x256xf32>
    %78 = arith.addf %60, %77 : vector<6x256xf32>
    %c0_76 = arith.constant 0 : index
    %c15_77 = arith.constant 15 : index
    %c0_78 = arith.constant 0 : index
    %79 = vector.load %arg2[%c0_76, %c15_77, %c0_78] : memref<1x48x128xbf16, #tpu.memory_space<vmem>>, vector<1x6x128xbf16>
    %80 = vector.shape_cast %79 : vector<1x6x128xbf16> to vector<6x128xbf16>
    %cst_79 = arith.constant dense<0.000000e+00> : vector<6x256xf32>
    %81 = tpu.matmul %80, %70, %cst_79 {dimension_numbers = #tpu.dot_dimension_numbers<[1], [0], [0], [1], [0, 0, 1, 1], [], []>} : vector<6x128xbf16>, vector<128x256xbf16>, vector<6x256xf32> -> vector<6x256xf32>
    %82 = arith.addf %64, %81 : vector<6x256xf32>
    %c0_80 = arith.constant 0 : index
    %c4_81 = arith.constant 4 : index
    %c0_82 = arith.constant 0 : index
    %83 = vector.load %arg2[%c0_80, %c4_81, %c0_82] : memref<1x48x128xbf16, #tpu.memory_space<vmem>>, vector<1x6x128xbf16>
    %84 = vector.shape_cast %83 : vector<1x6x128xbf16> to vector<6x128xbf16>
    %cst_83 = arith.constant dense<0.000000e+00> : vector<6x256xf32>
    %85 = tpu.matmul %84, %70, %cst_83 {dimension_numbers = #tpu.dot_dimension_numbers<[1], [0], [0], [1], [0, 0, 1, 1], [], []>} : vector<6x128xbf16>, vector<128x256xbf16>, vector<6x256xf32> -> vector<6x256xf32>
    %86 = arith.addf %68, %85 : vector<6x256xf32>
    %c5 = arith.constant 5 : index
    %c0_84 = arith.constant 0 : index
    %c0_85 = arith.constant 0 : index
    %87 = vector.load %arg3[%c5, %c0_84, %c0_85] : memref<9x128x256xbf16, #tpu.memory_space<vmem>>, vector<1x128x256xbf16>
    %88 = vector.shape_cast %87 : vector<1x128x256xbf16> to vector<128x256xbf16>
    %c0_86 = arith.constant 0 : index
    %c25_87 = arith.constant 25 : index
    %c0_88 = arith.constant 0 : index
    %89 = vector.load %arg2[%c0_86, %c25_87, %c0_88] : memref<1x48x128xbf16, #tpu.memory_space<vmem>>, vector<1x6x128xbf16>
    %90 = vector.shape_cast %89 : vector<1x6x128xbf16> to vector<6x128xbf16>
    %cst_89 = arith.constant dense<0.000000e+00> : vector<6x256xf32>
    %91 = tpu.matmul %90, %88, %cst_89 {dimension_numbers = #tpu.dot_dimension_numbers<[1], [0], [0], [1], [0, 0, 1, 1], [], []>} : vector<6x128xbf16>, vector<128x256xbf16>, vector<6x256xf32> -> vector<6x256xf32>
    %92 = arith.addf %74, %91 : vector<6x256xf32>
    %c0_90 = arith.constant 0 : index
    %c37_91 = arith.constant 37 : index
    %c0_92 = arith.constant 0 : index
    %93 = vector.load %arg2[%c0_90, %c37_91, %c0_92] : memref<1x48x128xbf16, #tpu.memory_space<vmem>>, vector<1x6x128xbf16>
    %94 = vector.shape_cast %93 : vector<1x6x128xbf16> to vector<6x128xbf16>
    %cst_93 = arith.constant dense<0.000000e+00> : vector<6x256xf32>
    %95 = tpu.matmul %94, %88, %cst_93 {dimension_numbers = #tpu.dot_dimension_numbers<[1], [0], [0], [1], [0, 0, 1, 1], [], []>} : vector<6x128xbf16>, vector<128x256xbf16>, vector<6x256xf32> -> vector<6x256xf32>
    %96 = arith.addf %78, %95 : vector<6x256xf32>
    %c0_94 = arith.constant 0 : index
    %c4_95 = arith.constant 4 : index
    %c0_96 = arith.constant 0 : index
    %97 = vector.load %arg2[%c0_94, %c4_95, %c0_96] : memref<1x48x128xbf16, #tpu.memory_space<vmem>>, vector<1x6x128xbf16>
    %98 = vector.shape_cast %97 : vector<1x6x128xbf16> to vector<6x128xbf16>
    %cst_97 = arith.constant dense<0.000000e+00> : vector<6x256xf32>
    %99 = tpu.matmul %98, %88, %cst_97 {dimension_numbers = #tpu.dot_dimension_numbers<[1], [0], [0], [1], [0, 0, 1, 1], [], []>} : vector<6x128xbf16>, vector<128x256xbf16>, vector<6x256xf32> -> vector<6x256xf32>
    %100 = arith.addf %82, %99 : vector<6x256xf32>
    %c0_98 = arith.constant 0 : index
    %c16 = arith.constant 16 : index
    %c0_99 = arith.constant 0 : index
    %101 = vector.load %arg2[%c0_98, %c16, %c0_99] : memref<1x48x128xbf16, #tpu.memory_space<vmem>>, vector<1x6x128xbf16>
    %102 = vector.shape_cast %101 : vector<1x6x128xbf16> to vector<6x128xbf16>
    %cst_100 = arith.constant dense<0.000000e+00> : vector<6x256xf32>
    %103 = tpu.matmul %102, %88, %cst_100 {dimension_numbers = #tpu.dot_dimension_numbers<[1], [0], [0], [1], [0, 0, 1, 1], [], []>} : vector<6x128xbf16>, vector<128x256xbf16>, vector<6x256xf32> -> vector<6x256xf32>
    %104 = arith.addf %86, %103 : vector<6x256xf32>
    %c6 = arith.constant 6 : index
    %c0_101 = arith.constant 0 : index
    %c0_102 = arith.constant 0 : index
    %105 = vector.load %arg3[%c6, %c0_101, %c0_102] : memref<9x128x256xbf16, #tpu.memory_space<vmem>>, vector<1x128x256xbf16>
    %106 = vector.shape_cast %105 : vector<1x128x256xbf16> to vector<128x256xbf16>
    %c0_103 = arith.constant 0 : index
    %c3_104 = arith.constant 3 : index
    %c0_105 = arith.constant 0 : index
    %107 = vector.load %arg2[%c0_103, %c3_104, %c0_105] : memref<1x48x128xbf16, #tpu.memory_space<vmem>>, vector<1x6x128xbf16>
    %108 = vector.shape_cast %107 : vector<1x6x128xbf16> to vector<6x128xbf16>
    %cst_106 = arith.constant dense<0.000000e+00> : vector<6x256xf32>
    %109 = tpu.matmul %108, %106, %cst_106 {dimension_numbers = #tpu.dot_dimension_numbers<[1], [0], [0], [1], [0, 0, 1, 1], [], []>} : vector<6x128xbf16>, vector<128x256xbf16>, vector<6x256xf32> -> vector<6x256xf32>
    %110 = arith.addf %92, %109 : vector<6x256xf32>
    %c0_107 = arith.constant 0 : index
    %c15_108 = arith.constant 15 : index
    %c0_109 = arith.constant 0 : index
    %111 = vector.load %arg2[%c0_107, %c15_108, %c0_109] : memref<1x48x128xbf16, #tpu.memory_space<vmem>>, vector<1x6x128xbf16>
    %112 = vector.shape_cast %111 : vector<1x6x128xbf16> to vector<6x128xbf16>
    %cst_110 = arith.constant dense<0.000000e+00> : vector<6x256xf32>
    %113 = tpu.matmul %112, %106, %cst_110 {dimension_numbers = #tpu.dot_dimension_numbers<[1], [0], [0], [1], [0, 0, 1, 1], [], []>} : vector<6x128xbf16>, vector<128x256xbf16>, vector<6x256xf32> -> vector<6x256xf32>
    %114 = arith.addf %96, %113 : vector<6x256xf32>
    %c0_111 = arith.constant 0 : index
    %c27 = arith.constant 27 : index
    %c0_112 = arith.constant 0 : index
    %115 = vector.load %arg2[%c0_111, %c27, %c0_112] : memref<1x48x128xbf16, #tpu.memory_space<vmem>>, vector<1x6x128xbf16>
    %116 = vector.shape_cast %115 : vector<1x6x128xbf16> to vector<6x128xbf16>
    %cst_113 = arith.constant dense<0.000000e+00> : vector<6x256xf32>
    %117 = tpu.matmul %116, %106, %cst_113 {dimension_numbers = #tpu.dot_dimension_numbers<[1], [0], [0], [1], [0, 0, 1, 1], [], []>} : vector<6x128xbf16>, vector<128x256xbf16>, vector<6x256xf32> -> vector<6x256xf32>
    %118 = arith.addf %100, %117 : vector<6x256xf32>
    %c0_114 = arith.constant 0 : index
    %c39 = arith.constant 39 : index
    %c0_115 = arith.constant 0 : index
    %119 = vector.load %arg2[%c0_114, %c39, %c0_115] : memref<1x48x128xbf16, #tpu.memory_space<vmem>>, vector<1x6x128xbf16>
    %120 = vector.shape_cast %119 : vector<1x6x128xbf16> to vector<6x128xbf16>
    %cst_116 = arith.constant dense<0.000000e+00> : vector<6x256xf32>
    %121 = tpu.matmul %120, %106, %cst_116 {dimension_numbers = #tpu.dot_dimension_numbers<[1], [0], [0], [1], [0, 0, 1, 1], [], []>} : vector<6x128xbf16>, vector<128x256xbf16>, vector<6x256xf32> -> vector<6x256xf32>
    %122 = arith.addf %104, %121 : vector<6x256xf32>
    %c7 = arith.constant 7 : index
    %c0_117 = arith.constant 0 : index
    %c0_118 = arith.constant 0 : index
    %123 = vector.load %arg3[%c7, %c0_117, %c0_118] : memref<9x128x256xbf16, #tpu.memory_space<vmem>>, vector<1x128x256xbf16>
    %124 = vector.shape_cast %123 : vector<1x128x256xbf16> to vector<128x256xbf16>
    %c0_119 = arith.constant 0 : index
    %c15_120 = arith.constant 15 : index
    %c0_121 = arith.constant 0 : index
    %125 = vector.load %arg2[%c0_119, %c15_120, %c0_121] : memref<1x48x128xbf16, #tpu.memory_space<vmem>>, vector<1x6x128xbf16>
    %126 = vector.shape_cast %125 : vector<1x6x128xbf16> to vector<6x128xbf16>
    %cst_122 = arith.constant dense<0.000000e+00> : vector<6x256xf32>
    %127 = tpu.matmul %126, %124, %cst_122 {dimension_numbers = #tpu.dot_dimension_numbers<[1], [0], [0], [1], [0, 0, 1, 1], [], []>} : vector<6x128xbf16>, vector<128x256xbf16>, vector<6x256xf32> -> vector<6x256xf32>
    %128 = arith.addf %110, %127 : vector<6x256xf32>
    %c0_123 = arith.constant 0 : index
    %c4_124 = arith.constant 4 : index
    %c0_125 = arith.constant 0 : index
    %129 = vector.load %arg2[%c0_123, %c4_124, %c0_125] : memref<1x48x128xbf16, #tpu.memory_space<vmem>>, vector<1x6x128xbf16>
    %130 = vector.shape_cast %129 : vector<1x6x128xbf16> to vector<6x128xbf16>
    %cst_126 = arith.constant dense<0.000000e+00> : vector<6x256xf32>
    %131 = tpu.matmul %130, %124, %cst_126 {dimension_numbers = #tpu.dot_dimension_numbers<[1], [0], [0], [1], [0, 0, 1, 1], [], []>} : vector<6x128xbf16>, vector<128x256xbf16>, vector<6x256xf32> -> vector<6x256xf32>
    %132 = arith.addf %114, %131 : vector<6x256xf32>
    %c0_127 = arith.constant 0 : index
    %c39_128 = arith.constant 39 : index
    %c0_129 = arith.constant 0 : index
    %133 = vector.load %arg2[%c0_127, %c39_128, %c0_129] : memref<1x48x128xbf16, #tpu.memory_space<vmem>>, vector<1x6x128xbf16>
    %134 = vector.shape_cast %133 : vector<1x6x128xbf16> to vector<6x128xbf16>
    %cst_130 = arith.constant dense<0.000000e+00> : vector<6x256xf32>
    %135 = tpu.matmul %134, %124, %cst_130 {dimension_numbers = #tpu.dot_dimension_numbers<[1], [0], [0], [1], [0, 0, 1, 1], [], []>} : vector<6x128xbf16>, vector<128x256xbf16>, vector<6x256xf32> -> vector<6x256xf32>
    %136 = arith.addf %118, %135 : vector<6x256xf32>
    %c0_131 = arith.constant 0 : index
    %c28 = arith.constant 28 : index
    %c0_132 = arith.constant 0 : index
    %137 = vector.load %arg2[%c0_131, %c28, %c0_132] : memref<1x48x128xbf16, #tpu.memory_space<vmem>>, vector<1x6x128xbf16>
    %138 = vector.shape_cast %137 : vector<1x6x128xbf16> to vector<6x128xbf16>
    %cst_133 = arith.constant dense<0.000000e+00> : vector<6x256xf32>
    %139 = tpu.matmul %138, %124, %cst_133 {dimension_numbers = #tpu.dot_dimension_numbers<[1], [0], [0], [1], [0, 0, 1, 1], [], []>} : vector<6x128xbf16>, vector<128x256xbf16>, vector<6x256xf32> -> vector<6x256xf32>
    %140 = arith.addf %122, %139 : vector<6x256xf32>
    %c8 = arith.constant 8 : index
    %c0_134 = arith.constant 0 : index
    %c0_135 = arith.constant 0 : index
    %141 = vector.load %arg3[%c8, %c0_134, %c0_135] : memref<9x128x256xbf16, #tpu.memory_space<vmem>>, vector<1x128x256xbf16>
    %142 = vector.shape_cast %141 : vector<1x128x256xbf16> to vector<128x256xbf16>
    %c0_136 = arith.constant 0 : index
    %c4_137 = arith.constant 4 : index
    %c0_138 = arith.constant 0 : index
    %143 = vector.load %arg2[%c0_136, %c4_137, %c0_138] : memref<1x48x128xbf16, #tpu.memory_space<vmem>>, vector<1x6x128xbf16>
    %144 = vector.shape_cast %143 : vector<1x6x128xbf16> to vector<6x128xbf16>
    %cst_139 = arith.constant dense<0.000000e+00> : vector<6x256xf32>
    %145 = tpu.matmul %144, %142, %cst_139 {dimension_numbers = #tpu.dot_dimension_numbers<[1], [0], [0], [1], [0, 0, 1, 1], [], []>} : vector<6x128xbf16>, vector<128x256xbf16>, vector<6x256xf32> -> vector<6x256xf32>
    %146 = arith.addf %128, %145 : vector<6x256xf32>
    %c0_140 = arith.constant 0 : index
    %c16_141 = arith.constant 16 : index
    %c0_142 = arith.constant 0 : index
    %147 = vector.load %arg2[%c0_140, %c16_141, %c0_142] : memref<1x48x128xbf16, #tpu.memory_space<vmem>>, vector<1x6x128xbf16>
    %148 = vector.shape_cast %147 : vector<1x6x128xbf16> to vector<6x128xbf16>
    %cst_143 = arith.constant dense<0.000000e+00> : vector<6x256xf32>
    %149 = tpu.matmul %148, %142, %cst_143 {dimension_numbers = #tpu.dot_dimension_numbers<[1], [0], [0], [1], [0, 0, 1, 1], [], []>} : vector<6x128xbf16>, vector<128x256xbf16>, vector<6x256xf32> -> vector<6x256xf32>
    %150 = arith.addf %132, %149 : vector<6x256xf32>
    %c0_144 = arith.constant 0 : index
    %c28_145 = arith.constant 28 : index
    %c0_146 = arith.constant 0 : index
    %151 = vector.load %arg2[%c0_144, %c28_145, %c0_146] : memref<1x48x128xbf16, #tpu.memory_space<vmem>>, vector<1x6x128xbf16>
    %152 = vector.shape_cast %151 : vector<1x6x128xbf16> to vector<6x128xbf16>
    %cst_147 = arith.constant dense<0.000000e+00> : vector<6x256xf32>
    %153 = tpu.matmul %152, %142, %cst_147 {dimension_numbers = #tpu.dot_dimension_numbers<[1], [0], [0], [1], [0, 0, 1, 1], [], []>} : vector<6x128xbf16>, vector<128x256xbf16>, vector<6x256xf32> -> vector<6x256xf32>
    %154 = arith.addf %136, %153 : vector<6x256xf32>
    %c0_148 = arith.constant 0 : index
    %c40 = arith.constant 40 : index
    %c0_149 = arith.constant 0 : index
    %155 = vector.load %arg2[%c0_148, %c40, %c0_149] : memref<1x48x128xbf16, #tpu.memory_space<vmem>>, vector<1x6x128xbf16>
    %156 = vector.shape_cast %155 : vector<1x6x128xbf16> to vector<6x128xbf16>
    %cst_150 = arith.constant dense<0.000000e+00> : vector<6x256xf32>
    %157 = tpu.matmul %156, %142, %cst_150 {dimension_numbers = #tpu.dot_dimension_numbers<[1], [0], [0], [1], [0, 0, 1, 1], [], []>} : vector<6x128xbf16>, vector<128x256xbf16>, vector<6x256xf32> -> vector<6x256xf32>
    %158 = arith.addf %140, %157 : vector<6x256xf32>
    %159 = vector.broadcast %0 : vector<1x256xf32> to vector<6x256xf32>
    %160 = arith.addf %146, %159 : vector<6x256xf32>
    %161 = vector.broadcast %0 : vector<1x256xf32> to vector<6x256xf32>
    %162 = arith.addf %150, %161 : vector<6x256xf32>
    %163 = arith.maximumf %160, %162 : vector<6x256xf32>
    %164 = vector.broadcast %0 : vector<1x256xf32> to vector<6x256xf32>
    %165 = arith.addf %154, %164 : vector<6x256xf32>
    %166 = arith.maximumf %163, %165 : vector<6x256xf32>
    %167 = vector.broadcast %0 : vector<1x256xf32> to vector<6x256xf32>
    %168 = arith.addf %158, %167 : vector<6x256xf32>
    %169 = arith.maximumf %166, %168 : vector<6x256xf32>
    %cst_151 = arith.constant 0.000000e+00 : f32
    %170 = vector.broadcast %cst_151 : f32 to vector<6x256xf32>
    %171 = arith.maximumf %169, %170 : vector<6x256xf32>
    %172 = tpu.iota {dimensions = array<i32: 0>} : vector<6x1xi32>
    %c3_i32 = arith.constant 3 : i32
    %c0_i32 = arith.constant 0 : i32
    %173 = arith.cmpi eq, %c3_i32, %c0_i32 : i32
    %c1_i32 = arith.constant 1 : i32
    %174 = arith.select %173, %c1_i32, %c3_i32 : i32
    %175 = vector.broadcast %174 : i32 to vector<6x1xi32>
    %176 = arith.remsi %172, %175 : vector<6x1xi32>
    %c0_i32_152 = arith.constant 0 : i32
    %177 = vector.broadcast %c0_i32_152 : i32 to vector<6x1xi32>
    %178 = arith.cmpi ne, %176, %177 : vector<6x1xi32>
    %c0_i32_153 = arith.constant 0 : i32
    %179 = vector.broadcast %c0_i32_153 : i32 to vector<6x1xi32>
    %180 = arith.cmpi slt, %176, %179 : vector<6x1xi32>
    %c0_i32_154 = arith.constant 0 : i32
    %181 = arith.cmpi slt, %174, %c0_i32_154 : i32
    %182 = vector.broadcast %181 : i1 to vector<6x1xi1>
    %183 = vector.broadcast %182 : vector<6x1xi1> to vector<6x1xi1>
    %184 = arith.xori %180, %183 : vector<6x1xi1>
    %185 = arith.andi %184, %178 : vector<6x1xi1>
    %186 = vector.broadcast %174 : i32 to vector<6x1xi32>
    %187 = arith.addi %176, %186 : vector<6x1xi32>
    %188 = arith.select %185, %187, %176 : vector<6x1xi1>, vector<6x1xi32>
    %c2_i32 = arith.constant 2 : i32
    %189 = vector.broadcast %c2_i32 : i32 to vector<6x1xi32>
    %190 = arith.cmpi slt, %188, %189 : vector<6x1xi32>
    %cst_155 = arith.constant 0.000000e+00 : f32
    %191 = vector.shape_cast %190 : vector<6x1xi1> to vector<6x1xi1>
    %192 = vector.broadcast %191 : vector<6x1xi1> to vector<6x256xi1>
    %193 = vector.broadcast %cst_155 : f32 to vector<6x256xf32>
    %194 = arith.select %192, %171, %193 : vector<6x256xi1>, vector<6x256xf32>
    %195 = arith.truncf %194 : vector<6x256xf32> to vector<6x256xbf16>
    %c0_156 = arith.constant 0 : index
    %c0_157 = arith.constant 0 : index
    %c0_158 = arith.constant 0 : index
    %196 = vector.load %arg5[%c0_156, %c0_157, %c0_158] : memref<1x6x256xbf16, #tpu.memory_space<vmem>>, vector<1x6x256xbf16>
    %197 = vector.shape_cast %196 : vector<1x6x256xbf16> to vector<6x256xbf16>
    %198 = vector.shape_cast %195 : vector<6x256xbf16> to vector<1x6x256xbf16>
    tpu.vector_store %arg5[%c0_156, %c0_157, %c0_158], %198 {strides = array<i32>} : memref<1x6x256xbf16, #tpu.memory_space<vmem>>, vector<1x6x256xbf16>,
    return
  }
  func.func @transform_0(%arg0: i32, %arg1: i32) -> (i32, i32, i32) {
    %c0_i32 = arith.constant 0 : i32
    %c0_i32_0 = arith.constant 0 : i32
    %c0_i32_1 = arith.constant 0 : i32
    return %arg1, %c0_i32, %c0_i32_0 : i32, i32, i32
  }
  func.func @transform_1(%arg0: i32, %arg1: i32) -> (i32, i32, i32) {
    %c0_i32 = arith.constant 0 : i32
    %c0_i32_0 = arith.constant 0 : i32
    %c0_i32_1 = arith.constant 0 : i32
    return %c0_i32, %c0_i32_0, %arg0 : i32, i32, i32
  }
  func.func @transform_2(%arg0: i32, %arg1: i32) -> (i32, i32) {
    %c0_i32 = arith.constant 0 : i32
    %c0_i32_0 = arith.constant 0 : i32
    return %c0_i32, %arg0 : i32, i32
  }
  func.func @transform_3(%arg0: i32, %arg1: i32) -> (i32, i32, i32) {
    %c0_i32 = arith.constant 0 : i32
    %c0_i32_0 = arith.constant 0 : i32
    return %arg1, %c0_i32, %arg0 : i32, i32, i32
  }
}

module attributes {stable_mosaic.version = 11 : i64} {
  func.func @conv_block_head_kernel(%arg0: i32, %arg1: i32, %arg2: memref<1x24x256xbf16, #tpu.memory_space<vmem>>, %arg3: memref<9x256x256xbf16, #tpu.memory_space<vmem>>, %arg4: memref<1x256xf32, #tpu.memory_space<vmem>>, %arg5: memref<1x256xf32, #tpu.memory_space<vmem>>, %arg6: memref<1x1x1x1xf32, #tpu.memory_space<vmem>>) attributes {dimension_semantics = [#tpu.dimension_semantics<parallel>, #tpu.dimension_semantics<parallel>], iteration_bounds = array<i64: 2, 2>, scalar_prefetch = 0 : i64, scratch_operands = 0 : i64, tpu.core_type = #tpu.core_type<tc>, window_params = [{transform_indices = @transform_0, window_bounds = array<i64: 1, 24, 256>}, {transform_indices = @transform_1, window_bounds = array<i64: 9, 256, 256>}, {transform_indices = @transform_2, window_bounds = array<i64: 1, 256>}, {transform_indices = @transform_3, window_bounds = array<i64: 1, 256>}, {transform_indices = @transform_4, window_bounds = array<i64: 1, 1, 1, 1>}]} {
    %c0 = arith.constant 0 : index
    %c0_0 = arith.constant 0 : index
    %0 = vector.load %arg4[%c0, %c0_0] : memref<1x256xf32, #tpu.memory_space<vmem>>, vector<1x256xf32>
    %c0_1 = arith.constant 0 : index
    %c0_2 = arith.constant 0 : index
    %c0_3 = arith.constant 0 : index
    %1 = vector.load %arg3[%c0_1, %c0_2, %c0_3] : memref<9x256x256xbf16, #tpu.memory_space<vmem>>, vector<1x256x256xbf16>
    %2 = vector.shape_cast %1 : vector<1x256x256xbf16> to vector<256x256xbf16>
    %c0_4 = arith.constant 0 : index
    %c0_5 = arith.constant 0 : index
    %c0_6 = arith.constant 0 : index
    %3 = vector.load %arg2[%c0_4, %c0_5, %c0_6] : memref<1x24x256xbf16, #tpu.memory_space<vmem>>, vector<1x2x256xbf16>
    %4 = vector.shape_cast %3 : vector<1x2x256xbf16> to vector<2x256xbf16>
    %cst = arith.constant dense<0.000000e+00> : vector<2x256xf32>
    %5 = tpu.matmul %4, %2, %cst {dimension_numbers = #tpu.dot_dimension_numbers<[1], [0], [0], [1], [0, 0, 1, 1], [], []>} : vector<2x256xbf16>, vector<256x256xbf16>, vector<2x256xf32> -> vector<2x256xf32>
    %c0_7 = arith.constant 0 : index
    %c6 = arith.constant 6 : index
    %c0_8 = arith.constant 0 : index
    %6 = vector.load %arg2[%c0_7, %c6, %c0_8] : memref<1x24x256xbf16, #tpu.memory_space<vmem>>, vector<1x2x256xbf16>
    %7 = vector.shape_cast %6 : vector<1x2x256xbf16> to vector<2x256xbf16>
    %cst_9 = arith.constant dense<0.000000e+00> : vector<2x256xf32>
    %8 = tpu.matmul %7, %2, %cst_9 {dimension_numbers = #tpu.dot_dimension_numbers<[1], [0], [0], [1], [0, 0, 1, 1], [], []>} : vector<2x256xbf16>, vector<256x256xbf16>, vector<2x256xf32> -> vector<2x256xf32>
    %c0_10 = arith.constant 0 : index
    %c12 = arith.constant 12 : index
    %c0_11 = arith.constant 0 : index
    %9 = vector.load %arg2[%c0_10, %c12, %c0_11] : memref<1x24x256xbf16, #tpu.memory_space<vmem>>, vector<1x2x256xbf16>
    %10 = vector.shape_cast %9 : vector<1x2x256xbf16> to vector<2x256xbf16>
    %cst_12 = arith.constant dense<0.000000e+00> : vector<2x256xf32>
    %11 = tpu.matmul %10, %2, %cst_12 {dimension_numbers = #tpu.dot_dimension_numbers<[1], [0], [0], [1], [0, 0, 1, 1], [], []>} : vector<2x256xbf16>, vector<256x256xbf16>, vector<2x256xf32> -> vector<2x256xf32>
    %c0_13 = arith.constant 0 : index
    %c18 = arith.constant 18 : index
    %c0_14 = arith.constant 0 : index
    %12 = vector.load %arg2[%c0_13, %c18, %c0_14] : memref<1x24x256xbf16, #tpu.memory_space<vmem>>, vector<1x2x256xbf16>
    %13 = vector.shape_cast %12 : vector<1x2x256xbf16> to vector<2x256xbf16>
    %cst_15 = arith.constant dense<0.000000e+00> : vector<2x256xf32>
    %14 = tpu.matmul %13, %2, %cst_15 {dimension_numbers = #tpu.dot_dimension_numbers<[1], [0], [0], [1], [0, 0, 1, 1], [], []>} : vector<2x256xbf16>, vector<256x256xbf16>, vector<2x256xf32> -> vector<2x256xf32>
    %c1 = arith.constant 1 : index
    %c0_16 = arith.constant 0 : index
    %c0_17 = arith.constant 0 : index
    %15 = vector.load %arg3[%c1, %c0_16, %c0_17] : memref<9x256x256xbf16, #tpu.memory_space<vmem>>, vector<1x256x256xbf16>
    %16 = vector.shape_cast %15 : vector<1x256x256xbf16> to vector<256x256xbf16>
    %c0_18 = arith.constant 0 : index
    %c6_19 = arith.constant 6 : index
    %c0_20 = arith.constant 0 : index
    %17 = vector.load %arg2[%c0_18, %c6_19, %c0_20] : memref<1x24x256xbf16, #tpu.memory_space<vmem>>, vector<1x2x256xbf16>
    %18 = vector.shape_cast %17 : vector<1x2x256xbf16> to vector<2x256xbf16>
    %cst_21 = arith.constant dense<0.000000e+00> : vector<2x256xf32>
    %19 = tpu.matmul %18, %16, %cst_21 {dimension_numbers = #tpu.dot_dimension_numbers<[1], [0], [0], [1], [0, 0, 1, 1], [], []>} : vector<2x256xbf16>, vector<256x256xbf16>, vector<2x256xf32> -> vector<2x256xf32>
    %20 = arith.addf %5, %19 : vector<2x256xf32>
    %c0_22 = arith.constant 0 : index
    %c1_23 = arith.constant 1 : index
    %c0_24 = arith.constant 0 : index
    %21 = vector.load %arg2[%c0_22, %c1_23, %c0_24] : memref<1x24x256xbf16, #tpu.memory_space<vmem>>, vector<1x2x256xbf16>
    %22 = vector.shape_cast %21 : vector<1x2x256xbf16> to vector<2x256xbf16>
    %cst_25 = arith.constant dense<0.000000e+00> : vector<2x256xf32>
    %23 = tpu.matmul %22, %16, %cst_25 {dimension_numbers = #tpu.dot_dimension_numbers<[1], [0], [0], [1], [0, 0, 1, 1], [], []>} : vector<2x256xbf16>, vector<256x256xbf16>, vector<2x256xf32> -> vector<2x256xf32>
    %24 = arith.addf %8, %23 : vector<2x256xf32>
    %c0_26 = arith.constant 0 : index
    %c18_27 = arith.constant 18 : index
    %c0_28 = arith.constant 0 : index
    %25 = vector.load %arg2[%c0_26, %c18_27, %c0_28] : memref<1x24x256xbf16, #tpu.memory_space<vmem>>, vector<1x2x256xbf16>
    %26 = vector.shape_cast %25 : vector<1x2x256xbf16> to vector<2x256xbf16>
    %cst_29 = arith.constant dense<0.000000e+00> : vector<2x256xf32>
    %27 = tpu.matmul %26, %16, %cst_29 {dimension_numbers = #tpu.dot_dimension_numbers<[1], [0], [0], [1], [0, 0, 1, 1], [], []>} : vector<2x256xbf16>, vector<256x256xbf16>, vector<2x256xf32> -> vector<2x256xf32>
    %28 = arith.addf %11, %27 : vector<2x256xf32>
    %c0_30 = arith.constant 0 : index
    %c13 = arith.constant 13 : index
    %c0_31 = arith.constant 0 : index
    %29 = vector.load %arg2[%c0_30, %c13, %c0_31] : memref<1x24x256xbf16, #tpu.memory_space<vmem>>, vector<1x2x256xbf16>
    %30 = vector.shape_cast %29 : vector<1x2x256xbf16> to vector<2x256xbf16>
    %cst_32 = arith.constant dense<0.000000e+00> : vector<2x256xf32>
    %31 = tpu.matmul %30, %16, %cst_32 {dimension_numbers = #tpu.dot_dimension_numbers<[1], [0], [0], [1], [0, 0, 1, 1], [], []>} : vector<2x256xbf16>, vector<256x256xbf16>, vector<2x256xf32> -> vector<2x256xf32>
    %32 = arith.addf %14, %31 : vector<2x256xf32>
    %c2 = arith.constant 2 : index
    %c0_33 = arith.constant 0 : index
    %c0_34 = arith.constant 0 : index
    %33 = vector.load %arg3[%c2, %c0_33, %c0_34] : memref<9x256x256xbf16, #tpu.memory_space<vmem>>, vector<1x256x256xbf16>
    %34 = vector.shape_cast %33 : vector<1x256x256xbf16> to vector<256x256xbf16>
    %c0_35 = arith.constant 0 : index
    %c1_36 = arith.constant 1 : index
    %c0_37 = arith.constant 0 : index
    %35 = vector.load %arg2[%c0_35, %c1_36, %c0_37] : memref<1x24x256xbf16, #tpu.memory_space<vmem>>, vector<1x2x256xbf16>
    %36 = vector.shape_cast %35 : vector<1x2x256xbf16> to vector<2x256xbf16>
    %cst_38 = arith.constant dense<0.000000e+00> : vector<2x256xf32>
    %37 = tpu.matmul %36, %34, %cst_38 {dimension_numbers = #tpu.dot_dimension_numbers<[1], [0], [0], [1], [0, 0, 1, 1], [], []>} : vector<2x256xbf16>, vector<256x256xbf16>, vector<2x256xf32> -> vector<2x256xf32>
    %38 = arith.addf %20, %37 : vector<2x256xf32>
    %c0_39 = arith.constant 0 : index
    %c7 = arith.constant 7 : index
    %c0_40 = arith.constant 0 : index
    %39 = vector.load %arg2[%c0_39, %c7, %c0_40] : memref<1x24x256xbf16, #tpu.memory_space<vmem>>, vector<1x2x256xbf16>
    %40 = vector.shape_cast %39 : vector<1x2x256xbf16> to vector<2x256xbf16>
    %cst_41 = arith.constant dense<0.000000e+00> : vector<2x256xf32>
    %41 = tpu.matmul %40, %34, %cst_41 {dimension_numbers = #tpu.dot_dimension_numbers<[1], [0], [0], [1], [0, 0, 1, 1], [], []>} : vector<2x256xbf16>, vector<256x256xbf16>, vector<2x256xf32> -> vector<2x256xf32>
    %42 = arith.addf %24, %41 : vector<2x256xf32>
    %c0_42 = arith.constant 0 : index
    %c13_43 = arith.constant 13 : index
    %c0_44 = arith.constant 0 : index
    %43 = vector.load %arg2[%c0_42, %c13_43, %c0_44] : memref<1x24x256xbf16, #tpu.memory_space<vmem>>, vector<1x2x256xbf16>
    %44 = vector.shape_cast %43 : vector<1x2x256xbf16> to vector<2x256xbf16>
    %cst_45 = arith.constant dense<0.000000e+00> : vector<2x256xf32>
    %45 = tpu.matmul %44, %34, %cst_45 {dimension_numbers = #tpu.dot_dimension_numbers<[1], [0], [0], [1], [0, 0, 1, 1], [], []>} : vector<2x256xbf16>, vector<256x256xbf16>, vector<2x256xf32> -> vector<2x256xf32>
    %46 = arith.addf %28, %45 : vector<2x256xf32>
    %c0_46 = arith.constant 0 : index
    %c19 = arith.constant 19 : index
    %c0_47 = arith.constant 0 : index
    %47 = vector.load %arg2[%c0_46, %c19, %c0_47] : memref<1x24x256xbf16, #tpu.memory_space<vmem>>, vector<1x2x256xbf16>
    %48 = vector.shape_cast %47 : vector<1x2x256xbf16> to vector<2x256xbf16>
    %cst_48 = arith.constant dense<0.000000e+00> : vector<2x256xf32>
    %49 = tpu.matmul %48, %34, %cst_48 {dimension_numbers = #tpu.dot_dimension_numbers<[1], [0], [0], [1], [0, 0, 1, 1], [], []>} : vector<2x256xbf16>, vector<256x256xbf16>, vector<2x256xf32> -> vector<2x256xf32>
    %50 = arith.addf %32, %49 : vector<2x256xf32>
    %c3 = arith.constant 3 : index
    %c0_49 = arith.constant 0 : index
    %c0_50 = arith.constant 0 : index
    %51 = vector.load %arg3[%c3, %c0_49, %c0_50] : memref<9x256x256xbf16, #tpu.memory_space<vmem>>, vector<1x256x256xbf16>
    %52 = vector.shape_cast %51 : vector<1x256x256xbf16> to vector<256x256xbf16>
    %c0_51 = arith.constant 0 : index
    %c12_52 = arith.constant 12 : index
    %c0_53 = arith.constant 0 : index
    %53 = vector.load %arg2[%c0_51, %c12_52, %c0_53] : memref<1x24x256xbf16, #tpu.memory_space<vmem>>, vector<1x2x256xbf16>
    %54 = vector.shape_cast %53 : vector<1x2x256xbf16> to vector<2x256xbf16>
    %cst_54 = arith.constant dense<0.000000e+00> : vector<2x256xf32>
    %55 = tpu.matmul %54, %52, %cst_54 {dimension_numbers = #tpu.dot_dimension_numbers<[1], [0], [0], [1], [0, 0, 1, 1], [], []>} : vector<2x256xbf16>, vector<256x256xbf16>, vector<2x256xf32> -> vector<2x256xf32>
    %56 = arith.addf %38, %55 : vector<2x256xf32>
    %c0_55 = arith.constant 0 : index
    %c18_56 = arith.constant 18 : index
    %c0_57 = arith.constant 0 : index
    %57 = vector.load %arg2[%c0_55, %c18_56, %c0_57] : memref<1x24x256xbf16, #tpu.memory_space<vmem>>, vector<1x2x256xbf16>
    %58 = vector.shape_cast %57 : vector<1x2x256xbf16> to vector<2x256xbf16>
    %cst_58 = arith.constant dense<0.000000e+00> : vector<2x256xf32>
    %59 = tpu.matmul %58, %52, %cst_58 {dimension_numbers = #tpu.dot_dimension_numbers<[1], [0], [0], [1], [0, 0, 1, 1], [], []>} : vector<2x256xbf16>, vector<256x256xbf16>, vector<2x256xf32> -> vector<2x256xf32>
    %60 = arith.addf %42, %59 : vector<2x256xf32>
    %c0_59 = arith.constant 0 : index
    %c2_60 = arith.constant 2 : index
    %c0_61 = arith.constant 0 : index
    %61 = vector.load %arg2[%c0_59, %c2_60, %c0_61] : memref<1x24x256xbf16, #tpu.memory_space<vmem>>, vector<1x2x256xbf16>
    %62 = vector.shape_cast %61 : vector<1x2x256xbf16> to vector<2x256xbf16>
    %cst_62 = arith.constant dense<0.000000e+00> : vector<2x256xf32>
    %63 = tpu.matmul %62, %52, %cst_62 {dimension_numbers = #tpu.dot_dimension_numbers<[1], [0], [0], [1], [0, 0, 1, 1], [], []>} : vector<2x256xbf16>, vector<256x256xbf16>, vector<2x256xf32> -> vector<2x256xf32>
    %64 = arith.addf %46, %63 : vector<2x256xf32>
    %c0_63 = arith.constant 0 : index
    %c8 = arith.constant 8 : index
    %c0_64 = arith.constant 0 : index
    %65 = vector.load %arg2[%c0_63, %c8, %c0_64] : memref<1x24x256xbf16, #tpu.memory_space<vmem>>, vector<1x2x256xbf16>
    %66 = vector.shape_cast %65 : vector<1x2x256xbf16> to vector<2x256xbf16>
    %cst_65 = arith.constant dense<0.000000e+00> : vector<2x256xf32>
    %67 = tpu.matmul %66, %52, %cst_65 {dimension_numbers = #tpu.dot_dimension_numbers<[1], [0], [0], [1], [0, 0, 1, 1], [], []>} : vector<2x256xbf16>, vector<256x256xbf16>, vector<2x256xf32> -> vector<2x256xf32>
    %68 = arith.addf %50, %67 : vector<2x256xf32>
    %c4 = arith.constant 4 : index
    %c0_66 = arith.constant 0 : index
    %c0_67 = arith.constant 0 : index
    %69 = vector.load %arg3[%c4, %c0_66, %c0_67] : memref<9x256x256xbf16, #tpu.memory_space<vmem>>, vector<1x256x256xbf16>
    %70 = vector.shape_cast %69 : vector<1x256x256xbf16> to vector<256x256xbf16>
    %c0_68 = arith.constant 0 : index
    %c18_69 = arith.constant 18 : index
    %c0_70 = arith.constant 0 : index
    %71 = vector.load %arg2[%c0_68, %c18_69, %c0_70] : memref<1x24x256xbf16, #tpu.memory_space<vmem>>, vector<1x2x256xbf16>
    %72 = vector.shape_cast %71 : vector<1x2x256xbf16> to vector<2x256xbf16>
    %cst_71 = arith.constant dense<0.000000e+00> : vector<2x256xf32>
    %73 = tpu.matmul %72, %70, %cst_71 {dimension_numbers = #tpu.dot_dimension_numbers<[1], [0], [0], [1], [0, 0, 1, 1], [], []>} : vector<2x256xbf16>, vector<256x256xbf16>, vector<2x256xf32> -> vector<2x256xf32>
    %74 = arith.addf %56, %73 : vector<2x256xf32>
    %c0_72 = arith.constant 0 : index
    %c13_73 = arith.constant 13 : index
    %c0_74 = arith.constant 0 : index
    %75 = vector.load %arg2[%c0_72, %c13_73, %c0_74] : memref<1x24x256xbf16, #tpu.memory_space<vmem>>, vector<1x2x256xbf16>
    %76 = vector.shape_cast %75 : vector<1x2x256xbf16> to vector<2x256xbf16>
    %cst_75 = arith.constant dense<0.000000e+00> : vector<2x256xf32>
    %77 = tpu.matmul %76, %70, %cst_75 {dimension_numbers = #tpu.dot_dimension_numbers<[1], [0], [0], [1], [0, 0, 1, 1], [], []>} : vector<2x256xbf16>, vector<256x256xbf16>, vector<2x256xf32> -> vector<2x256xf32>
    %78 = arith.addf %60, %77 : vector<2x256xf32>
    %c0_76 = arith.constant 0 : index
    %c8_77 = arith.constant 8 : index
    %c0_78 = arith.constant 0 : index
    %79 = vector.load %arg2[%c0_76, %c8_77, %c0_78] : memref<1x24x256xbf16, #tpu.memory_space<vmem>>, vector<1x2x256xbf16>
    %80 = vector.shape_cast %79 : vector<1x2x256xbf16> to vector<2x256xbf16>
    %cst_79 = arith.constant dense<0.000000e+00> : vector<2x256xf32>
    %81 = tpu.matmul %80, %70, %cst_79 {dimension_numbers = #tpu.dot_dimension_numbers<[1], [0], [0], [1], [0, 0, 1, 1], [], []>} : vector<2x256xbf16>, vector<256x256xbf16>, vector<2x256xf32> -> vector<2x256xf32>
    %82 = arith.addf %64, %81 : vector<2x256xf32>
    %c0_80 = arith.constant 0 : index
    %c3_81 = arith.constant 3 : index
    %c0_82 = arith.constant 0 : index
    %83 = vector.load %arg2[%c0_80, %c3_81, %c0_82] : memref<1x24x256xbf16, #tpu.memory_space<vmem>>, vector<1x2x256xbf16>
    %84 = vector.shape_cast %83 : vector<1x2x256xbf16> to vector<2x256xbf16>
    %cst_83 = arith.constant dense<0.000000e+00> : vector<2x256xf32>
    %85 = tpu.matmul %84, %70, %cst_83 {dimension_numbers = #tpu.dot_dimension_numbers<[1], [0], [0], [1], [0, 0, 1, 1], [], []>} : vector<2x256xbf16>, vector<256x256xbf16>, vector<2x256xf32> -> vector<2x256xf32>
    %86 = arith.addf %68, %85 : vector<2x256xf32>
    %c5 = arith.constant 5 : index
    %c0_84 = arith.constant 0 : index
    %c0_85 = arith.constant 0 : index
    %87 = vector.load %arg3[%c5, %c0_84, %c0_85] : memref<9x256x256xbf16, #tpu.memory_space<vmem>>, vector<1x256x256xbf16>
    %88 = vector.shape_cast %87 : vector<1x256x256xbf16> to vector<256x256xbf16>
    %c0_86 = arith.constant 0 : index
    %c13_87 = arith.constant 13 : index
    %c0_88 = arith.constant 0 : index
    %89 = vector.load %arg2[%c0_86, %c13_87, %c0_88] : memref<1x24x256xbf16, #tpu.memory_space<vmem>>, vector<1x2x256xbf16>
    %90 = vector.shape_cast %89 : vector<1x2x256xbf16> to vector<2x256xbf16>
    %cst_89 = arith.constant dense<0.000000e+00> : vector<2x256xf32>
    %91 = tpu.matmul %90, %88, %cst_89 {dimension_numbers = #tpu.dot_dimension_numbers<[1], [0], [0], [1], [0, 0, 1, 1], [], []>} : vector<2x256xbf16>, vector<256x256xbf16>, vector<2x256xf32> -> vector<2x256xf32>
    %92 = arith.addf %74, %91 : vector<2x256xf32>
    %c0_90 = arith.constant 0 : index
    %c19_91 = arith.constant 19 : index
    %c0_92 = arith.constant 0 : index
    %93 = vector.load %arg2[%c0_90, %c19_91, %c0_92] : memref<1x24x256xbf16, #tpu.memory_space<vmem>>, vector<1x2x256xbf16>
    %94 = vector.shape_cast %93 : vector<1x2x256xbf16> to vector<2x256xbf16>
    %cst_93 = arith.constant dense<0.000000e+00> : vector<2x256xf32>
    %95 = tpu.matmul %94, %88, %cst_93 {dimension_numbers = #tpu.dot_dimension_numbers<[1], [0], [0], [1], [0, 0, 1, 1], [], []>} : vector<2x256xbf16>, vector<256x256xbf16>, vector<2x256xf32> -> vector<2x256xf32>
    %96 = arith.addf %78, %95 : vector<2x256xf32>
    %c0_94 = arith.constant 0 : index
    %c3_95 = arith.constant 3 : index
    %c0_96 = arith.constant 0 : index
    %97 = vector.load %arg2[%c0_94, %c3_95, %c0_96] : memref<1x24x256xbf16, #tpu.memory_space<vmem>>, vector<1x2x256xbf16>
    %98 = vector.shape_cast %97 : vector<1x2x256xbf16> to vector<2x256xbf16>
    %cst_97 = arith.constant dense<0.000000e+00> : vector<2x256xf32>
    %99 = tpu.matmul %98, %88, %cst_97 {dimension_numbers = #tpu.dot_dimension_numbers<[1], [0], [0], [1], [0, 0, 1, 1], [], []>} : vector<2x256xbf16>, vector<256x256xbf16>, vector<2x256xf32> -> vector<2x256xf32>
    %100 = arith.addf %82, %99 : vector<2x256xf32>
    %c0_98 = arith.constant 0 : index
    %c9 = arith.constant 9 : index
    %c0_99 = arith.constant 0 : index
    %101 = vector.load %arg2[%c0_98, %c9, %c0_99] : memref<1x24x256xbf16, #tpu.memory_space<vmem>>, vector<1x2x256xbf16>
    %102 = vector.shape_cast %101 : vector<1x2x256xbf16> to vector<2x256xbf16>
    %cst_100 = arith.constant dense<0.000000e+00> : vector<2x256xf32>
    %103 = tpu.matmul %102, %88, %cst_100 {dimension_numbers = #tpu.dot_dimension_numbers<[1], [0], [0], [1], [0, 0, 1, 1], [], []>} : vector<2x256xbf16>, vector<256x256xbf16>, vector<2x256xf32> -> vector<2x256xf32>
    %104 = arith.addf %86, %103 : vector<2x256xf32>
    %c6_101 = arith.constant 6 : index
    %c0_102 = arith.constant 0 : index
    %c0_103 = arith.constant 0 : index
    %105 = vector.load %arg3[%c6_101, %c0_102, %c0_103] : memref<9x256x256xbf16, #tpu.memory_space<vmem>>, vector<1x256x256xbf16>
    %106 = vector.shape_cast %105 : vector<1x256x256xbf16> to vector<256x256xbf16>
    %c0_104 = arith.constant 0 : index
    %c2_105 = arith.constant 2 : index
    %c0_106 = arith.constant 0 : index
    %107 = vector.load %arg2[%c0_104, %c2_105, %c0_106] : memref<1x24x256xbf16, #tpu.memory_space<vmem>>, vector<1x2x256xbf16>
    %108 = vector.shape_cast %107 : vector<1x2x256xbf16> to vector<2x256xbf16>
    %cst_107 = arith.constant dense<0.000000e+00> : vector<2x256xf32>
    %109 = tpu.matmul %108, %106, %cst_107 {dimension_numbers = #tpu.dot_dimension_numbers<[1], [0], [0], [1], [0, 0, 1, 1], [], []>} : vector<2x256xbf16>, vector<256x256xbf16>, vector<2x256xf32> -> vector<2x256xf32>
    %110 = arith.addf %92, %109 : vector<2x256xf32>
    %c0_108 = arith.constant 0 : index
    %c8_109 = arith.constant 8 : index
    %c0_110 = arith.constant 0 : index
    %111 = vector.load %arg2[%c0_108, %c8_109, %c0_110] : memref<1x24x256xbf16, #tpu.memory_space<vmem>>, vector<1x2x256xbf16>
    %112 = vector.shape_cast %111 : vector<1x2x256xbf16> to vector<2x256xbf16>
    %cst_111 = arith.constant dense<0.000000e+00> : vector<2x256xf32>
    %113 = tpu.matmul %112, %106, %cst_111 {dimension_numbers = #tpu.dot_dimension_numbers<[1], [0], [0], [1], [0, 0, 1, 1], [], []>} : vector<2x256xbf16>, vector<256x256xbf16>, vector<2x256xf32> -> vector<2x256xf32>
    %114 = arith.addf %96, %113 : vector<2x256xf32>
    %c0_112 = arith.constant 0 : index
    %c14 = arith.constant 14 : index
    %c0_113 = arith.constant 0 : index
    %115 = vector.load %arg2[%c0_112, %c14, %c0_113] : memref<1x24x256xbf16, #tpu.memory_space<vmem>>, vector<1x2x256xbf16>
    %116 = vector.shape_cast %115 : vector<1x2x256xbf16> to vector<2x256xbf16>
    %cst_114 = arith.constant dense<0.000000e+00> : vector<2x256xf32>
    %117 = tpu.matmul %116, %106, %cst_114 {dimension_numbers = #tpu.dot_dimension_numbers<[1], [0], [0], [1], [0, 0, 1, 1], [], []>} : vector<2x256xbf16>, vector<256x256xbf16>, vector<2x256xf32> -> vector<2x256xf32>
    %118 = arith.addf %100, %117 : vector<2x256xf32>
    %c0_115 = arith.constant 0 : index
    %c20 = arith.constant 20 : index
    %c0_116 = arith.constant 0 : index
    %119 = vector.load %arg2[%c0_115, %c20, %c0_116] : memref<1x24x256xbf16, #tpu.memory_space<vmem>>, vector<1x2x256xbf16>
    %120 = vector.shape_cast %119 : vector<1x2x256xbf16> to vector<2x256xbf16>
    %cst_117 = arith.constant dense<0.000000e+00> : vector<2x256xf32>
    %121 = tpu.matmul %120, %106, %cst_117 {dimension_numbers = #tpu.dot_dimension_numbers<[1], [0], [0], [1], [0, 0, 1, 1], [], []>} : vector<2x256xbf16>, vector<256x256xbf16>, vector<2x256xf32> -> vector<2x256xf32>
    %122 = arith.addf %104, %121 : vector<2x256xf32>
    %c7_118 = arith.constant 7 : index
    %c0_119 = arith.constant 0 : index
    %c0_120 = arith.constant 0 : index
    %123 = vector.load %arg3[%c7_118, %c0_119, %c0_120] : memref<9x256x256xbf16, #tpu.memory_space<vmem>>, vector<1x256x256xbf16>
    %124 = vector.shape_cast %123 : vector<1x256x256xbf16> to vector<256x256xbf16>
    %c0_121 = arith.constant 0 : index
    %c8_122 = arith.constant 8 : index
    %c0_123 = arith.constant 0 : index
    %125 = vector.load %arg2[%c0_121, %c8_122, %c0_123] : memref<1x24x256xbf16, #tpu.memory_space<vmem>>, vector<1x2x256xbf16>
    %126 = vector.shape_cast %125 : vector<1x2x256xbf16> to vector<2x256xbf16>
    %cst_124 = arith.constant dense<0.000000e+00> : vector<2x256xf32>
    %127 = tpu.matmul %126, %124, %cst_124 {dimension_numbers = #tpu.dot_dimension_numbers<[1], [0], [0], [1], [0, 0, 1, 1], [], []>} : vector<2x256xbf16>, vector<256x256xbf16>, vector<2x256xf32> -> vector<2x256xf32>
    %128 = arith.addf %110, %127 : vector<2x256xf32>
    %c0_125 = arith.constant 0 : index
    %c3_126 = arith.constant 3 : index
    %c0_127 = arith.constant 0 : index
    %129 = vector.load %arg2[%c0_125, %c3_126, %c0_127] : memref<1x24x256xbf16, #tpu.memory_space<vmem>>, vector<1x2x256xbf16>
    %130 = vector.shape_cast %129 : vector<1x2x256xbf16> to vector<2x256xbf16>
    %cst_128 = arith.constant dense<0.000000e+00> : vector<2x256xf32>
    %131 = tpu.matmul %130, %124, %cst_128 {dimension_numbers = #tpu.dot_dimension_numbers<[1], [0], [0], [1], [0, 0, 1, 1], [], []>} : vector<2x256xbf16>, vector<256x256xbf16>, vector<2x256xf32> -> vector<2x256xf32>
    %132 = arith.addf %114, %131 : vector<2x256xf32>
    %c0_129 = arith.constant 0 : index
    %c20_130 = arith.constant 20 : index
    %c0_131 = arith.constant 0 : index
    %133 = vector.load %arg2[%c0_129, %c20_130, %c0_131] : memref<1x24x256xbf16, #tpu.memory_space<vmem>>, vector<1x2x256xbf16>
    %134 = vector.shape_cast %133 : vector<1x2x256xbf16> to vector<2x256xbf16>
    %cst_132 = arith.constant dense<0.000000e+00> : vector<2x256xf32>
    %135 = tpu.matmul %134, %124, %cst_132 {dimension_numbers = #tpu.dot_dimension_numbers<[1], [0], [0], [1], [0, 0, 1, 1], [], []>} : vector<2x256xbf16>, vector<256x256xbf16>, vector<2x256xf32> -> vector<2x256xf32>
    %136 = arith.addf %118, %135 : vector<2x256xf32>
    %c0_133 = arith.constant 0 : index
    %c15 = arith.constant 15 : index
    %c0_134 = arith.constant 0 : index
    %137 = vector.load %arg2[%c0_133, %c15, %c0_134] : memref<1x24x256xbf16, #tpu.memory_space<vmem>>, vector<1x2x256xbf16>
    %138 = vector.shape_cast %137 : vector<1x2x256xbf16> to vector<2x256xbf16>
    %cst_135 = arith.constant dense<0.000000e+00> : vector<2x256xf32>
    %139 = tpu.matmul %138, %124, %cst_135 {dimension_numbers = #tpu.dot_dimension_numbers<[1], [0], [0], [1], [0, 0, 1, 1], [], []>} : vector<2x256xbf16>, vector<256x256xbf16>, vector<2x256xf32> -> vector<2x256xf32>
    %140 = arith.addf %122, %139 : vector<2x256xf32>
    %c8_136 = arith.constant 8 : index
    %c0_137 = arith.constant 0 : index
    %c0_138 = arith.constant 0 : index
    %141 = vector.load %arg3[%c8_136, %c0_137, %c0_138] : memref<9x256x256xbf16, #tpu.memory_space<vmem>>, vector<1x256x256xbf16>
    %142 = vector.shape_cast %141 : vector<1x256x256xbf16> to vector<256x256xbf16>
    %c0_139 = arith.constant 0 : index
    %c3_140 = arith.constant 3 : index
    %c0_141 = arith.constant 0 : index
    %143 = vector.load %arg2[%c0_139, %c3_140, %c0_141] : memref<1x24x256xbf16, #tpu.memory_space<vmem>>, vector<1x2x256xbf16>
    %144 = vector.shape_cast %143 : vector<1x2x256xbf16> to vector<2x256xbf16>
    %cst_142 = arith.constant dense<0.000000e+00> : vector<2x256xf32>
    %145 = tpu.matmul %144, %142, %cst_142 {dimension_numbers = #tpu.dot_dimension_numbers<[1], [0], [0], [1], [0, 0, 1, 1], [], []>} : vector<2x256xbf16>, vector<256x256xbf16>, vector<2x256xf32> -> vector<2x256xf32>
    %146 = arith.addf %128, %145 : vector<2x256xf32>
    %c0_143 = arith.constant 0 : index
    %c9_144 = arith.constant 9 : index
    %c0_145 = arith.constant 0 : index
    %147 = vector.load %arg2[%c0_143, %c9_144, %c0_145] : memref<1x24x256xbf16, #tpu.memory_space<vmem>>, vector<1x2x256xbf16>
    %148 = vector.shape_cast %147 : vector<1x2x256xbf16> to vector<2x256xbf16>
    %cst_146 = arith.constant dense<0.000000e+00> : vector<2x256xf32>
    %149 = tpu.matmul %148, %142, %cst_146 {dimension_numbers = #tpu.dot_dimension_numbers<[1], [0], [0], [1], [0, 0, 1, 1], [], []>} : vector<2x256xbf16>, vector<256x256xbf16>, vector<2x256xf32> -> vector<2x256xf32>
    %150 = arith.addf %132, %149 : vector<2x256xf32>
    %c0_147 = arith.constant 0 : index
    %c15_148 = arith.constant 15 : index
    %c0_149 = arith.constant 0 : index
    %151 = vector.load %arg2[%c0_147, %c15_148, %c0_149] : memref<1x24x256xbf16, #tpu.memory_space<vmem>>, vector<1x2x256xbf16>
    %152 = vector.shape_cast %151 : vector<1x2x256xbf16> to vector<2x256xbf16>
    %cst_150 = arith.constant dense<0.000000e+00> : vector<2x256xf32>
    %153 = tpu.matmul %152, %142, %cst_150 {dimension_numbers = #tpu.dot_dimension_numbers<[1], [0], [0], [1], [0, 0, 1, 1], [], []>} : vector<2x256xbf16>, vector<256x256xbf16>, vector<2x256xf32> -> vector<2x256xf32>
    %154 = arith.addf %136, %153 : vector<2x256xf32>
    %c0_151 = arith.constant 0 : index
    %c21 = arith.constant 21 : index
    %c0_152 = arith.constant 0 : index
    %155 = vector.load %arg2[%c0_151, %c21, %c0_152] : memref<1x24x256xbf16, #tpu.memory_space<vmem>>, vector<1x2x256xbf16>
    %156 = vector.shape_cast %155 : vector<1x2x256xbf16> to vector<2x256xbf16>
    %cst_153 = arith.constant dense<0.000000e+00> : vector<2x256xf32>
    %157 = tpu.matmul %156, %142, %cst_153 {dimension_numbers = #tpu.dot_dimension_numbers<[1], [0], [0], [1], [0, 0, 1, 1], [], []>} : vector<2x256xbf16>, vector<256x256xbf16>, vector<2x256xf32> -> vector<2x256xf32>
    %158 = arith.addf %140, %157 : vector<2x256xf32>
    %159 = vector.broadcast %0 : vector<1x256xf32> to vector<2x256xf32>
    %160 = arith.addf %146, %159 : vector<2x256xf32>
    %161 = vector.broadcast %0 : vector<1x256xf32> to vector<2x256xf32>
    %162 = arith.addf %150, %161 : vector<2x256xf32>
    %163 = arith.maximumf %160, %162 : vector<2x256xf32>
    %164 = vector.broadcast %0 : vector<1x256xf32> to vector<2x256xf32>
    %165 = arith.addf %154, %164 : vector<2x256xf32>
    %166 = arith.maximumf %163, %165 : vector<2x256xf32>
    %167 = vector.broadcast %0 : vector<1x256xf32> to vector<2x256xf32>
    %168 = arith.addf %158, %167 : vector<2x256xf32>
    %169 = arith.maximumf %166, %168 : vector<2x256xf32>
    %cst_154 = arith.constant 0.000000e+00 : f32
    %170 = vector.broadcast %cst_154 : f32 to vector<2x256xf32>
    %171 = arith.maximumf %169, %170 : vector<2x256xf32>
    %172 = tpu.iota {dimensions = array<i32: 0>} : vector<2x1xi32>
    %c2_i32 = arith.constant 2 : i32
    %c0_i32 = arith.constant 0 : i32
    %173 = arith.cmpi eq, %c2_i32, %c0_i32 : i32
    %c1_i32 = arith.constant 1 : i32
    %174 = arith.select %173, %c1_i32, %c2_i32 : i32
    %175 = vector.broadcast %174 : i32 to vector<2x1xi32>
    %176 = arith.remsi %172, %175 : vector<2x1xi32>
    %c0_i32_155 = arith.constant 0 : i32
    %177 = vector.broadcast %c0_i32_155 : i32 to vector<2x1xi32>
    %178 = arith.cmpi ne, %176, %177 : vector<2x1xi32>
    %c0_i32_156 = arith.constant 0 : i32
    %179 = vector.broadcast %c0_i32_156 : i32 to vector<2x1xi32>
    %180 = arith.cmpi slt, %176, %179 : vector<2x1xi32>
    %c0_i32_157 = arith.constant 0 : i32
    %181 = arith.cmpi slt, %174, %c0_i32_157 : i32
    %182 = vector.broadcast %181 : i1 to vector<2x1xi1>
    %183 = vector.broadcast %182 : vector<2x1xi1> to vector<2x1xi1>
    %184 = arith.xori %180, %183 : vector<2x1xi1>
    %185 = arith.andi %184, %178 : vector<2x1xi1>
    %186 = vector.broadcast %174 : i32 to vector<2x1xi32>
    %187 = arith.addi %176, %186 : vector<2x1xi32>
    %188 = arith.select %185, %187, %176 : vector<2x1xi1>, vector<2x1xi32>
    %c1_i32_158 = arith.constant 1 : i32
    %189 = vector.broadcast %c1_i32_158 : i32 to vector<2x1xi32>
    %190 = arith.cmpi slt, %188, %189 : vector<2x1xi32>
    %191 = arith.extui %190 : vector<2x1xi1> to vector<2x1xi32>
    %192 = arith.sitofp %191 : vector<2x1xi32> to vector<2x1xf32>
    %193 = vector.broadcast %192 : vector<2x1xf32> to vector<2x256xf32>
    %194 = arith.mulf %171, %193 : vector<2x256xf32>
    %cst_159 = arith.constant dense<0.000000e+00> : vector<256xf32>
    %195 = vector.multi_reduction <add>, %194, %cst_159 [0] : vector<2x256xf32> to vector<256xf32>
    %196 = vector.shape_cast %195 : vector<256xf32> to vector<1x256xf32>
    %cst_160 = arith.constant 1.000000e+00 : f32
    %197 = vector.broadcast %cst_160 : f32 to vector<1x256xf32>
    %198 = arith.mulf %196, %197 : vector<1x256xf32>
    %c0_161 = arith.constant 0 : index
    %c0_162 = arith.constant 0 : index
    %199 = vector.load %arg5[%c0_161, %c0_162] : memref<1x256xf32, #tpu.memory_space<vmem>>, vector<1x256xf32>
    %200 = arith.mulf %198, %199 : vector<1x256xf32>
    %cst_163 = arith.constant dense<0.000000e+00> : vector<1xf32>
    %201 = vector.multi_reduction <add>, %200, %cst_163 [1] : vector<1x256xf32> to vector<1xf32>
    %202 = vector.shape_cast %201 : vector<1xf32> to vector<1x1x1xf32>
    %c0_164 = arith.constant 0 : index
    %c0_165 = arith.constant 0 : index
    %c0_166 = arith.constant 0 : index
    %c0_167 = arith.constant 0 : index
    %203 = vector.load %arg6[%c0_164, %c0_165, %c0_166, %c0_167] : memref<1x1x1x1xf32, #tpu.memory_space<vmem>>, vector<1x1x1x1xf32>
    %204 = vector.shape_cast %203 : vector<1x1x1x1xf32> to vector<1x1x1xf32>
    %205 = vector.shape_cast %202 : vector<1x1x1xf32> to vector<1x1x1x1xf32>
    tpu.vector_store %arg6[%c0_164, %c0_165, %c0_166, %c0_167], %205 {strides = array<i32>} : memref<1x1x1x1xf32, #tpu.memory_space<vmem>>, vector<1x1x1x1xf32>,
    return
  }
  func.func @transform_0(%arg0: i32, %arg1: i32) -> (i32, i32, i32) {
    %c0_i32 = arith.constant 0 : i32
    %c0_i32_0 = arith.constant 0 : i32
    %c0_i32_1 = arith.constant 0 : i32
    return %arg1, %c0_i32, %c0_i32_0 : i32, i32, i32
  }
  func.func @transform_1(%arg0: i32, %arg1: i32) -> (i32, i32, i32) {
    %c0_i32 = arith.constant 0 : i32
    %c0_i32_0 = arith.constant 0 : i32
    %c0_i32_1 = arith.constant 0 : i32
    return %c0_i32, %c0_i32_0, %arg0 : i32, i32, i32
  }
  func.func @transform_2(%arg0: i32, %arg1: i32) -> (i32, i32) {
    %c0_i32 = arith.constant 0 : i32
    %c0_i32_0 = arith.constant 0 : i32
    return %c0_i32, %arg0 : i32, i32
  }
  func.func @transform_3(%arg0: i32, %arg1: i32) -> (i32, i32) {
    %c0_i32 = arith.constant 0 : i32
    %c0_i32_0 = arith.constant 0 : i32
    return %c0_i32, %arg0 : i32, i32
  }
  func.func @transform_4(%arg0: i32, %arg1: i32) -> (i32, i32, i32, i32) {
    %c0_i32 = arith.constant 0 : i32
    %c0_i32_0 = arith.constant 0 : i32
    %c0_i32_1 = arith.constant 0 : i32
    return %arg0, %arg1, %c0_i32, %c0_i32_0 : i32, i32, i32, i32
  }
}

</mosaic_0001>

<bundles_post_ra>
// kernel: custom_cnn_forward.4
= control target key start
LH: loop header
LB: loop body
LE: loop exit
PB: predicated region body
PF: predicated region fallthrough
CT: control target
= control target key end

     0   :  { %8 = vsyncpa [#allocation3], 0  ;;  %s1032_s12 = smov 0   ;;  %s1208_s0 = inlined_call_operand.vmem [shape: bf16[2,4,64,32], index: 0, kind: input, shape index: {}]   ;;  %s1209_s1 = inlined_call_operand.vmem [shape: bf16[32,64], index: 1, kind: input, shape index: {}]   ;;  %s1210_s2 = inlined_call_operand.hbm [shape: f32[1,64], index: 2, kind: input, shape index: {}]   ;;  %s1211_s3 = inlined_call_operand.vmem [shape: bf16[2,64,64], index: 3, kind: output, shape index: {}]  }
   0x1 LB: > { %s1038_s13 = sadd.s32 4294967295, %s1009_s12   ;;  %p774_p0 = scmp.ge.s32.totalorder %s1009_s12, 1  ;;  %s1009_s12 = sphi %s1032_s12, %s14_s12  }
   0x2   : > { %p113_p1 = scmp.lt.s32.totalorder %s1009_s12, 3  ;;  %p1212_p3 = scmp.eq.s32.totalorder %s1038_s13, 0 }
   0x3   : > { %s1011_s15 = smov [#allocation2]   ;;  %s971_s20 = scalar_lea.hbm %s1210_s2, 16 }
   0x4   : > { %p1042_p2 = pnand %p774_p0, %p113_p1  ;;  %s129_s16 = sshll.u32 %s1011_s15, 4  ;;  %s130_s16 = int_to_ptr.vmem [resolvable:$true] %s129_s16 }
   0x5   : > { %p972_p6 = scmp.ne.s32.totalorder %s1210_s2, %s971_s20  ;;  %p978_p10 = scmp.lt.u32.totalorder %s971_s20, %s1210_s2 }
   0x6   : > { %s1214_s14 = scalar_select %p1042_p2, 1, 0 }
   0x7   : > { %p938_p4 = pneg %p1042_p2 }
   0x9   : > { %p1051_p5 = pnand %p1212_p3, %p938_p4 }
   0xb   : > { %p973_p7 = pneg %p1051_p5 }
   0xd   : > { %p974_p8 = pnand %p973_p7, %p972_p6 }
   0xf   : > { %p975_p9 = pneg %p974_p8 }
  0x11   : > { %p980_p11 = pnand %p978_p10, %p975_p9 }
  0x13   : > { %983 = shalt.err (!%p980_p11)
}
  0x14   : > { %s984_s25 = scalar_lea.vmem %s130_s16, 16  ;;  %s991_s26 = scalar_lea.vmem %s130_s16, 32 }
  0x15   : > { %p985_p12 = scmp.ne.s32.totalorder %s130_s16, %s984_s25  ;;  %p992_p1 = scmp.lt.s32.totalorder %s130_s16, %s130_s16 }
  0x16   : > { %p993_p4 = scmp.lt.s32.totalorder %s991_s26, %s984_s25 }
  0x17   : > { %p987_p13 = pnand %p985_p12, %p973_p7 }
  0x18   : > { %p994_p3 = por %p993_p4, %p992_p1 }
  0x19   : > { %p988_p0 = pneg %p987_p13 }
  0x1b   : > { %p995_p2 = pnand %p994_p3, %p988_p0 }
  0x1d   : > { %998 = shalt.err (!%p995_p2)
}
  0x1e   : > { %941 = dma.hbm_to_vmem [thread:$0]  (!%p1051_p5), %s1210_s2, 16, %s130_s16, [#allocation3]  }
  0x1f   : > { %p1216_p6 = scmp.ne.s32.totalorder %s1214_s14, 0 }
  0x20   : > { %p1217_p8 = scmp.eq.s32.totalorder (!%p1216_p6), %s1038_s13, 0 }
  0x21   : > { %150 = sbr.rel (%p1216_p6) target bundleno = 300 (0x12c), region = 32 }
  0x28   : > { %1004 = dma.done.wait (%p1217_p8), [#allocation3], 16   ;;  %p1218_p7 = pmov %p1217_p8 }
  0x29   : > { %p174_p9 = scmp.lt.s32.totalorder %s1038_s13, 1  ;;  %v953_v0 = vld [vmem:[%s1209_s1] sm:$0xff]   ;;  %v954_v1 = vld [vmem:[%s1209_s1 + $0x8] sm:$0xff]   ;;  %vm236_vm0 = vcmask 261120   ;;  %vm696_vm1 = vcmask 519168  }
  0x2a   : > { %1006 = vsyncadd (%p1218_p7), [#allocation3], 4294967280  ;;  %886 = vmatprep.subr.bf16.mxu0 %v953_v0  ;;  %898 = vmatprep.subr.bf16.mxu1 %v953_v0  ;;  %v1125_v18 = vld [vmem:[#allocation2] ss:$0 sm:$0xff] }
  0x2b   : > { %s1220_s13 = smov (!%p174_p9, %s1038_s13), 1  ;;  %887 = vmatpush3.bf16.msra.mxu0 %v953_v0  ;;  %899 = vmatpush3.bf16.msra.mxu1 %v953_v0 }
  0x2c   : > { %s852_s29 = sshll.u32 %s1220_s13, 7  ;;  %888 = vmatprep.subr.bf16.mxu0 %v954_v1  ;;  %900 = vmatprep.subr.bf16.mxu1 %v954_v1  ;;  %s853_s10 = sshll.u32 %s1220_s13, 5 }
  0x2d   : > { %s1085_s5 = scalar_lea.vmem %s1208_s0, %s852_s29  ;;  %s1179_s15 = scalar_lea.vmem %s1211_s3, %s853_s10 }
  0x2e   : > { %v955_v2 = vld [vmem:[%s1085_s5] sm:$0xff]   ;;  %v957_v4 = vld [vmem:[%s1085_s5 + $0x8] sm:$0xff]   ;;  %v959_v6 = vld [vmem:[%s1085_s5 + $0x10] sm:$0xff]  }
  0x2f   : > { %v956_v3 = vld [vmem:[%s1085_s5 + $0x20] sm:$0xff]   ;;  %890 = vmatprep.mubr.msk.bf16.mxu0 %vm236_vm0, %v955_v2  ;;  %v958_v5 = vld [vmem:[%s1085_s5 + $0x28] sm:$0xff]   ;;  %889 = vmatpush3.bf16.msra.mxu0 %v954_v1  ;;  %v960_v7 = vld [vmem:[%s1085_s5 + $0x30] sm:$0xff]  }
  0x30   : > { %902 = vmatprep.mubr.msk.bf16.mxu1 %vm236_vm0, %v956_v3  ;;  %901 = vmatpush3.bf16.msra.mxu1 %v954_v1  ;;  %v961_v8 = vld [vmem:[%s1085_s5 + $0x18] sm:$0xff]   ;;  %v963_v10 = vld [vmem:[%s1085_s5 + $0x40] sm:$0xff]   ;;  %v965_v12 = vld [vmem:[%s1085_s5 + $0x48] sm:$0xff]  }
  0x31   : > { %910 = vmatprep.subr.bf16.mxu0 %v953_v0  ;;  %922 = vmatprep.subr.bf16.mxu1 %v953_v0  ;;  %v962_v9 = vld [vmem:[%s1085_s5 + $0x38] sm:$0xff]   ;;  %v964_v11 = vld [vmem:[%s1085_s5 + $0x60] sm:$0xff]   ;;  %v966_v13 = vld [vmem:[%s1085_s5 + $0x68] sm:$0xff]  }
  0x32   : > { %891 = vmatmul.mubr.msk.bf16.vlgmr.msra.gmra.mrb[0].mxu0 %vm236_vm0, %v957_v4  ;;  %v967_v14 = vld [vmem:[%s1085_s5 + $0x50] sm:$0xff]   ;;  %v969_v16 = vld [vmem:[%s1085_s5 + $0x58] sm:$0xff]  }
  0x33   : > { %903 = vmatmul.mubr.msk.bf16.vlgmr.msra.gmra.mrb[0].mxu1 %vm236_vm0, %v958_v5  ;;  %911 = vmatpush3.bf16.msra.mxu0 %v953_v0  ;;  %v968_v15 = vld [vmem:[%s1085_s5 + $0x70] sm:$0xff]   ;;  %v970_v17 = vld [vmem:[%s1085_s5 + $0x78] sm:$0xff]  }
  0x34   : > { %923 = vmatpush3.bf16.msra.mxu1 %v953_v0  ;;  %894 = vmatprep.mubr.msk.bf16.mxu0 %vm236_vm0, %v959_v6 }
  0x35   : > { %906 = vmatprep.mubr.msk.bf16.mxu1 %vm236_vm0, %v960_v7  ;;  %912 = vmatprep.subr.bf16.mxu0 %v954_v1 }
  0x36   : > { %924 = vmatprep.subr.bf16.mxu1 %v954_v1 }
  0x37   : > { %913 = vmatpush3.bf16.msra.mxu0 %v954_v1 }
  0x38   : > { %925 = vmatpush3.bf16.msra.mxu1 %v954_v1 }
  0x3a   : > { %895 = vmatmul.mubr.msk.bf16.gmra.mrb[4].mxu0 %vm236_vm0, %v961_v8 }
  0x3b   : > { %907 = vmatmul.mubr.msk.bf16.gmra.mrb[4].mxu1 %vm236_vm0, %v962_v9  ;;  %914 = vmatprep.mubr.msk.bf16.mxu0 %vm236_vm0, %v963_v10 }
  0x3c   : > { %926 = vmatprep.mubr.msk.bf16.mxu1 %vm236_vm0, %v964_v11 }
  0x42   : > { %915 = vmatmul.mubr.msk.bf16.vlgmr.msra.gmra.mrb[8].mxu0 %vm236_vm0, %v965_v12 }
  0x43   : > { %927 = vmatmul.mubr.msk.bf16.vlgmr.msra.gmra.mrb[8].mxu1 %vm236_vm0, %v966_v13  ;;  %918 = vmatprep.mubr.msk.bf16.mxu0 %vm236_vm0, %v967_v14 }
  0x44   : > { %930 = vmatprep.mubr.msk.bf16.mxu1 %vm236_vm0, %v968_v15 }
  0x4a   : > { %919 = vmatmul.mubr.msk.bf16.gmra.mrb[12].mxu0 %vm236_vm0, %v969_v16 }
  0x4b   : > { %931 = vmatmul.mubr.msk.bf16.gmra.mrb[12].mxu1 %vm236_vm0, %v970_v17 }
 0x105   : > { %v892_v19 = vpop.f32.mrb[0].mxu0 }
 0x106   : > { %v904_v20 = vpop.f32.mrb[0].mxu1  ;;  %v292_v21 = vadd.f32 %v892_v19, %v1125_v18  ;;  %v283_v23 = vpop.f32.mrb[1].mxu0 }
 0x107   : > { %v398_v22 = vadd.f32 %v904_v20, %v1125_v18  ;;  %v389_v24 = vpop.f32.mrb[1].mxu1  ;;  %v284_v25 = vadd.f32 %v1125_v18, %v283_v23  ;;  %v893_v27 = vpop.f32.mrb[2].mxu0 }
 0x108   : > { %v390_v26 = vadd.f32 %v1125_v18, %v389_v24  ;;  %v905_v28 = vpop.f32.mrb[2].mxu1  ;;  %v295_v30 = vadd.f32 %v893_v27, %v1125_v18  ;;  %v286_v32 = vpop.f32.mrb[3].mxu0 }
 0x109   : > { %v422_v29 = vmax.f32 %v292_v21, %v398_v22  ;;  %v401_v31 = vadd.f32 %v905_v28, %v1125_v18  ;;  %v392_v33 = vpop.f32.mrb[3].mxu1  ;;  %v287_v35 = vadd.f32 %v1125_v18, %v286_v32 }
 0x10a   : > { %v420_v34 = vmax.f32 %v284_v25, %v390_v26  ;;  %v393_v36 = vadd.f32 %v1125_v18, %v392_v33 }
 0x10b   : > { %v423_v37 = vmax.f32 %v295_v30, %v401_v31 }
 0x10c   : > { %v421_v38 = vmax.f32 %v287_v35, %v393_v36 }
 0x10d   : > { %v896_v39 = vpop.f32.mrb[4].mxu0 }
 0x10e   : > { %v908_v40 = vpop.f32.mrb[4].mxu1  ;;  %v1136_v41 = vadd.f32 %v896_v39, %v1125_v18  ;;  %v299_v43 = vpop.f32.mrb[5].mxu0 }
 0x10f   : > { %v1139_v42 = vadd.f32 %v908_v40, %v1125_v18  ;;  %v405_v44 = vpop.f32.mrb[5].mxu1  ;;  %v1142_v45 = vadd.f32 %v1125_v18, %v299_v43  ;;  %v897_v47 = vpop.f32.mrb[6].mxu0 }
 0x110   : > { %v1145_v46 = vadd.f32 %v1125_v18, %v405_v44  ;;  %v909_v48 = vpop.f32.mrb[6].mxu1  ;;  %v1150_v50 = vadd.f32 %v897_v47, %v1125_v18  ;;  %v302_v52 = vpop.f32.mrb[7].mxu0 }
 0x111   : > { %v426_v49 = vmax.f32 %v1136_v41, %v1139_v42  ;;  %v1153_v51 = vadd.f32 %v909_v48, %v1125_v18  ;;  %v408_v53 = vpop.f32.mrb[7].mxu1  ;;  %v1158_v55 = vadd.f32 %v1125_v18, %v302_v52 }
 0x112   : > { %v424_v54 = vmax.f32 %v1142_v45, %v1145_v46  ;;  %v1161_v56 = vadd.f32 %v1125_v18, %v408_v53 }
 0x113   : > { %v427_v57 = vmax.f32 %v1150_v50, %v1153_v51 }
 0x114   : > { %v425_v58 = vmax.f32 %v1158_v55, %v1161_v56 }
 0x115   : > { %v916_v59 = vpop.f32.mrb[8].mxu0 }
 0x116   : > { %v928_v60 = vpop.f32.mrb[8].mxu1  ;;  %v512_v61 = vadd.f32 %v916_v59, %v1125_v18  ;;  %v503_v63 = vpop.f32.mrb[9].mxu0 }
 0x117   : > { %v626_v62 = vadd.f32 %v928_v60, %v1125_v18  ;;  %v617_v0 = vpop.f32.mrb[9].mxu1  ;;  %v504_v1 = vadd.f32 %v1125_v18, %v503_v63  ;;  %v917_v3 = vpop.f32.mrb[10].mxu0 }
 0x118   : > { %v618_v2 = vadd.f32 %v1125_v18, %v617_v0  ;;  %v929_v4 = vpop.f32.mrb[10].mxu1  ;;  %v536_v5 = vmax.f32 %v422_v29, %v512_v61  ;;  %v515_v6 = vadd.f32 %v917_v3, %v1125_v18  ;;  %v506_v7 = vpop.f32.mrb[11].mxu0 }
 0x119   : > { %v620_v8 = vpop.f32.mrb[11].mxu1  ;;  %v534_v9 = vmax.f32 %v420_v34, %v504_v1  ;;  %v507_v10 = vadd.f32 %v1125_v18, %v506_v7  ;;  %v629_v13 = vadd.f32 %v929_v4, %v1125_v18 }
 0x11a   : > { %v650_v11 = vmax.f32 %v536_v5, %v626_v62  ;;  %v537_v12 = vmax.f32 %v423_v37, %v515_v6  ;;  %v621_v16 = vadd.f32 %v1125_v18, %v620_v8 }
 0x11b   : > { %v648_v14 = vmax.f32 %v534_v9, %v618_v2  ;;  %v535_v15 = vmax.f32 %v421_v38, %v507_v10 }
 0x11c   : > { %v658_v17 = vmax.f32 %v650_v11, 0.0  ;;  %v651_v19 = vmax.f32 %v537_v12, %v629_v13 }
 0x11d   : > { %v656_v20 = vmax.f32 %v648_v14, 0.0  ;;  %v649_v21 = vmax.f32 %v535_v15, %v621_v16  ;;  %v920_v22 = vpop.f32.mrb[12].mxu0 }
 0x11e   : > { %v932_v23 = vpop.f32.mrb[12].mxu1  ;;  %v856_v24 = vpack.c.bf16 %v658_v17, %v658_v17  ;;  %v659_v25 = vmax.f32 %v651_v19, 0.0  ;;  %v528_v26 = vadd.f32 %v920_v22, %v1125_v18  ;;  %v519_v28 = vpop.f32.mrb[13].mxu0 }
 0x11f   : > { %v642_v27 = vadd.f32 %v932_v23, %v1125_v18  ;;  %v633_v29 = vpop.f32.mrb[13].mxu1  ;;  %v854_v30 = vpack.c.bf16 %v656_v20, %v656_v20  ;;  %v657_v31 = vmax.f32 %v649_v21, 0.0  ;;  %v520_v32 = vadd.f32 %v1125_v18, %v519_v28  ;;  %v921_v34 = vpop.f32.mrb[14].mxu0 }
 0x120   : > { %v634_v33 = vadd.f32 %v1125_v18, %v633_v29  ;;  %v933_v35 = vpop.f32.mrb[14].mxu1  ;;  %699 = vst.msk [vmem:[%s1179_s15 + $0x8] sm:$0xf] %vm696_vm1, %v856_v24  ;;  %v857_v36 = vpack.c.bf16 %v659_v25, %v659_v25  ;;  %v540_v37 = vmax.f32 %v426_v49, %v528_v26  ;;  %v531_v38 = vadd.f32 %v921_v34, %v1125_v18  ;;  %v522_v39 = vpop.f32.mrb[15].mxu0 }
 0x121   : > { %v636_v40 = vpop.f32.mrb[15].mxu1  ;;  %697 = vst.msk [vmem:[%s1179_s15] sm:$0xf] %vm696_vm1, %v854_v30  ;;  %v855_v41 = vpack.c.bf16 %v657_v31, %v657_v31  ;;  %v538_v42 = vmax.f32 %v424_v54, %v520_v32  ;;  %v523_v43 = vadd.f32 %v1125_v18, %v522_v39  ;;  %v645_v46 = vadd.f32 %v933_v35, %v1125_v18 }
 0x122   : > { %700 = vst.msk [vmem:[%s1179_s15 + $0xc] sm:$0xf] %vm696_vm1, %v857_v36  ;;  %v654_v44 = vmax.f32 %v540_v37, %v642_v27  ;;  %v541_v45 = vmax.f32 %v427_v57, %v531_v38  ;;  %v637_v49 = vadd.f32 %v1125_v18, %v636_v40 }
 0x123   : > { %698 = vst.msk [vmem:[%s1179_s15 + $0x4] sm:$0xf] %vm696_vm1, %v855_v41  ;;  %v652_v47 = vmax.f32 %v538_v42, %v634_v33  ;;  %v539_v48 = vmax.f32 %v425_v58, %v523_v43 }
 0x124   : > { %v662_v50 = vmax.f32 %v654_v44, 0.0  ;;  %v655_v51 = vmax.f32 %v541_v45, %v645_v46 }
 0x125   : > { %v660_v52 = vmax.f32 %v652_v47, 0.0  ;;  %v653_v53 = vmax.f32 %v539_v48, %v637_v49 }
 0x126   : > { %v860_v54 = vpack.c.bf16 %v662_v50, %v662_v50  ;;  %v663_v55 = vmax.f32 %v655_v51, 0.0 }
 0x127   : > { %v858_v56 = vpack.c.bf16 %v660_v52, %v660_v52  ;;  %v661_v59 = vmax.f32 %v653_v53, 0.0 }
 0x128   : > { %703 = vst.msk [vmem:[%s1179_s15 + $0x18] sm:$0xf] %vm696_vm1, %v860_v54  ;;  %v861_v57 = vpack.c.bf16 %v663_v55, %v663_v55 }
 0x129   : > { %701 = vst.msk [vmem:[%s1179_s15 + $0x10] sm:$0xf] %vm696_vm1, %v858_v56  ;;  %v859_v60 = vpack.c.bf16 %v661_v59, %v661_v59 }
 0x12a   : > { %704 = vst.msk [vmem:[%s1179_s15 + $0x1c] sm:$0xf] %vm696_vm1, %v861_v57 }
 0x12b   : > { %702 = vst.msk [vmem:[%s1179_s15 + $0x14] sm:$0xf] %vm696_vm1, %v859_v60 }
 0x12c PF: > { %s14_s12 = sadd.s32 1, %s1009_s12  }
 0x12d   : > { %p11_p2 = scmp.ge.s32.totalorder %s14_s12, 4  }
 0x12f   :  { %13 = sbr.rel (!%p11_p2) target bundleno = 1 (0x1), region = 70 }
 0x136   :  { %726 = vsyncpa [#allocation3], 1 }
 0x137   :  { %728 = vsyncpa [#allocation3 + $0x1], 1 }

// kernel: custom_cnn_forward.6
= control target key start
LH: loop header
LB: loop body
LE: loop exit
PB: predicated region body
PF: predicated region fallthrough
CT: control target
= control target key end

     0   :  { %s3555_s12 = smov 0   ;;  %s3557_s13 = smov 0   ;;  %s4688_s0 = inlined_call_operand.vmem [shape: bf16[2,48,128], index: 0, kind: input, shape index: {}]   ;;  %s4689_s1 = inlined_call_operand.vmem [shape: bf16[9,128,256], index: 1, kind: input, shape index: {}]   ;;  %s4690_s2 = inlined_call_operand.vmem [shape: f32[1,256], index: 2, kind: input, shape index: {}]   ;;  %s4691_s3 = inlined_call_operand.vmem [shape: bf16[2,6,256], index: 3, kind: output, shape index: {}]  }
   0x1   :  { %s3559_s14 = smov 0  }
   0x2 LB: > { %s22_s15 = sadd.s32 1, %s3528_s13  ;;  %p2960_p0 = scmp.ge.s32.totalorder %s3532_s14, 1  ;;  %s3532_s14 = sphi %s3559_s14, %s13_s14   ;;  %s3528_s13 = sphi %s3557_s13, %s4693_s13   ;;  %s3524_s12 = sphi %s3555_s12, %s4692_s12  }
   0x3   : > { %p23_p1 = scmp.ge.s32.totalorder %s22_s15, 2  ;;  %p172_p2 = scmp.lt.s32.totalorder %s3532_s14, 3 }
   0x5   : > { %s4695_s15 = smov (%p23_p1, %s22_s15), 0  ;;  %p173_p3 = pnand %p2960_p0, %p172_p2 }
   0x6   : > { %v3578_v0 = vld [vmem:[%s4689_s1 + $0x84] ss:$8 sps:$4 sm:$0xff] (!%p173_p3)   ;;  %v3534_v2 = vmov (!%p173_p3), 0   ;;  %v3591_v3 = vld [vmem:[%s4689_s1 + $0x80] ss:$8 sps:$4 sm:$0xff] (!%p173_p3)   ;;  %p209_p4 = scmp.lt.s32.totalorder (!%p173_p3), %s3524_s12, 1 }
   0x7   : > { %176 = sbr.rel (%p173_p3) target bundleno = 811 (0x32b), region = 32  ;;  %v3583_v1 = vld [vmem:[%s4689_s1 + $0x4] ss:$8 sps:$4 sm:$0xff] (!%p173_p3)   ;;  %395 = vmatprep.mubr.bf16.mxu0 (!%p173_p3), %v3534_v2  ;;  %516 = vmatprep.mubr.bf16.mxu1 (!%p173_p3), %v3534_v2  ;;  %v3596_v4 = vld [vmem:[%s4689_s1] ss:$8 sps:$4 sm:$0xff] (!%p173_p3)  }
   0x8   : > { %363 = vmatprep.subr.bf16.mxu0 (!%p173_p3), %v3578_v0  ;;  %484 = vmatprep.subr.bf16.mxu1 (!%p173_p3), %v3583_v1  ;;  %v3602_v5 = vld [vmem:[%s4689_s1 + $0x94] ss:$8 sps:$4 sm:$0xff] (!%p173_p3)   ;;  %v3614_v7 = vld [vmem:[%s4689_s1 + $0x90] ss:$8 sps:$4 sm:$0xff] (!%p173_p3)   ;;  %v3626_v9 = vld [vmem:[%s4689_s1 + $0xa4] ss:$8 sps:$4 sm:$0xff] (!%p173_p3)  }
   0x9   : > { %364 = vmatpush1.bf16.msra.mxu0 (!%p173_p3), %v3591_v3  ;;  %485 = vmatpush1.bf16.msra.mxu1 (!%p173_p3), %v3596_v4  ;;  %v3609_v6 = vld [vmem:[%s4689_s1 + $0x14] ss:$8 sps:$4 sm:$0xff] (!%p173_p3)   ;;  %v3620_v8 = vld [vmem:[%s4689_s1 + $0x10] ss:$8 sps:$4 sm:$0xff] (!%p173_p3)   ;;  %v3631_v10 = vld [vmem:[%s4689_s1 + $0x24] ss:$8 sps:$4 sm:$0xff] (!%p173_p3)  }
   0xa   : > { %365 = vmatprep.subr.bf16.mxu0 (!%p173_p3), %v3602_v5  ;;  %486 = vmatprep.subr.bf16.mxu1 (!%p173_p3), %v3609_v6  ;;  %v3636_v11 = vld [vmem:[%s4689_s1 + $0xa0] ss:$8 sps:$4 sm:$0xff] (!%p173_p3)   ;;  %v3648_v13 = vld [vmem:[%s4689_s1 + $0xb4] ss:$8 sps:$4 sm:$0xff] (!%p173_p3)   ;;  %v3661_v15 = vld [vmem:[%s4689_s1 + $0xb0] ss:$8 sps:$4 sm:$0xff] (!%p173_p3)  }
   0xb   : > { %v3641_v12 = vld [vmem:[%s4689_s1 + $0x20] ss:$8 sps:$4 sm:$0xff] (!%p173_p3)   ;;  %v3655_v14 = vld [vmem:[%s4689_s1 + $0x34] ss:$8 sps:$4 sm:$0xff] (!%p173_p3)   ;;  %v3668_v16 = vld [vmem:[%s4689_s1 + $0x30] ss:$8 sps:$4 sm:$0xff] (!%p173_p3)  }
   0xc   : > { %v3673_v17 = vld [vmem:[%s4689_s1 + $0xc4] ss:$8 sps:$4 sm:$0xff] (!%p173_p3)   ;;  %v3688_v19 = vld [vmem:[%s4689_s1 + $0xc0] ss:$8 sps:$4 sm:$0xff] (!%p173_p3)   ;;  %v3700_v21 = vld [vmem:[%s4689_s1 + $0xd4] ss:$8 sps:$4 sm:$0xff] (!%p173_p3)  }
   0xd   : > { %366 = vmatpush1.bf16.msra.mxu0 (!%p173_p3), %v3614_v7  ;;  %487 = vmatpush1.bf16.msra.mxu1 (!%p173_p3), %v3620_v8  ;;  %v3680_v18 = vld [vmem:[%s4689_s1 + $0x44] ss:$8 sps:$4 sm:$0xff] (!%p173_p3)   ;;  %v3693_v20 = vld [vmem:[%s4689_s1 + $0x40] ss:$8 sps:$4 sm:$0xff] (!%p173_p3)   ;;  %v3707_v22 = vld [vmem:[%s4689_s1 + $0x54] ss:$8 sps:$4 sm:$0xff] (!%p173_p3)  }
   0xe   : > { %367 = vmatprep.subr.bf16.mxu0 %v3626_v9  ;;  %488 = vmatprep.subr.bf16.mxu1 %v3631_v10  ;;  %s4697_s12 = smov (!%p209_p4, %s3524_s12), 1  ;;  %v3715_v23 = vld [vmem:[%s4689_s1 + $0xd0] ss:$8 sps:$4 sm:$0xff]   ;;  %v3727_v25 = vld [vmem:[%s4689_s1 + $0xe4] ss:$8 sps:$4 sm:$0xff]  }
   0xf   : > { %s3253_s10 = smul.u32 24, %s4697_s12  ;;  %v3720_v24 = vld [vmem:[%s4689_s1 + $0x50] ss:$8 sps:$4 sm:$0xff]   ;;  %v3732_v26 = vld [vmem:[%s4689_s1 + $0x64] ss:$8 sps:$4 sm:$0xff]   ;;  %s3251_s20 = sshll.u32 %s4697_s12, 3 }
  0x10   : > { %v3742_v27 = vld [vmem:[%s4689_s1 + $0xe0] ss:$8 sps:$4 sm:$0xff]   ;;  %v3760_v31 = vld [vmem:[%s4689_s1 + $0xf4] ss:$8 sps:$4 sm:$0xff]   ;;  %v3770_v33 = vld [vmem:[%s4689_s1 + $0xf0] ss:$8 sps:$4 sm:$0xff]   ;;  %s233_s23 = scalar_lea.vmem %s4691_s3, %s3251_s20 }
  0x11   : > { %368 = vmatpush1.bf16.msra.mxu0 %v3636_v11  ;;  %489 = vmatpush1.bf16.msra.mxu1 %v3641_v12  ;;  %s3737_s25 = scalar_lea.vmem %s4688_s0, %s3253_s10  ;;  %v3747_v28 = vld [vmem:[%s4689_s1 + $0x60] ss:$8 sps:$4 sm:$0xff]   ;;  %v3765_v32 = vld [vmem:[%s4689_s1 + $0x74] ss:$8 sps:$4 sm:$0xff]   ;;  %v3778_v35 = vld [vmem:[%s4689_s1 + $0x70] ss:$8 sps:$4 sm:$0xff]  }
  0x12   : > { %369 = vmatprep.subr.bf16.mxu0 %v3648_v13  ;;  %490 = vmatprep.subr.bf16.mxu1 %v3655_v14  ;;  %v3752_v29 = vld [vmem:[%s3737_s25 + $0x4] sm:$0xc]  ;;  %v255_v30 = vld [vmem:[%s3737_s25 + $0x8] sm:$0x1]  ;;  %v253_v37 = vld [vmem:[%s3737_s25] sm:$0x7] }
  0x13   : > { %v2980_v34 = vcombine.low %v3752_v29, %v255_v30  ;;  %v3331_v38 = vld [vmem:[%s3737_s25] ss:$0 sps:$4 sm:$0xff]   ;;  %v3850_v43 = vld [vmem:[%s3737_s25 + $0x10] sm:$0xc]  ;;  %v258_v44 = vld [vmem:[%s3737_s25 + $0x14] sm:$0x1] }
  0x14   : > { %v532_v39 = vshll.u32 %v3331_v38, 16  ;;  %v530_v40 = vshrl.u32 %v3331_v38, 16  ;;  %v3014_v45 = vcombine.low %v3850_v43, %v258_v44  ;;  %v3865_v47 = vld [vmem:[%s3737_s25 + $0xc] sm:$0x7]  ;;  %v3337_v54 = vld [vmem:[%s4689_s1 + $0x100] ss:$8 sps:$4 sm:$0xff]  }
  0x15   : > { %370 = vmatpush1.bf16.msra.mxu0 %v3661_v15  ;;  %491 = vmatpush1.bf16.msra.mxu1 %v3668_v16  ;;  %v281_v36 = vrot.slane %v2980_v34, 2  ;;  %v3334_v48 = vld [vmem:[%s3737_s25 + $0xc] ss:$0 sps:$4 sm:$0xff]   ;;  %v3338_v55 = vld [vmem:[%s4689_s1 + $0x114] ss:$8 sps:$4 sm:$0xff]  }
  0x16   : > { %371 = vmatprep.subr.bf16.mxu0 %v3673_v17  ;;  %492 = vmatprep.subr.bf16.mxu1 %v3680_v18  ;;  %v534_v41 = vrot.slane %v532_v39, 1  ;;  %v3860_v46 = vrot.slane %v3014_v45, 2  ;;  %v715_v49 = vshll.u32 %v3334_v48, 16  ;;  %v713_v50 = vshrl.u32 %v3334_v48, 16  ;;  %v3335_v52 = vld [vmem:[%s4689_s1 + $0x104] ss:$8 sps:$4 sm:$0xff]  }
  0x17   : > { %v3340_v56 = vld [vmem:[%s4689_s1 + $0x110] ss:$8 sps:$4 sm:$0xff]   ;;  %v3341_v57 = vld [vmem:[%s4689_s1 + $0x124] ss:$8 sps:$4 sm:$0xff]   ;;  %v3343_v58 = vld [vmem:[%s4689_s1 + $0x120] ss:$8 sps:$4 sm:$0xff]  }
  0x18   : > { %v3818_v42 = vor.u32 %v534_v41, %v530_v40  ;;  %v717_v51 = vrot.slane %v715_v49, 1  ;;  %v3344_v59 = vld [vmem:[%s4689_s1 + $0x134] ss:$8 sps:$4 sm:$0xff]   ;;  %v3346_v60 = vld [vmem:[%s4689_s1 + $0x130] ss:$8 sps:$4 sm:$0xff]  }
  0x19   : > { %372 = vmatpush1.bf16.msra.mxu0 %v3688_v19  ;;  %493 = vmatpush1.bf16.msra.mxu1 %v3693_v20  ;;  %v3347_v61 = vld [vmem:[%s4689_s1 + $0x144] ss:$8 sps:$4 sm:$0xff]   ;;  %v942_v62 = vld [vmem:[%s3737_s25 + $0x8] sm:$0x3]  ;;  %v3374_v30 = vld [vmem:[%s4689_s1 + $0x1d4] ss:$8 sps:$4 sm:$0xff]  }
  0x1a   : > { %373 = vmatprep.subr.bf16.mxu0 %v3700_v21  ;;  %494 = vmatprep.subr.bf16.mxu1 %v3707_v22  ;;  %v3905_v53 = vor.u32 %v717_v51, %v713_v50  ;;  %v3349_v63 = vld [vmem:[%s4689_s1 + $0x140] ss:$8 sps:$4 sm:$0xff]   ;;  %v4018_v34 = vld [vmem:[%s4689_s1 + $0x1f4] ss:$8 sps:$4 sm:$0xff]   ;;  %v1339_v38 = vld [vmem:[%s3737_s25 + $0x4] sm:$0x8] }
  0x1b   : > { %v4041_v39 = vld [vmem:[%s3737_s25 + $0x8] sm:$0x7] }
  0x1c   : > { %v3083_v41 = vcombine.low %v1339_v38, %v4041_v39 }
  0x1d   : > { %374 = vmatpush1.bf16.msra.mxu0 %v3715_v23  ;;  %495 = vmatpush1.bf16.msra.mxu1 %v3720_v24 }
  0x1e   : > { %375 = vmatprep.subr.bf16.mxu0 %v3727_v25  ;;  %496 = vmatprep.subr.bf16.mxu1 %v3732_v26  ;;  %v1347_v50 = vshrl.u32 %v3083_v41, 16  ;;  %v1350_v51 = vshll.u32 %v3083_v41, 16  ;;  %v4158_v41 = vld [vmem:[%s4689_s1 + $0x284] ss:$8 sps:$4 sm:$0xff]  }
  0x21   : > { %376 = vmatpush1.bf16.msra.mxu0 %v3742_v27  ;;  %497 = vmatpush1.bf16.msra.mxu1 %v3747_v28 }
  0x22   : > { %377 = vmatprep.subr.bf16.mxu0 %v3760_v31  ;;  %498 = vmatprep.subr.bf16.mxu1 %v3765_v32 }
  0x25   : > { %378 = vmatpush1.bf16.msra.mxu0 %v3770_v33  ;;  %499 = vmatpush1.bf16.msra.mxu1 %v3778_v35 }
  0x26   : > { %537 = vmatprep.subr.bf16.mxu0 %v3578_v0  ;;  %578 = vmatprep.subr.bf16.mxu1 %v3583_v1 }
  0x28   : > { %396 = vmatmul.mubr.bf16.vlgmr.msra.gmra.mrb[0].mxu0 %v281_v36  ;;  %517 = vmatmul.mubr.bf16.vlgmr.msra.gmra.mrb[0].mxu1 %v253_v37  ;;  %v4037_v37 = vld [vmem:[%s3737_s25 + $0x4] sm:$0x1] }
  0x29   : > { %538 = vmatpush1.bf16.msra.mxu0 %v3591_v3  ;;  %579 = vmatpush1.bf16.msra.mxu1 %v3596_v4 }
  0x2a   : > { %539 = vmatprep.subr.bf16.mxu0 %v3602_v5  ;;  %580 = vmatprep.subr.bf16.mxu1 %v3609_v6 }
  0x2b   : > { %569 = vmatprep.mubr.bf16.mxu0 %v3534_v2  ;;  %610 = vmatprep.mubr.bf16.mxu1 %v3534_v2 }
  0x2d   : > { %540 = vmatpush1.bf16.msra.mxu0 %v3614_v7  ;;  %581 = vmatpush1.bf16.msra.mxu1 %v3620_v8 }
  0x2e   : > { %541 = vmatprep.subr.bf16.mxu0 %v3626_v9  ;;  %582 = vmatprep.subr.bf16.mxu1 %v3631_v10 }
  0x31   : > { %542 = vmatpush1.bf16.msra.mxu0 %v3636_v11  ;;  %583 = vmatpush1.bf16.msra.mxu1 %v3641_v12 }
  0x32   : > { %543 = vmatprep.subr.bf16.mxu0 %v3648_v13  ;;  %584 = vmatprep.subr.bf16.mxu1 %v3655_v14 }
  0x35   : > { %544 = vmatpush1.bf16.msra.mxu0 %v3661_v15  ;;  %585 = vmatpush1.bf16.msra.mxu1 %v3668_v16 }
  0x36   : > { %545 = vmatprep.subr.bf16.mxu0 %v3673_v17  ;;  %586 = vmatprep.subr.bf16.mxu1 %v3680_v18 }
  0x39   : > { %546 = vmatpush1.bf16.msra.mxu0 %v3688_v19  ;;  %587 = vmatpush1.bf16.msra.mxu1 %v3693_v20 }
  0x3a   : > { %547 = vmatprep.subr.bf16.mxu0 %v3700_v21  ;;  %588 = vmatprep.subr.bf16.mxu1 %v3707_v22 }
  0x3d   : > { %548 = vmatpush1.bf16.msra.mxu0 %v3715_v23  ;;  %589 = vmatpush1.bf16.msra.mxu1 %v3720_v24 }
  0x3e   : > { %549 = vmatprep.subr.bf16.mxu0 %v3727_v25  ;;  %590 = vmatprep.subr.bf16.mxu1 %v3732_v26 }
  0x41   : > { %550 = vmatpush1.bf16.msra.mxu0 %v3742_v27  ;;  %591 = vmatpush1.bf16.msra.mxu1 %v3747_v28 }
  0x42   : > { %551 = vmatprep.subr.bf16.mxu0 %v3760_v31  ;;  %592 = vmatprep.subr.bf16.mxu1 %v3765_v32 }
  0x45   : > { %552 = vmatpush1.bf16.msra.mxu0 %v3770_v33  ;;  %593 = vmatpush1.bf16.msra.mxu1 %v3778_v35 }
  0x46   : > { %626 = vmatprep.subr.bf16.mxu0 %v3578_v0  ;;  %667 = vmatprep.subr.bf16.mxu1 %v3583_v1 }
  0x48   : > { %570 = vmatmul.mubr.bf16.vlgmr.msra.gmra.mrb[4].mxu0 %v3818_v42  ;;  %611 = vmatmul.mubr.bf16.vlgmr.msra.gmra.mrb[4].mxu1 %v281_v36  ;;  %v1280_v36 = vld [vmem:[%s3737_s25] sm:$0xe] }
  0x49   : > { %627 = vmatpush1.bf16.msra.mxu0 %v3591_v3  ;;  %668 = vmatpush1.bf16.msra.mxu1 %v3596_v4  ;;  %v3082_v40 = vcombine.low %v1280_v36, %v4037_v37 }
  0x4a   : > { %628 = vmatprep.subr.bf16.mxu0 %v3602_v5  ;;  %669 = vmatprep.subr.bf16.mxu1 %v3609_v6 }
  0x4b   : > { %658 = vmatprep.mubr.bf16.mxu0 %v3534_v2  ;;  %699 = vmatprep.mubr.bf16.mxu1 %v3534_v2  ;;  %v1288_v44 = vshrl.u32 %v3082_v40, 16  ;;  %v1291_v49 = vshll.u32 %v3082_v40, 16 }
  0x4d   : > { %629 = vmatpush1.bf16.msra.mxu0 %v3614_v7  ;;  %670 = vmatpush1.bf16.msra.mxu1 %v3620_v8 }
  0x4e   : > { %630 = vmatprep.subr.bf16.mxu0 %v3626_v9  ;;  %671 = vmatprep.subr.bf16.mxu1 %v3631_v10 }
  0x51   : > { %631 = vmatpush1.bf16.msra.mxu0 %v3636_v11  ;;  %672 = vmatpush1.bf16.msra.mxu1 %v3641_v12 }
  0x52   : > { %632 = vmatprep.subr.bf16.mxu0 %v3648_v13  ;;  %673 = vmatprep.subr.bf16.mxu1 %v3655_v14 }
  0x55   : > { %633 = vmatpush1.bf16.msra.mxu0 %v3661_v15  ;;  %674 = vmatpush1.bf16.msra.mxu1 %v3668_v16 }
  0x56   : > { %634 = vmatprep.subr.bf16.mxu0 %v3673_v17  ;;  %675 = vmatprep.subr.bf16.mxu1 %v3680_v18 }
  0x59   : > { %635 = vmatpush1.bf16.msra.mxu0 %v3688_v19  ;;  %676 = vmatpush1.bf16.msra.mxu1 %v3693_v20 }
  0x5a   : > { %636 = vmatprep.subr.bf16.mxu0 %v3700_v21  ;;  %677 = vmatprep.subr.bf16.mxu1 %v3707_v22 }
  0x5d   : > { %637 = vmatpush1.bf16.msra.mxu0 %v3715_v23  ;;  %678 = vmatpush1.bf16.msra.mxu1 %v3720_v24 }
  0x5e   : > { %638 = vmatprep.subr.bf16.mxu0 %v3727_v25  ;;  %679 = vmatprep.subr.bf16.mxu1 %v3732_v26 }
  0x61   : > { %639 = vmatpush1.bf16.msra.mxu0 %v3742_v27  ;;  %680 = vmatpush1.bf16.msra.mxu1 %v3747_v28 }
  0x62   : > { %640 = vmatprep.subr.bf16.mxu0 %v3760_v31  ;;  %681 = vmatprep.subr.bf16.mxu1 %v3765_v32 }
  0x65   : > { %641 = vmatpush1.bf16.msra.mxu0 %v3770_v33  ;;  %682 = vmatpush1.bf16.msra.mxu1 %v3778_v35 }
  0x66   : > { %720 = vmatprep.subr.bf16.mxu0 %v3578_v0  ;;  %761 = vmatprep.subr.bf16.mxu1 %v3583_v1  ;;  %v3350_v0 = vld [vmem:[%s4689_s1 + $0x154] ss:$8 sps:$4 sm:$0xff]   ;;  %v3048_v1 = vcombine.low %v3752_v29, %v942_v62  ;;  %v3373_v29 = vld [vmem:[%s4689_s1 + $0x1c0] ss:$8 sps:$4 sm:$0xff]   ;;  %v4056_v62 = vld [vmem:[%s4689_s1 + $0x204] ss:$8 sps:$4 sm:$0xff]  }
  0x68   : > { %659 = vmatmul.mubr.bf16.vlgmr.msra.gmra.mrb[8].mxu0 %v3860_v46  ;;  %700 = vmatmul.mubr.bf16.vlgmr.msra.gmra.mrb[8].mxu1 %v3865_v47 }
  0x69   : > { %721 = vmatpush1.bf16.msra.mxu0 %v3591_v3  ;;  %762 = vmatpush1.bf16.msra.mxu1 %v3596_v4  ;;  %v3352_v3 = vld [vmem:[%s4689_s1 + $0x150] ss:$8 sps:$4 sm:$0xff]   ;;  %v3353_v4 = vld [vmem:[%s4689_s1 + $0x164] ss:$8 sps:$4 sm:$0xff]  }
  0x6a   : > { %722 = vmatprep.subr.bf16.mxu0 %v3602_v5  ;;  %763 = vmatprep.subr.bf16.mxu1 %v3609_v6  ;;  %v947_v5 = vshrl.u32 %v3048_v1, 16  ;;  %v950_v6 = vshll.u32 %v3048_v1, 16  ;;  %v4067_v1 = vld [vmem:[%s4689_s1 + $0x200] ss:$8 sps:$4 sm:$0xff]  }
  0x6b   : > { %752 = vmatprep.mubr.bf16.mxu0 %v3534_v2  ;;  %793 = vmatprep.mubr.bf16.mxu1 %v3534_v2 }
  0x6d   : > { %723 = vmatpush1.bf16.msra.mxu0 %v3614_v7  ;;  %764 = vmatpush1.bf16.msra.mxu1 %v3620_v8  ;;  %v3355_v7 = vld [vmem:[%s4689_s1 + $0x160] ss:$8 sps:$4 sm:$0xff]   ;;  %v3356_v8 = vld [vmem:[%s4689_s1 + $0x174] ss:$8 sps:$4 sm:$0xff]  }
  0x6e   : > { %724 = vmatprep.subr.bf16.mxu0 %v3626_v9  ;;  %765 = vmatprep.subr.bf16.mxu1 %v3631_v10  ;;  %v949_v9 = vrot.slane %v947_v5, 2  ;;  %v952_v10 = vrot.slane %v950_v6, 3  ;;  %v3391_v5 = vld [vmem:[%s4689_s1 + $0x224] ss:$8 sps:$4 sm:$0xff]   ;;  %v3393_v6 = vld [vmem:[%s4689_s1 + $0x220] ss:$8 sps:$4 sm:$0xff]  }
  0x71   : > { %725 = vmatpush1.bf16.msra.mxu0 %v3636_v11  ;;  %766 = vmatpush1.bf16.msra.mxu1 %v3641_v12  ;;  %v3358_v11 = vld [vmem:[%s4689_s1 + $0x170] ss:$8 sps:$4 sm:$0xff]   ;;  %v953_v12 = vor.u32 %v952_v10, %v949_v9  ;;  %v3397_v9 = vld [vmem:[%s4689_s1 + $0x244] ss:$8 sps:$4 sm:$0xff]   ;;  %v3399_v10 = vld [vmem:[%s4689_s1 + $0x240] ss:$8 sps:$4 sm:$0xff]  }
  0x72   : > { %726 = vmatprep.subr.bf16.mxu0 %v3648_v13  ;;  %767 = vmatprep.subr.bf16.mxu1 %v3655_v14  ;;  %v1041_v13 = vld [vmem:[%s3737_s25 + $0x14] sm:$0x3] }
  0x73   : > { %v3049_v14 = vcombine.low %v3850_v43, %v1041_v13  ;;  %v4118_v13 = vld [vmem:[%s4689_s1 + $0x264] ss:$8 sps:$4 sm:$0xff]  }
  0x75   : > { %727 = vmatpush1.bf16.msra.mxu0 %v3661_v15  ;;  %768 = vmatpush1.bf16.msra.mxu1 %v3668_v16  ;;  %v1046_v15 = vshrl.u32 %v3049_v14, 16  ;;  %v1049_v16 = vshll.u32 %v3049_v14, 16 }
  0x76   : > { %728 = vmatprep.subr.bf16.mxu0 %v3673_v17  ;;  %769 = vmatprep.subr.bf16.mxu1 %v3680_v18 }
  0x77   : > { %v1048_v17 = vrot.slane %v1046_v15, 2  ;;  %v1051_v18 = vrot.slane %v1049_v16, 3 }
  0x79   : > { %729 = vmatpush1.bf16.msra.mxu0 %v3688_v19  ;;  %770 = vmatpush1.bf16.msra.mxu1 %v3693_v20  ;;  %v3359_v19 = vld [vmem:[%s4689_s1 + $0x184] ss:$8 sps:$4 sm:$0xff]   ;;  %v3968_v20 = vor.u32 %v1051_v18, %v1048_v17 }
  0x7a   : > { %730 = vmatprep.subr.bf16.mxu0 %v3700_v21  ;;  %771 = vmatprep.subr.bf16.mxu1 %v3707_v22  ;;  %v3361_v21 = vld [vmem:[%s4689_s1 + $0x180] ss:$8 sps:$4 sm:$0xff]   ;;  %v3362_v22 = vld [vmem:[%s4689_s1 + $0x194] ss:$8 sps:$4 sm:$0xff]  }
  0x7d   : > { %731 = vmatpush1.bf16.msra.mxu0 %v3715_v23  ;;  %772 = vmatpush1.bf16.msra.mxu1 %v3720_v24  ;;  %v3364_v23 = vld [vmem:[%s4689_s1 + $0x190] ss:$8 sps:$4 sm:$0xff]   ;;  %v3365_v24 = vld [vmem:[%s4689_s1 + $0x1a4] ss:$8 sps:$4 sm:$0xff]  }
  0x7e   : > { %732 = vmatprep.subr.bf16.mxu0 %v3727_v25  ;;  %773 = vmatprep.subr.bf16.mxu1 %v3732_v26  ;;  %v3367_v25 = vld [vmem:[%s4689_s1 + $0x1a0] ss:$8 sps:$4 sm:$0xff]   ;;  %v3368_v26 = vld [vmem:[%s4689_s1 + $0x1b4] ss:$8 sps:$4 sm:$0xff]  }
  0x81   : > { %733 = vmatpush1.bf16.msra.mxu0 %v3742_v27  ;;  %774 = vmatpush1.bf16.msra.mxu1 %v3747_v28  ;;  %v3370_v27 = vld [vmem:[%s4689_s1 + $0x1b0] ss:$8 sps:$4 sm:$0xff]   ;;  %v3371_v28 = vld [vmem:[%s4689_s1 + $0x1c4] ss:$8 sps:$4 sm:$0xff]  }
  0x82   : > { %734 = vmatprep.subr.bf16.mxu0 %v3760_v31  ;;  %775 = vmatprep.subr.bf16.mxu1 %v3765_v32  ;;  %v3376_v31 = vld [vmem:[%s4689_s1 + $0x1d0] ss:$8 sps:$4 sm:$0xff]   ;;  %v3377_v32 = vld [vmem:[%s4689_s1 + $0x1e4] ss:$8 sps:$4 sm:$0xff]  }
  0x85   : > { %735 = vmatpush1.bf16.msra.mxu0 %v3770_v33  ;;  %776 = vmatpush1.bf16.msra.mxu1 %v3778_v35  ;;  %v4013_v33 = vld [vmem:[%s4689_s1 + $0x1e0] ss:$8 sps:$4 sm:$0xff]   ;;  %v4025_v35 = vld [vmem:[%s4689_s1 + $0x1f0] ss:$8 sps:$4 sm:$0xff]  }
  0x86   : > { %899 = vmatprep.subr.bf16.mxu0 %v3335_v52  ;;  %955 = vmatprep.subr.bf16.mxu1 %v3335_v52 }
  0x88   : > { %753 = vmatmul.mubr.bf16.vlgmr.msra.gmra.mrb[12].mxu0 %v3905_v53  ;;  %794 = vmatmul.mubr.bf16.vlgmr.msra.gmra.mrb[12].mxu1 %v3860_v46 }
  0x89   : > { %900 = vmatpush1.bf16.msra.mxu0 %v3337_v54  ;;  %956 = vmatpush1.bf16.msra.mxu1 %v3337_v54 }
  0x8a   : > { %901 = vmatprep.subr.bf16.mxu0 %v3338_v55  ;;  %957 = vmatprep.subr.bf16.mxu1 %v3338_v55 }
  0x8b   : > { %931 = vmatprep.mubr.bf16.mxu0 %v3534_v2  ;;  %987 = vmatprep.mubr.bf16.mxu1 %v3534_v2 }
  0x8d   : > { %902 = vmatpush1.bf16.msra.mxu0 %v3340_v56  ;;  %958 = vmatpush1.bf16.msra.mxu1 %v3340_v56 }
  0x8e   : > { %903 = vmatprep.subr.bf16.mxu0 %v3341_v57  ;;  %959 = vmatprep.subr.bf16.mxu1 %v3341_v57 }
  0x91   : > { %904 = vmatpush1.bf16.msra.mxu0 %v3343_v58  ;;  %960 = vmatpush1.bf16.msra.mxu1 %v3343_v58 }
  0x92   : > { %905 = vmatprep.subr.bf16.mxu0 %v3344_v59  ;;  %961 = vmatprep.subr.bf16.mxu1 %v3344_v59 }
  0x95   : > { %906 = vmatpush1.bf16.msra.mxu0 %v3346_v60  ;;  %962 = vmatpush1.bf16.msra.mxu1 %v3346_v60 }
  0x96   : > { %907 = vmatprep.subr.bf16.mxu0 %v3347_v61  ;;  %963 = vmatprep.subr.bf16.mxu1 %v3347_v61 }
  0x99   : > { %908 = vmatpush1.bf16.msra.mxu0 %v3349_v63  ;;  %964 = vmatpush1.bf16.msra.mxu1 %v3349_v63 }
  0x9a   : > { %909 = vmatprep.subr.bf16.mxu0 %v3350_v0  ;;  %965 = vmatprep.subr.bf16.mxu1 %v3350_v0 }
  0x9d   : > { %910 = vmatpush1.bf16.msra.mxu0 %v3352_v3  ;;  %966 = vmatpush1.bf16.msra.mxu1 %v3352_v3 }
  0x9e   : > { %911 = vmatprep.subr.bf16.mxu0 %v3353_v4  ;;  %967 = vmatprep.subr.bf16.mxu1 %v3353_v4 }
  0xa1   : > { %912 = vmatpush1.bf16.msra.mxu0 %v3355_v7  ;;  %968 = vmatpush1.bf16.msra.mxu1 %v3355_v7 }
  0xa2   : > { %913 = vmatprep.subr.bf16.mxu0 %v3356_v8  ;;  %969 = vmatprep.subr.bf16.mxu1 %v3356_v8 }
  0xa5   : > { %914 = vmatpush1.bf16.msra.mxu0 %v3358_v11  ;;  %970 = vmatpush1.bf16.msra.mxu1 %v3358_v11 }
  0xa6   : > { %998 = vmatprep.subr.bf16.mxu0 %v3335_v52  ;;  %1054 = vmatprep.subr.bf16.mxu1 %v3335_v52 }
  0xa8   : > { %932 = vmatmul.mubr.bf16.vlgmr.msra.gmra.mrb[16].mxu0 %v3818_v42  ;;  %988 = vmatmul.mubr.bf16.vlgmr.msra.gmra.mrb[16].mxu1 %v953_v12  ;;  %v3402_v12 = vld [vmem:[%s4689_s1 + $0x250] ss:$8 sps:$4 sm:$0xff]  }
  0xa9   : > { %999 = vmatpush1.bf16.msra.mxu0 %v3337_v54  ;;  %1055 = vmatpush1.bf16.msra.mxu1 %v3337_v54 }
  0xaa   : > { %1000 = vmatprep.subr.bf16.mxu0 %v3338_v55  ;;  %1056 = vmatprep.subr.bf16.mxu1 %v3338_v55 }
  0xab   : > { %1030 = vmatprep.mubr.bf16.mxu0 %v3534_v2  ;;  %1086 = vmatprep.mubr.bf16.mxu1 %v3534_v2 }
  0xad   : > { %1001 = vmatpush1.bf16.msra.mxu0 %v3340_v56  ;;  %1057 = vmatpush1.bf16.msra.mxu1 %v3340_v56 }
  0xae   : > { %1002 = vmatprep.subr.bf16.mxu0 %v3341_v57  ;;  %1058 = vmatprep.subr.bf16.mxu1 %v3341_v57 }
  0xb1   : > { %1003 = vmatpush1.bf16.msra.mxu0 %v3343_v58  ;;  %1059 = vmatpush1.bf16.msra.mxu1 %v3343_v58  ;;  %v1290_v58 = vrot.slane %v1288_v44, 1  ;;  %v4181_v44 = vld [vmem:[%s4689_s1 + $0x290] ss:$8 sps:$4 sm:$0xff]  }
  0xb2   : > { %1004 = vmatprep.subr.bf16.mxu0 %v3344_v59  ;;  %1060 = vmatprep.subr.bf16.mxu1 %v3344_v59  ;;  %v1293_v59 = vrot.slane %v1291_v49, 2  ;;  %v3419_v49 = vld [vmem:[%s4689_s1 + $0x2b4] ss:$8 sps:$4 sm:$0xff]  }
  0xb5   : > { %1005 = vmatpush1.bf16.msra.mxu0 %v3346_v60  ;;  %1061 = vmatpush1.bf16.msra.mxu1 %v3346_v60  ;;  %v1349_v60 = vrot.slane %v1347_v50, 3  ;;  %v3421_v50 = vld [vmem:[%s4689_s1 + $0x2b0] ss:$8 sps:$4 sm:$0xff]  }
  0xb6   : > { %1006 = vmatprep.subr.bf16.mxu0 %v3347_v61  ;;  %1062 = vmatprep.subr.bf16.mxu1 %v3347_v61  ;;  %v1352_v61 = vrot.slane %v1350_v51, 4  ;;  %v3422_v51 = vld [vmem:[%s4689_s1 + $0x2c4] ss:$8 sps:$4 sm:$0xff]  }
  0xb9   : > { %1007 = vmatpush1.bf16.msra.mxu0 %v3349_v63  ;;  %1063 = vmatpush1.bf16.msra.mxu1 %v3349_v63  ;;  %v4058_v63 = vor.u32 %v1293_v59, %v1290_v58 }
  0xba   : > { %1008 = vmatprep.subr.bf16.mxu0 %v3350_v0  ;;  %1064 = vmatprep.subr.bf16.mxu1 %v3350_v0  ;;  %v4060_v0 = vor.u32 %v1352_v61, %v1349_v60 }
  0xbd   : > { %1009 = vmatpush1.bf16.msra.mxu0 %v3352_v3  ;;  %1065 = vmatpush1.bf16.msra.mxu1 %v3352_v3  ;;  %v4074_v3 = vld [vmem:[%s4689_s1 + $0x214] ss:$8 sps:$4 sm:$0xff]  }
  0xbe   : > { %1010 = vmatprep.subr.bf16.mxu0 %v3353_v4  ;;  %1066 = vmatprep.subr.bf16.mxu1 %v3353_v4  ;;  %v4083_v4 = vld [vmem:[%s4689_s1 + $0x210] ss:$8 sps:$4 sm:$0xff]  }
  0xc1   : > { %1011 = vmatpush1.bf16.msra.mxu0 %v3355_v7  ;;  %1067 = vmatpush1.bf16.msra.mxu1 %v3355_v7  ;;  %v3394_v7 = vld [vmem:[%s4689_s1 + $0x234] ss:$8 sps:$4 sm:$0xff]  }
  0xc2   : > { %1012 = vmatprep.subr.bf16.mxu0 %v3356_v8  ;;  %1068 = vmatprep.subr.bf16.mxu1 %v3356_v8  ;;  %v3396_v8 = vld [vmem:[%s4689_s1 + $0x230] ss:$8 sps:$4 sm:$0xff]  }
  0xc5   : > { %1013 = vmatpush1.bf16.msra.mxu0 %v3358_v11  ;;  %1069 = vmatpush1.bf16.msra.mxu1 %v3358_v11  ;;  %v3400_v11 = vld [vmem:[%s4689_s1 + $0x254] ss:$8 sps:$4 sm:$0xff]  }
  0xc6   : > { %1194 = vmatprep.subr.bf16.mxu0 %v3359_v19  ;;  %1237 = vmatprep.subr.bf16.mxu1 %v3359_v19 }
  0xc8   : > { %1031 = vmatmul.mubr.bf16.vlgmr.msra.gmra.mrb[20].mxu0 %v3905_v53  ;;  %1087 = vmatmul.mubr.bf16.vlgmr.msra.gmra.mrb[20].mxu1 %v3968_v20 }
  0xc9   : > { %1195 = vmatpush1.bf16.msra.mxu0 %v3361_v21  ;;  %1238 = vmatpush1.bf16.msra.mxu1 %v3361_v21 }
  0xca   : > { %1196 = vmatprep.subr.bf16.mxu0 %v3362_v22  ;;  %1239 = vmatprep.subr.bf16.mxu1 %v3362_v22 }
  0xcb   : > { %1226 = vmatprep.mubr.bf16.mxu0 %v3534_v2  ;;  %1269 = vmatprep.mubr.bf16.mxu1 %v3534_v2 }
  0xcd   : > { %1197 = vmatpush1.bf16.msra.mxu0 %v3364_v23  ;;  %1240 = vmatpush1.bf16.msra.mxu1 %v3364_v23 }
  0xce   : > { %1198 = vmatprep.subr.bf16.mxu0 %v3365_v24  ;;  %1241 = vmatprep.subr.bf16.mxu1 %v3365_v24 }
  0xd1   : > { %1199 = vmatpush1.bf16.msra.mxu0 %v3367_v25  ;;  %1242 = vmatpush1.bf16.msra.mxu1 %v3367_v25 }
  0xd2   : > { %1200 = vmatprep.subr.bf16.mxu0 %v3368_v26  ;;  %1243 = vmatprep.subr.bf16.mxu1 %v3368_v26 }
  0xd5   : > { %1201 = vmatpush1.bf16.msra.mxu0 %v3370_v27  ;;  %1244 = vmatpush1.bf16.msra.mxu1 %v3370_v27 }
  0xd6   : > { %1202 = vmatprep.subr.bf16.mxu0 %v3371_v28  ;;  %1245 = vmatprep.subr.bf16.mxu1 %v3371_v28 }
  0xd9   : > { %1203 = vmatpush1.bf16.msra.mxu0 %v3373_v29  ;;  %1246 = vmatpush1.bf16.msra.mxu1 %v3373_v29 }
  0xda   : > { %1204 = vmatprep.subr.bf16.mxu0 %v3374_v30  ;;  %1247 = vmatprep.subr.bf16.mxu1 %v3374_v30 }
  0xdd   : > { %1205 = vmatpush1.bf16.msra.mxu0 %v3376_v31  ;;  %1248 = vmatpush1.bf16.msra.mxu1 %v3376_v31 }
  0xde   : > { %1206 = vmatprep.subr.bf16.mxu0 %v3377_v32  ;;  %1249 = vmatprep.subr.bf16.mxu1 %v3377_v32 }
  0xe1   : > { %1207 = vmatpush1.bf16.msra.mxu0 %v4013_v33  ;;  %1250 = vmatpush1.bf16.msra.mxu1 %v4013_v33 }
  0xe2   : > { %1208 = vmatprep.subr.bf16.mxu0 %v4018_v34  ;;  %1251 = vmatprep.subr.bf16.mxu1 %v4018_v34 }
  0xe5   : > { %1209 = vmatpush1.bf16.msra.mxu0 %v4025_v35  ;;  %1252 = vmatpush1.bf16.msra.mxu1 %v4025_v35 }
  0xe6   : > { %1296 = vmatprep.subr.bf16.mxu0 %v3359_v19  ;;  %1355 = vmatprep.subr.bf16.mxu1 %v3359_v19 }
  0xe8   : > { %1227 = vmatmul.mubr.bf16.vlgmr.msra.gmra.mrb[24].mxu0 %v3865_v47  ;;  %1270 = vmatmul.mubr.bf16.vlgmr.msra.gmra.mrb[24].mxu1 %v3860_v46 }
  0xe9   : > { %1297 = vmatpush1.bf16.msra.mxu0 %v3361_v21  ;;  %1356 = vmatpush1.bf16.msra.mxu1 %v3361_v21 }
  0xea   : > { %1298 = vmatprep.subr.bf16.mxu0 %v3362_v22  ;;  %1357 = vmatprep.subr.bf16.mxu1 %v3362_v22 }
  0xeb   : > { %1328 = vmatprep.mubr.bf16.mxu0 %v3534_v2  ;;  %1387 = vmatprep.mubr.bf16.mxu1 %v3534_v2 }
  0xed   : > { %1299 = vmatpush1.bf16.msra.mxu0 %v3364_v23  ;;  %1358 = vmatpush1.bf16.msra.mxu1 %v3364_v23  ;;  %v3405_v23 = vld [vmem:[%s4689_s1 + $0x260] ss:$8 sps:$4 sm:$0xff]  }
  0xee   : > { %1300 = vmatprep.subr.bf16.mxu0 %v3365_v24  ;;  %1359 = vmatprep.subr.bf16.mxu1 %v3365_v24 }
  0xf1   : > { %1301 = vmatpush1.bf16.msra.mxu0 %v3367_v25  ;;  %1360 = vmatpush1.bf16.msra.mxu1 %v3367_v25 }
  0xf2   : > { %1302 = vmatprep.subr.bf16.mxu0 %v3368_v26  ;;  %1361 = vmatprep.subr.bf16.mxu1 %v3368_v26  ;;  %v3406_v26 = vld [vmem:[%s4689_s1 + $0x274] ss:$8 sps:$4 sm:$0xff]  }
  0xf5   : > { %1303 = vmatpush1.bf16.msra.mxu0 %v3370_v27  ;;  %1362 = vmatpush1.bf16.msra.mxu1 %v3370_v27  ;;  %v3408_v27 = vld [vmem:[%s4689_s1 + $0x270] ss:$8 sps:$4 sm:$0xff]  }
  0xf6   : > { %1304 = vmatprep.subr.bf16.mxu0 %v3371_v28  ;;  %1363 = vmatprep.subr.bf16.mxu1 %v3371_v28 }
  0xf9   : > { %1305 = vmatpush1.bf16.msra.mxu0 %v3373_v29  ;;  %1364 = vmatpush1.bf16.msra.mxu1 %v3373_v29 }
  0xfa   : > { %1306 = vmatprep.subr.bf16.mxu0 %v3374_v30  ;;  %1365 = vmatprep.subr.bf16.mxu1 %v3374_v30 }
  0xfb   : > { %v397_v42 = vpop.f32.mrb[0].mxu0  ;;  %v518_v43 = vpop.f32.mrb[0].mxu1 }
  0xfc   : > { %v4045_v45 = vadd.f32 %v518_v43, %v397_v42  ;;  %v399_v47 = vpop.f32.mrb[1].mxu0  ;;  %v520_v48 = vpop.f32.mrb[1].mxu1  ;;  %v4165_v43 = vld [vmem:[%s4689_s1 + $0x280] ss:$8 sps:$4 sm:$0xff]  }
  0xfd   : > { %v4047_v52 = vadd.f32 %v520_v48, %v399_v47  ;;  %v401_v54 = vpop.f32.mrb[2].mxu0  ;;  %v522_v55 = vpop.f32.mrb[2].mxu1  ;;  %1307 = vmatpush1.bf16.msra.mxu0 %v3376_v31  ;;  %1366 = vmatpush1.bf16.msra.mxu1 %v3376_v31  ;;  %v3416_v47 = vld [vmem:[%s4689_s1 + $0x2a4] ss:$8 sps:$4 sm:$0xff]   ;;  %v3418_v48 = vld [vmem:[%s4689_s1 + $0x2a0] ss:$8 sps:$4 sm:$0xff]  }
  0xfe   : > { %v402_v56 = vpop.f32.mrb[3].mxu0  ;;  %v523_v57 = vpop.f32.mrb[3].mxu1  ;;  %1308 = vmatprep.subr.bf16.mxu0 %v3377_v32  ;;  %1367 = vmatprep.subr.bf16.mxu1 %v3377_v32  ;;  %v3424_v54 = vld [vmem:[%s4689_s1 + $0x2c0] ss:$8 sps:$4 sm:$0xff]   ;;  %v3425_v55 = vld [vmem:[%s4689_s1 + $0x2d4] ss:$8 sps:$4 sm:$0xff]  }
  0xff   : > { %v4213_v56 = vld [vmem:[%s4689_s1 + $0x2d0] ss:$8 sps:$4 sm:$0xff]   ;;  %v4218_v57 = vld [vmem:[%s4689_s1 + $0x2e4] ss:$8 sps:$4 sm:$0xff]  }
 0x101   : > { %1309 = vmatpush1.bf16.msra.mxu0 %v4013_v33  ;;  %1368 = vmatpush1.bf16.msra.mxu1 %v4013_v33 }
 0x102   : > { %1310 = vmatprep.subr.bf16.mxu0 %v4018_v34  ;;  %1369 = vmatprep.subr.bf16.mxu1 %v4018_v34 }
 0x105   : > { %1311 = vmatpush1.bf16.msra.mxu0 %v4025_v35  ;;  %1370 = vmatpush1.bf16.msra.mxu1 %v4025_v35  ;;  %v1624_v35 = vld [vmem:[%s3737_s25] sm:$0xc] }
 0x106   : > { %1495 = vmatprep.subr.bf16.mxu0 %v4056_v62  ;;  %1538 = vmatprep.subr.bf16.mxu1 %v4056_v62  ;;  %v3116_v40 = vcombine.low %v1624_v35, %v4037_v37  ;;  %v4172_v37 = vld [vmem:[%s4689_s1 + $0x294] ss:$8 sps:$4 sm:$0xff]  }
 0x108   : > { %1329 = vmatmul.mubr.bf16.vlgmr.msra.gmra.mrb[28].mxu0 %v4058_v63  ;;  %1388 = vmatmul.mubr.bf16.vlgmr.msra.gmra.mrb[28].mxu1 %v4060_v0  ;;  %v4160_v42 = vrot.slane %v3116_v40, 2 }
 0x109   : > { %1496 = vmatpush1.bf16.msra.mxu0 %v4067_v1  ;;  %1539 = vmatpush1.bf16.msra.mxu1 %v4067_v1 }
 0x10a   : > { %1497 = vmatprep.subr.bf16.mxu0 %v4074_v3  ;;  %1540 = vmatprep.subr.bf16.mxu1 %v4074_v3 }
 0x10b   : > { %1527 = vmatprep.mubr.bf16.mxu0 %v3534_v2  ;;  %1570 = vmatprep.mubr.bf16.mxu1 %v3534_v2 }
 0x10d   : > { %1498 = vmatpush1.bf16.msra.mxu0 %v4083_v4  ;;  %1541 = vmatpush1.bf16.msra.mxu1 %v4083_v4 }
 0x10e   : > { %1499 = vmatprep.subr.bf16.mxu0 %v3391_v5  ;;  %1542 = vmatprep.subr.bf16.mxu1 %v3391_v5 }
 0x111   : > { %1500 = vmatpush1.bf16.msra.mxu0 %v3393_v6  ;;  %1543 = vmatpush1.bf16.msra.mxu1 %v3393_v6 }
 0x112   : > { %1501 = vmatprep.subr.bf16.mxu0 %v3394_v7  ;;  %1544 = vmatprep.subr.bf16.mxu1 %v3394_v7 }
 0x115   : > { %1502 = vmatpush1.bf16.msra.mxu0 %v3396_v8  ;;  %1545 = vmatpush1.bf16.msra.mxu1 %v3396_v8 }
 0x116   : > { %1503 = vmatprep.subr.bf16.mxu0 %v3397_v9  ;;  %1546 = vmatprep.subr.bf16.mxu1 %v3397_v9 }
 0x119   : > { %1504 = vmatpush1.bf16.msra.mxu0 %v3399_v10  ;;  %1547 = vmatpush1.bf16.msra.mxu1 %v3399_v10 }
 0x11a   : > { %1505 = vmatprep.subr.bf16.mxu0 %v3400_v11  ;;  %1548 = vmatprep.subr.bf16.mxu1 %v3400_v11 }
 0x11b   : > { %v571_v14 = vpop.f32.mrb[4].mxu0  ;;  %v612_v15 = vpop.f32.mrb[4].mxu1 }
 0x11c   : > { %v4120_v16 = vadd.f32 %v612_v15, %v571_v14  ;;  %v573_v17 = vpop.f32.mrb[5].mxu0  ;;  %v614_v18 = vpop.f32.mrb[5].mxu1 }
 0x11d   : > { %v4122_v19 = vadd.f32 %v614_v18, %v573_v17  ;;  %v575_v21 = vpop.f32.mrb[6].mxu0  ;;  %v616_v22 = vpop.f32.mrb[6].mxu1  ;;  %1506 = vmatpush1.bf16.msra.mxu0 %v3402_v12  ;;  %1549 = vmatpush1.bf16.msra.mxu1 %v3402_v12 }
 0x11e   : > { %v576_v24 = vpop.f32.mrb[7].mxu0  ;;  %v617_v25 = vpop.f32.mrb[7].mxu1  ;;  %1507 = vmatprep.subr.bf16.mxu0 %v4118_v13  ;;  %1550 = vmatprep.subr.bf16.mxu1 %v4118_v13  ;;  %v4289_v22 = vld [vmem:[%s4689_s1 + $0x310] ss:$8 sps:$4 sm:$0xff]  }
 0x11f   : > { %v3443_v24 = vld [vmem:[%s4689_s1 + $0x334] ss:$8 sps:$4 sm:$0xff]   ;;  %v3445_v25 = vld [vmem:[%s4689_s1 + $0x330] ss:$8 sps:$4 sm:$0xff]  }
 0x121   : > { %1508 = vmatpush1.bf16.msra.mxu0 %v3405_v23  ;;  %1551 = vmatpush1.bf16.msra.mxu1 %v3405_v23 }
 0x122   : > { %1509 = vmatprep.subr.bf16.mxu0 %v3406_v26  ;;  %1552 = vmatprep.subr.bf16.mxu1 %v3406_v26 }
 0x125   : > { %1510 = vmatpush1.bf16.msra.mxu0 %v3408_v27  ;;  %1553 = vmatpush1.bf16.msra.mxu1 %v3408_v27 }
 0x126   : > { %1581 = vmatprep.subr.bf16.mxu0 %v4056_v62  ;;  %1630 = vmatprep.subr.bf16.mxu1 %v4056_v62 }
 0x128   : > { %1528 = vmatmul.mubr.bf16.vlgmr.msra.gmra.mrb[32].mxu0 %v3860_v46  ;;  %1571 = vmatmul.mubr.bf16.vlgmr.msra.gmra.mrb[32].mxu1 %v3905_v53 }
 0x129   : > { %1582 = vmatpush1.bf16.msra.mxu0 %v4067_v1  ;;  %1631 = vmatpush1.bf16.msra.mxu1 %v4067_v1 }
 0x12a   : > { %1583 = vmatprep.subr.bf16.mxu0 %v4074_v3  ;;  %1632 = vmatprep.subr.bf16.mxu1 %v4074_v3 }
 0x12b   : > { %1613 = vmatprep.mubr.bf16.mxu0 %v3534_v2  ;;  %1662 = vmatprep.mubr.bf16.mxu1 %v3534_v2 }
 0x12d   : > { %1584 = vmatpush1.bf16.msra.mxu0 %v4083_v4  ;;  %1633 = vmatpush1.bf16.msra.mxu1 %v4083_v4 }
 0x12e   : > { %1585 = vmatprep.subr.bf16.mxu0 %v3391_v5  ;;  %1634 = vmatprep.subr.bf16.mxu1 %v3391_v5  ;;  %v3430_v5 = vld [vmem:[%s4689_s1 + $0x2e0] ss:$8 sps:$4 sm:$0xff]  }
 0x131   : > { %1586 = vmatpush1.bf16.msra.mxu0 %v3393_v6  ;;  %1635 = vmatpush1.bf16.msra.mxu1 %v3393_v6 }
 0x132   : > { %1587 = vmatprep.subr.bf16.mxu0 %v3394_v7  ;;  %1636 = vmatprep.subr.bf16.mxu1 %v3394_v7 }
 0x135   : > { %1588 = vmatpush1.bf16.msra.mxu0 %v3396_v8  ;;  %1637 = vmatpush1.bf16.msra.mxu1 %v3396_v8  ;;  %v3431_v8 = vld [vmem:[%s4689_s1 + $0x2f4] ss:$8 sps:$4 sm:$0xff]  }
 0x136   : > { %1589 = vmatprep.subr.bf16.mxu0 %v3397_v9  ;;  %1638 = vmatprep.subr.bf16.mxu1 %v3397_v9  ;;  %v3433_v9 = vld [vmem:[%s4689_s1 + $0x2f0] ss:$8 sps:$4 sm:$0xff]  }
 0x139   : > { %1590 = vmatpush1.bf16.msra.mxu0 %v3399_v10  ;;  %1639 = vmatpush1.bf16.msra.mxu1 %v3399_v10 }
 0x13a   : > { %1591 = vmatprep.subr.bf16.mxu0 %v3400_v11  ;;  %1640 = vmatprep.subr.bf16.mxu1 %v3400_v11 }
 0x13b   : > { %v660_v46 = vpop.f32.mrb[8].mxu0  ;;  %v701_v28 = vpop.f32.mrb[8].mxu1 }
 0x13c   : > { %v4147_v29 = vadd.f32 %v701_v28, %v660_v46  ;;  %v662_v30 = vpop.f32.mrb[9].mxu0  ;;  %v703_v31 = vpop.f32.mrb[9].mxu1  ;;  %v3449_v46 = vld [vmem:[%s4689_s1 + $0x354] ss:$8 sps:$4 sm:$0xff]   ;;  %v4329_v28 = vld [vmem:[%s4689_s1 + $0x350] ss:$8 sps:$4 sm:$0xff]  }
 0x13d   : > { %v4149_v32 = vadd.f32 %v703_v31, %v662_v30  ;;  %v664_v33 = vpop.f32.mrb[10].mxu0  ;;  %v705_v34 = vpop.f32.mrb[10].mxu1  ;;  %1592 = vmatpush1.bf16.msra.mxu0 %v3402_v12  ;;  %1641 = vmatpush1.bf16.msra.mxu1 %v3402_v12  ;;  %v4334_v30 = vld [vmem:[%s4689_s1 + $0x364] ss:$8 sps:$4 sm:$0xff]  }
 0x13e   : > { %v665_v36 = vpop.f32.mrb[11].mxu0  ;;  %v706_v38 = vpop.f32.mrb[11].mxu1  ;;  %1593 = vmatprep.subr.bf16.mxu0 %v4118_v13  ;;  %1642 = vmatprep.subr.bf16.mxu1 %v4118_v13 }
 0x141   : > { %1594 = vmatpush1.bf16.msra.mxu0 %v3405_v23  ;;  %1643 = vmatpush1.bf16.msra.mxu1 %v3405_v23  ;;  %v4296_v23 = vld [vmem:[%s4689_s1 + $0x324] ss:$8 sps:$4 sm:$0xff]  }
 0x142   : > { %1595 = vmatprep.subr.bf16.mxu0 %v3406_v26  ;;  %1644 = vmatprep.subr.bf16.mxu1 %v3406_v26  ;;  %v3446_v26 = vld [vmem:[%s4689_s1 + $0x344] ss:$8 sps:$4 sm:$0xff]  }
 0x145   : > { %1596 = vmatpush1.bf16.msra.mxu0 %v3408_v27  ;;  %1645 = vmatpush1.bf16.msra.mxu1 %v3408_v27  ;;  %v4319_v27 = vld [vmem:[%s4689_s1 + $0x340] ss:$8 sps:$4 sm:$0xff]  }
 0x146   : > { %1770 = vmatprep.subr.bf16.mxu0 %v4158_v41  ;;  %1813 = vmatprep.subr.bf16.mxu1 %v4158_v41 }
 0x148   : > { %1614 = vmatmul.mubr.bf16.vlgmr.msra.gmra.mrb[36].mxu0 %v4060_v0  ;;  %1663 = vmatmul.mubr.bf16.vlgmr.msra.gmra.mrb[36].mxu1 %v4160_v42 }
 0x149   : > { %1771 = vmatpush1.bf16.msra.mxu0 %v4165_v43  ;;  %1814 = vmatpush1.bf16.msra.mxu1 %v4165_v43 }
 0x14a   : > { %1772 = vmatprep.subr.bf16.mxu0 %v4172_v37  ;;  %1815 = vmatprep.subr.bf16.mxu1 %v4172_v37 }
 0x14b   : > { %1802 = vmatprep.mubr.bf16.mxu0 %v3534_v2  ;;  %1845 = vmatprep.mubr.bf16.mxu1 %v3534_v2 }
 0x14d   : > { %1773 = vmatpush1.bf16.msra.mxu0 %v4181_v44  ;;  %1816 = vmatpush1.bf16.msra.mxu1 %v4181_v44 }
 0x14e   : > { %1774 = vmatprep.subr.bf16.mxu0 %v3416_v47  ;;  %1817 = vmatprep.subr.bf16.mxu1 %v3416_v47 }
 0x151   : > { %1775 = vmatpush1.bf16.msra.mxu0 %v3418_v48  ;;  %1818 = vmatpush1.bf16.msra.mxu1 %v3418_v48 }
 0x152   : > { %1776 = vmatprep.subr.bf16.mxu0 %v3419_v49  ;;  %1819 = vmatprep.subr.bf16.mxu1 %v3419_v49 }
 0x155   : > { %1777 = vmatpush1.bf16.msra.mxu0 %v3421_v50  ;;  %1820 = vmatpush1.bf16.msra.mxu1 %v3421_v50 }
 0x156   : > { %1778 = vmatprep.subr.bf16.mxu0 %v3422_v51  ;;  %1821 = vmatprep.subr.bf16.mxu1 %v3422_v51 }
 0x159   : > { %1779 = vmatpush1.bf16.msra.mxu0 %v3424_v54  ;;  %1822 = vmatpush1.bf16.msra.mxu1 %v3424_v54 }
 0x15a   : > { %1780 = vmatprep.subr.bf16.mxu0 %v3425_v55  ;;  %1823 = vmatprep.subr.bf16.mxu1 %v3425_v55 }
 0x15b   : > { %v754_v58 = vpop.f32.mrb[12].mxu0  ;;  %v795_v59 = vpop.f32.mrb[12].mxu1 }
 0x15c   : > { %v4220_v60 = vadd.f32 %v795_v59, %v754_v58  ;;  %v756_v61 = vpop.f32.mrb[13].mxu0  ;;  %v797_v62 = vpop.f32.mrb[13].mxu1 }
 0x15d   : > { %v4222_v1 = vadd.f32 %v797_v62, %v756_v61  ;;  %v758_v3 = vpop.f32.mrb[14].mxu0  ;;  %v799_v4 = vpop.f32.mrb[14].mxu1  ;;  %1781 = vmatpush1.bf16.msra.mxu0 %v4213_v56  ;;  %1824 = vmatpush1.bf16.msra.mxu1 %v4213_v56 }
 0x15e   : > { %v759_v6 = vpop.f32.mrb[15].mxu0  ;;  %v800_v7 = vpop.f32.mrb[15].mxu1  ;;  %1782 = vmatprep.subr.bf16.mxu0 %v4218_v57  ;;  %1825 = vmatprep.subr.bf16.mxu1 %v4218_v57 }
 0x161   : > { %1783 = vmatpush1.bf16.msra.mxu0 %v3430_v5  ;;  %1826 = vmatpush1.bf16.msra.mxu1 %v3430_v5 }
 0x162   : > { %1784 = vmatprep.subr.bf16.mxu0 %v3431_v8  ;;  %1827 = vmatprep.subr.bf16.mxu1 %v3431_v8 }
 0x165   : > { %1785 = vmatpush1.bf16.msra.mxu0 %v3433_v9  ;;  %1828 = vmatpush1.bf16.msra.mxu1 %v3433_v9 }
 0x166   : > { %1856 = vmatprep.subr.bf16.mxu0 %v4158_v41  ;;  %1899 = vmatprep.subr.bf16.mxu1 %v4158_v41 }
 0x168   : > { %1803 = vmatmul.mubr.bf16.vlgmr.msra.gmra.mrb[40].mxu0 %v3905_v53  ;;  %1846 = vmatmul.mubr.bf16.vlgmr.msra.gmra.mrb[40].mxu1 %v3968_v20 }
 0x169   : > { %1857 = vmatpush1.bf16.msra.mxu0 %v4165_v43  ;;  %1900 = vmatpush1.bf16.msra.mxu1 %v4165_v43 }
 0x16a   : > { %1858 = vmatprep.subr.bf16.mxu0 %v4172_v37  ;;  %1901 = vmatprep.subr.bf16.mxu1 %v4172_v37 }
 0x16b   : > { %1888 = vmatprep.mubr.bf16.mxu0 %v3534_v2  ;;  %1931 = vmatprep.mubr.bf16.mxu1 %v3534_v2 }
 0x16d   : > { %1859 = vmatpush1.bf16.msra.mxu0 %v4181_v44  ;;  %1902 = vmatpush1.bf16.msra.mxu1 %v4181_v44 }
 0x16e   : > { %1860 = vmatprep.subr.bf16.mxu0 %v3416_v47  ;;  %1903 = vmatprep.subr.bf16.mxu1 %v3416_v47 }
 0x171   : > { %1861 = vmatpush1.bf16.msra.mxu0 %v3418_v48  ;;  %1904 = vmatpush1.bf16.msra.mxu1 %v3418_v48  ;;  %v4367_v48 = vld [vmem:[%s4689_s1 + $0x370] ss:$8 sps:$4 sm:$0xff]  }
 0x172   : > { %1862 = vmatprep.subr.bf16.mxu0 %v3419_v49  ;;  %1905 = vmatprep.subr.bf16.mxu1 %v3419_v49  ;;  %v4389_v49 = vld [vmem:[%s3737_s25 + $0x10] sm:$0x1] }
 0x175   : > { %1863 = vmatpush1.bf16.msra.mxu0 %v3421_v50  ;;  %1906 = vmatpush1.bf16.msra.mxu1 %v3421_v50  ;;  %v2184_v50 = vld [vmem:[%s3737_s25 + $0x10] sm:$0x8] }
 0x176   : > { %1864 = vmatprep.subr.bf16.mxu0 %v3422_v51  ;;  %1907 = vmatprep.subr.bf16.mxu1 %v3422_v51  ;;  %v4393_v51 = vld [vmem:[%s3737_s25 + $0x14] sm:$0x7] }
 0x179   : > { %1865 = vmatpush1.bf16.msra.mxu0 %v3424_v54  ;;  %1908 = vmatpush1.bf16.msra.mxu1 %v3424_v54 }
 0x17a   : > { %1866 = vmatprep.subr.bf16.mxu0 %v3425_v55  ;;  %1909 = vmatprep.subr.bf16.mxu1 %v3425_v55  ;;  %v3182_v55 = vcombine.low %v2184_v50, %v4393_v51 }
 0x17b   : > { %v933_v53 = vpop.f32.mrb[16].mxu0  ;;  %v989_v20 = vpop.f32.mrb[16].mxu1 }
 0x17c   : > { %v4250_v10 = vadd.f32 %v933_v53, %v4045_v45  ;;  %v4253_v11 = vadd.f32 %v989_v20, %v4120_v16  ;;  %v935_v12 = vpop.f32.mrb[17].mxu0  ;;  %v991_v13 = vpop.f32.mrb[17].mxu1  ;;  %v4273_v16 = vld [vmem:[%s4689_s1 + $0x300] ss:$8 sps:$4 sm:$0xff]   ;;  %v2192_v3 = vshrl.u32 %v3182_v55, 16  ;;  %v2195_v4 = vshll.u32 %v3182_v55, 16 }
 0x17d   : > { %v4256_v14 = vadd.f32 %v935_v12, %v4047_v52  ;;  %v4259_v15 = vadd.f32 %v991_v13, %v4122_v19  ;;  %v937_v17 = vpop.f32.mrb[18].mxu0  ;;  %v993_v18 = vpop.f32.mrb[18].mxu1  ;;  %1867 = vmatpush1.bf16.msra.mxu0 %v4213_v56  ;;  %1910 = vmatpush1.bf16.msra.mxu1 %v4213_v56  ;;  %v4268_v52 = vld [vmem:[%s4689_s1 + $0x304] ss:$8 sps:$4 sm:$0xff]   ;;  %v4280_v19 = vld [vmem:[%s4689_s1 + $0x314] ss:$8 sps:$4 sm:$0xff]  }
 0x17e   : > { %v938_v21 = vpop.f32.mrb[19].mxu0  ;;  %v994_v45 = vpop.f32.mrb[19].mxu1  ;;  %1868 = vmatprep.subr.bf16.mxu0 %v4218_v57  ;;  %1911 = vmatprep.subr.bf16.mxu1 %v4218_v57  ;;  %v2197_v12 = vrot.slane %v2195_v4, 4  ;;  %v4422_v13 = vld [vmem:[%s4689_s1 + $0x384] ss:$8 sps:$4 sm:$0xff]  }
 0x17f   : > { %v4431_v17 = vld [vmem:[%s4689_s1 + $0x380] ss:$8 sps:$4 sm:$0xff]   ;;  %v4438_v18 = vld [vmem:[%s4689_s1 + $0x394] ss:$8 sps:$4 sm:$0xff]   ;;  %v4446_v21 = vld [vmem:[%s4689_s1 + $0x390] ss:$8 sps:$4 sm:$0xff]  }
 0x180   : > { %v4453_v45 = vld [vmem:[%s4689_s1 + $0x3a4] ss:$8 sps:$4 sm:$0xff]   ;;  %v3493_v4 = vld [vmem:[%s4689_s1 + $0x420] ss:$8 sps:$4 sm:$0xff]  }
 0x181   : > { %1869 = vmatpush1.bf16.msra.mxu0 %v3430_v5  ;;  %1912 = vmatpush1.bf16.msra.mxu1 %v3430_v5 }
 0x182   : > { %1870 = vmatprep.subr.bf16.mxu0 %v3431_v8  ;;  %1913 = vmatprep.subr.bf16.mxu1 %v3431_v8 }
 0x185   : > { %1871 = vmatpush1.bf16.msra.mxu0 %v3433_v9  ;;  %1914 = vmatpush1.bf16.msra.mxu1 %v3433_v9 }
 0x186   : > { %2039 = vmatprep.subr.bf16.mxu0 %v4268_v52  ;;  %2082 = vmatprep.subr.bf16.mxu1 %v4268_v52 }
 0x188   : > { %1889 = vmatmul.mubr.bf16.vlgmr.msra.gmra.mrb[44].mxu0 %v4160_v42  ;;  %1932 = vmatmul.mubr.bf16.vlgmr.msra.gmra.mrb[44].mxu1 %v4041_v39  ;;  %v3442_v39 = vld [vmem:[%s4689_s1 + $0x320] ss:$8 sps:$4 sm:$0xff]  }
 0x189   : > { %2040 = vmatpush1.bf16.msra.mxu0 %v4273_v16  ;;  %2083 = vmatpush1.bf16.msra.mxu1 %v4273_v16 }
 0x18a   : > { %2041 = vmatprep.subr.bf16.mxu0 %v4280_v19  ;;  %2084 = vmatprep.subr.bf16.mxu1 %v4280_v19 }
 0x18b   : > { %2071 = vmatprep.mubr.bf16.mxu0 %v3534_v2  ;;  %2114 = vmatprep.mubr.bf16.mxu1 %v3534_v2 }
 0x18d   : > { %2042 = vmatpush1.bf16.msra.mxu0 %v4289_v22  ;;  %2085 = vmatpush1.bf16.msra.mxu1 %v4289_v22 }
 0x18e   : > { %2043 = vmatprep.subr.bf16.mxu0 %v4296_v23  ;;  %2086 = vmatprep.subr.bf16.mxu1 %v4296_v23 }
 0x191   : > { %2044 = vmatpush1.bf16.msra.mxu0 %v3442_v39  ;;  %2087 = vmatpush1.bf16.msra.mxu1 %v3442_v39 }
 0x192   : > { %2045 = vmatprep.subr.bf16.mxu0 %v3443_v24  ;;  %2088 = vmatprep.subr.bf16.mxu1 %v3443_v24 }
 0x195   : > { %2046 = vmatpush1.bf16.msra.mxu0 %v3445_v25  ;;  %2089 = vmatpush1.bf16.msra.mxu1 %v3445_v25 }
 0x196   : > { %2047 = vmatprep.subr.bf16.mxu0 %v3446_v26  ;;  %2090 = vmatprep.subr.bf16.mxu1 %v3446_v26 }
 0x199   : > { %2048 = vmatpush1.bf16.msra.mxu0 %v4319_v27  ;;  %2091 = vmatpush1.bf16.msra.mxu1 %v4319_v27 }
 0x19a   : > { %2049 = vmatprep.subr.bf16.mxu0 %v3449_v46  ;;  %2092 = vmatprep.subr.bf16.mxu1 %v3449_v46 }
 0x19b   : > { %v1032_v31 = vpop.f32.mrb[20].mxu0  ;;  %v1088_v33 = vpop.f32.mrb[20].mxu1 }
 0x19c   : > { %v4337_v34 = vadd.f32 %v1032_v31, %v4147_v29  ;;  %v4340_v35 = vadd.f32 %v1088_v33, %v4220_v60  ;;  %v1034_v36 = vpop.f32.mrb[21].mxu0  ;;  %v1090_v38 = vpop.f32.mrb[21].mxu1  ;;  %v4353_v29 = vld [vmem:[%s4689_s1 + $0x360] ss:$8 sps:$4 sm:$0xff]  }
 0x19d   : > { %v4343_v40 = vadd.f32 %v1034_v36, %v4149_v32  ;;  %v4346_v41 = vadd.f32 %v1090_v38, %v4222_v1  ;;  %v1036_v43 = vpop.f32.mrb[22].mxu0  ;;  %v1092_v37 = vpop.f32.mrb[22].mxu1  ;;  %2050 = vmatpush1.bf16.msra.mxu0 %v4329_v28  ;;  %2093 = vmatpush1.bf16.msra.mxu1 %v4329_v28  ;;  %v4360_v32 = vld [vmem:[%s4689_s1 + $0x374] ss:$8 sps:$4 sm:$0xff]  }
 0x19e   : > { %v1037_v44 = vpop.f32.mrb[23].mxu0  ;;  %v1093_v47 = vpop.f32.mrb[23].mxu1  ;;  %2051 = vmatprep.subr.bf16.mxu0 %v4334_v30  ;;  %2094 = vmatprep.subr.bf16.mxu1 %v4334_v30 }
 0x1a1   : > { %2052 = vmatpush1.bf16.msra.mxu0 %v4353_v29  ;;  %2095 = vmatpush1.bf16.msra.mxu1 %v4353_v29 }
 0x1a2   : > { %2053 = vmatprep.subr.bf16.mxu0 %v4360_v32  ;;  %2096 = vmatprep.subr.bf16.mxu1 %v4360_v32 }
 0x1a5   : > { %2054 = vmatpush1.bf16.msra.mxu0 %v4367_v48  ;;  %2097 = vmatpush1.bf16.msra.mxu1 %v4367_v48 }
 0x1a6   : > { %2141 = vmatprep.subr.bf16.mxu0 %v4268_v52  ;;  %2200 = vmatprep.subr.bf16.mxu1 %v4268_v52  ;;  %v3468_v52 = vld [vmem:[%s4689_s1 + $0x3a0] ss:$8 sps:$4 sm:$0xff]  }
 0x1a8   : > { %2072 = vmatmul.mubr.bf16.vlgmr.msra.gmra.mrb[48].mxu0 %v4058_v63  ;;  %2115 = vmatmul.mubr.bf16.vlgmr.msra.gmra.mrb[48].mxu1 %v4060_v0  ;;  %v2125_v63 = vld [vmem:[%s3737_s25 + $0xc] sm:$0xe] }
 0x1a9   : > { %2142 = vmatpush1.bf16.msra.mxu0 %v4273_v16  ;;  %2201 = vmatpush1.bf16.msra.mxu1 %v4273_v16  ;;  %v3181_v54 = vcombine.low %v2125_v63, %v4389_v49  ;;  %v3469_v16 = vld [vmem:[%s4689_s1 + $0x3b4] ss:$8 sps:$4 sm:$0xff]  }
 0x1aa   : > { %2143 = vmatprep.subr.bf16.mxu0 %v4280_v19  ;;  %2202 = vmatprep.subr.bf16.mxu1 %v4280_v19  ;;  %v3471_v19 = vld [vmem:[%s4689_s1 + $0x3b0] ss:$8 sps:$4 sm:$0xff]  }
 0x1ab   : > { %2173 = vmatprep.mubr.bf16.mxu0 %v3534_v2  ;;  %2232 = vmatprep.mubr.bf16.mxu1 %v3534_v2  ;;  %v2133_v58 = vshrl.u32 %v3181_v54, 16  ;;  %v2136_v59 = vshll.u32 %v3181_v54, 16 }
 0x1ad   : > { %2144 = vmatpush1.bf16.msra.mxu0 %v4289_v22  ;;  %2203 = vmatpush1.bf16.msra.mxu1 %v4289_v22  ;;  %v2135_v20 = vrot.slane %v2133_v58, 1  ;;  %v3472_v22 = vld [vmem:[%s4689_s1 + $0x3c4] ss:$8 sps:$4 sm:$0xff]  }
 0x1ae   : > { %2145 = vmatprep.subr.bf16.mxu0 %v4296_v23  ;;  %2204 = vmatprep.subr.bf16.mxu1 %v4296_v23  ;;  %v3474_v23 = vld [vmem:[%s4689_s1 + $0x3c0] ss:$8 sps:$4 sm:$0xff]  }
 0x1b1   : > { %2146 = vmatpush1.bf16.msra.mxu0 %v3442_v39  ;;  %2205 = vmatpush1.bf16.msra.mxu1 %v3442_v39  ;;  %v3475_v39 = vld [vmem:[%s4689_s1 + $0x3d4] ss:$8 sps:$4 sm:$0xff]  }
 0x1b2   : > { %2147 = vmatprep.subr.bf16.mxu0 %v3443_v24  ;;  %2206 = vmatprep.subr.bf16.mxu1 %v3443_v24  ;;  %v4482_v24 = vld [vmem:[%s4689_s1 + $0x3d0] ss:$8 sps:$4 sm:$0xff]  }
 0x1b5   : > { %2148 = vmatpush1.bf16.msra.mxu0 %v3445_v25  ;;  %2207 = vmatpush1.bf16.msra.mxu1 %v3445_v25  ;;  %v4487_v25 = vld [vmem:[%s4689_s1 + $0x3e4] ss:$8 sps:$4 sm:$0xff]  }
 0x1b6   : > { %2149 = vmatprep.subr.bf16.mxu0 %v3446_v26  ;;  %2208 = vmatprep.subr.bf16.mxu1 %v3446_v26 }
 0x1b9   : > { %2150 = vmatpush1.bf16.msra.mxu0 %v4319_v27  ;;  %2209 = vmatpush1.bf16.msra.mxu1 %v4319_v27 }
 0x1ba   : > { %2151 = vmatprep.subr.bf16.mxu0 %v3449_v46  ;;  %2210 = vmatprep.subr.bf16.mxu1 %v3449_v46 }
 0x1bb   : > { %v1228_v56 = vpop.f32.mrb[24].mxu0  ;;  %v1271_v57 = vpop.f32.mrb[24].mxu1 }
 0x1bc   : > { %v4400_v60 = vadd.f32 %v1228_v56, %v4250_v10  ;;  %v4403_v61 = vadd.f32 %v1271_v57, %v4253_v11  ;;  %v1230_v62 = vpop.f32.mrb[25].mxu0  ;;  %v1273_v1 = vpop.f32.mrb[25].mxu1  ;;  %v2138_v10 = vrot.slane %v2136_v59, 2  ;;  %v2194_v11 = vrot.slane %v2192_v3, 3  ;;  %v2469_v56 = vld [vmem:[%s3737_s25 + $0xc] sm:$0xc] }
 0x1bd   : > { %v4406_v5 = vadd.f32 %v1230_v62, %v4256_v14  ;;  %v4409_v6 = vadd.f32 %v1273_v1, %v4259_v15  ;;  %v1232_v7 = vpop.f32.mrb[26].mxu0  ;;  %v1275_v8 = vpop.f32.mrb[26].mxu1  ;;  %2152 = vmatpush1.bf16.msra.mxu0 %v4329_v28  ;;  %2211 = vmatpush1.bf16.msra.mxu1 %v4329_v28  ;;  %v3215_v59 = vcombine.low %v2469_v56, %v4389_v49  ;;  %v4556_v62 = vld [vmem:[%s4689_s1 + $0x400] ss:$8 sps:$4 sm:$0xff]   ;;  %v4563_v49 = vld [vmem:[%s4689_s1 + $0x414] ss:$8 sps:$4 sm:$0xff]  }
 0x1be   : > { %v1233_v9 = vpop.f32.mrb[27].mxu0  ;;  %v1276_v53 = vpop.f32.mrb[27].mxu1  ;;  %2153 = vmatprep.subr.bf16.mxu0 %v4334_v30  ;;  %2212 = vmatprep.subr.bf16.mxu1 %v4334_v30  ;;  %v2139_v14 = vor.u32 %v2138_v10, %v2135_v20  ;;  %v4424_v15 = vor.u32 %v2197_v12, %v2194_v11  ;;  %v4572_v1 = vld [vmem:[%s4689_s1 + $0x410] ss:$8 sps:$4 sm:$0xff]   ;;  %v4579_v3 = vld [vmem:[%s4689_s1 + $0x424] ss:$8 sps:$4 sm:$0xff]  }
 0x1bf   : > { %v3497_v7 = vld [vmem:[%s4689_s1 + $0x444] ss:$8 sps:$4 sm:$0xff]   ;;  %v3499_v8 = vld [vmem:[%s4689_s1 + $0x440] ss:$8 sps:$4 sm:$0xff]   ;;  %v3500_v9 = vld [vmem:[%s4689_s1 + $0x454] ss:$8 sps:$4 sm:$0xff]  }
 0x1c0   : > { %v4608_v53 = vld [vmem:[%s4689_s1 + $0x450] ss:$8 sps:$4 sm:$0xff]   ;;  %v4613_v20 = vld [vmem:[%s4689_s1 + $0x464] ss:$8 sps:$4 sm:$0xff]  }
 0x1c1   : > { %2154 = vmatpush1.bf16.msra.mxu0 %v4353_v29  ;;  %2213 = vmatpush1.bf16.msra.mxu1 %v4353_v29 }
 0x1c2   : > { %2155 = vmatprep.subr.bf16.mxu0 %v4360_v32  ;;  %2214 = vmatprep.subr.bf16.mxu1 %v4360_v32 }
 0x1c5   : > { %2156 = vmatpush1.bf16.msra.mxu0 %v4367_v48  ;;  %2215 = vmatpush1.bf16.msra.mxu1 %v4367_v48 }
 0x1c6   : > { %2340 = vmatprep.subr.bf16.mxu0 %v4422_v13  ;;  %2383 = vmatprep.subr.bf16.mxu1 %v4422_v13 }
 0x1c8   : > { %2174 = vmatmul.mubr.bf16.vlgmr.msra.gmra.mrb[52].mxu0 %v2139_v14  ;;  %2233 = vmatmul.mubr.bf16.vlgmr.msra.gmra.mrb[52].mxu1 %v4424_v15 }
 0x1c9   : > { %2341 = vmatpush1.bf16.msra.mxu0 %v4431_v17  ;;  %2384 = vmatpush1.bf16.msra.mxu1 %v4431_v17 }
 0x1ca   : > { %2342 = vmatprep.subr.bf16.mxu0 %v4438_v18  ;;  %2385 = vmatprep.subr.bf16.mxu1 %v4438_v18 }
 0x1cb   : > { %2372 = vmatprep.mubr.bf16.mxu0 %v3534_v2  ;;  %2415 = vmatprep.mubr.bf16.mxu1 %v3534_v2 }
 0x1cd   : > { %2343 = vmatpush1.bf16.msra.mxu0 %v4446_v21  ;;  %2386 = vmatpush1.bf16.msra.mxu1 %v4446_v21 }
 0x1ce   : > { %2344 = vmatprep.subr.bf16.mxu0 %v4453_v45  ;;  %2387 = vmatprep.subr.bf16.mxu1 %v4453_v45 }
 0x1d1   : > { %2345 = vmatpush1.bf16.msra.mxu0 %v3468_v52  ;;  %2388 = vmatpush1.bf16.msra.mxu1 %v3468_v52 }
 0x1d2   : > { %2346 = vmatprep.subr.bf16.mxu0 %v3469_v16  ;;  %2389 = vmatprep.subr.bf16.mxu1 %v3469_v16 }
 0x1d5   : > { %2347 = vmatpush1.bf16.msra.mxu0 %v3471_v19  ;;  %2390 = vmatpush1.bf16.msra.mxu1 %v3471_v19 }
 0x1d6   : > { %2348 = vmatprep.subr.bf16.mxu0 %v3472_v22  ;;  %2391 = vmatprep.subr.bf16.mxu1 %v3472_v22 }
 0x1d9   : > { %2349 = vmatpush1.bf16.msra.mxu0 %v3474_v23  ;;  %2392 = vmatpush1.bf16.msra.mxu1 %v3474_v23 }
 0x1da   : > { %2350 = vmatprep.subr.bf16.mxu0 %v3475_v39  ;;  %2393 = vmatprep.subr.bf16.mxu1 %v3475_v39 }
 0x1db   : > { %v1330_v26 = vpop.f32.mrb[28].mxu0  ;;  %v1389_v27 = vpop.f32.mrb[28].mxu1 }
 0x1dc   : > { %v4490_v46 = vadd.f32 %v1330_v26, %v4337_v34  ;;  %v4493_v28 = vadd.f32 %v1389_v27, %v4340_v35  ;;  %v1332_v30 = vpop.f32.mrb[29].mxu0  ;;  %v1391_v31 = vpop.f32.mrb[29].mxu1  ;;  %v3480_v34 = vld [vmem:[%s4689_s1 + $0x3e0] ss:$8 sps:$4 sm:$0xff]  }
 0x1dd   : > { %v4496_v33 = vadd.f32 %v1332_v30, %v4343_v40  ;;  %v4499_v36 = vadd.f32 %v1391_v31, %v4346_v41  ;;  %v1334_v38 = vpop.f32.mrb[30].mxu0  ;;  %v1393_v43 = vpop.f32.mrb[30].mxu1  ;;  %2351 = vmatpush1.bf16.msra.mxu0 %v4482_v24  ;;  %2394 = vmatpush1.bf16.msra.mxu1 %v4482_v24  ;;  %v3481_v40 = vld [vmem:[%s4689_s1 + $0x3f4] ss:$8 sps:$4 sm:$0xff]   ;;  %v3483_v41 = vld [vmem:[%s4689_s1 + $0x3f0] ss:$8 sps:$4 sm:$0xff]  }
 0x1de   : > { %v1335_v35 = vpop.f32.mrb[31].mxu0  ;;  %v1394_v37 = vpop.f32.mrb[31].mxu1  ;;  %2352 = vmatprep.subr.bf16.mxu0 %v4487_v25  ;;  %2395 = vmatprep.subr.bf16.mxu1 %v4487_v25 }
 0x1e1   : > { %2353 = vmatpush1.bf16.msra.mxu0 %v3480_v34  ;;  %2396 = vmatpush1.bf16.msra.mxu1 %v3480_v34 }
 0x1e2   : > { %2354 = vmatprep.subr.bf16.mxu0 %v3481_v40  ;;  %2397 = vmatprep.subr.bf16.mxu1 %v3481_v40 }
 0x1e5   : > { %2355 = vmatpush1.bf16.msra.mxu0 %v3483_v41  ;;  %2398 = vmatpush1.bf16.msra.mxu1 %v3483_v41 }
 0x1e6   : > { %2426 = vmatprep.subr.bf16.mxu0 %v4422_v13  ;;  %2475 = vmatprep.subr.bf16.mxu1 %v4422_v13 }
 0x1e8   : > { %2373 = vmatmul.mubr.bf16.vlgmr.msra.gmra.mrb[56].mxu0 %v4060_v0  ;;  %2416 = vmatmul.mubr.bf16.vlgmr.msra.gmra.mrb[56].mxu1 %v4160_v42 }
 0x1e9   : > { %2427 = vmatpush1.bf16.msra.mxu0 %v4431_v17  ;;  %2476 = vmatpush1.bf16.msra.mxu1 %v4431_v17 }
 0x1ea   : > { %2428 = vmatprep.subr.bf16.mxu0 %v4438_v18  ;;  %2477 = vmatprep.subr.bf16.mxu1 %v4438_v18 }
 0x1eb   : > { %2458 = vmatprep.mubr.bf16.mxu0 %v3534_v2  ;;  %2507 = vmatprep.mubr.bf16.mxu1 %v3534_v2 }
 0x1ed   : > { %2429 = vmatpush1.bf16.msra.mxu0 %v4446_v21  ;;  %2478 = vmatpush1.bf16.msra.mxu1 %v4446_v21 }
 0x1ee   : > { %2430 = vmatprep.subr.bf16.mxu0 %v4453_v45  ;;  %2479 = vmatprep.subr.bf16.mxu1 %v4453_v45 }
 0x1f1   : > { %2431 = vmatpush1.bf16.msra.mxu0 %v3468_v52  ;;  %2480 = vmatpush1.bf16.msra.mxu1 %v3468_v52  ;;  %v3505_v52 = vld [vmem:[%s4689_s1 + $0x460] ss:$8 sps:$4 sm:$0xff]  }
 0x1f2   : > { %2432 = vmatprep.subr.bf16.mxu0 %v3469_v16  ;;  %2481 = vmatprep.subr.bf16.mxu1 %v3469_v16 }
 0x1f5   : > { %2433 = vmatpush1.bf16.msra.mxu0 %v3471_v19  ;;  %2482 = vmatpush1.bf16.msra.mxu1 %v3471_v19 }
 0x1f6   : > { %2434 = vmatprep.subr.bf16.mxu0 %v3472_v22  ;;  %2483 = vmatprep.subr.bf16.mxu1 %v3472_v22  ;;  %v3506_v22 = vld [vmem:[%s4689_s1 + $0x474] ss:$8 sps:$4 sm:$0xff]  }
 0x1f9   : > { %2435 = vmatpush1.bf16.msra.mxu0 %v3474_v23  ;;  %2484 = vmatpush1.bf16.msra.mxu1 %v3474_v23  ;;  %v3508_v23 = vld [vmem:[%s4689_s1 + $0x470] ss:$8 sps:$4 sm:$0xff]  }
 0x1fa   : > { %2436 = vmatprep.subr.bf16.mxu0 %v3475_v39  ;;  %2485 = vmatprep.subr.bf16.mxu1 %v3475_v39  ;;  %v3509_v39 = vld [vmem:[%s3737_s25 + $0x8] sm:$0x7] }
 0x1fb   : > { %v1529_v0 = vpop.f32.mrb[32].mxu0  ;;  %v1572_v29 = vpop.f32.mrb[32].mxu1 }
 0x1fc   : > { %v4529_v44 = vadd.f32 %v1529_v0, %v4400_v60  ;;  %v4532_v47 = vadd.f32 %v1572_v29, %v4403_v61  ;;  %v1531_v32 = vpop.f32.mrb[33].mxu0  ;;  %v1574_v48 = vpop.f32.mrb[33].mxu1  ;;  %v4549_v60 = vld [vmem:[%s4689_s1 + $0x404] ss:$8 sps:$4 sm:$0xff]   ;;  %v4551_v61 = vrot.slane %v3215_v59, 2 }
 0x1fd   : > { %v4535_v63 = vadd.f32 %v1531_v32, %v4406_v5  ;;  %v4538_v50 = vadd.f32 %v1574_v48, %v4409_v6  ;;  %v1533_v54 = vpop.f32.mrb[34].mxu0  ;;  %v1576_v55 = vpop.f32.mrb[34].mxu1  ;;  %2437 = vmatpush1.bf16.msra.mxu0 %v4482_v24  ;;  %2486 = vmatpush1.bf16.msra.mxu1 %v4482_v24  ;;  %v3494_v5 = vld [vmem:[%s4689_s1 + $0x434] ss:$8 sps:$4 sm:$0xff]   ;;  %v3496_v6 = vld [vmem:[%s4689_s1 + $0x430] ss:$8 sps:$4 sm:$0xff]  }
 0x1fe   : > { %v1534_v57 = vpop.f32.mrb[35].mxu0  ;;  %v1577_v58 = vpop.f32.mrb[35].mxu1  ;;  %2438 = vmatprep.subr.bf16.mxu0 %v4487_v25  ;;  %2487 = vmatprep.subr.bf16.mxu1 %v4487_v25 }
 0x201   : > { %2439 = vmatpush1.bf16.msra.mxu0 %v3480_v34  ;;  %2488 = vmatpush1.bf16.msra.mxu1 %v3480_v34 }
 0x202   : > { %2440 = vmatprep.subr.bf16.mxu0 %v3481_v40  ;;  %2489 = vmatprep.subr.bf16.mxu1 %v3481_v40 }
 0x205   : > { %2441 = vmatpush1.bf16.msra.mxu0 %v3483_v41  ;;  %2490 = vmatpush1.bf16.msra.mxu1 %v3483_v41 }
 0x206   : > { %2615 = vmatprep.subr.bf16.mxu0 %v4549_v60  ;;  %2658 = vmatprep.subr.bf16.mxu1 %v4549_v60 }
 0x208   : > { %2459 = vmatmul.mubr.bf16.vlgmr.msra.gmra.mrb[60].mxu0 %v4424_v15  ;;  %2508 = vmatmul.mubr.bf16.vlgmr.msra.gmra.mrb[60].mxu1 %v4551_v61 }
 0x209   : > { %2616 = vmatpush1.bf16.msra.mxu0 %v4556_v62  ;;  %2659 = vmatpush1.bf16.msra.mxu1 %v4556_v62 }
 0x20a   : > { %2617 = vmatprep.subr.bf16.mxu0 %v4563_v49  ;;  %2660 = vmatprep.subr.bf16.mxu1 %v4563_v49 }
 0x20b   : > { %2647 = vmatprep.mubr.bf16.mxu0 %v3534_v2  ;;  %2690 = vmatprep.mubr.bf16.mxu1 %v3534_v2 }
 0x20d   : > { %2618 = vmatpush1.bf16.msra.mxu0 %v4572_v1  ;;  %2661 = vmatpush1.bf16.msra.mxu1 %v4572_v1 }
 0x20e   : > { %2619 = vmatprep.subr.bf16.mxu0 %v4579_v3  ;;  %2662 = vmatprep.subr.bf16.mxu1 %v4579_v3 }
 0x211   : > { %2620 = vmatpush1.bf16.msra.mxu0 %v3493_v4  ;;  %2663 = vmatpush1.bf16.msra.mxu1 %v3493_v4 }
 0x212   : > { %2621 = vmatprep.subr.bf16.mxu0 %v3494_v5  ;;  %2664 = vmatprep.subr.bf16.mxu1 %v3494_v5 }
 0x215   : > { %2622 = vmatpush1.bf16.msra.mxu0 %v3496_v6  ;;  %2665 = vmatpush1.bf16.msra.mxu1 %v3496_v6 }
 0x216   : > { %2623 = vmatprep.subr.bf16.mxu0 %v3497_v7  ;;  %2666 = vmatprep.subr.bf16.mxu1 %v3497_v7 }
 0x219   : > { %2624 = vmatpush1.bf16.msra.mxu0 %v3499_v8  ;;  %2667 = vmatpush1.bf16.msra.mxu1 %v3499_v8 }
 0x21a   : > { %2625 = vmatprep.subr.bf16.mxu0 %v3500_v9  ;;  %2668 = vmatprep.subr.bf16.mxu1 %v3500_v9 }
 0x21b   : > { %v1615_v10 = vpop.f32.mrb[36].mxu0  ;;  %v1664_v11 = vpop.f32.mrb[36].mxu1 }
 0x21c   : > { %v4616_v12 = vadd.f32 %v1615_v10, %v4490_v46  ;;  %v4619_v13 = vadd.f32 %v1664_v11, %v4493_v28  ;;  %v1617_v14 = vpop.f32.mrb[37].mxu0  ;;  %v1666_v15 = vpop.f32.mrb[37].mxu1 }
 0x21d   : > { %v4622_v17 = vadd.f32 %v1617_v14, %v4496_v33  ;;  %v4625_v18 = vadd.f32 %v1666_v15, %v4499_v36  ;;  %v1619_v21 = vpop.f32.mrb[38].mxu0  ;;  %v1668_v45 = vpop.f32.mrb[38].mxu1  ;;  %2626 = vmatpush1.bf16.msra.mxu0 %v4608_v53  ;;  %2669 = vmatpush1.bf16.msra.mxu1 %v4608_v53 }
 0x21e   : > { %v1620_v16 = vpop.f32.mrb[39].mxu0  ;;  %v1669_v19 = vpop.f32.mrb[39].mxu1  ;;  %2627 = vmatprep.subr.bf16.mxu0 %v4613_v20  ;;  %2670 = vmatprep.subr.bf16.mxu1 %v4613_v20 }
 0x221   : > { %2628 = vmatpush1.bf16.msra.mxu0 %v3505_v52  ;;  %2671 = vmatpush1.bf16.msra.mxu1 %v3505_v52 }
 0x222   : > { %2629 = vmatprep.subr.bf16.mxu0 %v3506_v22  ;;  %2672 = vmatprep.subr.bf16.mxu1 %v3506_v22 }
 0x225   : > { %2630 = vmatpush1.bf16.msra.mxu0 %v3508_v23  ;;  %2673 = vmatpush1.bf16.msra.mxu1 %v3508_v23 }
 0x226   : > { %2701 = vmatprep.subr.bf16.mxu0 %v4549_v60  ;;  %2744 = vmatprep.subr.bf16.mxu1 %v4549_v60 }
 0x228   : > { %2648 = vmatmul.mubr.bf16.vlgmr.msra.gmra.mrb[64].mxu0 %v4160_v42  ;;  %2691 = vmatmul.mubr.bf16.vlgmr.msra.gmra.mrb[64].mxu1 %v3509_v39 }
 0x229   : > { %2702 = vmatpush1.bf16.msra.mxu0 %v4556_v62  ;;  %2745 = vmatpush1.bf16.msra.mxu1 %v4556_v62 }
 0x22a   : > { %2703 = vmatprep.subr.bf16.mxu0 %v4563_v49  ;;  %2746 = vmatprep.subr.bf16.mxu1 %v4563_v49 }
 0x22b   : > { %2733 = vmatprep.mubr.bf16.mxu0 %v3534_v2  ;;  %2776 = vmatprep.mubr.bf16.mxu1 %v3534_v2 }
 0x22d   : > { %2704 = vmatpush1.bf16.msra.mxu0 %v4572_v1  ;;  %2747 = vmatpush1.bf16.msra.mxu1 %v4572_v1 }
 0x22e   : > { %2705 = vmatprep.subr.bf16.mxu0 %v4579_v3  ;;  %2748 = vmatprep.subr.bf16.mxu1 %v4579_v3 }
 0x231   : > { %2706 = vmatpush1.bf16.msra.mxu0 %v3493_v4  ;;  %2749 = vmatpush1.bf16.msra.mxu1 %v3493_v4 }
 0x232   : > { %2707 = vmatprep.subr.bf16.mxu0 %v3494_v5  ;;  %2750 = vmatprep.subr.bf16.mxu1 %v3494_v5 }
 0x235   : > { %2708 = vmatpush1.bf16.msra.mxu0 %v3496_v6  ;;  %2751 = vmatpush1.bf16.msra.mxu1 %v3496_v6 }
 0x236   : > { %2709 = vmatprep.subr.bf16.mxu0 %v3497_v7  ;;  %2752 = vmatprep.subr.bf16.mxu1 %v3497_v7 }
 0x239   : > { %2710 = vmatpush1.bf16.msra.mxu0 %v3499_v8  ;;  %2753 = vmatpush1.bf16.msra.mxu1 %v3499_v8 }
 0x23a   : > { %2711 = vmatprep.subr.bf16.mxu0 %v3500_v9  ;;  %2754 = vmatprep.subr.bf16.mxu1 %v3500_v9 }
 0x23b   : > { %v1804_v2 = vpop.f32.mrb[40].mxu0  ;;  %v1847_v42 = vpop.f32.mrb[40].mxu1 }
 0x23c   : > { %v1811_v24 = vadd.f32 %v1804_v2, %v4529_v44  ;;  %v1854_v25 = vadd.f32 %v1847_v42, %v4532_v47  ;;  %v1806_v26 = vpop.f32.mrb[41].mxu0  ;;  %v1849_v27 = vpop.f32.mrb[41].mxu1 }
 0x23d   : > { %v1812_v46 = vadd.f32 %v1806_v26, %v4535_v63  ;;  %v1855_v28 = vadd.f32 %v1849_v27, %v4538_v50  ;;  %v1808_v30 = vpop.f32.mrb[42].mxu0  ;;  %v1851_v31 = vpop.f32.mrb[42].mxu1  ;;  %2712 = vmatpush1.bf16.msra.mxu0 %v4608_v53  ;;  %2755 = vmatpush1.bf16.msra.mxu1 %v4608_v53 }
 0x23e   : > { %v1809_v33 = vpop.f32.mrb[43].mxu0  ;;  %v1852_v36 = vpop.f32.mrb[43].mxu1  ;;  %2713 = vmatprep.subr.bf16.mxu0 %v4613_v20  ;;  %2756 = vmatprep.subr.bf16.mxu1 %v4613_v20  ;;  %v2788_v30 = vlaneseq }
 0x23f   : > { %v236_v36 = vld [vmem:[%s4690_s2] sm:$0x3] }
 0x240   : > { %v2789_v31 = vshrl.u32 %v2788_v30, 7 }
 0x241   : > { %2714 = vmatpush1.bf16.msra.mxu0 %v3505_v52  ;;  %2757 = vmatpush1.bf16.msra.mxu1 %v3505_v52 }
 0x242   : > { %2715 = vmatprep.subr.bf16.mxu0 %v3506_v22  ;;  %2758 = vmatprep.subr.bf16.mxu1 %v3506_v22  ;;  %v2790_v33 = vsub.s32 0, %v2789_v31 }
 0x245   : > { %2716 = vmatpush1.bf16.msra.mxu0 %v3508_v23  ;;  %2759 = vmatpush1.bf16.msra.mxu1 %v3508_v23 }
 0x248   : > { %2734 = vmatmul.mubr.bf16.vlgmr.msra.gmra.mrb[68].mxu0 %v4551_v61  ;;  %2777 = vmatmul.mubr.bf16.vlgmr.msra.gmra.mrb[68].mxu1 %v4393_v51 }
 0x25b   : > { %v1890_v38 = vpop.f32.mrb[44].mxu0  ;;  %v1933_v43 = vpop.f32.mrb[44].mxu1 }
 0x25c   : > { %v1897_v34 = vadd.f32 %v1890_v38, %v4616_v12  ;;  %v1940_v35 = vadd.f32 %v1933_v43, %v4619_v13  ;;  %v1892_v37 = vpop.f32.mrb[45].mxu0  ;;  %v1935_v40 = vpop.f32.mrb[45].mxu1  ;;  %v2794_v38 = vsub.s32 1, %v2789_v31  ;;  %v2791_v43 = vrot.slane %v236_v36, %v2790_v33 }
 0x25d   : > { %v1898_v41 = vadd.f32 %v1892_v37, %v4622_v17  ;;  %v1941_v0 = vadd.f32 %v1935_v40, %v4625_v18  ;;  %v1894_v29 = vpop.f32.mrb[46].mxu0  ;;  %v1937_v44 = vpop.f32.mrb[46].mxu1 }
 0x25e   : > { %v1895_v47 = vpop.f32.mrb[47].mxu0  ;;  %v1938_v32 = vpop.f32.mrb[47].mxu1  ;;  %v2795_v37 = vrot.slane %v236_v36, %v2794_v38 }
 0x27b   : > { %v2073_v48 = vpop.f32.mrb[48].mxu0  ;;  %v2116_v63 = vpop.f32.mrb[48].mxu1 }
 0x27c   : > { %v2080_v50 = vadd.f32 %v2073_v48, %v1811_v24  ;;  %v2123_v51 = vadd.f32 %v2116_v63, %v1854_v25  ;;  %v2075_v54 = vpop.f32.mrb[49].mxu0  ;;  %v2118_v55 = vpop.f32.mrb[49].mxu1 }
 0x27d   : > { %v2081_v56 = vadd.f32 %v2075_v54, %v1812_v46  ;;  %v2124_v57 = vadd.f32 %v2118_v55, %v1855_v28  ;;  %v2077_v58 = vpop.f32.mrb[50].mxu0  ;;  %v2120_v59 = vpop.f32.mrb[50].mxu1 }
 0x27e   : > { %v2078_v60 = vpop.f32.mrb[51].mxu0  ;;  %v2121_v61 = vpop.f32.mrb[51].mxu1 }
 0x27f   : > { %v4671_v59 = vmul.u32.u64.low 2863311531, %v2789_v31  ;;  %v4672_v60 = vmul.u32.u64.high 2863311531, %v2789_v31, %v4671_v59 }
 0x281   : > { %v2822_v61 = vshrl.u32 %v4672_v60, 1 }
 0x29b   : > { %v2175_v62 = vpop.f32.mrb[52].mxu0  ;;  %v2234_v49 = vpop.f32.mrb[52].mxu1 }
 0x29c   : > { %v2182_v1 = vadd.f32 %v2175_v62, %v1897_v34  ;;  %v2241_v3 = vadd.f32 %v2234_v49, %v1940_v35  ;;  %v2177_v4 = vpop.f32.mrb[53].mxu0  ;;  %v2236_v5 = vpop.f32.mrb[53].mxu1  ;;  %v2823_v62 = vmul.u32 3, %v2822_v61 }
 0x29d   : > { %v2183_v6 = vadd.f32 %v2177_v4, %v1898_v41  ;;  %v2242_v7 = vadd.f32 %v2236_v5, %v1941_v0  ;;  %v2179_v8 = vpop.f32.mrb[54].mxu0  ;;  %v2238_v9 = vpop.f32.mrb[54].mxu1 }
 0x29e   : > { %v2180_v53 = vpop.f32.mrb[55].mxu0  ;;  %v2239_v20 = vpop.f32.mrb[55].mxu1  ;;  %v2824_v49 = vsub.s32 %v2789_v31, %v2823_v62 }
 0x2a0   : > { %vm2827_vm0 = vcmp.ne.s32.totalorder %v2824_v49, 0  ;;  %vm2828_vm1 = vcmp.lt.s32.totalorder %v2824_v49, 0 }
 0x2a1   : > { %vm2829_vm2 = vmand %vm2828_vm1, %vm2827_vm0 }
 0x2bb   : > { %v2374_v10 = vpop.f32.mrb[56].mxu0  ;;  %v2417_v11 = vpop.f32.mrb[56].mxu1 }
 0x2bc   : > { %v2381_v12 = vadd.f32 %v2374_v10, %v2080_v50  ;;  %v2424_v13 = vadd.f32 %v2417_v11, %v2123_v51  ;;  %v2376_v14 = vpop.f32.mrb[57].mxu0  ;;  %v2419_v15 = vpop.f32.mrb[57].mxu1 }
 0x2bd   : > { %v2382_v17 = vadd.f32 %v2376_v14, %v2081_v56  ;;  %v2425_v18 = vadd.f32 %v2419_v15, %v2124_v57  ;;  %v2378_v21 = vpop.f32.mrb[58].mxu0  ;;  %v2421_v45 = vpop.f32.mrb[58].mxu1 }
 0x2be   : > { %v2379_v52 = vpop.f32.mrb[59].mxu0  ;;  %v2422_v16 = vpop.f32.mrb[59].mxu1 }
 0x2db   : > { %v2460_v19 = vpop.f32.mrb[60].mxu0  ;;  %v2509_v22 = vpop.f32.mrb[60].mxu1 }
 0x2dc   : > { %v2467_v23 = vadd.f32 %v2460_v19, %v2182_v1  ;;  %v2516_v39 = vadd.f32 %v2509_v22, %v2241_v3  ;;  %v2462_v2 = vpop.f32.mrb[61].mxu0  ;;  %v2511_v42 = vpop.f32.mrb[61].mxu1 }
 0x2dd   : > { %v2468_v24 = vadd.f32 %v2462_v2, %v2183_v6  ;;  %v2517_v25 = vadd.f32 %v2511_v42, %v2242_v7  ;;  %v2464_v26 = vpop.f32.mrb[62].mxu0  ;;  %v2513_v27 = vpop.f32.mrb[62].mxu1  ;;  %v2830_v6 = vadd.s32 3, %v2824_v49 }
 0x2de   : > { %v2465_v46 = vpop.f32.mrb[63].mxu0  ;;  %v2514_v28 = vpop.f32.mrb[63].mxu1 }
 0x2fb   : > { %v2649_v34 = vpop.f32.mrb[64].mxu0  ;;  %v2692_v35 = vpop.f32.mrb[64].mxu1 }
 0x2fc   : > { %v2656_v40 = vadd.f32 %v2649_v34, %v2381_v12  ;;  %v2699_v41 = vadd.f32 %v2692_v35, %v2424_v13  ;;  %v2651_v0 = vpop.f32.mrb[65].mxu0  ;;  %v2694_v29 = vpop.f32.mrb[65].mxu1 }
 0x2fd   : > { %v2657_v44 = vadd.f32 %v2651_v0, %v2382_v17  ;;  %v2700_v47 = vadd.f32 %v2694_v29, %v2425_v18  ;;  %v2653_v32 = vpop.f32.mrb[66].mxu0  ;;  %v2696_v48 = vpop.f32.mrb[66].mxu1  ;;  %v2831_v18 = vsel %vm2829_vm2, %v2830_v6, %v2824_v49 }
 0x2fe   : > { %v2798_v63 = vadd.f32 %v2791_v43, %v2656_v40  ;;  %v2800_v50 = vadd.f32 %v2791_v43, %v2699_v41  ;;  %v2654_v51 = vpop.f32.mrb[67].mxu0  ;;  %v2697_v54 = vpop.f32.mrb[67].mxu1  ;;  %vm2832_vm3 = vcmp.lt.s32.totalorder %v2831_v18, 2 }
 0x2ff   : > { %v2799_v55 = vadd.f32 %v2795_v37, %v2657_v44  ;;  %v2801_v56 = vadd.f32 %v2795_v37, %v2700_v47 }
 0x300   : > { %v2802_v57 = vmax.f32 %v2798_v63, %v2800_v50 }
 0x301   : > { %v2803_v58 = vmax.f32 %v2799_v55, %v2801_v56 }
 0x31b   : > { %v2735_v1 = vpop.f32.mrb[68].mxu0  ;;  %v2778_v3 = vpop.f32.mrb[68].mxu1 }
 0x31c   : > { %v2742_v4 = vadd.f32 %v2735_v1, %v2467_v23  ;;  %v2785_v5 = vadd.f32 %v2778_v3, %v2516_v39  ;;  %v2737_v7 = vpop.f32.mrb[69].mxu0  ;;  %v2780_v8 = vpop.f32.mrb[69].mxu1 }
 0x31d   : > { %v2743_v9 = vadd.f32 %v2737_v7, %v2468_v24  ;;  %v2786_v53 = vadd.f32 %v2780_v8, %v2517_v25  ;;  %v2739_v20 = vpop.f32.mrb[70].mxu0  ;;  %v2782_v10 = vpop.f32.mrb[70].mxu1 }
 0x31e   : > { %v2804_v11 = vadd.f32 %v2791_v43, %v2742_v4  ;;  %v2740_v12 = vpop.f32.mrb[71].mxu0  ;;  %v2783_v13 = vpop.f32.mrb[71].mxu1  ;;  %v2808_v17 = vadd.f32 %v2791_v43, %v2785_v5 }
 0x31f   : > { %v2805_v14 = vadd.f32 %v2795_v37, %v2743_v9  ;;  %v2809_v45 = vadd.f32 %v2795_v37, %v2786_v53 }
 0x320   : > { %v2806_v15 = vmax.f32 %v2802_v57, %v2804_v11 }
 0x321   : > { %v2807_v21 = vmax.f32 %v2803_v58, %v2805_v14 }
 0x322   : > { %v2810_v52 = vmax.f32 %v2806_v15, %v2808_v17 }
 0x323   : > { %v2811_v16 = vmax.f32 %v2807_v21, %v2809_v45 }
 0x324   : > { %v2812_v19 = vmax.f32 %v2810_v52, 0.0 }
 0x325   : > { %v2813_v22 = vmax.f32 %v2811_v16, 0.0 }
 0x326   : > { %v2835_v23 = vsel %vm2832_vm3, %v2812_v19, 0.0 }
 0x327   : > { %v2836_v39 = vsel %vm2832_vm3, %v2813_v22, 0.0 }
 0x328   : > { %v3252_v2 = vpack.c.bf16 %v2836_v39, %v2835_v23 }
 0x32a   : > { %2845 = vst [vmem:[%s233_s23] sm:$0x77] %v3252_v2 }
 0x32b PF: > { %s13_s14 = sadd.s32 1, %s3532_s14   ;;  %s4692_s12 = smov %s3528_s13 }
 0x32c   : > { %p10_p5 = scmp.ge.s32.totalorder %s13_s14, 4   ;;  %s4693_s13 = smov %s4695_s15 }
 0x32e   :  { %12 = sbr.rel (!%p10_p5) target bundleno = 2 (0x2), region = 76 }

// kernel: custom_cnn_forward.5
= control target key start
LH: loop header
LB: loop body
LE: loop exit
PB: predicated region body
PF: predicated region fallthrough
CT: control target
= control target key end

     0   :  { %s3935_s12 = smov 0   ;;  %s3937_s13 = smov 0   ;;  %s4534_s0 = inlined_call_operand.vmem [shape: bf16[2,120,64], index: 0, kind: input, shape index: {}]   ;;  %s4535_s1 = inlined_call_operand.vmem [shape: bf16[9,64,128], index: 1, kind: input, shape index: {}]   ;;  %s4536_s2 = inlined_call_operand.vmem [shape: f32[1,128], index: 2, kind: input, shape index: {}]   ;;  %s4537_s3 = inlined_call_operand.vmem [shape: bf16[2,20,128], index: 3, kind: output, shape index: {}]  }
   0x1   :  { %s3939_s14 = smov 0  }
   0x2 LB: > { %s25_s15 = sadd.s32 1, %s3909_s13  ;;  %p2934_p0 = scmp.ge.s32.totalorder %s3913_s14, 1  ;;  %s3913_s14 = sphi %s3939_s14, %s13_s14   ;;  %s3909_s13 = sphi %s3937_s13, %s4545_s13   ;;  %s3905_s12 = sphi %s3935_s12, %s4544_s12  }
   0x3   : > { %p27_p1 = scmp.ge.s32.totalorder %s25_s15, 2  ;;  %p168_p2 = scmp.lt.s32.totalorder %s3913_s14, 3 }
   0x5   : > { %s4547_s15 = smov (%p27_p1, %s25_s15), 0  ;;  %p169_p3 = pnand %p2934_p0, %p168_p2 }
   0x6   : > { %v3956_v0 = vld [vmem:[%s4535_s1 + $0x20] sm:$0xff] (!%p169_p3)   ;;  %p202_p4 = scmp.lt.s32.totalorder (!%p169_p3), %s3905_s12, 1  ;;  %v3967_v2 = vld [vmem:[%s4535_s1 + $0x28] sm:$0xff] (!%p169_p3)   ;;  %v3983_v4 = vld [vmem:[%s4535_s1 + $0x30] sm:$0xff] (!%p169_p3)   ;;  %vm292_vm0 = vcmask (!%p169_p3), 523264   ;;  %vm264_vm1 = vcmask (!%p169_p3), 1044480  }
   0x7   : > { %172 = sbr.rel (%p169_p3) target bundleno = 526 (0x20e), region = 32  ;;  %v3961_v1 = vld [vmem:[%s4535_s1] sm:$0xff] (!%p169_p3)   ;;  %3365 = vmatprep.subr.bf16.mxu0 (!%p169_p3), %v3956_v0  ;;  %v3976_v3 = vld [vmem:[%s4535_s1 + $0x8] sm:$0xff] (!%p169_p3)   ;;  %v3990_v5 = vld [vmem:[%s4535_s1 + $0x10] sm:$0xff] (!%p169_p3)   ;;  %vm437_vm2 = vsmask.f32 (!%p169_p3), 7424 }
   0x8   : > { %3377 = vmatprep.subr.bf16.mxu1 (!%p169_p3), %v3961_v1  ;;  %3366 = vmatpush3.bf16.msra.mxu0 (!%p169_p3), %v3956_v0  ;;  %v3995_v6 = vld [vmem:[%s4535_s1 + $0x38] sm:$0xff] (!%p169_p3)   ;;  %vm562_vm3 = vcmask (!%p169_p3), 1046528   ;;  %vm628_vm4 = vcmask (!%p169_p3), 1045504   ;;  %vm700_vm5 = vsmask.f32 (!%p169_p3), 5376 }
   0x9   : > { %3378 = vmatpush3.bf16.msra.mxu1 (!%p169_p3), %v3961_v1  ;;  %3367 = vmatprep.subr.bf16.mxu0 (!%p169_p3), %v3967_v2  ;;  %v4006_v7 = vld [vmem:[%s4535_s1 + $0x18] sm:$0xff] (!%p169_p3)   ;;  %vm908_vm6 = vsmask.f32 (!%p169_p3), 4352  ;;  %vm1038_vm7 = vsmask.f32 (!%p169_p3), 6400 }
   0xa   : > { %3379 = vmatprep.subr.bf16.mxu1 (!%p169_p3), %v3976_v3 }
   0xc   : > { %3368 = vmatpush3.bf16.msra.mxu0 (!%p169_p3), %v3967_v2 }
   0xd   : > { %3380 = vmatpush3.bf16.msra.mxu1 (!%p169_p3), %v3976_v3  ;;  %3369 = vmatprep.subr.bf16.mxu0 (!%p169_p3), %v3983_v4 }
   0xe   : > { %s4549_s12 = smov (!%p202_p4, %s3905_s12), 1  ;;  %3381 = vmatprep.subr.bf16.mxu1 %v3990_v5 }
   0xf   : > { %s3797_s26 = smul.u32 60, %s4549_s12 }
  0x10   : > { %3370 = vmatpush3.bf16.msra.mxu0 %v3983_v4 }
  0x11   : > { %s4000_s6 = scalar_lea.vmem %s4534_s0, %s3797_s26  ;;  %3382 = vmatpush3.bf16.msra.mxu1 %v3990_v5  ;;  %3371 = vmatprep.subr.bf16.mxu0 %v3995_v6  ;;  %s3798_s26 = smul.u32 12, %s4549_s12 }
  0x12   : > { %v4011_v8 = vld [vmem:[%s4000_s6 + $0x14] sm:$0xf]  ;;  %v238_v9 = vld [vmem:[%s4000_s6 + $0x18] sm:$0x1]  ;;  %v4016_v10 = vld [vmem:[%s4000_s6 + $0xc] sm:$0xf8]   ;;  %3383 = vmatprep.subr.bf16.mxu1 %v4006_v7 }
  0x13   : > { %v2946_v11 = vcombine.low %v4011_v8, %v238_v9  ;;  %v3839_v12 = vld [vmem:[%s4000_s6] sm:$0xff]   ;;  %v265_v13 = vrot.slane %v4016_v10, 3  ;;  %v3841_v17 = vld [vmem:[%s4000_s6 + $0x8] ss:$0 sps:$4 sm:$0x77]   ;;  %v910_v56 = vshrl.u32 %v4016_v10, 16  ;;  %s221_s29 = scalar_lea.vmem %s4537_s3, %s3798_s26 }
  0x14   : > { %v438_v15 = vshrl.u32 %v3839_v12, 16  ;;  %v440_v16 = vshll.u32 %v3839_v12, 16  ;;  %3385 = vmatprep.mubr.msk.bf16.mxu1 %vm292_vm0, %v3839_v12  ;;  %v445_v20 = vshll.u32 %v3841_v17, 16  ;;  %3372 = vmatpush3.bf16.msra.mxu0 %v3995_v6  ;;  %v3840_v21 = vld [vmem:[%s4000_s6 + $0x8] ss:$0 sps:$4 sm:$0x33]  }
  0x15   : > { %v266_v14 = vrot.slane %v2946_v11, 3  ;;  %3384 = vmatpush3.bf16.msra.mxu1 %v4006_v7  ;;  %3389 = vmatprep.subr.bf16.mxu0 %v3956_v0  ;;  %v4048_v25 = vld [vmem:[%s4000_s6 + $0x2c] sm:$0xfe]   ;;  %v3843_v26 = vld [vmem:[%s4000_s6 + $0x34] ss:$0 sps:$4 sm:$0x77]  }
  0x16   : > { %v442_v19 = vrot.slane %v440_v16, 1  ;;  %v447_v23 = vrot.slane %v445_v20, 1  ;;  %3401 = vmatprep.subr.bf16.mxu1 %v3961_v1  ;;  %v449_v27 = vshrl.u32 %v3841_v17, 16  ;;  %v3844_v28 = vld [vmem:[%s4000_s6 + $0x1c] sm:$0xfc]   ;;  %v563_v30 = vrot.slane %v4048_v25, 1 }
  0x17   : > { %v267_v18 = vsel %vm264_vm1, %v265_v13, %v266_v14  ;;  %v3845_v29 = vld [vmem:[%s4000_s6 + $0x24] ss:$0 sps:$4 sm:$0xff]   ;;  %v4060_v31 = vrot.slane %v3843_v26, 1  ;;  %v686_v32 = vld [vmem:[%s4000_s6 + $0x1c] sm:$0xc]  ;;  %v629_v37 = vrot.slane %v3844_v28, 2 }
  0x18   : > { %3373 = vmatprep.mubr.msk.bf16.mxu0 %vm292_vm0, %v267_v18  ;;  %v443_v22 = vor.u32 %v442_v19, %v438_v15  ;;  %3386 = vmatmul.mubr.msk.bf16.vlgmr.msra.gmra.mrb[0].mxu1 %vm292_vm0, %v3840_v21  ;;  %v4065_v33 = vld [vmem:[%s4000_s6 + $0x20] sm:$0xf]  ;;  %v4068_v34 = vld [vmem:[%s4000_s6 + $0x24] sm:$0xf]  ;;  %v4070_v35 = vor.u32 %v449_v27, %v447_v23  ;;  %v689_v36 = vld [vmem:[%s4000_s6 + $0x28] sm:$0x1] }
  0x19   : > { %3374 = vmatmul.mubr.msk.bf16.vlgmr.msra.gmra.mrb[0].mxu0 %vm292_vm0, %v266_v14  ;;  %3402 = vmatpush3.bf16.msra.mxu1 %v3961_v1  ;;  %v4074_v38 = vrot.slane %v3845_v29, 2  ;;  %v2974_v39 = vcombine.low %v686_v32, %v4065_v33  ;;  %v4084_v40 = vsel %vm562_vm3, %v563_v30, %v4060_v31  ;;  %v2975_v41 = vcombine.low %v4068_v34, %v689_v36  ;;  %v904_v53 = vld [vmem:[%s4000_s6 + $0x18] sm:$0x3]  ;;  %v3849_v11 = vld [vmem:[%s4535_s1 + $0x48] sm:$0xff]   ;;  %v3850_v13 = vld [vmem:[%s4535_s1 + $0x50] sm:$0xff]  }
  0x1a   : > { %v4036_v24 = vsel %vm437_vm2, %v443_v22, %v447_v23  ;;  %3390 = vmatpush3.bf16.msra.mxu0 %v3956_v0  ;;  %3403 = vmatprep.subr.bf16.mxu1 %v3976_v3  ;;  %v2994_v55 = vcombine.low %v4011_v8, %v904_v53  ;;  %v913_v57 = vshll.u32 %v4016_v10, 16  ;;  %v912_v60 = vrot.slane %v910_v56, 3  ;;  %v3854_v26 = vld [vmem:[%s4535_s1 + $0x60] sm:$0xff]   ;;  %v3855_v29 = vld [vmem:[%s4535_s1 + $0x68] sm:$0xff]   ;;  %v1336_v30 = vld [vmem:[%s4000_s6 + $0x10] sm:$0xe] }
  0x1b   : > { %3391 = vmatprep.subr.bf16.mxu0 %v3967_v2  ;;  %3397 = vmatprep.mubr.msk.bf16.mxu0 %vm292_vm0, %v4036_v24  ;;  %v4091_v42 = vsel %vm628_vm4, %v629_v37, %v4074_v38  ;;  %v702_v43 = vshrl.u32 %v2974_v39, 16  ;;  %v705_v44 = vshll.u32 %v2974_v39, 16  ;;  %v710_v45 = vshrl.u32 %v2975_v41, 16  ;;  %v1248_v27 = vld [vmem:[%s4000_s6] sm:$0xc]  ;;  %v3856_v37 = vld [vmem:[%s4535_s1 + $0x70] sm:$0xff]  }
  0x1c   : > { %3409 = vmatprep.mubr.msk.bf16.mxu1 %vm292_vm0, %v267_v18  ;;  %v713_v46 = vshll.u32 %v2975_v41, 16  ;;  %v918_v58 = vshrl.u32 %v2994_v55, 16  ;;  %v921_v59 = vshll.u32 %v2994_v55, 16  ;;  %v915_v61 = vrot.slane %v913_v57, 4  ;;  %v3851_v18 = vld [vmem:[%s4535_s1 + $0x58] sm:$0xff]  }
  0x1d   : > { %3404 = vmatpush3.bf16.msra.mxu1 %v3976_v3  ;;  %v704_v47 = vrot.slane %v702_v43, 2  ;;  %v707_v48 = vrot.slane %v705_v44, 3  ;;  %v712_v49 = vrot.slane %v710_v45, 2  ;;  %v1043_v15 = vshll.u32 %v4048_v25, 16  ;;  %v4197_v28 = vld [vmem:[%s4000_s6 + $0x4] sm:$0xf] }
  0x1e   : > { %3392 = vmatpush3.bf16.msra.mxu0 %v3967_v2  ;;  %3405 = vmatprep.subr.bf16.mxu1 %v3990_v5  ;;  %v715_v50 = vrot.slane %v713_v46, 3  ;;  %v920_v62 = vrot.slane %v918_v58, 3  ;;  %v923_v63 = vrot.slane %v921_v59, 4  ;;  %v3018_v32 = vcombine.low %v1248_v27, %v4197_v28 }
  0x1f   : > { %3393 = vmatprep.subr.bf16.mxu0 %v3983_v4  ;;  %v708_v51 = vor.u32 %v707_v48, %v704_v47  ;;  %v1045_v20 = vrot.slane %v1043_v15, 2  ;;  %v3022_v36 = vcombine.low %v1336_v30, %v4011_v8  ;;  %v4322_v15 = vld [vmem:[%s4000_s6 + $0x34] sm:$0xf] }
  0x20   : > { %v4108_v52 = vor.u32 %v715_v50, %v712_v49  ;;  %v924_v9 = vor.u32 %v923_v63, %v920_v62  ;;  %v1263_v39 = vshrl.u32 %v3018_v32, 16  ;;  %v1266_v41 = vshll.u32 %v3018_v32, 16 }
  0x21   : > { %3406 = vmatpush3.bf16.msra.mxu1 %v3990_v5  ;;  %v1348_v45 = vshll.u32 %v3022_v36, 16 }
  0x22   : > { %3394 = vmatpush3.bf16.msra.mxu0 %v3983_v4  ;;  %3407 = vmatprep.subr.bf16.mxu1 %v4006_v7  ;;  %v4119_v54 = vsel %vm700_vm5, %v708_v51, %v4108_v52  ;;  %v1265_v48 = vrot.slane %v1263_v39, 2  ;;  %v1268_v49 = vrot.slane %v1266_v41, 3 }
  0x23   : > { %3395 = vmatprep.subr.bf16.mxu0 %v3995_v6  ;;  %v1350_v55 = vrot.slane %v1348_v45, 2 }
  0x24   : > { %v1269_v58 = vor.u32 %v1268_v49, %v1265_v48  ;;  %v3882_v48 = vld [vmem:[%s4535_s1 + $0xf0] sm:$0xff]  }
  0x25   : > { %3408 = vmatpush3.bf16.msra.mxu1 %v4006_v7 }
  0x26   : > { %3396 = vmatpush3.bf16.msra.mxu0 %v3995_v6  ;;  %3425 = vmatprep.subr.bf16.mxu1 %v3961_v1 }
  0x27   : > { %3413 = vmatprep.subr.bf16.mxu0 %v3956_v0 }
  0x28   : > { %3410 = vmatmul.mubr.msk.bf16.vlgmr.msra.gmra.mrb[4].mxu1 %vm292_vm0, %v266_v14  ;;  %v1040_v14 = vshrl.u32 %v4048_v25, 16 }
  0x29   : > { %3398 = vmatmul.mubr.msk.bf16.vlgmr.msra.gmra.mrb[4].mxu0 %vm292_vm0, %v4070_v35  ;;  %3426 = vmatpush3.bf16.msra.mxu1 %v3961_v1 }
  0x2a   : > { %3414 = vmatpush3.bf16.msra.mxu0 %v3956_v0  ;;  %3427 = vmatprep.subr.bf16.mxu1 %v3976_v3  ;;  %v1042_v19 = vrot.slane %v1040_v14, 1  ;;  %v4319_v14 = vld [vmem:[%s4000_s6 + $0x30] sm:$0xf] }
  0x2b   : > { %3415 = vmatprep.subr.bf16.mxu0 %v3967_v2  ;;  %3421 = vmatprep.mubr.msk.bf16.mxu0 %vm292_vm0, %v4084_v40 }
  0x2c   : > { %3433 = vmatprep.mubr.msk.bf16.mxu1 %vm292_vm0, %v4091_v42  ;;  %v1046_v23 = vor.u32 %v1045_v20, %v1042_v19  ;;  %v3874_v20 = vld [vmem:[%s4535_s1 + $0xd0] sm:$0xff]  }
  0x2d   : > { %3428 = vmatpush3.bf16.msra.mxu1 %v3976_v3 }
  0x2e   : > { %3416 = vmatpush3.bf16.msra.mxu0 %v3967_v2  ;;  %3429 = vmatprep.subr.bf16.mxu1 %v3990_v5 }
  0x2f   : > { %3417 = vmatprep.subr.bf16.mxu0 %v3983_v4 }
  0x31   : > { %3430 = vmatpush3.bf16.msra.mxu1 %v3990_v5 }
  0x32   : > { %3418 = vmatpush3.bf16.msra.mxu0 %v3983_v4  ;;  %3431 = vmatprep.subr.bf16.mxu1 %v4006_v7 }
  0x33   : > { %3419 = vmatprep.subr.bf16.mxu0 %v3995_v6 }
  0x35   : > { %3432 = vmatpush3.bf16.msra.mxu1 %v4006_v7 }
  0x36   : > { %3420 = vmatpush3.bf16.msra.mxu0 %v3995_v6  ;;  %3449 = vmatprep.subr.bf16.mxu1 %v3961_v1 }
  0x37   : > { %3437 = vmatprep.subr.bf16.mxu0 %v3956_v0 }
  0x38   : > { %3434 = vmatmul.mubr.msk.bf16.vlgmr.msra.gmra.mrb[8].mxu1 %vm292_vm0, %v4074_v38 }
  0x39   : > { %3422 = vmatmul.mubr.msk.bf16.vlgmr.msra.gmra.mrb[8].mxu0 %vm292_vm0, %v4060_v31  ;;  %3450 = vmatpush3.bf16.msra.mxu1 %v3961_v1  ;;  %v1854_v1 = vld [vmem:[%s4000_s6 + $0x10] sm:$0xc] }
  0x3a   : > { %3438 = vmatpush3.bf16.msra.mxu0 %v3956_v0  ;;  %3451 = vmatprep.subr.bf16.mxu1 %v3976_v3  ;;  %v3848_v0 = vld [vmem:[%s4535_s1 + $0x40] sm:$0xff]  }
  0x3b   : > { %3439 = vmatprep.subr.bf16.mxu0 %v3967_v2  ;;  %3445 = vmatprep.mubr.msk.bf16.mxu0 %vm292_vm0, %v4119_v54 }
  0x3c   : > { %3457 = vmatprep.mubr.msk.bf16.mxu1 %vm292_vm0, %v4084_v40 }
  0x3d   : > { %3452 = vmatpush3.bf16.msra.mxu1 %v3976_v3  ;;  %v3065_v3 = vcombine.low %v1854_v1, %v4011_v8  ;;  %v1345_v8 = vshrl.u32 %v3022_v36, 16  ;;  %v3864_v1 = vld [vmem:[%s4535_s1 + $0x90] sm:$0xff]  }
  0x3e   : > { %3440 = vmatpush3.bf16.msra.mxu0 %v3967_v2  ;;  %3453 = vmatprep.subr.bf16.mxu1 %v3990_v5  ;;  %v4147_v2 = vld [vmem:[%s4000_s6 + $0x18] ss:$0 sps:$4 sm:$0xff]  }
  0x3f   : > { %3441 = vmatprep.subr.bf16.mxu0 %v3983_v4  ;;  %v1858_v10 = vrot.slane %v3065_v3, 2  ;;  %v1353_v46 = vshrl.u32 %v4147_v2, 16  ;;  %v1356_v47 = vshll.u32 %v4147_v2, 16  ;;  %v1347_v53 = vrot.slane %v1345_v8, 1  ;;  %v1604_v3 = vld [vmem:[%s4000_s6] sm:$0x8] }
  0x41   : > { %3454 = vmatpush3.bf16.msra.mxu1 %v3990_v5  ;;  %v4152_v5 = vrot.slane %v4147_v2, 2  ;;  %v1355_v56 = vrot.slane %v1353_v46, 1  ;;  %v1358_v57 = vrot.slane %v1356_v47, 2  ;;  %v3865_v2 = vld [vmem:[%s4535_s1 + $0x98] sm:$0xff]   ;;  %v3880_v46 = vld [vmem:[%s4535_s1 + $0xe0] sm:$0xff]  }
  0x42   : > { %3442 = vmatpush3.bf16.msra.mxu0 %v3983_v4  ;;  %3455 = vmatprep.subr.bf16.mxu1 %v4006_v7  ;;  %v916_v4 = vor.u32 %v915_v61, %v912_v60  ;;  %v1351_v60 = vor.u32 %v1350_v55, %v1347_v53 }
  0x43   : > { %3443 = vmatprep.subr.bf16.mxu0 %v3995_v6  ;;  %v4160_v12 = vsel %vm628_vm4, %v1858_v10, %v4152_v5  ;;  %v4228_v61 = vor.u32 %v1358_v57, %v1355_v56 }
  0x45   : > { %3456 = vmatpush3.bf16.msra.mxu1 %v4006_v7  ;;  %v3853_v7 = vld [vmem:[%s4000_s6 + $0x34] ss:$0 sps:$4 sm:$0xff]   ;;  %v4240_v63 = vsel %vm1038_vm7, %v1351_v60, %v4228_v61  ;;  %v3883_v60 = vld [vmem:[%s4535_s1 + $0xf8] sm:$0xff]  }
  0x46   : > { %3444 = vmatpush3.bf16.msra.mxu0 %v3995_v6  ;;  %3473 = vmatprep.subr.bf16.mxu1 %v3848_v0  ;;  %v925_v6 = vsel %vm908_vm6, %v916_v4, %v924_v9  ;;  %v1048_v16 = vshrl.u32 %v3853_v7, 16  ;;  %v1051_v17 = vshll.u32 %v3853_v7, 16  ;;  %v3044_v4 = vcombine.low %v1604_v3, %v4197_v28  ;;  %v3870_v7 = vld [vmem:[%s4535_s1 + $0xb8] sm:$0xff]  }
  0x47   : > { %3461 = vmatprep.subr.bf16.mxu0 %v3848_v0 }
  0x48   : > { %3458 = vmatmul.mubr.msk.bf16.vlgmr.msra.gmra.mrb[12].mxu1 %vm292_vm0, %v4060_v31  ;;  %v1050_v21 = vrot.slane %v1048_v16, 1  ;;  %v1053_v22 = vrot.slane %v1051_v17, 2  ;;  %v4325_v16 = vld [vmem:[%s4000_s6 + $0x38] sm:$0x3]  ;;  %v3084_v17 = vcombine.low %v4065_v33, %v4068_v34 }
  0x49   : > { %3446 = vmatmul.mubr.msk.bf16.vlgmr.msra.gmra.mrb[12].mxu0 %vm292_vm0, %v4108_v52  ;;  %3474 = vmatpush3.bf16.msra.mxu1 %v3848_v0  ;;  %v3089_v19 = vcombine.low %v4322_v15, %v4325_v16  ;;  %v4344_v33 = vld [vmem:[%s4000_s6 + $0x28] ss:$0 sps:$4 sm:$0x77]  }
  0x4a   : > { %3462 = vmatpush3.bf16.msra.mxu0 %v3848_v0  ;;  %3475 = vmatprep.subr.bf16.mxu1 %v3849_v11  ;;  %v2059_v27 = vshrl.u32 %v3084_v17, 16  ;;  %v2070_v45 = vshrl.u32 %v4344_v33, 16 }
  0x4b   : > { %3463 = vmatprep.subr.bf16.mxu0 %v3849_v11  ;;  %3469 = vmatprep.mubr.msk.bf16.mxu0 %vm292_vm0, %v4036_v24  ;;  %v4179_v24 = vor.u32 %v1053_v22, %v1050_v21  ;;  %v2061_v21 = vshll.u32 %v3084_v17, 16  ;;  %v3885_v17 = vld [vmem:[%s4535_s1 + $0x100] sm:$0xff]  }
  0x4c   : > { %3481 = vmatprep.mubr.msk.bf16.mxu1 %vm292_vm0, %v925_v6  ;;  %v3869_v6 = vld [vmem:[%s4535_s1 + $0xb0] sm:$0xff]  }
  0x4d   : > { %3476 = vmatpush3.bf16.msra.mxu1 %v3849_v11  ;;  %v4186_v25 = vsel %vm1038_vm7, %v1046_v23, %v4179_v24  ;;  %v2063_v28 = vrot.slane %v2061_v21, 1 }
  0x4e   : > { %3464 = vmatpush3.bf16.msra.mxu0 %v3849_v11  ;;  %3477 = vmatprep.subr.bf16.mxu1 %v3850_v13 }
  0x4f   : > { %3465 = vmatprep.subr.bf16.mxu0 %v3850_v13 }
  0x51   : > { %3478 = vmatpush3.bf16.msra.mxu1 %v3850_v13 }
  0x52   : > { %3466 = vmatpush3.bf16.msra.mxu0 %v3850_v13  ;;  %3479 = vmatprep.subr.bf16.mxu1 %v3851_v18 }
  0x53   : > { %3467 = vmatprep.subr.bf16.mxu0 %v3851_v18 }
  0x55   : > { %3480 = vmatpush3.bf16.msra.mxu1 %v3851_v18 }
  0x56   : > { %3468 = vmatpush3.bf16.msra.mxu0 %v3851_v18  ;;  %3497 = vmatprep.subr.bf16.mxu1 %v3848_v0 }
  0x57   : > { %3485 = vmatprep.subr.bf16.mxu0 %v3848_v0 }
  0x58   : > { %3482 = vmatmul.mubr.msk.bf16.vlgmr.msra.gmra.mrb[16].mxu1 %vm292_vm0, %v924_v9 }
  0x59   : > { %3470 = vmatmul.mubr.msk.bf16.vlgmr.msra.gmra.mrb[16].mxu0 %vm292_vm0, %v4070_v35  ;;  %3498 = vmatpush3.bf16.msra.mxu1 %v3848_v0  ;;  %v4207_v35 = vld [vmem:[%s4000_s6 + $0x8] sm:$0x1f]  }
  0x5a   : > { %3486 = vmatpush3.bf16.msra.mxu0 %v3848_v0  ;;  %3499 = vmatprep.subr.bf16.mxu1 %v3849_v11  ;;  %v1271_v43 = vshrl.u32 %v4207_v35, 16  ;;  %v1274_v44 = vshll.u32 %v4207_v35, 16  ;;  %v3863_v0 = vld [vmem:[%s4535_s1 + $0x88] sm:$0xff]   ;;  %v4269_v9 = vrot.slane %v4207_v35, 3 }
  0x5b   : > { %3487 = vmatprep.subr.bf16.mxu0 %v3849_v11  ;;  %3493 = vmatprep.mubr.msk.bf16.mxu0 %vm292_vm0, %v4119_v54 }
  0x5c   : > { %3505 = vmatprep.mubr.msk.bf16.mxu1 %vm292_vm0, %v4186_v25  ;;  %v1273_v50 = vrot.slane %v1271_v43, 2  ;;  %v1276_v51 = vrot.slane %v1274_v44, 3 }
  0x5d   : > { %3500 = vmatpush3.bf16.msra.mxu1 %v3849_v11 }
  0x5e   : > { %3488 = vmatpush3.bf16.msra.mxu0 %v3849_v11  ;;  %3501 = vmatprep.subr.bf16.mxu1 %v3850_v13  ;;  %v4226_v59 = vor.u32 %v1276_v51, %v1273_v50  ;;  %v3868_v11 = vld [vmem:[%s4535_s1 + $0xa8] sm:$0xff]  }
  0x5f   : > { %3489 = vmatprep.subr.bf16.mxu0 %v3850_v13 }
  0x60   : > { %v4234_v62 = vsel %vm700_vm5, %v1269_v58, %v4226_v59 }
  0x61   : > { %3502 = vmatpush3.bf16.msra.mxu1 %v3850_v13 }
  0x62   : > { %3490 = vmatpush3.bf16.msra.mxu0 %v3850_v13  ;;  %3503 = vmatprep.subr.bf16.mxu1 %v3851_v18  ;;  %v2130_v13 = vld [vmem:[%s4000_s6 + $0x2c] sm:$0x8] }
  0x63   : > { %3491 = vmatprep.subr.bf16.mxu0 %v3851_v18 }
  0x65   : > { %3504 = vmatpush3.bf16.msra.mxu1 %v3851_v18 }
  0x66   : > { %3492 = vmatpush3.bf16.msra.mxu0 %v3851_v18  ;;  %3521 = vmatprep.subr.bf16.mxu1 %v3854_v26  ;;  %v3088_v18 = vcombine.low %v2130_v13, %v4319_v14 }
  0x67   : > { %3509 = vmatprep.subr.bf16.mxu0 %v3854_v26 }
  0x68   : > { %3506 = vmatmul.mubr.msk.bf16.vlgmr.msra.gmra.mrb[20].mxu1 %vm292_vm0, %v4179_v24  ;;  %v2145_v22 = vshrl.u32 %v3088_v18, 16  ;;  %v2148_v23 = vshll.u32 %v3088_v18, 16  ;;  %v3886_v18 = vld [vmem:[%s4535_s1 + $0x108] sm:$0xff]  }
  0x69   : > { %3494 = vmatmul.mubr.msk.bf16.vlgmr.msra.gmra.mrb[20].mxu0 %vm292_vm0, %v4108_v52  ;;  %3522 = vmatpush3.bf16.msra.mxu1 %v3854_v26 }
  0x6a   : > { %3510 = vmatpush3.bf16.msra.mxu0 %v3854_v26  ;;  %3523 = vmatprep.subr.bf16.mxu1 %v3855_v29  ;;  %v2147_v30 = vrot.slane %v2145_v22, 3  ;;  %v2150_v32 = vrot.slane %v2148_v23, 4 }
  0x6b   : > { %3511 = vmatprep.subr.bf16.mxu0 %v3855_v29  ;;  %3517 = vmatprep.mubr.msk.bf16.mxu0 %vm292_vm0, %v4091_v42  ;;  %v3857_v42 = vld [vmem:[%s4535_s1 + $0x78] sm:$0xff]  }
  0x6c   : > { %3529 = vmatprep.mubr.msk.bf16.mxu1 %vm292_vm0, %v4084_v40  ;;  %v2151_v41 = vor.u32 %v2150_v32, %v2147_v30 }
  0x6d   : > { %3524 = vmatpush3.bf16.msra.mxu1 %v3855_v29 }
  0x6e   : > { %3512 = vmatpush3.bf16.msra.mxu0 %v3855_v29  ;;  %3525 = vmatprep.subr.bf16.mxu1 %v3856_v37 }
  0x6f   : > { %3513 = vmatprep.subr.bf16.mxu0 %v3856_v37 }
  0x71   : > { %3526 = vmatpush3.bf16.msra.mxu1 %v3856_v37 }
  0x72   : > { %3514 = vmatpush3.bf16.msra.mxu0 %v3856_v37  ;;  %3527 = vmatprep.subr.bf16.mxu1 %v3857_v42 }
  0x73   : > { %3515 = vmatprep.subr.bf16.mxu0 %v3857_v42 }
  0x75   : > { %3528 = vmatpush3.bf16.msra.mxu1 %v3857_v42 }
  0x76   : > { %3516 = vmatpush3.bf16.msra.mxu0 %v3857_v42  ;;  %3545 = vmatprep.subr.bf16.mxu1 %v3854_v26 }
  0x77   : > { %3533 = vmatprep.subr.bf16.mxu0 %v3854_v26 }
  0x78   : > { %3530 = vmatmul.mubr.msk.bf16.vlgmr.msra.gmra.mrb[24].mxu1 %vm292_vm0, %v4060_v31 }
  0x79   : > { %3518 = vmatmul.mubr.msk.bf16.vlgmr.msra.gmra.mrb[24].mxu0 %vm292_vm0, %v4074_v38  ;;  %3546 = vmatpush3.bf16.msra.mxu1 %v3854_v26  ;;  %v3862_v38 = vld [vmem:[%s4535_s1 + $0x80] sm:$0xff]  }
  0x7a   : > { %3534 = vmatpush3.bf16.msra.mxu0 %v3854_v26  ;;  %3547 = vmatprep.subr.bf16.mxu1 %v3855_v29  ;;  %v3875_v26 = vld [vmem:[%s4535_s1 + $0xd8] sm:$0xff]  }
  0x7b   : > { %3535 = vmatprep.subr.bf16.mxu0 %v3855_v29  ;;  %3541 = vmatprep.mubr.msk.bf16.mxu0 %vm292_vm0, %v4234_v62 }
  0x7c   : > { %3553 = vmatprep.mubr.msk.bf16.mxu1 %vm292_vm0, %v4240_v63 }
  0x7d   : > { %3548 = vmatpush3.bf16.msra.mxu1 %v3855_v29 }
  0x7e   : > { %3536 = vmatpush3.bf16.msra.mxu0 %v3855_v29  ;;  %3549 = vmatprep.subr.bf16.mxu1 %v3856_v37  ;;  %v2066_v29 = vshll.u32 %v4344_v33, 16 }
  0x7f   : > { %3537 = vmatprep.subr.bf16.mxu0 %v3856_v37 }
  0x80   : > { %v2068_v39 = vrot.slane %v2066_v29, 1 }
  0x81   : > { %3550 = vmatpush3.bf16.msra.mxu1 %v3856_v37 }
  0x82   : > { %3538 = vmatpush3.bf16.msra.mxu0 %v3856_v37  ;;  %3551 = vmatprep.subr.bf16.mxu1 %v3857_v42  ;;  %v2064_v37 = vor.u32 %v2063_v28, %v2059_v27  ;;  %v2072_v47 = vor.u32 %v2070_v45, %v2068_v39 }
  0x83   : > { %3539 = vmatprep.subr.bf16.mxu0 %v3857_v42 }
  0x84   : > { %v2069_v44 = vsel %vm437_vm2, %v2064_v37, %v2068_v39 }
  0x85   : > { %3552 = vmatpush3.bf16.msra.mxu1 %v3857_v42 }
  0x86   : > { %3540 = vmatpush3.bf16.msra.mxu0 %v3857_v42  ;;  %3569 = vmatprep.subr.bf16.mxu1 %v3862_v38  ;;  %v3881_v42 = vld [vmem:[%s4535_s1 + $0xe8] sm:$0xff]  }
  0x87   : > { %3557 = vmatprep.subr.bf16.mxu0 %v3862_v38 }
  0x88   : > { %3554 = vmatmul.mubr.msk.bf16.vlgmr.msra.gmra.mrb[28].mxu1 %vm292_vm0, %v4228_v61 }
  0x89   : > { %3542 = vmatmul.mubr.msk.bf16.vlgmr.msra.gmra.mrb[28].mxu0 %vm292_vm0, %v4226_v59  ;;  %3570 = vmatpush3.bf16.msra.mxu1 %v3862_v38 }
  0x8a   : > { %3558 = vmatpush3.bf16.msra.mxu0 %v3862_v38  ;;  %3571 = vmatprep.subr.bf16.mxu1 %v3863_v0 }
  0x8b   : > { %3559 = vmatprep.subr.bf16.mxu0 %v3863_v0  ;;  %3565 = vmatprep.mubr.msk.bf16.mxu0 %vm292_vm0, %v4084_v40  ;;  %v1608_v40 = vrot.slane %v3044_v4, 3 }
  0x8c   : > { %3577 = vmatprep.mubr.msk.bf16.mxu1 %vm292_vm0, %v4119_v54 }
  0x8d   : > { %3572 = vmatpush3.bf16.msra.mxu1 %v3863_v0  ;;  %v4277_v10 = vsel %vm264_vm1, %v1608_v40, %v4269_v9 }
  0x8e   : > { %3560 = vmatpush3.bf16.msra.mxu0 %v3863_v0  ;;  %3573 = vmatprep.subr.bf16.mxu1 %v3864_v1 }
  0x8f   : > { %3561 = vmatprep.subr.bf16.mxu0 %v3864_v1 }
  0x91   : > { %3574 = vmatpush3.bf16.msra.mxu1 %v3864_v1 }
  0x92   : > { %3562 = vmatpush3.bf16.msra.mxu0 %v3864_v1  ;;  %3575 = vmatprep.subr.bf16.mxu1 %v3865_v2 }
  0x93   : > { %3563 = vmatprep.subr.bf16.mxu0 %v3865_v2 }
  0x95   : > { %3576 = vmatpush3.bf16.msra.mxu1 %v3865_v2 }
  0x96   : > { %3564 = vmatpush3.bf16.msra.mxu0 %v3865_v2  ;;  %3593 = vmatprep.subr.bf16.mxu1 %v3862_v38 }
  0x97   : > { %3581 = vmatprep.subr.bf16.mxu0 %v3862_v38 }
  0x98   : > { %3578 = vmatmul.mubr.msk.bf16.vlgmr.msra.gmra.mrb[32].mxu1 %vm292_vm0, %v4108_v52 }
  0x99   : > { %3566 = vmatmul.mubr.msk.bf16.vlgmr.msra.gmra.mrb[32].mxu0 %vm292_vm0, %v4060_v31  ;;  %3594 = vmatpush3.bf16.msra.mxu1 %v3862_v38  ;;  %v3867_v31 = vld [vmem:[%s4535_s1 + $0xa0] sm:$0xff]  }
  0x9a   : > { %3582 = vmatpush3.bf16.msra.mxu0 %v3862_v38  ;;  %3595 = vmatprep.subr.bf16.mxu1 %v3863_v0 }
  0x9b   : > { %3583 = vmatprep.subr.bf16.mxu0 %v3863_v0  ;;  %3589 = vmatprep.mubr.msk.bf16.mxu0 %vm292_vm0, %v4240_v63 }
  0x9c   : > { %3601 = vmatprep.mubr.msk.bf16.mxu1 %vm292_vm0, %v4277_v10 }
  0x9d   : > { %3596 = vmatpush3.bf16.msra.mxu1 %v3863_v0 }
  0x9e   : > { %3584 = vmatpush3.bf16.msra.mxu0 %v3863_v0  ;;  %3597 = vmatprep.subr.bf16.mxu1 %v3864_v1 }
  0x9f   : > { %3585 = vmatprep.subr.bf16.mxu0 %v3864_v1 }
  0xa1   : > { %3598 = vmatpush3.bf16.msra.mxu1 %v3864_v1 }
  0xa2   : > { %3586 = vmatpush3.bf16.msra.mxu0 %v3864_v1  ;;  %3599 = vmatprep.subr.bf16.mxu1 %v3865_v2 }
  0xa3   : > { %3587 = vmatprep.subr.bf16.mxu0 %v3865_v2 }
  0xa5   : > { %3600 = vmatpush3.bf16.msra.mxu1 %v3865_v2 }
  0xa6   : > { %3588 = vmatpush3.bf16.msra.mxu0 %v3865_v2  ;;  %3617 = vmatprep.subr.bf16.mxu1 %v3867_v31  ;;  %v4393_v2 = vrot.slane %v4344_v33, 1 }
  0xa7   : > { %3605 = vmatprep.subr.bf16.mxu0 %v3867_v31 }
  0xa8   : > { %3602 = vmatmul.mubr.msk.bf16.vlgmr.msra.gmra.mrb[36].mxu1 %vm292_vm0, %v4269_v9 }
  0xa9   : > { %3590 = vmatmul.mubr.msk.bf16.vlgmr.msra.gmra.mrb[36].mxu0 %vm292_vm0, %v4228_v61  ;;  %3618 = vmatpush3.bf16.msra.mxu1 %v3867_v31 }
  0xaa   : > { %3606 = vmatpush3.bf16.msra.mxu0 %v3867_v31  ;;  %3619 = vmatprep.subr.bf16.mxu1 %v3868_v11 }
  0xab   : > { %3607 = vmatprep.subr.bf16.mxu0 %v3868_v11  ;;  %3613 = vmatprep.mubr.msk.bf16.mxu0 %vm292_vm0, %v4119_v54  ;;  %v3873_v54 = vld [vmem:[%s4535_s1 + $0xc8] sm:$0xff]  }
  0xac   : > { %3625 = vmatprep.mubr.msk.bf16.mxu1 %vm292_vm0, %v4186_v25  ;;  %v2156_v25 = vshll.u32 %v3089_v19, 16 }
  0xad   : > { %3620 = vmatpush3.bf16.msra.mxu1 %v3868_v11 }
  0xae   : > { %3608 = vmatpush3.bf16.msra.mxu0 %v3868_v11  ;;  %3621 = vmatprep.subr.bf16.mxu1 %v3869_v6  ;;  %v2158_v36 = vrot.slane %v2156_v25, 4 }
  0xaf   : > { %3609 = vmatprep.subr.bf16.mxu0 %v3869_v6 }
  0xb1   : > { %3622 = vmatpush3.bf16.msra.mxu1 %v3869_v6 }
  0xb2   : > { %3610 = vmatpush3.bf16.msra.mxu0 %v3869_v6  ;;  %3623 = vmatprep.subr.bf16.mxu1 %v3870_v7 }
  0xb3   : > { %3611 = vmatprep.subr.bf16.mxu0 %v3870_v7 }
  0xb5   : > { %3624 = vmatpush3.bf16.msra.mxu1 %v3870_v7 }
  0xb6   : > { %3612 = vmatpush3.bf16.msra.mxu0 %v3870_v7  ;;  %3641 = vmatprep.subr.bf16.mxu1 %v3867_v31 }
  0xb7   : > { %3629 = vmatprep.subr.bf16.mxu0 %v3867_v31 }
  0xb8   : > { %3626 = vmatmul.mubr.msk.bf16.vlgmr.msra.gmra.mrb[40].mxu1 %vm292_vm0, %v4179_v24  ;;  %v2153_v24 = vshrl.u32 %v3089_v19, 16  ;;  %v3887_v19 = vld [vmem:[%s4535_s1 + $0x110] sm:$0xff]  }
  0xb9   : > { %3614 = vmatmul.mubr.msk.bf16.vlgmr.msra.gmra.mrb[40].mxu0 %vm292_vm0, %v4108_v52  ;;  %3642 = vmatpush3.bf16.msra.mxu1 %v3867_v31  ;;  %v3872_v52 = vld [vmem:[%s4535_s1 + $0xc0] sm:$0xff]  }
  0xba   : > { %3630 = vmatpush3.bf16.msra.mxu0 %v3867_v31  ;;  %3643 = vmatprep.subr.bf16.mxu1 %v3868_v11  ;;  %v2155_v35 = vrot.slane %v2153_v24, 3 }
  0xbb   : > { %3631 = vmatprep.subr.bf16.mxu0 %v3868_v11  ;;  %3637 = vmatprep.mubr.msk.bf16.mxu0 %vm292_vm0, %v4277_v10 }
  0xbc   : > { %3649 = vmatprep.mubr.msk.bf16.mxu1 %vm292_vm0, %v4160_v12  ;;  %v4350_v43 = vor.u32 %v2158_v36, %v2155_v35 }
  0xbd   : > { %3644 = vmatpush3.bf16.msra.mxu1 %v3868_v11 }
  0xbe   : > { %3632 = vmatpush3.bf16.msra.mxu0 %v3868_v11  ;;  %3645 = vmatprep.subr.bf16.mxu1 %v3869_v6  ;;  %v4359_v8 = vsel %vm908_vm6, %v2151_v41, %v4350_v43 }
  0xbf   : > { %3633 = vmatprep.subr.bf16.mxu0 %v3869_v6 }
  0xc1   : > { %3646 = vmatpush3.bf16.msra.mxu1 %v3869_v6 }
  0xc2   : > { %3634 = vmatpush3.bf16.msra.mxu0 %v3869_v6  ;;  %3647 = vmatprep.subr.bf16.mxu1 %v3870_v7 }
  0xc3   : > { %3635 = vmatprep.subr.bf16.mxu0 %v3870_v7 }
  0xc5   : > { %3648 = vmatpush3.bf16.msra.mxu1 %v3870_v7 }
  0xc6   : > { %3636 = vmatpush3.bf16.msra.mxu0 %v3870_v7  ;;  %3665 = vmatprep.subr.bf16.mxu1 %v3872_v52 }
  0xc7   : > { %3653 = vmatprep.subr.bf16.mxu0 %v3872_v52 }
  0xc8   : > { %3650 = vmatmul.mubr.msk.bf16.vlgmr.msra.gmra.mrb[44].mxu1 %vm292_vm0, %v4152_v5 }
  0xc9   : > { %3638 = vmatmul.mubr.msk.bf16.vlgmr.msra.gmra.mrb[44].mxu0 %vm292_vm0, %v4269_v9  ;;  %3666 = vmatpush3.bf16.msra.mxu1 %v3872_v52 }
  0xca   : > { %3654 = vmatpush3.bf16.msra.mxu0 %v3872_v52  ;;  %3667 = vmatprep.subr.bf16.mxu1 %v3873_v54 }
  0xcb   : > { %3655 = vmatprep.subr.bf16.mxu0 %v3873_v54  ;;  %3661 = vmatprep.mubr.msk.bf16.mxu0 %vm292_vm0, %v4234_v62  ;;  %v2404_v62 = vld [vmem:[%s4000_s6 + $0x20] sm:$0xe] }
  0xcc   : > { %3673 = vmatprep.mubr.msk.bf16.mxu1 %vm292_vm0, %v4240_v63  ;;  %v3110_v0 = vcombine.low %v2404_v62, %v4068_v34 }
  0xcd   : > { %3668 = vmatpush3.bf16.msra.mxu1 %v3873_v54 }
  0xce   : > { %3656 = vmatpush3.bf16.msra.mxu0 %v3873_v54  ;;  %3669 = vmatprep.subr.bf16.mxu1 %v3874_v20  ;;  %v2408_v1 = vrot.slane %v3110_v0, 1 }
  0xcf   : > { %3657 = vmatprep.subr.bf16.mxu0 %v3874_v20 }
  0xd0   : > { %v4401_v34 = vsel %vm562_vm3, %v2408_v1, %v4393_v2 }
  0xd1   : > { %3670 = vmatpush3.bf16.msra.mxu1 %v3874_v20 }
  0xd2   : > { %3658 = vmatpush3.bf16.msra.mxu0 %v3874_v20  ;;  %3671 = vmatprep.subr.bf16.mxu1 %v3875_v26 }
  0xd3   : > { %3659 = vmatprep.subr.bf16.mxu0 %v3875_v26 }
  0xd5   : > { %3672 = vmatpush3.bf16.msra.mxu1 %v3875_v26 }
  0xd6   : > { %3660 = vmatpush3.bf16.msra.mxu0 %v3875_v26  ;;  %3689 = vmatprep.subr.bf16.mxu1 %v3872_v52 }
  0xd7   : > { %3677 = vmatprep.subr.bf16.mxu0 %v3872_v52 }
  0xd8   : > { %3674 = vmatmul.mubr.msk.bf16.vlgmr.msra.gmra.mrb[48].mxu1 %vm292_vm0, %v4228_v61 }
  0xd9   : > { %3662 = vmatmul.mubr.msk.bf16.vlgmr.msra.gmra.mrb[48].mxu0 %vm292_vm0, %v4226_v59  ;;  %3690 = vmatpush3.bf16.msra.mxu1 %v3872_v52 }
  0xda   : > { %3678 = vmatpush3.bf16.msra.mxu0 %v3872_v52  ;;  %3691 = vmatprep.subr.bf16.mxu1 %v3873_v54 }
  0xdb   : > { %3679 = vmatprep.subr.bf16.mxu0 %v3873_v54  ;;  %3685 = vmatprep.mubr.msk.bf16.mxu0 %vm292_vm0, %v2069_v44 }
  0xdc   : > { %3697 = vmatprep.mubr.msk.bf16.mxu1 %vm292_vm0, %v4359_v8 }
  0xdd   : > { %3692 = vmatpush3.bf16.msra.mxu1 %v3873_v54 }
  0xde   : > { %3680 = vmatpush3.bf16.msra.mxu0 %v3873_v54  ;;  %3693 = vmatprep.subr.bf16.mxu1 %v3874_v20 }
  0xdf   : > { %3681 = vmatprep.subr.bf16.mxu0 %v3874_v20 }
  0xe1   : > { %3694 = vmatpush3.bf16.msra.mxu1 %v3874_v20 }
  0xe2   : > { %3682 = vmatpush3.bf16.msra.mxu0 %v3874_v20  ;;  %3695 = vmatprep.subr.bf16.mxu1 %v3875_v26 }
  0xe3   : > { %3683 = vmatprep.subr.bf16.mxu0 %v3875_v26 }
  0xe5   : > { %3696 = vmatpush3.bf16.msra.mxu1 %v3875_v26 }
  0xe6   : > { %3684 = vmatpush3.bf16.msra.mxu0 %v3875_v26  ;;  %3713 = vmatprep.subr.bf16.mxu1 %v3880_v46 }
  0xe7   : > { %3701 = vmatprep.subr.bf16.mxu0 %v3880_v46 }
  0xe8   : > { %3698 = vmatmul.mubr.msk.bf16.vlgmr.msra.gmra.mrb[52].mxu1 %vm292_vm0, %v4350_v43 }
  0xe9   : > { %3686 = vmatmul.mubr.msk.bf16.vlgmr.msra.gmra.mrb[52].mxu0 %vm292_vm0, %v2072_v47  ;;  %3714 = vmatpush3.bf16.msra.mxu1 %v3880_v46 }
  0xea   : > { %3702 = vmatpush3.bf16.msra.mxu0 %v3880_v46  ;;  %3715 = vmatprep.subr.bf16.mxu1 %v3881_v42 }
  0xeb   : > { %3703 = vmatprep.subr.bf16.mxu0 %v3881_v42  ;;  %3709 = vmatprep.mubr.msk.bf16.mxu0 %vm292_vm0, %v4240_v63  ;;  %v3387_v50 = vpop.f32.mrb[0].mxu1 }
  0xec   : > { %v3375_v49 = vpop.f32.mrb[0].mxu0  ;;  %3721 = vmatprep.mubr.msk.bf16.mxu1 %vm292_vm0, %v4277_v10  ;;  %v419_v55 = vpop.f32.mrb[1].mxu1 }
  0xed   : > { %v333_v51 = vpop.f32.mrb[1].mxu0  ;;  %v4381_v53 = vadd.f32 %v3387_v50, %v3375_v49  ;;  %v3388_v58 = vpop.f32.mrb[2].mxu1  ;;  %3716 = vmatpush3.bf16.msra.mxu1 %v3881_v42 }
  0xee   : > { %v3376_v56 = vpop.f32.mrb[2].mxu0  ;;  %3704 = vmatpush3.bf16.msra.mxu0 %v3881_v42  ;;  %v4383_v57 = vadd.f32 %v419_v55, %v333_v51  ;;  %v422_v63 = vpop.f32.mrb[3].mxu1  ;;  %3717 = vmatprep.subr.bf16.mxu1 %v3882_v48 }
  0xef   : > { %v336_v59 = vpop.f32.mrb[3].mxu0  ;;  %3705 = vmatprep.subr.bf16.mxu0 %v3882_v48 }
  0xf0   : > { %v4389_v38 = vadd.f32 %v422_v63, %v336_v59 }
  0xf1   : > { %3718 = vmatpush3.bf16.msra.mxu1 %v3882_v48 }
  0xf2   : > { %3706 = vmatpush3.bf16.msra.mxu0 %v3882_v48  ;;  %3719 = vmatprep.subr.bf16.mxu1 %v3883_v60 }
  0xf3   : > { %3707 = vmatprep.subr.bf16.mxu0 %v3883_v60 }
  0xf5   : > { %3720 = vmatpush3.bf16.msra.mxu1 %v3883_v60 }
  0xf6   : > { %3708 = vmatpush3.bf16.msra.mxu0 %v3883_v60  ;;  %3737 = vmatprep.subr.bf16.mxu1 %v3880_v46 }
  0xf7   : > { %3725 = vmatprep.subr.bf16.mxu0 %v3880_v46 }
  0xf8   : > { %3722 = vmatmul.mubr.msk.bf16.vlgmr.msra.gmra.mrb[56].mxu1 %vm292_vm0, %v4269_v9 }
  0xf9   : > { %3710 = vmatmul.mubr.msk.bf16.vlgmr.msra.gmra.mrb[56].mxu0 %vm292_vm0, %v4228_v61  ;;  %3738 = vmatpush3.bf16.msra.mxu1 %v3880_v46 }
  0xfa   : > { %3726 = vmatpush3.bf16.msra.mxu0 %v3880_v46  ;;  %3739 = vmatprep.subr.bf16.mxu1 %v3881_v42 }
  0xfb   : > { %3727 = vmatprep.subr.bf16.mxu0 %v3881_v42  ;;  %3733 = vmatprep.mubr.msk.bf16.mxu0 %vm292_vm0, %v4359_v8  ;;  %v3411_v4 = vpop.f32.mrb[4].mxu1 }
  0xfc   : > { %v3399_v3 = vpop.f32.mrb[4].mxu0  ;;  %3745 = vmatprep.mubr.msk.bf16.mxu1 %vm292_vm0, %v4401_v34  ;;  %v540_v31 = vpop.f32.mrb[5].mxu1 }
  0xfd   : > { %v492_v40 = vpop.f32.mrb[5].mxu0  ;;  %v4407_v61 = vadd.f32 %v3411_v4, %v3399_v3  ;;  %v3412_v7 = vpop.f32.mrb[6].mxu1  ;;  %3740 = vmatpush3.bf16.msra.mxu1 %v3881_v42 }
  0xfe   : > { %v3400_v11 = vpop.f32.mrb[6].mxu0  ;;  %3728 = vmatpush3.bf16.msra.mxu0 %v3881_v42  ;;  %v4409_v6 = vadd.f32 %v540_v31, %v492_v40  ;;  %v543_v54 = vpop.f32.mrb[7].mxu1  ;;  %3741 = vmatprep.subr.bf16.mxu1 %v3882_v48 }
  0xff   : > { %v495_v52 = vpop.f32.mrb[7].mxu0  ;;  %3729 = vmatprep.subr.bf16.mxu0 %v3882_v48 }
 0x100   : > { %v4411_v13 = vadd.f32 %v543_v54, %v495_v52 }
 0x101   : > { %3742 = vmatpush3.bf16.msra.mxu1 %v3882_v48 }
 0x102   : > { %3730 = vmatpush3.bf16.msra.mxu0 %v3882_v48  ;;  %3743 = vmatprep.subr.bf16.mxu1 %v3883_v60 }
 0x103   : > { %3731 = vmatprep.subr.bf16.mxu0 %v3883_v60 }
 0x105   : > { %3744 = vmatpush3.bf16.msra.mxu1 %v3883_v60 }
 0x106   : > { %3732 = vmatpush3.bf16.msra.mxu0 %v3883_v60  ;;  %3761 = vmatprep.subr.bf16.mxu1 %v3885_v17 }
 0x107   : > { %3749 = vmatprep.subr.bf16.mxu0 %v3885_v17 }
 0x108   : > { %3746 = vmatmul.mubr.msk.bf16.vlgmr.msra.gmra.mrb[60].mxu1 %vm292_vm0, %v4393_v2 }
 0x109   : > { %3734 = vmatmul.mubr.msk.bf16.vlgmr.msra.gmra.mrb[60].mxu0 %vm292_vm0, %v4350_v43  ;;  %3762 = vmatpush3.bf16.msra.mxu1 %v3885_v17  ;;  %v3132_v43 = vcombine.low %v4325_v16, %v4325_v16 }
 0x10a   : > { %3750 = vmatpush3.bf16.msra.mxu0 %v3885_v17  ;;  %3763 = vmatprep.subr.bf16.mxu1 %v3886_v18 }
 0x10b   : > { %3751 = vmatprep.subr.bf16.mxu0 %v3886_v18  ;;  %3757 = vmatprep.mubr.msk.bf16.mxu0 %vm292_vm0, %v4277_v10  ;;  %v3435_v33 = vpop.f32.mrb[8].mxu1  ;;  %v3888_v10 = vld [vmem:[%s4535_s1 + $0x118] sm:$0xff]  }
 0x10c   : > { %v3423_v20 = vpop.f32.mrb[8].mxu0  ;;  %3769 = vmatprep.mubr.msk.bf16.mxu1 %vm292_vm0, %v4160_v12  ;;  %v672_v23 = vpop.f32.mrb[9].mxu1  ;;  %v3131_v12 = vcombine.low %v4319_v14, %v4322_v15 }
 0x10d   : > { %v606_v21 = vpop.f32.mrb[9].mxu0  ;;  %v4430_v22 = vadd.f32 %v3435_v33, %v3423_v20  ;;  %v3436_v26 = vpop.f32.mrb[10].mxu1  ;;  %3764 = vmatpush3.bf16.msra.mxu1 %v3886_v18 }
 0x10e   : > { %v3424_v24 = vpop.f32.mrb[10].mxu0  ;;  %3752 = vmatpush3.bf16.msra.mxu0 %v3886_v18  ;;  %v4432_v25 = vadd.f32 %v672_v23, %v606_v21  ;;  %v675_v28 = vpop.f32.mrb[11].mxu1  ;;  %3765 = vmatprep.subr.bf16.mxu1 %v3887_v19 }
 0x10f   : > { %v609_v27 = vpop.f32.mrb[11].mxu0  ;;  %3753 = vmatprep.subr.bf16.mxu0 %v3887_v19 }
 0x110   : > { %v4437_v29 = vadd.f32 %v675_v28, %v609_v27 }
 0x111   : > { %3766 = vmatpush3.bf16.msra.mxu1 %v3887_v19 }
 0x112   : > { %3754 = vmatpush3.bf16.msra.mxu0 %v3887_v19  ;;  %3767 = vmatprep.subr.bf16.mxu1 %v3888_v10 }
 0x113   : > { %3755 = vmatprep.subr.bf16.mxu0 %v3888_v10 }
 0x115   : > { %3768 = vmatpush3.bf16.msra.mxu1 %v3888_v10 }
 0x116   : > { %3756 = vmatpush3.bf16.msra.mxu0 %v3888_v10  ;;  %3785 = vmatprep.subr.bf16.mxu1 %v3885_v17 }
 0x117   : > { %3773 = vmatprep.subr.bf16.mxu0 %v3885_v17 }
 0x118   : > { %3770 = vmatmul.mubr.msk.bf16.vlgmr.msra.gmra.mrb[64].mxu1 %vm292_vm0, %v4152_v5 }
 0x119   : > { %3758 = vmatmul.mubr.msk.bf16.vlgmr.msra.gmra.mrb[64].mxu0 %vm292_vm0, %v4269_v9  ;;  %3786 = vmatpush3.bf16.msra.mxu1 %v3885_v17 }
 0x11a   : > { %3774 = vmatpush3.bf16.msra.mxu0 %v3885_v17  ;;  %3787 = vmatprep.subr.bf16.mxu1 %v3886_v18 }
 0x11b   : > { %3775 = vmatprep.subr.bf16.mxu0 %v3886_v18  ;;  %3781 = vmatprep.mubr.msk.bf16.mxu0 %vm292_vm0, %v4401_v34  ;;  %v3459_v32 = vpop.f32.mrb[12].mxu1 }
 0x11c   : > { %v3447_v30 = vpop.f32.mrb[12].mxu0  ;;  %3793 = vmatprep.mubr.msk.bf16.mxu1 %vm292_vm0, %v3131_v12  ;;  %v806_v9 = vpop.f32.mrb[13].mxu1 }
 0x11d   : > { %v758_v35 = vpop.f32.mrb[13].mxu0  ;;  %v815_v36 = vadd.f32 %v3459_v32, %v3447_v30  ;;  %v3460_v15 = vpop.f32.mrb[14].mxu1  ;;  %3788 = vmatpush3.bf16.msra.mxu1 %v3886_v18 }
 0x11e   : > { %v3448_v37 = vpop.f32.mrb[14].mxu0  ;;  %3776 = vmatpush3.bf16.msra.mxu0 %v3886_v18  ;;  %v807_v14 = vadd.f32 %v806_v9, %v758_v35  ;;  %v809_v39 = vpop.f32.mrb[15].mxu1  ;;  %3789 = vmatprep.subr.bf16.mxu1 %v3887_v19 }
 0x11f   : > { %v761_v5 = vpop.f32.mrb[15].mxu0  ;;  %3777 = vmatprep.subr.bf16.mxu0 %v3887_v19 }
 0x120   : > { %v810_v41 = vadd.f32 %v809_v39, %v761_v5 }
 0x121   : > { %3790 = vmatpush3.bf16.msra.mxu1 %v3887_v19 }
 0x122   : > { %3778 = vmatpush3.bf16.msra.mxu0 %v3887_v19  ;;  %3791 = vmatprep.subr.bf16.mxu1 %v3888_v10 }
 0x123   : > { %3779 = vmatprep.subr.bf16.mxu0 %v3888_v10 }
 0x125   : > { %3792 = vmatpush3.bf16.msra.mxu1 %v3888_v10 }
 0x126   : > { %3780 = vmatpush3.bf16.msra.mxu0 %v3888_v10 }
 0x128   : > { %3794 = vmatmul.mubr.msk.bf16.vlgmr.msra.gmra.mrb[68].mxu1 %vm292_vm0, %v3132_v43 }
 0x129   : > { %3782 = vmatmul.mubr.msk.bf16.vlgmr.msra.gmra.mrb[68].mxu0 %vm292_vm0, %v4393_v2 }
 0x12b   : > { %v3483_v45 = vpop.f32.mrb[16].mxu1 }
 0x12c   : > { %v3471_v44 = vpop.f32.mrb[16].mxu0  ;;  %v982_v47 = vadd.f32 %v3483_v45, %v4407_v61  ;;  %v966_v48 = vpop.f32.mrb[17].mxu1 }
 0x12d   : > { %v903_v8 = vadd.f32 %v3471_v44, %v4381_v53  ;;  %v887_v46 = vpop.f32.mrb[17].mxu0  ;;  %v980_v50 = vadd.f32 %v966_v48, %v4409_v6  ;;  %v3484_v16 = vpop.f32.mrb[18].mxu1 }
 0x12e   : > { %v901_v42 = vadd.f32 %v887_v46, %v4383_v57  ;;  %v3472_v49 = vpop.f32.mrb[18].mxu0  ;;  %v969_v56 = vpop.f32.mrb[19].mxu1 }
 0x12f   : > { %v890_v51 = vpop.f32.mrb[19].mxu0  ;;  %v981_v58 = vadd.f32 %v969_v56, %v4411_v13 }
 0x130   : > { %v902_v55 = vadd.f32 %v890_v51, %v4389_v38 }
 0x13b   : > { %v3507_v60 = vpop.f32.mrb[20].mxu1 }
 0x13c   : > { %v3495_v59 = vpop.f32.mrb[20].mxu0  ;;  %v1112_v63 = vadd.f32 %v3507_v60, %v815_v36  ;;  %v1096_v57 = vpop.f32.mrb[21].mxu1 }
 0x13d   : > { %v1033_v53 = vadd.f32 %v3495_v59, %v4430_v22  ;;  %v1017_v62 = vpop.f32.mrb[21].mxu0  ;;  %v1110_v2 = vadd.f32 %v1096_v57, %v807_v14  ;;  %v3508_v34 = vpop.f32.mrb[22].mxu1 }
 0x13e   : > { %v1031_v0 = vadd.f32 %v1017_v62, %v4432_v25  ;;  %v3496_v1 = vpop.f32.mrb[22].mxu0  ;;  %v1099_v40 = vpop.f32.mrb[23].mxu1 }
 0x13f   : > { %v1020_v3 = vpop.f32.mrb[23].mxu0  ;;  %v1111_v38 = vadd.f32 %v1099_v40, %v810_v41 }
 0x140   : > { %v1032_v4 = vadd.f32 %v1020_v3, %v4437_v29 }
 0x14b   : > { %v3531_v11 = vpop.f32.mrb[24].mxu1 }
 0x14c   : > { %v3519_v61 = vpop.f32.mrb[24].mxu0  ;;  %v1247_v7 = vadd.f32 %v3531_v11, %v982_v47  ;;  %v1231_v54 = vpop.f32.mrb[25].mxu1 }
 0x14d   : > { %v1196_v31 = vadd.f32 %v3519_v61, %v903_v8  ;;  %v1180_v6 = vpop.f32.mrb[25].mxu0  ;;  %v1245_v17 = vadd.f32 %v1231_v54, %v980_v50  ;;  %v3532_v18 = vpop.f32.mrb[26].mxu1 }
 0x14e   : > { %v1194_v52 = vadd.f32 %v1180_v6, %v901_v42  ;;  %v3520_v13 = vpop.f32.mrb[26].mxu0  ;;  %v1234_v33 = vpop.f32.mrb[27].mxu1 }
 0x14f   : > { %v1183_v19 = vpop.f32.mrb[27].mxu0  ;;  %v1246_v21 = vadd.f32 %v1234_v33, %v981_v58 }
 0x150   : > { %v1195_v20 = vadd.f32 %v1183_v19, %v902_v55 }
 0x15b   : > { %v3555_v24 = vpop.f32.mrb[28].mxu1 }
 0x15c   : > { %v3543_v22 = vpop.f32.mrb[28].mxu0  ;;  %v1417_v26 = vadd.f32 %v3555_v24, %v1112_v63  ;;  %v1401_v10 = vpop.f32.mrb[29].mxu1 }
 0x15d   : > { %v1335_v23 = vadd.f32 %v3543_v22, %v1033_v53  ;;  %v1319_v25 = vpop.f32.mrb[29].mxu0  ;;  %v1415_v29 = vadd.f32 %v1401_v10, %v1110_v2  ;;  %v3556_v12 = vpop.f32.mrb[30].mxu1 }
 0x15e   : > { %v1333_v27 = vadd.f32 %v1319_v25, %v1031_v0  ;;  %v3544_v28 = vpop.f32.mrb[30].mxu0  ;;  %v1404_v35 = vpop.f32.mrb[31].mxu1 }
 0x15f   : > { %v1322_v30 = vpop.f32.mrb[31].mxu0  ;;  %v1416_v36 = vadd.f32 %v1404_v35, %v1111_v38 }
 0x160   : > { %v1334_v32 = vadd.f32 %v1322_v30, %v1032_v4 }
 0x16b   : > { %v3579_v14 = vpop.f32.mrb[32].mxu1 }
 0x16c   : > { %v3567_v9 = vpop.f32.mrb[32].mxu0  ;;  %v1552_v5 = vadd.f32 %v3579_v14, %v1247_v7  ;;  %v1536_v41 = vpop.f32.mrb[33].mxu1 }
 0x16d   : > { %v1501_v37 = vadd.f32 %v3567_v9, %v1196_v31  ;;  %v1485_v15 = vpop.f32.mrb[33].mxu0  ;;  %v1550_v44 = vadd.f32 %v1536_v41, %v1245_v17  ;;  %v3580_v8 = vpop.f32.mrb[34].mxu1 }
 0x16e   : > { %v1499_v39 = vadd.f32 %v1485_v15, %v1194_v52  ;;  %v3568_v43 = vpop.f32.mrb[34].mxu0  ;;  %v1539_v47 = vpop.f32.mrb[35].mxu1 }
 0x16f   : > { %v1488_v45 = vpop.f32.mrb[35].mxu0  ;;  %v1551_v42 = vadd.f32 %v1539_v47, %v1246_v21 }
 0x170   : > { %v1500_v46 = vadd.f32 %v1488_v45, %v1195_v20 }
 0x17b   : > { %v3603_v50 = vpop.f32.mrb[36].mxu1 }
 0x17c   : > { %v3591_v48 = vpop.f32.mrb[36].mxu0  ;;  %v1667_v51 = vadd.f32 %v3603_v50, %v1417_v26  ;;  %v1651_v56 = vpop.f32.mrb[37].mxu1 }
 0x17d   : > { %v1603_v49 = vadd.f32 %v3591_v48, %v1335_v23  ;;  %v1587_v16 = vpop.f32.mrb[37].mxu0  ;;  %v1665_v59 = vadd.f32 %v1651_v56, %v1415_v29  ;;  %v3604_v53 = vpop.f32.mrb[38].mxu1 }
 0x17e   : > { %v1601_v55 = vadd.f32 %v1587_v16, %v1333_v27  ;;  %v3592_v58 = vpop.f32.mrb[38].mxu0  ;;  %v1654_v63 = vpop.f32.mrb[39].mxu1 }
 0x17f   : > { %v1590_v60 = vpop.f32.mrb[39].mxu0  ;;  %v1666_v0 = vadd.f32 %v1654_v63, %v1416_v36 }
 0x180   : > { %v1602_v62 = vadd.f32 %v1590_v60, %v1334_v32 }
 0x18b   : > { %v3627_v2 = vpop.f32.mrb[40].mxu1 }
 0x18c   : > { %v3615_v57 = vpop.f32.mrb[40].mxu0  ;;  %v1802_v3 = vadd.f32 %v3627_v2, %v1552_v5  ;;  %v1786_v40 = vpop.f32.mrb[41].mxu1 }
 0x18d   : > { %v1751_v1 = vadd.f32 %v3615_v57, %v1501_v37  ;;  %v1735_v34 = vpop.f32.mrb[41].mxu0  ;;  %v1800_v61 = vadd.f32 %v1786_v40, %v1550_v44  ;;  %v3628_v31 = vpop.f32.mrb[42].mxu1  ;;  %v2743_v40 = vlaneseq }
 0x18e   : > { %v1749_v4 = vadd.f32 %v1735_v34, %v1499_v39  ;;  %v3616_v38 = vpop.f32.mrb[42].mxu0  ;;  %v1789_v7 = vpop.f32.mrb[43].mxu1 }
 0x18f   : > { %v1738_v11 = vpop.f32.mrb[43].mxu0  ;;  %v1801_v52 = vadd.f32 %v1789_v7, %v1551_v42 }
 0x190   : > { %v1750_v6 = vadd.f32 %v1738_v11, %v1500_v46 }
 0x19b   : > { %v3651_v17 = vpop.f32.mrb[44].mxu1 }
 0x19c   : > { %v3639_v54 = vpop.f32.mrb[44].mxu0  ;;  %v1917_v19 = vadd.f32 %v3651_v17, %v1667_v51  ;;  %v1901_v33 = vpop.f32.mrb[45].mxu1 }
 0x19d   : > { %v1853_v13 = vadd.f32 %v3639_v54, %v1603_v49  ;;  %v1837_v18 = vpop.f32.mrb[45].mxu0  ;;  %v1915_v22 = vadd.f32 %v1901_v33, %v1665_v59  ;;  %v3652_v23 = vpop.f32.mrb[46].mxu1 }
 0x19e   : > { %v1851_v20 = vadd.f32 %v1837_v18, %v1601_v55  ;;  %v3640_v21 = vpop.f32.mrb[46].mxu0  ;;  %v1904_v26 = vpop.f32.mrb[47].mxu1 }
 0x19f   : > { %v1840_v24 = vpop.f32.mrb[47].mxu0  ;;  %v1916_v27 = vadd.f32 %v1904_v26, %v1666_v0 }
 0x1a0   : > { %v1852_v25 = vadd.f32 %v1840_v24, %v1602_v62 }
 0x1ab   : > { %v3675_v29 = vpop.f32.mrb[48].mxu1 }
 0x1ac   : > { %v3663_v10 = vpop.f32.mrb[48].mxu0  ;;  %v2052_v30 = vadd.f32 %v3675_v29, %v1802_v3  ;;  %v2036_v35 = vpop.f32.mrb[49].mxu1  ;;  %v4480_v29 = vld [vmem:[%s4536_s2] ss:$0 sm:$0xff] }
 0x1ad   : > { %v2001_v28 = vadd.f32 %v3663_v10, %v1751_v1  ;;  %v1985_v12 = vpop.f32.mrb[49].mxu0  ;;  %v2050_v9 = vadd.f32 %v2036_v35, %v1800_v61  ;;  %v3676_v37 = vpop.f32.mrb[50].mxu1 }
 0x1ae   : > { %v1999_v32 = vadd.f32 %v1985_v12, %v1749_v4  ;;  %v3664_v36 = vpop.f32.mrb[50].mxu0  ;;  %v2039_v5 = vpop.f32.mrb[51].mxu1 }
 0x1af   : > { %v1988_v14 = vpop.f32.mrb[51].mxu0  ;;  %v2051_v39 = vadd.f32 %v2039_v5, %v1801_v52 }
 0x1b0   : > { %v2000_v15 = vadd.f32 %v1988_v14, %v1750_v6 }
 0x1bb   : > { %v3699_v44 = vpop.f32.mrb[52].mxu1 }
 0x1bc   : > { %v3687_v41 = vpop.f32.mrb[52].mxu0  ;;  %v2217_v45 = vadd.f32 %v3699_v44, %v1917_v19  ;;  %v2201_v47 = vpop.f32.mrb[53].mxu1 }
 0x1bd   : > { %v2129_v43 = vadd.f32 %v3687_v41, %v1853_v13  ;;  %v2113_v8 = vpop.f32.mrb[53].mxu0  ;;  %v2215_v48 = vadd.f32 %v2201_v47, %v1915_v22  ;;  %v3700_v49 = vpop.f32.mrb[54].mxu1  ;;  %v2744_v13 = vshrl.u32 %v2743_v40, 7 }
 0x1be   : > { %v2127_v46 = vadd.f32 %v2113_v8, %v1851_v20  ;;  %v3688_v42 = vpop.f32.mrb[54].mxu0  ;;  %v2204_v51 = vpop.f32.mrb[55].mxu1 }
 0x1bf   : > { %v2116_v50 = vpop.f32.mrb[55].mxu0  ;;  %v2216_v55 = vadd.f32 %v2204_v51, %v1916_v27  ;;  %v2746_v22 = vadd.s32 16, %v2744_v13  ;;  %v4471_v26 = vmul.u32.u64.low 3435973837, %v2744_v13  ;;  %v4472_v27 = vmul.u32.u64.high 3435973837, %v2744_v13, %v4471_v26 }
 0x1c0   : > { %v2128_v16 = vadd.f32 %v2116_v50, %v1852_v25  ;;  %v2745_v25 = vadd.s32 8, %v2744_v13 }
 0x1c1   : > { %v4468_v23 = vmul.u32.u64.low 3435973837, %v2746_v22  ;;  %v4469_v24 = vmul.u32.u64.high 3435973837, %v2746_v22, %v4468_v23 }
 0x1cb   : > { %v3723_v59 = vpop.f32.mrb[56].mxu1 }
 0x1cc   : > { %v3711_v56 = vpop.f32.mrb[56].mxu0  ;;  %v2352_v60 = vadd.f32 %v3723_v59, %v2052_v30  ;;  %v2336_v63 = vpop.f32.mrb[57].mxu1 }
 0x1cd   : > { %v2301_v58 = vadd.f32 %v3711_v56, %v2001_v28  ;;  %v2285_v53 = vpop.f32.mrb[57].mxu0  ;;  %v2350_v57 = vadd.f32 %v2336_v63, %v2050_v9  ;;  %v3724_v1 = vpop.f32.mrb[58].mxu1  ;;  %v4474_v10 = vmul.u32.u64.low 3435973837, %v2745_v25  ;;  %v4475_v28 = vmul.u32.u64.high 3435973837, %v2745_v25, %v4474_v10 }
 0x1ce   : > { %v2299_v62 = vadd.f32 %v2285_v53, %v1999_v32  ;;  %v3712_v0 = vpop.f32.mrb[58].mxu0  ;;  %v2339_v3 = vpop.f32.mrb[59].mxu1 }
 0x1cf   : > { %v2288_v2 = vpop.f32.mrb[59].mxu0  ;;  %v2351_v4 = vadd.f32 %v2339_v3, %v2051_v39  ;;  %v2764_v51 = vshrl.u32 %v4475_v28, 2 }
 0x1d0   : > { %v2300_v34 = vadd.f32 %v2288_v2, %v2000_v15  ;;  %v2775_v15 = vshrl.u32 %v4469_v24, 2 }
 0x1db   : > { %v3747_v31 = vpop.f32.mrb[60].mxu1 }
 0x1dc   : > { %v3735_v38 = vpop.f32.mrb[60].mxu0  ;;  %v2467_v6 = vadd.f32 %v3747_v31, %v2217_v45  ;;  %v2451_v52 = vpop.f32.mrb[61].mxu1 }
 0x1dd   : > { %v2403_v61 = vadd.f32 %v3735_v38, %v2129_v43  ;;  %v2387_v11 = vpop.f32.mrb[61].mxu0  ;;  %v4462_v17 = vadd.f32 %v2451_v52, %v2215_v48  ;;  %v3748_v18 = vpop.f32.mrb[62].mxu1  ;;  %v2753_v48 = vshrl.u32 %v4472_v27, 2 }
 0x1de   : > { %v2401_v7 = vadd.f32 %v2387_v11, %v2127_v46  ;;  %v3736_v54 = vpop.f32.mrb[62].mxu0  ;;  %v2454_v33 = vpop.f32.mrb[63].mxu1 }
 0x1df   : > { %v2390_v19 = vpop.f32.mrb[63].mxu0  ;;  %v4466_v21 = vadd.f32 %v2454_v33, %v2216_v55  ;;  %v2754_v59 = vmul.u32 5, %v2753_v48 }
 0x1e0   : > { %v4464_v20 = vadd.f32 %v2390_v19, %v2128_v16  ;;  %v2776_v16 = vmul.u32 5, %v2775_v15 }
 0x1e2   : > { %v2777_v53 = vsub.s32 %v2746_v22, %v2776_v16 }
 0x1e4   : > { %vm2782_vm8 = vcmp.ne.s32.totalorder %v2777_v53, 0  ;;  %vm2785_vm9 = vcmp.lt.s32.totalorder %v2777_v53, 0 }
 0x1e5   : > { %vm4491_vm10 = vmand %vm2785_vm9, %vm2782_vm8 }
 0x1eb   : > { %v3771_v32 = vpop.f32.mrb[64].mxu1 }
 0x1ec   : > { %v3759_v12 = vpop.f32.mrb[64].mxu0  ;;  %v2602_v36 = vadd.f32 %v3771_v32, %v2352_v60  ;;  %v2586_v37 = vpop.f32.mrb[65].mxu1  ;;  %v2765_v60 = vmul.u32 5, %v2764_v51 }
 0x1ed   : > { %v2551_v30 = vadd.f32 %v3759_v12, %v2301_v58  ;;  %v2535_v35 = vpop.f32.mrb[65].mxu0  ;;  %v2600_v39 = vadd.f32 %v2586_v37, %v2350_v57  ;;  %v3772_v41 = vpop.f32.mrb[66].mxu1  ;;  %v2791_v57 = vadd.s32 5, %v2777_v53 }
 0x1ee   : > { %v2549_v9 = vadd.f32 %v2535_v35, %v2299_v62  ;;  %v3760_v14 = vpop.f32.mrb[66].mxu0  ;;  %v2724_v44 = vadd.f32 %v4480_v29, %v2602_v36  ;;  %v2589_v46 = vpop.f32.mrb[67].mxu1  ;;  %v2755_v62 = vsub.s32 %v2744_v13, %v2754_v59  ;;  %v2766_v63 = vsub.s32 %v2745_v25, %v2765_v60 }
 0x1ef   : > { %v2721_v5 = vadd.f32 %v4480_v29, %v2551_v30  ;;  %v2538_v43 = vpop.f32.mrb[67].mxu0  ;;  %v2722_v47 = vadd.f32 %v4480_v29, %v2600_v39  ;;  %v2601_v42 = vadd.f32 %v2589_v46, %v2351_v4  ;;  %v2794_v18 = vsel %vm4491_vm10, %v2791_v57, %v2777_v53 }
 0x1f0   : > { %v2719_v8 = vadd.f32 %v4480_v29, %v2549_v9  ;;  %v2550_v45 = vadd.f32 %v2538_v43, %v2300_v34  ;;  %vm2780_vm11 = vcmp.ne.s32.totalorder %v2755_v62, 0  ;;  %vm2783_vm12 = vcmp.lt.s32.totalorder %v2755_v62, 0 }
 0x1f1   : > { %v2727_v49 = vmax.f32 %v2721_v5, %v2724_v44  ;;  %v2723_v56 = vadd.f32 %v4480_v29, %v2601_v42  ;;  %vm2781_vm13 = vcmp.ne.s32.totalorder %v2766_v63, 0  ;;  %vm2784_vm14 = vcmp.lt.s32.totalorder %v2766_v63, 0  ;;  %vm4501_vm15 = vmand %vm2783_vm12, %vm2780_vm11 }
 0x1f2   : > { %v2720_v50 = vadd.f32 %v4480_v29, %v2550_v45  ;;  %v2725_v55 = vmax.f32 %v2719_v8, %v2722_v47  ;;  %v2789_v54 = vadd.s32 5, %v2755_v62  ;;  %v2790_v22 = vadd.s32 5, %v2766_v63  ;;  %vm4510_vm0 = vmand %vm2784_vm14, %vm2781_vm13 }
 0x1f3   : > { %vm2797_vm1 = vcmp.lt.s32.totalorder %v2794_v18, 4 }
 0x1f4   : > { %v2726_v58 = vmax.f32 %v2720_v50, %v2723_v56  ;;  %v2792_v28 = vsel %vm4501_vm15, %v2789_v54, %v2755_v62  ;;  %v2793_v32 = vsel %vm4510_vm0, %v2790_v22, %v2766_v63 }
 0x1f5   : > { %vm2795_vm2 = vcmp.lt.s32.totalorder %v2792_v28, 4  ;;  %vm2796_vm3 = vcmp.lt.s32.totalorder %v2793_v32, 4 }
 0x1fb   : > { %v3795_v2 = vpop.f32.mrb[68].mxu1 }
 0x1fc   : > { %v3783_v0 = vpop.f32.mrb[68].mxu0  ;;  %v2712_v4 = vadd.f32 %v3795_v2, %v2467_v6  ;;  %v2696_v38 = vpop.f32.mrb[69].mxu1 }
 0x1fd   : > { %v2653_v1 = vadd.f32 %v3783_v0, %v2403_v61  ;;  %v2637_v3 = vpop.f32.mrb[69].mxu0  ;;  %v2710_v52 = vadd.f32 %v2696_v38, %v4462_v17  ;;  %v3796_v61 = vpop.f32.mrb[70].mxu1 }
 0x1fe   : > { %v2651_v40 = vadd.f32 %v2637_v3, %v2401_v7  ;;  %v3784_v31 = vpop.f32.mrb[70].mxu0  ;;  %v2699_v33 = vpop.f32.mrb[71].mxu1  ;;  %v2736_v17 = vadd.f32 %v4480_v29, %v2712_v4 }
 0x1ff   : > { %v2730_v11 = vadd.f32 %v4480_v29, %v2653_v1  ;;  %v2640_v13 = vpop.f32.mrb[71].mxu0  ;;  %v2711_v24 = vadd.f32 %v2699_v33, %v4466_v21  ;;  %v2734_v27 = vadd.f32 %v4480_v29, %v2710_v52 }
 0x200   : > { %v2728_v19 = vadd.f32 %v4480_v29, %v2651_v40  ;;  %v2652_v7 = vadd.f32 %v2640_v13, %v4464_v20 }
 0x201   : > { %v2733_v23 = vmax.f32 %v2727_v49, %v2730_v11  ;;  %v2735_v21 = vadd.f32 %v4480_v29, %v2711_v24 }
 0x202   : > { %v2731_v26 = vmax.f32 %v2725_v55, %v2728_v19  ;;  %v2729_v10 = vadd.f32 %v4480_v29, %v2652_v7 }
 0x203   : > { %v2739_v20 = vmax.f32 %v2733_v23, %v2736_v17 }
 0x204   : > { %v2737_v12 = vmax.f32 %v2731_v26, %v2734_v27  ;;  %v2732_v30 = vmax.f32 %v2726_v58, %v2729_v10 }
 0x205   : > { %v2742_v35 = vmax.f32 %v2739_v20, 0.0 }
 0x206   : > { %v2740_v36 = vmax.f32 %v2737_v12, 0.0  ;;  %v2738_v9 = vmax.f32 %v2732_v30, %v2735_v21 }
 0x207   : > { %v2806_v37 = vsel %vm2797_vm1, %v2742_v35, 0.0 }
 0x208   : > { %v3143_v14 = vpack.c.bf16 %v2806_v37, %v2806_v37  ;;  %v2741_v15 = vmax.f32 %v2738_v9, 0.0  ;;  %v2804_v5 = vsel %vm2795_vm2, %v2740_v36, 0.0 }
 0x20a   : > { %2822 = vst [vmem:[%s221_s29 + $0x8] sm:$0x3] %v3143_v14  ;;  %v2805_v39 = vsel %vm2796_vm3, %v2741_v15, 0.0 }
 0x20b   : > { %v3147_v41 = vpack.c.bf16 %v2805_v39, %v2804_v5 }
 0x20d   : > { %3148 = vst [vmem:[%s221_s29] sm:$0xff] %v3147_v41  }
 0x20e PF: > { %s13_s14 = sadd.s32 1, %s3913_s14   ;;  %s4544_s12 = smov %s3909_s13 }
 0x20f   : > { %p10_p5 = scmp.ge.s32.totalorder %s13_s14, 4   ;;  %s4545_s13 = smov %s4547_s15 }
 0x211   :  { %12 = sbr.rel (!%p10_p5) target bundleno = 2 (0x2), region = 76 }

// kernel: custom_cnn_forward.7
= control target key start
LH: loop header
LB: loop body
LE: loop exit
PB: predicated region body
PF: predicated region fallthrough
CT: control target
= control target key end

     0   :  { %s6424_s15 = smov 0   ;;  %s6426_s16 = smov 0   ;;  %s9499_s0 = inlined_call_operand.vmem [shape: bf16[2,24,256], index: 0, kind: input, shape index: {}]   ;;  %s9500_s1 = inlined_call_operand.vmem [shape: bf16[9,256,512], index: 1, kind: input, shape index: {}]   ;;  %s9501_s2 = inlined_call_operand.vmem [shape: f32[1,512], index: 2, kind: input, shape index: {}]   ;;  %s9502_s3 = inlined_call_operand.vmem [shape: f32[1,512], index: 3, kind: input, shape index: {}]   ;;  %s9503_s4 = inlined_call_operand.vmem [shape: f32[2,2,1,1], index: 4, kind: output, shape index: {}]  }
   0x1   :  { %s6428_s17 = smov 0   ;;  %s6430_s18 = smov 0  }
   0x2   :  { %s6432_s19 = smov 0   ;;  %s6434_s20 = smov 0  }
   0x3   :  { %s6436_s21 = smov 0  }
   0x4 LB: > { %s23_s22 = sadd.s32 1, %s6388_s19  ;;  %s26_s23 = sadd.s32 1, %s6392_s20  ;;  %s6396_s21 = sphi %s6436_s21, %s14_s21   ;;  %s6392_s20 = sphi %s6434_s20, %s9572_s20   ;;  %s6388_s19 = sphi %s6432_s19, %s9571_s19   ;;  %s6384_s18 = sphi %s6430_s18, %s9570_s18   ;;  %s6380_s17 = sphi %s6428_s17, %s9569_s17   ;;  %s6376_s16 = sphi %s6426_s16, %s9568_s16   ;;  %s6372_s15 = sphi %s6424_s15, %s9567_s15  }
   0x5   : > { %p24_p0 = scmp.ge.s32.totalorder %s23_s22, 2  ;;  %p66_p1 = scmp.ne.s32.totalorder %s6376_s16, %s6372_s15 }
   0x6   : > { %p67_p2 = scmp.eq.s32.totalorder %s6396_s21, 0  ;;  %s59_s25 = sadd.s32 1, %s6376_s16 }
   0x7   : > { %s9574_s22 = smov (%p24_p0, %s23_s22), 0  ;;  %s9576_s23 = smov (!%p24_p0, %s26_s23), %s6392_s20 }
   0x8   : > { %p68_p3 = por %p67_p2, %p66_p1  ;;  %p28_p4 = scmp.ge.s32.totalorder %s9576_s23, 2 }
   0x9   : > { %p5191_p6 = scmp.ge.s32.totalorder %s6396_s21, 4 }
   0xa   : > { %s9578_s23 = smov (%p28_p4, %s9576_s23), 0 }
   0xb   : > { %s56_s24 = ssub.s32 %s6392_s20, %s9578_s23  ;;  %172 = sbr.rel (%p5191_p6) target bundleno = 166 (0xa6), region = 16 }
   0xc   : > { %p57_p5 = scmp.eq.s32.totalorder %s56_s24, 0 }
   0xe   : > { %s6473_s26 = scalar_select %p57_p5, %s6376_s16, %s59_s25  }
  0x12   : > { %183 = sbr.rel (!%p68_p3) target bundleno = 166 (0xa6), region = 24  ;;  %s185_s27 = sand.u32 (%p68_p3), 1, %s6376_s16  }
  0x13   : > { %s5778_s28 = sshll.u32 (%p68_p3), %s6392_s20, 3  ;;  %s5779_s29 = smul.u32 (%p68_p3), 2304, %s185_s27 }
  0x14   : > { %s6481_s6 = scalar_lea.vmem (%p68_p3), %s9500_s1, %s5778_s28 }
  0x15   : > { %v792_v0 = vld [vmem:[%s6481_s6] sm:$0xff] (%p68_p3)  ;;  %v794_v1 = vld [vmem:[%s6481_s6 + $0x10] sm:$0xff] (%p68_p3)  ;;  %s6489_s7 = scalar_lea.vmem (%p68_p3), [#allocation2], %s5779_s29 }
  0x16   : > { %v796_v2 = vld [vmem:[%s6481_s6 + $0x20] sm:$0xff] (%p68_p3)  ;;  %v798_v3 = vld [vmem:[%s6481_s6 + $0x30] sm:$0xff] (%p68_p3)  ;;  %793 = vst [vmem:[%s6489_s7] sm:$0xff] (%p68_p3), %v792_v0  ;;  %795 = vst [vmem:[%s6489_s7 + $0x8] sm:$0xff] (%p68_p3), %v794_v1 }
  0x17   : > { %v800_v4 = vld [vmem:[%s6481_s6 + $0x40] sm:$0xff] (%p68_p3)  ;;  %v802_v5 = vld [vmem:[%s6481_s6 + $0x50] sm:$0xff] (%p68_p3)  ;;  %797 = vst [vmem:[%s6489_s7 + $0x10] sm:$0xff] (%p68_p3), %v796_v2  ;;  %799 = vst [vmem:[%s6489_s7 + $0x18] sm:$0xff] (%p68_p3), %v798_v3 }
  0x18   : > { %801 = vst [vmem:[%s6489_s7 + $0x20] sm:$0xff] (%p68_p3), %v800_v4  ;;  %803 = vst [vmem:[%s6489_s7 + $0x28] sm:$0xff] (%p68_p3), %v802_v5  ;;  %v804_v6 = vld [vmem:[%s6481_s6 + $0x60] sm:$0xff] (%p68_p3)  ;;  %v806_v7 = vld [vmem:[%s6481_s6 + $0x70] sm:$0xff] (%p68_p3) }
  0x19   : > { %v808_v8 = vld [vmem:[%s6481_s6 + $0x80] sm:$0xff]  ;;  %805 = vst [vmem:[%s6489_s7 + $0x30] sm:$0xff] %v804_v6  ;;  %807 = vst [vmem:[%s6489_s7 + $0x38] sm:$0xff] %v806_v7  ;;  %v810_v9 = vld [vmem:[%s6481_s6 + $0x90] sm:$0xff] }
  0x1a   : > { %809 = vst [vmem:[%s6489_s7 + $0x40] sm:$0xff] %v808_v8  ;;  %v812_v10 = vld [vmem:[%s6481_s6 + $0xa0] sm:$0xff]  ;;  %v814_v11 = vld [vmem:[%s6481_s6 + $0xb0] sm:$0xff]  ;;  %811 = vst [vmem:[%s6489_s7 + $0x48] sm:$0xff] %v810_v9 }
  0x1b   : > { %813 = vst [vmem:[%s6489_s7 + $0x50] sm:$0xff] %v812_v10  ;;  %815 = vst [vmem:[%s6489_s7 + $0x58] sm:$0xff] %v814_v11  ;;  %v816_v12 = vld [vmem:[%s6481_s6 + $0xc0] sm:$0xff]  ;;  %v818_v13 = vld [vmem:[%s6481_s6 + $0xd0] sm:$0xff] }
  0x1c   : > { %v820_v14 = vld [vmem:[%s6481_s6 + $0xe0] sm:$0xff]  ;;  %817 = vst [vmem:[%s6489_s7 + $0x60] sm:$0xff] %v816_v12  ;;  %819 = vst [vmem:[%s6489_s7 + $0x68] sm:$0xff] %v818_v13  ;;  %v822_v15 = vld [vmem:[%s6481_s6 + $0xf0] sm:$0xff] }
  0x1d   : > { %821 = vst [vmem:[%s6489_s7 + $0x70] sm:$0xff] %v820_v14  ;;  %v824_v16 = vld [vmem:[%s6481_s6 + $0x100] sm:$0xff]  ;;  %v826_v17 = vld [vmem:[%s6481_s6 + $0x110] sm:$0xff]  ;;  %823 = vst [vmem:[%s6489_s7 + $0x78] sm:$0xff] %v822_v15 }
  0x1e   : > { %825 = vst [vmem:[%s6489_s7 + $0x80] sm:$0xff] %v824_v16  ;;  %827 = vst [vmem:[%s6489_s7 + $0x88] sm:$0xff] %v826_v17  ;;  %v828_v18 = vld [vmem:[%s6481_s6 + $0x120] sm:$0xff]  ;;  %v830_v19 = vld [vmem:[%s6481_s6 + $0x130] sm:$0xff] }
  0x1f   : > { %v832_v20 = vld [vmem:[%s6481_s6 + $0x140] sm:$0xff]  ;;  %829 = vst [vmem:[%s6489_s7 + $0x90] sm:$0xff] %v828_v18  ;;  %831 = vst [vmem:[%s6489_s7 + $0x98] sm:$0xff] %v830_v19  ;;  %v834_v21 = vld [vmem:[%s6481_s6 + $0x150] sm:$0xff] }
  0x20   : > { %833 = vst [vmem:[%s6489_s7 + $0xa0] sm:$0xff] %v832_v20  ;;  %v836_v22 = vld [vmem:[%s6481_s6 + $0x160] sm:$0xff]  ;;  %v838_v23 = vld [vmem:[%s6481_s6 + $0x170] sm:$0xff]  ;;  %835 = vst [vmem:[%s6489_s7 + $0xa8] sm:$0xff] %v834_v21 }
  0x21   : > { %837 = vst [vmem:[%s6489_s7 + $0xb0] sm:$0xff] %v836_v22  ;;  %839 = vst [vmem:[%s6489_s7 + $0xb8] sm:$0xff] %v838_v23  ;;  %v840_v24 = vld [vmem:[%s6481_s6 + $0x180] sm:$0xff]  ;;  %v842_v25 = vld [vmem:[%s6481_s6 + $0x190] sm:$0xff] }
  0x22   : > { %v844_v26 = vld [vmem:[%s6481_s6 + $0x1a0] sm:$0xff]  ;;  %841 = vst [vmem:[%s6489_s7 + $0xc0] sm:$0xff] %v840_v24  ;;  %843 = vst [vmem:[%s6489_s7 + $0xc8] sm:$0xff] %v842_v25  ;;  %v846_v27 = vld [vmem:[%s6481_s6 + $0x1b0] sm:$0xff] }
  0x23   : > { %845 = vst [vmem:[%s6489_s7 + $0xd0] sm:$0xff] %v844_v26  ;;  %v848_v28 = vld [vmem:[%s6481_s6 + $0x1c0] sm:$0xff]  ;;  %v850_v29 = vld [vmem:[%s6481_s6 + $0x1d0] sm:$0xff]  ;;  %847 = vst [vmem:[%s6489_s7 + $0xd8] sm:$0xff] %v846_v27 }
  0x24   : > { %849 = vst [vmem:[%s6489_s7 + $0xe0] sm:$0xff] %v848_v28  ;;  %851 = vst [vmem:[%s6489_s7 + $0xe8] sm:$0xff] %v850_v29  ;;  %v852_v30 = vld [vmem:[%s6481_s6 + $0x1e0] sm:$0xff]  ;;  %v854_v31 = vld [vmem:[%s6481_s6 + $0x1f0] sm:$0xff] }
  0x25   : > { %v856_v32 = vld [vmem:[%s6481_s6 + $0x200] sm:$0xff]  ;;  %853 = vst [vmem:[%s6489_s7 + $0xf0] sm:$0xff] %v852_v30  ;;  %855 = vst [vmem:[%s6489_s7 + $0xf8] sm:$0xff] %v854_v31  ;;  %v858_v33 = vld [vmem:[%s6481_s6 + $0x210] sm:$0xff] }
  0x26   : > { %857 = vst [vmem:[%s6489_s7 + $0x100] sm:$0xff] %v856_v32  ;;  %v860_v34 = vld [vmem:[%s6481_s6 + $0x220] sm:$0xff]  ;;  %v862_v35 = vld [vmem:[%s6481_s6 + $0x230] sm:$0xff]  ;;  %859 = vst [vmem:[%s6489_s7 + $0x108] sm:$0xff] %v858_v33 }
  0x27   : > { %861 = vst [vmem:[%s6489_s7 + $0x110] sm:$0xff] %v860_v34  ;;  %863 = vst [vmem:[%s6489_s7 + $0x118] sm:$0xff] %v862_v35  ;;  %v864_v36 = vld [vmem:[%s6481_s6 + $0x240] sm:$0xff]  ;;  %v866_v37 = vld [vmem:[%s6481_s6 + $0x250] sm:$0xff] }
  0x28   : > { %v868_v38 = vld [vmem:[%s6481_s6 + $0x260] sm:$0xff]  ;;  %865 = vst [vmem:[%s6489_s7 + $0x120] sm:$0xff] %v864_v36  ;;  %867 = vst [vmem:[%s6489_s7 + $0x128] sm:$0xff] %v866_v37  ;;  %v870_v39 = vld [vmem:[%s6481_s6 + $0x270] sm:$0xff] }
  0x29   : > { %869 = vst [vmem:[%s6489_s7 + $0x130] sm:$0xff] %v868_v38  ;;  %v872_v40 = vld [vmem:[%s6481_s6 + $0x280] sm:$0xff]  ;;  %v874_v41 = vld [vmem:[%s6481_s6 + $0x290] sm:$0xff]  ;;  %871 = vst [vmem:[%s6489_s7 + $0x138] sm:$0xff] %v870_v39 }
  0x2a   : > { %873 = vst [vmem:[%s6489_s7 + $0x140] sm:$0xff] %v872_v40  ;;  %875 = vst [vmem:[%s6489_s7 + $0x148] sm:$0xff] %v874_v41  ;;  %v876_v42 = vld [vmem:[%s6481_s6 + $0x2a0] sm:$0xff]  ;;  %v878_v43 = vld [vmem:[%s6481_s6 + $0x2b0] sm:$0xff] }
  0x2b   : > { %v880_v44 = vld [vmem:[%s6481_s6 + $0x2c0] sm:$0xff]  ;;  %877 = vst [vmem:[%s6489_s7 + $0x150] sm:$0xff] %v876_v42  ;;  %879 = vst [vmem:[%s6489_s7 + $0x158] sm:$0xff] %v878_v43  ;;  %v882_v45 = vld [vmem:[%s6481_s6 + $0x2d0] sm:$0xff] }
  0x2c   : > { %881 = vst [vmem:[%s6489_s7 + $0x160] sm:$0xff] %v880_v44  ;;  %v884_v46 = vld [vmem:[%s6481_s6 + $0x2e0] sm:$0xff]  ;;  %v886_v47 = vld [vmem:[%s6481_s6 + $0x2f0] sm:$0xff]  ;;  %883 = vst [vmem:[%s6489_s7 + $0x168] sm:$0xff] %v882_v45 }
  0x2d   : > { %885 = vst [vmem:[%s6489_s7 + $0x170] sm:$0xff] %v884_v46  ;;  %887 = vst [vmem:[%s6489_s7 + $0x178] sm:$0xff] %v886_v47  ;;  %v888_v48 = vld [vmem:[%s6481_s6 + $0x300] sm:$0xff]  ;;  %v890_v49 = vld [vmem:[%s6481_s6 + $0x310] sm:$0xff] }
  0x2e   : > { %v892_v50 = vld [vmem:[%s6481_s6 + $0x320] sm:$0xff]  ;;  %889 = vst [vmem:[%s6489_s7 + $0x180] sm:$0xff] %v888_v48  ;;  %891 = vst [vmem:[%s6489_s7 + $0x188] sm:$0xff] %v890_v49  ;;  %v894_v51 = vld [vmem:[%s6481_s6 + $0x330] sm:$0xff] }
  0x2f   : > { %893 = vst [vmem:[%s6489_s7 + $0x190] sm:$0xff] %v892_v50  ;;  %v896_v52 = vld [vmem:[%s6481_s6 + $0x340] sm:$0xff]  ;;  %v898_v53 = vld [vmem:[%s6481_s6 + $0x350] sm:$0xff]  ;;  %895 = vst [vmem:[%s6489_s7 + $0x198] sm:$0xff] %v894_v51 }
  0x30   : > { %897 = vst [vmem:[%s6489_s7 + $0x1a0] sm:$0xff] %v896_v52  ;;  %899 = vst [vmem:[%s6489_s7 + $0x1a8] sm:$0xff] %v898_v53  ;;  %v900_v54 = vld [vmem:[%s6481_s6 + $0x360] sm:$0xff]  ;;  %v902_v55 = vld [vmem:[%s6481_s6 + $0x370] sm:$0xff] }
  0x31   : > { %v904_v56 = vld [vmem:[%s6481_s6 + $0x380] sm:$0xff]  ;;  %901 = vst [vmem:[%s6489_s7 + $0x1b0] sm:$0xff] %v900_v54  ;;  %903 = vst [vmem:[%s6489_s7 + $0x1b8] sm:$0xff] %v902_v55  ;;  %v906_v57 = vld [vmem:[%s6481_s6 + $0x390] sm:$0xff] }
  0x32   : > { %905 = vst [vmem:[%s6489_s7 + $0x1c0] sm:$0xff] %v904_v56  ;;  %v908_v58 = vld [vmem:[%s6481_s6 + $0x3a0] sm:$0xff]  ;;  %v910_v59 = vld [vmem:[%s6481_s6 + $0x3b0] sm:$0xff]  ;;  %907 = vst [vmem:[%s6489_s7 + $0x1c8] sm:$0xff] %v906_v57 }
  0x33   : > { %909 = vst [vmem:[%s6489_s7 + $0x1d0] sm:$0xff] %v908_v58  ;;  %911 = vst [vmem:[%s6489_s7 + $0x1d8] sm:$0xff] %v910_v59  ;;  %v912_v60 = vld [vmem:[%s6481_s6 + $0x3c0] sm:$0xff]  ;;  %v914_v61 = vld [vmem:[%s6481_s6 + $0x3d0] sm:$0xff] }
  0x34   : > { %v916_v62 = vld [vmem:[%s6481_s6 + $0x3e0] sm:$0xff]  ;;  %913 = vst [vmem:[%s6489_s7 + $0x1e0] sm:$0xff] %v912_v60  ;;  %915 = vst [vmem:[%s6489_s7 + $0x1e8] sm:$0xff] %v914_v61  ;;  %v918_v63 = vld [vmem:[%s6481_s6 + $0x3f0] sm:$0xff] }
  0x35   : > { %917 = vst [vmem:[%s6489_s7 + $0x1f0] sm:$0xff] %v916_v62  ;;  %v920_v0 = vld [vmem:[%s6481_s6 + $0x400] sm:$0xff]  ;;  %v922_v1 = vld [vmem:[%s6481_s6 + $0x410] sm:$0xff]  ;;  %919 = vst [vmem:[%s6489_s7 + $0x1f8] sm:$0xff] %v918_v63 }
  0x36   : > { %921 = vst [vmem:[%s6489_s7 + $0x200] sm:$0xff] %v920_v0  ;;  %923 = vst [vmem:[%s6489_s7 + $0x208] sm:$0xff] %v922_v1  ;;  %v924_v2 = vld [vmem:[%s6481_s6 + $0x420] sm:$0xff]  ;;  %v926_v3 = vld [vmem:[%s6481_s6 + $0x430] sm:$0xff] }
  0x37   : > { %v928_v4 = vld [vmem:[%s6481_s6 + $0x440] sm:$0xff]  ;;  %925 = vst [vmem:[%s6489_s7 + $0x210] sm:$0xff] %v924_v2  ;;  %927 = vst [vmem:[%s6489_s7 + $0x218] sm:$0xff] %v926_v3  ;;  %v930_v5 = vld [vmem:[%s6481_s6 + $0x450] sm:$0xff] }
  0x38   : > { %929 = vst [vmem:[%s6489_s7 + $0x220] sm:$0xff] %v928_v4  ;;  %v932_v6 = vld [vmem:[%s6481_s6 + $0x460] sm:$0xff]  ;;  %v934_v7 = vld [vmem:[%s6481_s6 + $0x470] sm:$0xff]  ;;  %931 = vst [vmem:[%s6489_s7 + $0x228] sm:$0xff] %v930_v5 }
  0x39   : > { %933 = vst [vmem:[%s6489_s7 + $0x230] sm:$0xff] %v932_v6  ;;  %935 = vst [vmem:[%s6489_s7 + $0x238] sm:$0xff] %v934_v7  ;;  %v936_v8 = vld [vmem:[%s6481_s6 + $0x480] sm:$0xff]  ;;  %v938_v9 = vld [vmem:[%s6481_s6 + $0x490] sm:$0xff] }
  0x3a   : > { %v940_v10 = vld [vmem:[%s6481_s6 + $0x4a0] sm:$0xff]  ;;  %937 = vst [vmem:[%s6489_s7 + $0x240] sm:$0xff] %v936_v8  ;;  %939 = vst [vmem:[%s6489_s7 + $0x248] sm:$0xff] %v938_v9  ;;  %v942_v11 = vld [vmem:[%s6481_s6 + $0x4b0] sm:$0xff] }
  0x3b   : > { %941 = vst [vmem:[%s6489_s7 + $0x250] sm:$0xff] %v940_v10  ;;  %v944_v12 = vld [vmem:[%s6481_s6 + $0x4c0] sm:$0xff]  ;;  %v946_v13 = vld [vmem:[%s6481_s6 + $0x4d0] sm:$0xff]  ;;  %943 = vst [vmem:[%s6489_s7 + $0x258] sm:$0xff] %v942_v11 }
  0x3c   : > { %945 = vst [vmem:[%s6489_s7 + $0x260] sm:$0xff] %v944_v12  ;;  %947 = vst [vmem:[%s6489_s7 + $0x268] sm:$0xff] %v946_v13  ;;  %v948_v14 = vld [vmem:[%s6481_s6 + $0x4e0] sm:$0xff]  ;;  %v950_v15 = vld [vmem:[%s6481_s6 + $0x4f0] sm:$0xff] }
  0x3d   : > { %v952_v16 = vld [vmem:[%s6481_s6 + $0x500] sm:$0xff]  ;;  %949 = vst [vmem:[%s6489_s7 + $0x270] sm:$0xff] %v948_v14  ;;  %951 = vst [vmem:[%s6489_s7 + $0x278] sm:$0xff] %v950_v15  ;;  %v954_v17 = vld [vmem:[%s6481_s6 + $0x510] sm:$0xff] }
  0x3e   : > { %953 = vst [vmem:[%s6489_s7 + $0x280] sm:$0xff] %v952_v16  ;;  %v956_v18 = vld [vmem:[%s6481_s6 + $0x520] sm:$0xff]  ;;  %v958_v19 = vld [vmem:[%s6481_s6 + $0x530] sm:$0xff]  ;;  %955 = vst [vmem:[%s6489_s7 + $0x288] sm:$0xff] %v954_v17 }
  0x3f   : > { %957 = vst [vmem:[%s6489_s7 + $0x290] sm:$0xff] %v956_v18  ;;  %959 = vst [vmem:[%s6489_s7 + $0x298] sm:$0xff] %v958_v19  ;;  %v960_v20 = vld [vmem:[%s6481_s6 + $0x540] sm:$0xff]  ;;  %v962_v21 = vld [vmem:[%s6481_s6 + $0x550] sm:$0xff] }
  0x40   : > { %v964_v22 = vld [vmem:[%s6481_s6 + $0x560] sm:$0xff]  ;;  %961 = vst [vmem:[%s6489_s7 + $0x2a0] sm:$0xff] %v960_v20  ;;  %963 = vst [vmem:[%s6489_s7 + $0x2a8] sm:$0xff] %v962_v21  ;;  %v966_v23 = vld [vmem:[%s6481_s6 + $0x570] sm:$0xff] }
  0x41   : > { %965 = vst [vmem:[%s6489_s7 + $0x2b0] sm:$0xff] %v964_v22  ;;  %v968_v24 = vld [vmem:[%s6481_s6 + $0x580] sm:$0xff]  ;;  %v970_v25 = vld [vmem:[%s6481_s6 + $0x590] sm:$0xff]  ;;  %967 = vst [vmem:[%s6489_s7 + $0x2b8] sm:$0xff] %v966_v23 }
  0x42   : > { %969 = vst [vmem:[%s6489_s7 + $0x2c0] sm:$0xff] %v968_v24  ;;  %971 = vst [vmem:[%s6489_s7 + $0x2c8] sm:$0xff] %v970_v25  ;;  %v972_v26 = vld [vmem:[%s6481_s6 + $0x5a0] sm:$0xff]  ;;  %v974_v27 = vld [vmem:[%s6481_s6 + $0x5b0] sm:$0xff] }
  0x43   : > { %v976_v28 = vld [vmem:[%s6481_s6 + $0x5c0] sm:$0xff]  ;;  %973 = vst [vmem:[%s6489_s7 + $0x2d0] sm:$0xff] %v972_v26  ;;  %975 = vst [vmem:[%s6489_s7 + $0x2d8] sm:$0xff] %v974_v27  ;;  %v978_v29 = vld [vmem:[%s6481_s6 + $0x5d0] sm:$0xff] }
  0x44   : > { %977 = vst [vmem:[%s6489_s7 + $0x2e0] sm:$0xff] %v976_v28  ;;  %v980_v30 = vld [vmem:[%s6481_s6 + $0x5e0] sm:$0xff]  ;;  %v982_v31 = vld [vmem:[%s6481_s6 + $0x5f0] sm:$0xff]  ;;  %979 = vst [vmem:[%s6489_s7 + $0x2e8] sm:$0xff] %v978_v29 }
  0x45   : > { %981 = vst [vmem:[%s6489_s7 + $0x2f0] sm:$0xff] %v980_v30  ;;  %983 = vst [vmem:[%s6489_s7 + $0x2f8] sm:$0xff] %v982_v31  ;;  %v984_v32 = vld [vmem:[%s6481_s6 + $0x600] sm:$0xff]  ;;  %v986_v33 = vld [vmem:[%s6481_s6 + $0x610] sm:$0xff] }
  0x46   : > { %v988_v34 = vld [vmem:[%s6481_s6 + $0x620] sm:$0xff]  ;;  %985 = vst [vmem:[%s6489_s7 + $0x300] sm:$0xff] %v984_v32  ;;  %987 = vst [vmem:[%s6489_s7 + $0x308] sm:$0xff] %v986_v33  ;;  %v990_v35 = vld [vmem:[%s6481_s6 + $0x630] sm:$0xff] }
  0x47   : > { %989 = vst [vmem:[%s6489_s7 + $0x310] sm:$0xff] %v988_v34  ;;  %v992_v36 = vld [vmem:[%s6481_s6 + $0x640] sm:$0xff]  ;;  %v994_v37 = vld [vmem:[%s6481_s6 + $0x650] sm:$0xff]  ;;  %991 = vst [vmem:[%s6489_s7 + $0x318] sm:$0xff] %v990_v35 }
  0x48   : > { %993 = vst [vmem:[%s6489_s7 + $0x320] sm:$0xff] %v992_v36  ;;  %995 = vst [vmem:[%s6489_s7 + $0x328] sm:$0xff] %v994_v37  ;;  %v996_v38 = vld [vmem:[%s6481_s6 + $0x660] sm:$0xff]  ;;  %v998_v39 = vld [vmem:[%s6481_s6 + $0x670] sm:$0xff] }
  0x49   : > { %v1000_v40 = vld [vmem:[%s6481_s6 + $0x680] sm:$0xff]  ;;  %997 = vst [vmem:[%s6489_s7 + $0x330] sm:$0xff] %v996_v38  ;;  %999 = vst [vmem:[%s6489_s7 + $0x338] sm:$0xff] %v998_v39  ;;  %v1002_v41 = vld [vmem:[%s6481_s6 + $0x690] sm:$0xff] }
  0x4a   : > { %1001 = vst [vmem:[%s6489_s7 + $0x340] sm:$0xff] %v1000_v40  ;;  %v1004_v42 = vld [vmem:[%s6481_s6 + $0x6a0] sm:$0xff]  ;;  %v1006_v43 = vld [vmem:[%s6481_s6 + $0x6b0] sm:$0xff]  ;;  %1003 = vst [vmem:[%s6489_s7 + $0x348] sm:$0xff] %v1002_v41 }
  0x4b   : > { %1005 = vst [vmem:[%s6489_s7 + $0x350] sm:$0xff] %v1004_v42  ;;  %1007 = vst [vmem:[%s6489_s7 + $0x358] sm:$0xff] %v1006_v43  ;;  %v1008_v44 = vld [vmem:[%s6481_s6 + $0x6c0] sm:$0xff]  ;;  %v1010_v45 = vld [vmem:[%s6481_s6 + $0x6d0] sm:$0xff] }
  0x4c   : > { %v1012_v46 = vld [vmem:[%s6481_s6 + $0x6e0] sm:$0xff]  ;;  %1009 = vst [vmem:[%s6489_s7 + $0x360] sm:$0xff] %v1008_v44  ;;  %1011 = vst [vmem:[%s6489_s7 + $0x368] sm:$0xff] %v1010_v45  ;;  %v1014_v47 = vld [vmem:[%s6481_s6 + $0x6f0] sm:$0xff] }
  0x4d   : > { %1013 = vst [vmem:[%s6489_s7 + $0x370] sm:$0xff] %v1012_v46  ;;  %v1016_v48 = vld [vmem:[%s6481_s6 + $0x700] sm:$0xff]  ;;  %v1018_v49 = vld [vmem:[%s6481_s6 + $0x710] sm:$0xff]  ;;  %1015 = vst [vmem:[%s6489_s7 + $0x378] sm:$0xff] %v1014_v47 }
  0x4e   : > { %1017 = vst [vmem:[%s6489_s7 + $0x380] sm:$0xff] %v1016_v48  ;;  %1019 = vst [vmem:[%s6489_s7 + $0x388] sm:$0xff] %v1018_v49  ;;  %v1020_v50 = vld [vmem:[%s6481_s6 + $0x720] sm:$0xff]  ;;  %v1022_v51 = vld [vmem:[%s6481_s6 + $0x730] sm:$0xff] }
  0x4f   : > { %v1024_v52 = vld [vmem:[%s6481_s6 + $0x740] sm:$0xff]  ;;  %1021 = vst [vmem:[%s6489_s7 + $0x390] sm:$0xff] %v1020_v50  ;;  %1023 = vst [vmem:[%s6489_s7 + $0x398] sm:$0xff] %v1022_v51  ;;  %v1026_v53 = vld [vmem:[%s6481_s6 + $0x750] sm:$0xff] }
  0x50   : > { %1025 = vst [vmem:[%s6489_s7 + $0x3a0] sm:$0xff] %v1024_v52  ;;  %v1028_v54 = vld [vmem:[%s6481_s6 + $0x760] sm:$0xff]  ;;  %v1030_v55 = vld [vmem:[%s6481_s6 + $0x770] sm:$0xff]  ;;  %1027 = vst [vmem:[%s6489_s7 + $0x3a8] sm:$0xff] %v1026_v53 }
  0x51   : > { %1029 = vst [vmem:[%s6489_s7 + $0x3b0] sm:$0xff] %v1028_v54  ;;  %1031 = vst [vmem:[%s6489_s7 + $0x3b8] sm:$0xff] %v1030_v55  ;;  %v1032_v56 = vld [vmem:[%s6481_s6 + $0x780] sm:$0xff]  ;;  %v1034_v57 = vld [vmem:[%s6481_s6 + $0x790] sm:$0xff] }
  0x52   : > { %v1036_v58 = vld [vmem:[%s6481_s6 + $0x7a0] sm:$0xff]  ;;  %1033 = vst [vmem:[%s6489_s7 + $0x3c0] sm:$0xff] %v1032_v56  ;;  %1035 = vst [vmem:[%s6489_s7 + $0x3c8] sm:$0xff] %v1034_v57  ;;  %v1038_v59 = vld [vmem:[%s6481_s6 + $0x7b0] sm:$0xff] }
  0x53   : > { %1037 = vst [vmem:[%s6489_s7 + $0x3d0] sm:$0xff] %v1036_v58  ;;  %v1040_v60 = vld [vmem:[%s6481_s6 + $0x7c0] sm:$0xff]  ;;  %v1042_v61 = vld [vmem:[%s6481_s6 + $0x7d0] sm:$0xff]  ;;  %1039 = vst [vmem:[%s6489_s7 + $0x3d8] sm:$0xff] %v1038_v59 }
  0x54   : > { %1041 = vst [vmem:[%s6489_s7 + $0x3e0] sm:$0xff] %v1040_v60  ;;  %1043 = vst [vmem:[%s6489_s7 + $0x3e8] sm:$0xff] %v1042_v61  ;;  %v1044_v62 = vld [vmem:[%s6481_s6 + $0x7e0] sm:$0xff]  ;;  %v1046_v63 = vld [vmem:[%s6481_s6 + $0x7f0] sm:$0xff] }
  0x55   : > { %v1048_v0 = vld [vmem:[%s6481_s6 + $0x800] sm:$0xff]  ;;  %1045 = vst [vmem:[%s6489_s7 + $0x3f0] sm:$0xff] %v1044_v62  ;;  %1047 = vst [vmem:[%s6489_s7 + $0x3f8] sm:$0xff] %v1046_v63  ;;  %v1050_v1 = vld [vmem:[%s6481_s6 + $0x810] sm:$0xff] }
  0x56   : > { %1049 = vst [vmem:[%s6489_s7 + $0x400] sm:$0xff] %v1048_v0  ;;  %v1052_v2 = vld [vmem:[%s6481_s6 + $0x820] sm:$0xff]  ;;  %v1054_v3 = vld [vmem:[%s6481_s6 + $0x830] sm:$0xff]  ;;  %1051 = vst [vmem:[%s6489_s7 + $0x408] sm:$0xff] %v1050_v1 }
  0x57   : > { %1053 = vst [vmem:[%s6489_s7 + $0x410] sm:$0xff] %v1052_v2  ;;  %1055 = vst [vmem:[%s6489_s7 + $0x418] sm:$0xff] %v1054_v3  ;;  %v1056_v4 = vld [vmem:[%s6481_s6 + $0x840] sm:$0xff]  ;;  %v1058_v5 = vld [vmem:[%s6481_s6 + $0x850] sm:$0xff] }
  0x58   : > { %v1060_v6 = vld [vmem:[%s6481_s6 + $0x860] sm:$0xff]  ;;  %1057 = vst [vmem:[%s6489_s7 + $0x420] sm:$0xff] %v1056_v4  ;;  %1059 = vst [vmem:[%s6489_s7 + $0x428] sm:$0xff] %v1058_v5  ;;  %v1062_v7 = vld [vmem:[%s6481_s6 + $0x870] sm:$0xff] }
  0x59   : > { %1061 = vst [vmem:[%s6489_s7 + $0x430] sm:$0xff] %v1060_v6  ;;  %v1064_v8 = vld [vmem:[%s6481_s6 + $0x880] sm:$0xff]  ;;  %v1066_v9 = vld [vmem:[%s6481_s6 + $0x890] sm:$0xff]  ;;  %1063 = vst [vmem:[%s6489_s7 + $0x438] sm:$0xff] %v1062_v7 }
  0x5a   : > { %1065 = vst [vmem:[%s6489_s7 + $0x440] sm:$0xff] %v1064_v8  ;;  %1067 = vst [vmem:[%s6489_s7 + $0x448] sm:$0xff] %v1066_v9  ;;  %v1068_v10 = vld [vmem:[%s6481_s6 + $0x8a0] sm:$0xff]  ;;  %v1070_v11 = vld [vmem:[%s6481_s6 + $0x8b0] sm:$0xff] }
  0x5b   : > { %v1072_v12 = vld [vmem:[%s6481_s6 + $0x8c0] sm:$0xff]  ;;  %1069 = vst [vmem:[%s6489_s7 + $0x450] sm:$0xff] %v1068_v10  ;;  %1071 = vst [vmem:[%s6489_s7 + $0x458] sm:$0xff] %v1070_v11  ;;  %v1074_v13 = vld [vmem:[%s6481_s6 + $0x8d0] sm:$0xff] }
  0x5c   : > { %1073 = vst [vmem:[%s6489_s7 + $0x460] sm:$0xff] %v1072_v12  ;;  %v1076_v14 = vld [vmem:[%s6481_s6 + $0x8e0] sm:$0xff]  ;;  %v1078_v15 = vld [vmem:[%s6481_s6 + $0x8f0] sm:$0xff]  ;;  %1075 = vst [vmem:[%s6489_s7 + $0x468] sm:$0xff] %v1074_v13 }
  0x5d   : > { %1077 = vst [vmem:[%s6489_s7 + $0x470] sm:$0xff] %v1076_v14  ;;  %1079 = vst [vmem:[%s6489_s7 + $0x478] sm:$0xff] %v1078_v15  ;;  %v1080_v16 = vld [vmem:[%s6481_s6 + $0x900] sm:$0xff]  ;;  %v1082_v17 = vld [vmem:[%s6481_s6 + $0x910] sm:$0xff] }
  0x5e   : > { %v1084_v18 = vld [vmem:[%s6481_s6 + $0x920] sm:$0xff]  ;;  %1081 = vst [vmem:[%s6489_s7 + $0x480] sm:$0xff] %v1080_v16  ;;  %1083 = vst [vmem:[%s6489_s7 + $0x488] sm:$0xff] %v1082_v17  ;;  %v1086_v19 = vld [vmem:[%s6481_s6 + $0x930] sm:$0xff] }
  0x5f   : > { %1085 = vst [vmem:[%s6489_s7 + $0x490] sm:$0xff] %v1084_v18  ;;  %v1088_v20 = vld [vmem:[%s6481_s6 + $0x940] sm:$0xff]  ;;  %v1090_v21 = vld [vmem:[%s6481_s6 + $0x950] sm:$0xff]  ;;  %1087 = vst [vmem:[%s6489_s7 + $0x498] sm:$0xff] %v1086_v19 }
  0x60   : > { %1089 = vst [vmem:[%s6489_s7 + $0x4a0] sm:$0xff] %v1088_v20  ;;  %1091 = vst [vmem:[%s6489_s7 + $0x4a8] sm:$0xff] %v1090_v21  ;;  %v1092_v22 = vld [vmem:[%s6481_s6 + $0x960] sm:$0xff]  ;;  %v1094_v23 = vld [vmem:[%s6481_s6 + $0x970] sm:$0xff] }
  0x61   : > { %v1096_v24 = vld [vmem:[%s6481_s6 + $0x980] sm:$0xff]  ;;  %1093 = vst [vmem:[%s6489_s7 + $0x4b0] sm:$0xff] %v1092_v22  ;;  %1095 = vst [vmem:[%s6489_s7 + $0x4b8] sm:$0xff] %v1094_v23  ;;  %v1098_v25 = vld [vmem:[%s6481_s6 + $0x990] sm:$0xff] }
  0x62   : > { %1097 = vst [vmem:[%s6489_s7 + $0x4c0] sm:$0xff] %v1096_v24  ;;  %v1100_v26 = vld [vmem:[%s6481_s6 + $0x9a0] sm:$0xff]  ;;  %v1102_v27 = vld [vmem:[%s6481_s6 + $0x9b0] sm:$0xff]  ;;  %1099 = vst [vmem:[%s6489_s7 + $0x4c8] sm:$0xff] %v1098_v25 }
  0x63   : > { %1101 = vst [vmem:[%s6489_s7 + $0x4d0] sm:$0xff] %v1100_v26  ;;  %1103 = vst [vmem:[%s6489_s7 + $0x4d8] sm:$0xff] %v1102_v27  ;;  %v1104_v28 = vld [vmem:[%s6481_s6 + $0x9c0] sm:$0xff]  ;;  %v1106_v29 = vld [vmem:[%s6481_s6 + $0x9d0] sm:$0xff] }
  0x64   : > { %v1108_v30 = vld [vmem:[%s6481_s6 + $0x9e0] sm:$0xff]  ;;  %1105 = vst [vmem:[%s6489_s7 + $0x4e0] sm:$0xff] %v1104_v28  ;;  %1107 = vst [vmem:[%s6489_s7 + $0x4e8] sm:$0xff] %v1106_v29  ;;  %v1110_v31 = vld [vmem:[%s6481_s6 + $0x9f0] sm:$0xff] }
  0x65   : > { %1109 = vst [vmem:[%s6489_s7 + $0x4f0] sm:$0xff] %v1108_v30  ;;  %v1112_v32 = vld [vmem:[%s6481_s6 + $0xa00] sm:$0xff]  ;;  %v1114_v33 = vld [vmem:[%s6481_s6 + $0xa10] sm:$0xff]  ;;  %1111 = vst [vmem:[%s6489_s7 + $0x4f8] sm:$0xff] %v1110_v31 }
  0x66   : > { %1113 = vst [vmem:[%s6489_s7 + $0x500] sm:$0xff] %v1112_v32  ;;  %1115 = vst [vmem:[%s6489_s7 + $0x508] sm:$0xff] %v1114_v33  ;;  %v1116_v34 = vld [vmem:[%s6481_s6 + $0xa20] sm:$0xff]  ;;  %v1118_v35 = vld [vmem:[%s6481_s6 + $0xa30] sm:$0xff] }
  0x67   : > { %v1120_v36 = vld [vmem:[%s6481_s6 + $0xa40] sm:$0xff]  ;;  %1117 = vst [vmem:[%s6489_s7 + $0x510] sm:$0xff] %v1116_v34  ;;  %1119 = vst [vmem:[%s6489_s7 + $0x518] sm:$0xff] %v1118_v35  ;;  %v1122_v37 = vld [vmem:[%s6481_s6 + $0xa50] sm:$0xff] }
  0x68   : > { %1121 = vst [vmem:[%s6489_s7 + $0x520] sm:$0xff] %v1120_v36  ;;  %v1124_v38 = vld [vmem:[%s6481_s6 + $0xa60] sm:$0xff]  ;;  %v1126_v39 = vld [vmem:[%s6481_s6 + $0xa70] sm:$0xff]  ;;  %1123 = vst [vmem:[%s6489_s7 + $0x528] sm:$0xff] %v1122_v37 }
  0x69   : > { %1125 = vst [vmem:[%s6489_s7 + $0x530] sm:$0xff] %v1124_v38  ;;  %1127 = vst [vmem:[%s6489_s7 + $0x538] sm:$0xff] %v1126_v39  ;;  %v1128_v40 = vld [vmem:[%s6481_s6 + $0xa80] sm:$0xff]  ;;  %v1130_v41 = vld [vmem:[%s6481_s6 + $0xa90] sm:$0xff] }
  0x6a   : > { %v1132_v42 = vld [vmem:[%s6481_s6 + $0xaa0] sm:$0xff]  ;;  %1129 = vst [vmem:[%s6489_s7 + $0x540] sm:$0xff] %v1128_v40  ;;  %1131 = vst [vmem:[%s6489_s7 + $0x548] sm:$0xff] %v1130_v41  ;;  %v1134_v43 = vld [vmem:[%s6481_s6 + $0xab0] sm:$0xff] }
  0x6b   : > { %1133 = vst [vmem:[%s6489_s7 + $0x550] sm:$0xff] %v1132_v42  ;;  %v1136_v44 = vld [vmem:[%s6481_s6 + $0xac0] sm:$0xff]  ;;  %v1138_v45 = vld [vmem:[%s6481_s6 + $0xad0] sm:$0xff]  ;;  %1135 = vst [vmem:[%s6489_s7 + $0x558] sm:$0xff] %v1134_v43 }
  0x6c   : > { %1137 = vst [vmem:[%s6489_s7 + $0x560] sm:$0xff] %v1136_v44  ;;  %1139 = vst [vmem:[%s6489_s7 + $0x568] sm:$0xff] %v1138_v45  ;;  %v1140_v46 = vld [vmem:[%s6481_s6 + $0xae0] sm:$0xff]  ;;  %v1142_v47 = vld [vmem:[%s6481_s6 + $0xaf0] sm:$0xff] }
  0x6d   : > { %v1144_v48 = vld [vmem:[%s6481_s6 + $0xb00] sm:$0xff]  ;;  %1141 = vst [vmem:[%s6489_s7 + $0x570] sm:$0xff] %v1140_v46  ;;  %1143 = vst [vmem:[%s6489_s7 + $0x578] sm:$0xff] %v1142_v47  ;;  %v1146_v49 = vld [vmem:[%s6481_s6 + $0xb10] sm:$0xff] }
  0x6e   : > { %1145 = vst [vmem:[%s6489_s7 + $0x580] sm:$0xff] %v1144_v48  ;;  %v1148_v50 = vld [vmem:[%s6481_s6 + $0xb20] sm:$0xff]  ;;  %v1150_v51 = vld [vmem:[%s6481_s6 + $0xb30] sm:$0xff]  ;;  %1147 = vst [vmem:[%s6489_s7 + $0x588] sm:$0xff] %v1146_v49 }
  0x6f   : > { %1149 = vst [vmem:[%s6489_s7 + $0x590] sm:$0xff] %v1148_v50  ;;  %1151 = vst [vmem:[%s6489_s7 + $0x598] sm:$0xff] %v1150_v51  ;;  %v1152_v52 = vld [vmem:[%s6481_s6 + $0xb40] sm:$0xff]  ;;  %v1154_v53 = vld [vmem:[%s6481_s6 + $0xb50] sm:$0xff] }
  0x70   : > { %v1156_v54 = vld [vmem:[%s6481_s6 + $0xb60] sm:$0xff]  ;;  %1153 = vst [vmem:[%s6489_s7 + $0x5a0] sm:$0xff] %v1152_v52  ;;  %1155 = vst [vmem:[%s6489_s7 + $0x5a8] sm:$0xff] %v1154_v53  ;;  %v1158_v55 = vld [vmem:[%s6481_s6 + $0xb70] sm:$0xff] }
  0x71   : > { %1157 = vst [vmem:[%s6489_s7 + $0x5b0] sm:$0xff] %v1156_v54  ;;  %v1160_v56 = vld [vmem:[%s6481_s6 + $0xb80] sm:$0xff]  ;;  %v1162_v57 = vld [vmem:[%s6481_s6 + $0xb90] sm:$0xff]  ;;  %1159 = vst [vmem:[%s6489_s7 + $0x5b8] sm:$0xff] %v1158_v55 }
  0x72   : > { %1161 = vst [vmem:[%s6489_s7 + $0x5c0] sm:$0xff] %v1160_v56  ;;  %1163 = vst [vmem:[%s6489_s7 + $0x5c8] sm:$0xff] %v1162_v57  ;;  %v1164_v58 = vld [vmem:[%s6481_s6 + $0xba0] sm:$0xff]  ;;  %v1166_v59 = vld [vmem:[%s6481_s6 + $0xbb0] sm:$0xff] }
  0x73   : > { %v1168_v60 = vld [vmem:[%s6481_s6 + $0xbc0] sm:$0xff]  ;;  %1165 = vst [vmem:[%s6489_s7 + $0x5d0] sm:$0xff] %v1164_v58  ;;  %1167 = vst [vmem:[%s6489_s7 + $0x5d8] sm:$0xff] %v1166_v59  ;;  %v1170_v61 = vld [vmem:[%s6481_s6 + $0xbd0] sm:$0xff] }
  0x74   : > { %1169 = vst [vmem:[%s6489_s7 + $0x5e0] sm:$0xff] %v1168_v60  ;;  %v1172_v62 = vld [vmem:[%s6481_s6 + $0xbe0] sm:$0xff]  ;;  %v1174_v63 = vld [vmem:[%s6481_s6 + $0xbf0] sm:$0xff]  ;;  %1171 = vst [vmem:[%s6489_s7 + $0x5e8] sm:$0xff] %v1170_v61 }
  0x75   : > { %1173 = vst [vmem:[%s6489_s7 + $0x5f0] sm:$0xff] %v1172_v62  ;;  %1175 = vst [vmem:[%s6489_s7 + $0x5f8] sm:$0xff] %v1174_v63  ;;  %v1176_v0 = vld [vmem:[%s6481_s6 + $0xc00] sm:$0xff]  ;;  %v1178_v1 = vld [vmem:[%s6481_s6 + $0xc10] sm:$0xff] }
  0x76   : > { %v1180_v2 = vld [vmem:[%s6481_s6 + $0xc20] sm:$0xff]  ;;  %1177 = vst [vmem:[%s6489_s7 + $0x600] sm:$0xff] %v1176_v0  ;;  %1179 = vst [vmem:[%s6489_s7 + $0x608] sm:$0xff] %v1178_v1  ;;  %v1182_v3 = vld [vmem:[%s6481_s6 + $0xc30] sm:$0xff] }
  0x77   : > { %1181 = vst [vmem:[%s6489_s7 + $0x610] sm:$0xff] %v1180_v2  ;;  %v1184_v4 = vld [vmem:[%s6481_s6 + $0xc40] sm:$0xff]  ;;  %v1186_v5 = vld [vmem:[%s6481_s6 + $0xc50] sm:$0xff]  ;;  %1183 = vst [vmem:[%s6489_s7 + $0x618] sm:$0xff] %v1182_v3 }
  0x78   : > { %1185 = vst [vmem:[%s6489_s7 + $0x620] sm:$0xff] %v1184_v4  ;;  %1187 = vst [vmem:[%s6489_s7 + $0x628] sm:$0xff] %v1186_v5  ;;  %v1188_v6 = vld [vmem:[%s6481_s6 + $0xc60] sm:$0xff]  ;;  %v1190_v7 = vld [vmem:[%s6481_s6 + $0xc70] sm:$0xff] }
  0x79   : > { %v1192_v8 = vld [vmem:[%s6481_s6 + $0xc80] sm:$0xff]  ;;  %1189 = vst [vmem:[%s6489_s7 + $0x630] sm:$0xff] %v1188_v6  ;;  %1191 = vst [vmem:[%s6489_s7 + $0x638] sm:$0xff] %v1190_v7  ;;  %v1194_v9 = vld [vmem:[%s6481_s6 + $0xc90] sm:$0xff] }
  0x7a   : > { %1193 = vst [vmem:[%s6489_s7 + $0x640] sm:$0xff] %v1192_v8  ;;  %v1196_v10 = vld [vmem:[%s6481_s6 + $0xca0] sm:$0xff]  ;;  %v1198_v11 = vld [vmem:[%s6481_s6 + $0xcb0] sm:$0xff]  ;;  %1195 = vst [vmem:[%s6489_s7 + $0x648] sm:$0xff] %v1194_v9 }
  0x7b   : > { %1197 = vst [vmem:[%s6489_s7 + $0x650] sm:$0xff] %v1196_v10  ;;  %1199 = vst [vmem:[%s6489_s7 + $0x658] sm:$0xff] %v1198_v11  ;;  %v1200_v12 = vld [vmem:[%s6481_s6 + $0xcc0] sm:$0xff]  ;;  %v1202_v13 = vld [vmem:[%s6481_s6 + $0xcd0] sm:$0xff] }
  0x7c   : > { %v1204_v14 = vld [vmem:[%s6481_s6 + $0xce0] sm:$0xff]  ;;  %1201 = vst [vmem:[%s6489_s7 + $0x660] sm:$0xff] %v1200_v12  ;;  %1203 = vst [vmem:[%s6489_s7 + $0x668] sm:$0xff] %v1202_v13  ;;  %v1206_v15 = vld [vmem:[%s6481_s6 + $0xcf0] sm:$0xff] }
  0x7d   : > { %1205 = vst [vmem:[%s6489_s7 + $0x670] sm:$0xff] %v1204_v14  ;;  %v1208_v16 = vld [vmem:[%s6481_s6 + $0xd00] sm:$0xff]  ;;  %v1210_v17 = vld [vmem:[%s6481_s6 + $0xd10] sm:$0xff]  ;;  %1207 = vst [vmem:[%s6489_s7 + $0x678] sm:$0xff] %v1206_v15 }
  0x7e   : > { %1209 = vst [vmem:[%s6489_s7 + $0x680] sm:$0xff] %v1208_v16  ;;  %1211 = vst [vmem:[%s6489_s7 + $0x688] sm:$0xff] %v1210_v17  ;;  %v1212_v18 = vld [vmem:[%s6481_s6 + $0xd20] sm:$0xff]  ;;  %v1214_v19 = vld [vmem:[%s6481_s6 + $0xd30] sm:$0xff] }
  0x7f   : > { %v1216_v20 = vld [vmem:[%s6481_s6 + $0xd40] sm:$0xff]  ;;  %1213 = vst [vmem:[%s6489_s7 + $0x690] sm:$0xff] %v1212_v18  ;;  %1215 = vst [vmem:[%s6489_s7 + $0x698] sm:$0xff] %v1214_v19  ;;  %v1218_v21 = vld [vmem:[%s6481_s6 + $0xd50] sm:$0xff] }
  0x80   : > { %1217 = vst [vmem:[%s6489_s7 + $0x6a0] sm:$0xff] %v1216_v20  ;;  %v1220_v22 = vld [vmem:[%s6481_s6 + $0xd60] sm:$0xff]  ;;  %v1222_v23 = vld [vmem:[%s6481_s6 + $0xd70] sm:$0xff]  ;;  %1219 = vst [vmem:[%s6489_s7 + $0x6a8] sm:$0xff] %v1218_v21 }
  0x81   : > { %1221 = vst [vmem:[%s6489_s7 + $0x6b0] sm:$0xff] %v1220_v22  ;;  %1223 = vst [vmem:[%s6489_s7 + $0x6b8] sm:$0xff] %v1222_v23  ;;  %v1224_v24 = vld [vmem:[%s6481_s6 + $0xd80] sm:$0xff]  ;;  %v1226_v25 = vld [vmem:[%s6481_s6 + $0xd90] sm:$0xff] }
  0x82   : > { %v1228_v26 = vld [vmem:[%s6481_s6 + $0xda0] sm:$0xff]  ;;  %1225 = vst [vmem:[%s6489_s7 + $0x6c0] sm:$0xff] %v1224_v24  ;;  %1227 = vst [vmem:[%s6489_s7 + $0x6c8] sm:$0xff] %v1226_v25  ;;  %v1230_v27 = vld [vmem:[%s6481_s6 + $0xdb0] sm:$0xff] }
  0x83   : > { %1229 = vst [vmem:[%s6489_s7 + $0x6d0] sm:$0xff] %v1228_v26  ;;  %v1232_v28 = vld [vmem:[%s6481_s6 + $0xdc0] sm:$0xff]  ;;  %v1234_v29 = vld [vmem:[%s6481_s6 + $0xdd0] sm:$0xff]  ;;  %1231 = vst [vmem:[%s6489_s7 + $0x6d8] sm:$0xff] %v1230_v27 }
  0x84   : > { %1233 = vst [vmem:[%s6489_s7 + $0x6e0] sm:$0xff] %v1232_v28  ;;  %1235 = vst [vmem:[%s6489_s7 + $0x6e8] sm:$0xff] %v1234_v29  ;;  %v1236_v30 = vld [vmem:[%s6481_s6 + $0xde0] sm:$0xff]  ;;  %v1238_v31 = vld [vmem:[%s6481_s6 + $0xdf0] sm:$0xff] }
  0x85   : > { %v1240_v32 = vld [vmem:[%s6481_s6 + $0xe00] sm:$0xff]  ;;  %1237 = vst [vmem:[%s6489_s7 + $0x6f0] sm:$0xff] %v1236_v30  ;;  %1239 = vst [vmem:[%s6489_s7 + $0x6f8] sm:$0xff] %v1238_v31  ;;  %v1242_v33 = vld [vmem:[%s6481_s6 + $0xe10] sm:$0xff] }
  0x86   : > { %1241 = vst [vmem:[%s6489_s7 + $0x700] sm:$0xff] %v1240_v32  ;;  %v1244_v34 = vld [vmem:[%s6481_s6 + $0xe20] sm:$0xff]  ;;  %v1246_v35 = vld [vmem:[%s6481_s6 + $0xe30] sm:$0xff]  ;;  %1243 = vst [vmem:[%s6489_s7 + $0x708] sm:$0xff] %v1242_v33 }
  0x87   : > { %1245 = vst [vmem:[%s6489_s7 + $0x710] sm:$0xff] %v1244_v34  ;;  %1247 = vst [vmem:[%s6489_s7 + $0x718] sm:$0xff] %v1246_v35  ;;  %v1248_v36 = vld [vmem:[%s6481_s6 + $0xe40] sm:$0xff]  ;;  %v1250_v37 = vld [vmem:[%s6481_s6 + $0xe50] sm:$0xff] }
  0x88   : > { %v1252_v38 = vld [vmem:[%s6481_s6 + $0xe60] sm:$0xff]  ;;  %1249 = vst [vmem:[%s6489_s7 + $0x720] sm:$0xff] %v1248_v36  ;;  %1251 = vst [vmem:[%s6489_s7 + $0x728] sm:$0xff] %v1250_v37  ;;  %v1254_v39 = vld [vmem:[%s6481_s6 + $0xe70] sm:$0xff] }
  0x89   : > { %1253 = vst [vmem:[%s6489_s7 + $0x730] sm:$0xff] %v1252_v38  ;;  %v1256_v40 = vld [vmem:[%s6481_s6 + $0xe80] sm:$0xff]  ;;  %v1258_v41 = vld [vmem:[%s6481_s6 + $0xe90] sm:$0xff]  ;;  %1255 = vst [vmem:[%s6489_s7 + $0x738] sm:$0xff] %v1254_v39 }
  0x8a   : > { %1257 = vst [vmem:[%s6489_s7 + $0x740] sm:$0xff] %v1256_v40  ;;  %1259 = vst [vmem:[%s6489_s7 + $0x748] sm:$0xff] %v1258_v41  ;;  %v1260_v42 = vld [vmem:[%s6481_s6 + $0xea0] sm:$0xff]  ;;  %v1262_v43 = vld [vmem:[%s6481_s6 + $0xeb0] sm:$0xff] }
  0x8b   : > { %v1264_v44 = vld [vmem:[%s6481_s6 + $0xec0] sm:$0xff]  ;;  %1261 = vst [vmem:[%s6489_s7 + $0x750] sm:$0xff] %v1260_v42  ;;  %1263 = vst [vmem:[%s6489_s7 + $0x758] sm:$0xff] %v1262_v43  ;;  %v1266_v45 = vld [vmem:[%s6481_s6 + $0xed0] sm:$0xff] }
  0x8c   : > { %1265 = vst [vmem:[%s6489_s7 + $0x760] sm:$0xff] %v1264_v44  ;;  %v1268_v46 = vld [vmem:[%s6481_s6 + $0xee0] sm:$0xff]  ;;  %v1270_v47 = vld [vmem:[%s6481_s6 + $0xef0] sm:$0xff]  ;;  %1267 = vst [vmem:[%s6489_s7 + $0x768] sm:$0xff] %v1266_v45 }
  0x8d   : > { %1269 = vst [vmem:[%s6489_s7 + $0x770] sm:$0xff] %v1268_v46  ;;  %1271 = vst [vmem:[%s6489_s7 + $0x778] sm:$0xff] %v1270_v47  ;;  %v1272_v48 = vld [vmem:[%s6481_s6 + $0xf00] sm:$0xff]  ;;  %v1274_v49 = vld [vmem:[%s6481_s6 + $0xf10] sm:$0xff] }
  0x8e   : > { %v1276_v50 = vld [vmem:[%s6481_s6 + $0xf20] sm:$0xff]  ;;  %1273 = vst [vmem:[%s6489_s7 + $0x780] sm:$0xff] %v1272_v48  ;;  %1275 = vst [vmem:[%s6489_s7 + $0x788] sm:$0xff] %v1274_v49  ;;  %v1278_v51 = vld [vmem:[%s6481_s6 + $0xf30] sm:$0xff] }
  0x8f   : > { %1277 = vst [vmem:[%s6489_s7 + $0x790] sm:$0xff] %v1276_v50  ;;  %v1280_v52 = vld [vmem:[%s6481_s6 + $0xf40] sm:$0xff]  ;;  %v1282_v53 = vld [vmem:[%s6481_s6 + $0xf50] sm:$0xff]  ;;  %1279 = vst [vmem:[%s6489_s7 + $0x798] sm:$0xff] %v1278_v51 }
  0x90   : > { %1281 = vst [vmem:[%s6489_s7 + $0x7a0] sm:$0xff] %v1280_v52  ;;  %1283 = vst [vmem:[%s6489_s7 + $0x7a8] sm:$0xff] %v1282_v53  ;;  %v1284_v54 = vld [vmem:[%s6481_s6 + $0xf60] sm:$0xff]  ;;  %v1286_v55 = vld [vmem:[%s6481_s6 + $0xf70] sm:$0xff] }
  0x91   : > { %v1288_v56 = vld [vmem:[%s6481_s6 + $0xf80] sm:$0xff]  ;;  %1285 = vst [vmem:[%s6489_s7 + $0x7b0] sm:$0xff] %v1284_v54  ;;  %1287 = vst [vmem:[%s6489_s7 + $0x7b8] sm:$0xff] %v1286_v55  ;;  %v1290_v57 = vld [vmem:[%s6481_s6 + $0xf90] sm:$0xff] }
  0x92   : > { %1289 = vst [vmem:[%s6489_s7 + $0x7c0] sm:$0xff] %v1288_v56  ;;  %v1292_v58 = vld [vmem:[%s6481_s6 + $0xfa0] sm:$0xff]  ;;  %v1294_v59 = vld [vmem:[%s6481_s6 + $0xfb0] sm:$0xff]  ;;  %1291 = vst [vmem:[%s6489_s7 + $0x7c8] sm:$0xff] %v1290_v57 }
  0x93   : > { %1293 = vst [vmem:[%s6489_s7 + $0x7d0] sm:$0xff] %v1292_v58  ;;  %1295 = vst [vmem:[%s6489_s7 + $0x7d8] sm:$0xff] %v1294_v59  ;;  %v1296_v60 = vld [vmem:[%s6481_s6 + $0xfc0] sm:$0xff]  ;;  %v1298_v61 = vld [vmem:[%s6481_s6 + $0xfd0] sm:$0xff] }
  0x94   : > { %v1300_v62 = vld [vmem:[%s6481_s6 + $0xfe0] sm:$0xff]  ;;  %1297 = vst [vmem:[%s6489_s7 + $0x7e0] sm:$0xff] %v1296_v60  ;;  %1299 = vst [vmem:[%s6489_s7 + $0x7e8] sm:$0xff] %v1298_v61  ;;  %v1302_v63 = vld [vmem:[%s6481_s6 + $0xff0] sm:$0xff] }
  0x95   : > { %1301 = vst [vmem:[%s6489_s7 + $0x7f0] sm:$0xff] %v1300_v62  ;;  %v1304_v0 = vld [vmem:[%s6481_s6 + $0x1000] sm:$0xff]  ;;  %v1306_v1 = vld [vmem:[%s6481_s6 + $0x1010] sm:$0xff]  ;;  %1303 = vst [vmem:[%s6489_s7 + $0x7f8] sm:$0xff] %v1302_v63 }
  0x96   : > { %1305 = vst [vmem:[%s6489_s7 + $0x800] sm:$0xff] %v1304_v0  ;;  %1307 = vst [vmem:[%s6489_s7 + $0x808] sm:$0xff] %v1306_v1  ;;  %v1308_v2 = vld [vmem:[%s6481_s6 + $0x1020] sm:$0xff]  ;;  %v1310_v3 = vld [vmem:[%s6481_s6 + $0x1030] sm:$0xff] }
  0x97   : > { %v1312_v4 = vld [vmem:[%s6481_s6 + $0x1040] sm:$0xff]  ;;  %1309 = vst [vmem:[%s6489_s7 + $0x810] sm:$0xff] %v1308_v2  ;;  %1311 = vst [vmem:[%s6489_s7 + $0x818] sm:$0xff] %v1310_v3  ;;  %v1314_v5 = vld [vmem:[%s6481_s6 + $0x1050] sm:$0xff] }
  0x98   : > { %1313 = vst [vmem:[%s6489_s7 + $0x820] sm:$0xff] %v1312_v4  ;;  %v1316_v6 = vld [vmem:[%s6481_s6 + $0x1060] sm:$0xff]  ;;  %v1318_v7 = vld [vmem:[%s6481_s6 + $0x1070] sm:$0xff]  ;;  %1315 = vst [vmem:[%s6489_s7 + $0x828] sm:$0xff] %v1314_v5 }
  0x99   : > { %1317 = vst [vmem:[%s6489_s7 + $0x830] sm:$0xff] %v1316_v6  ;;  %1319 = vst [vmem:[%s6489_s7 + $0x838] sm:$0xff] %v1318_v7  ;;  %v1320_v8 = vld [vmem:[%s6481_s6 + $0x1080] sm:$0xff]  ;;  %v1322_v9 = vld [vmem:[%s6481_s6 + $0x1090] sm:$0xff] }
  0x9a   : > { %v1324_v10 = vld [vmem:[%s6481_s6 + $0x10a0] sm:$0xff]  ;;  %1321 = vst [vmem:[%s6489_s7 + $0x840] sm:$0xff] %v1320_v8  ;;  %1323 = vst [vmem:[%s6489_s7 + $0x848] sm:$0xff] %v1322_v9  ;;  %v1326_v11 = vld [vmem:[%s6481_s6 + $0x10b0] sm:$0xff] }
  0x9b   : > { %1325 = vst [vmem:[%s6489_s7 + $0x850] sm:$0xff] %v1324_v10  ;;  %v1328_v12 = vld [vmem:[%s6481_s6 + $0x10c0] sm:$0xff]  ;;  %v1330_v13 = vld [vmem:[%s6481_s6 + $0x10d0] sm:$0xff]  ;;  %1327 = vst [vmem:[%s6489_s7 + $0x858] sm:$0xff] %v1326_v11 }
  0x9c   : > { %1329 = vst [vmem:[%s6489_s7 + $0x860] sm:$0xff] %v1328_v12  ;;  %1331 = vst [vmem:[%s6489_s7 + $0x868] sm:$0xff] %v1330_v13  ;;  %v1332_v14 = vld [vmem:[%s6481_s6 + $0x10e0] sm:$0xff]  ;;  %v1334_v15 = vld [vmem:[%s6481_s6 + $0x10f0] sm:$0xff] }
  0x9d   : > { %v1336_v16 = vld [vmem:[%s6481_s6 + $0x1100] sm:$0xff]  ;;  %1333 = vst [vmem:[%s6489_s7 + $0x870] sm:$0xff] %v1332_v14  ;;  %1335 = vst [vmem:[%s6489_s7 + $0x878] sm:$0xff] %v1334_v15  ;;  %v1338_v17 = vld [vmem:[%s6481_s6 + $0x1110] sm:$0xff] }
  0x9e   : > { %1337 = vst [vmem:[%s6489_s7 + $0x880] sm:$0xff] %v1336_v16  ;;  %v1340_v18 = vld [vmem:[%s6481_s6 + $0x1120] sm:$0xff]  ;;  %v1342_v19 = vld [vmem:[%s6481_s6 + $0x1130] sm:$0xff]  ;;  %1339 = vst [vmem:[%s6489_s7 + $0x888] sm:$0xff] %v1338_v17 }
  0x9f   : > { %1341 = vst [vmem:[%s6489_s7 + $0x890] sm:$0xff] %v1340_v18  ;;  %1343 = vst [vmem:[%s6489_s7 + $0x898] sm:$0xff] %v1342_v19  ;;  %v1344_v20 = vld [vmem:[%s6481_s6 + $0x1140] sm:$0xff]  ;;  %v1346_v21 = vld [vmem:[%s6481_s6 + $0x1150] sm:$0xff] }
  0xa0   : > { %v1348_v22 = vld [vmem:[%s6481_s6 + $0x1160] sm:$0xff]  ;;  %1345 = vst [vmem:[%s6489_s7 + $0x8a0] sm:$0xff] %v1344_v20  ;;  %1347 = vst [vmem:[%s6489_s7 + $0x8a8] sm:$0xff] %v1346_v21  ;;  %v1350_v23 = vld [vmem:[%s6481_s6 + $0x1170] sm:$0xff] }
  0xa1   : > { %1349 = vst [vmem:[%s6489_s7 + $0x8b0] sm:$0xff] %v1348_v22  ;;  %v1352_v24 = vld [vmem:[%s6481_s6 + $0x1180] sm:$0xff]  ;;  %v1354_v25 = vld [vmem:[%s6481_s6 + $0x1190] sm:$0xff]  ;;  %1351 = vst [vmem:[%s6489_s7 + $0x8b8] sm:$0xff] %v1350_v23 }
  0xa2   : > { %1353 = vst [vmem:[%s6489_s7 + $0x8c0] sm:$0xff] %v1352_v24  ;;  %1355 = vst [vmem:[%s6489_s7 + $0x8c8] sm:$0xff] %v1354_v25  ;;  %v1356_v26 = vld [vmem:[%s6481_s6 + $0x11a0] sm:$0xff]  ;;  %v1358_v27 = vld [vmem:[%s6481_s6 + $0x11b0] sm:$0xff] }
  0xa3   : > { %v1360_v28 = vld [vmem:[%s6481_s6 + $0x11c0] sm:$0xff]  ;;  %1357 = vst [vmem:[%s6489_s7 + $0x8d0] sm:$0xff] %v1356_v26  ;;  %1359 = vst [vmem:[%s6489_s7 + $0x8d8] sm:$0xff] %v1358_v27  ;;  %v1362_v29 = vld [vmem:[%s6481_s6 + $0x11d0] sm:$0xff] }
  0xa4   : > { %1361 = vst [vmem:[%s6489_s7 + $0x8e0] sm:$0xff] %v1360_v28  ;;  %v1364_v30 = vld [vmem:[%s6481_s6 + $0x11e0] sm:$0xff]  ;;  %v1366_v31 = vld [vmem:[%s6481_s6 + $0x11f0] sm:$0xff]  ;;  %1363 = vst [vmem:[%s6489_s7 + $0x8e8] sm:$0xff] %v1362_v29 }
  0xa5   : > { %1365 = vst [vmem:[%s6489_s7 + $0x8f0] sm:$0xff] %v1364_v30  ;;  %1367 = vst [vmem:[%s6489_s7 + $0x8f8] sm:$0xff] %v1366_v31 }
  0xa6 PF: > { %p5194_p7 = scmp.ge.s32.totalorder %s6396_s21, 1  ;;  %p1388_p8 = scmp.lt.s32.totalorder %s6396_s21, 5 }
  0xa8   : > { %p1389_p9 = pnand %p5194_p7, %p1388_p8 }
  0xaa   : > { %1392 = sbr.rel (%p1389_p9) target bundleno = 1720 (0x6b8), region = 70 }
  0xb1   : > { %s1395_s8 = sand.u32 1, %s6372_s15   ;;  %p1435_p10 = scmp.lt.s32.totalorder %s6380_s17, 1  ;;  %vm5041_vm1 = vcmask 1041408   ;;  %vm5070_vm2 = vcmask 1040384   ;;  %vm5076_vm3 = vcmask 0  }
  0xb2   : > { %s5780_s9 = smul.u32 2304, %s1395_s8  ;;  %s5196_s15 = sshll.u32 %s6384_s18, 1 }
  0xb3   : > { %s9580_s17 = smov (!%p1435_p10, %s6380_s17), 1  ;;  %p1442_p11 = scmp.lt.s32.totalorder %s5196_s15, 3 }
  0xb4   : > { %s7064_s10 = scalar_lea.vmem [#allocation2], %s5780_s9  ;;  %s5781_s11 = smul.u32 24, %s9580_s17 }
  0xb5   : > { %v7067_v32 = vld [vmem:[%s7064_s10 + $0x104] ss:$8 sps:$4 sm:$0xff]   ;;  %v7074_v34 = vld [vmem:[%s7064_s10 + $0x100] ss:$8 sps:$4 sm:$0xff]   ;;  %v7081_v36 = vld [vmem:[%s7064_s10 + $0x114] ss:$8 sps:$4 sm:$0xff]  }
  0xb6   : > { %v7070_v33 = vld [vmem:[%s7064_s10 + $0x4] ss:$8 sps:$4 sm:$0xff]   ;;  %1697 = vmatprep.subr.bf16.mxu0 %v7067_v32  ;;  %v7077_v35 = vld [vmem:[%s7064_s10] ss:$8 sps:$4 sm:$0xff]   ;;  %v7086_v37 = vld [vmem:[%s7064_s10 + $0x14] ss:$8 sps:$4 sm:$0xff]   ;;  %s7244_s14 = scalar_lea.vmem %s9499_s0, %s5781_s11 }
  0xb7   : > { %1905 = vmatprep.subr.bf16.mxu1 %v7070_v33  ;;  %1698 = vmatpush1.bf16.msra.mxu0 %v7074_v34  ;;  %v7089_v38 = vld [vmem:[%s7064_s10 + $0x110] ss:$8 sps:$4 sm:$0xff]   ;;  %v7097_v40 = vld [vmem:[%s7064_s10 + $0x124] ss:$8 sps:$4 sm:$0xff]   ;;  %v7103_v42 = vld [vmem:[%s7064_s10 + $0x120] ss:$8 sps:$4 sm:$0xff]  }
  0xb8   : > { %1906 = vmatpush1.bf16.msra.mxu1 %v7077_v35  ;;  %1699 = vmatprep.subr.bf16.mxu0 %v7081_v36  ;;  %v7093_v39 = vld [vmem:[%s7064_s10 + $0x10] ss:$8 sps:$4 sm:$0xff]   ;;  %v7100_v41 = vld [vmem:[%s7064_s10 + $0x24] ss:$8 sps:$4 sm:$0xff]   ;;  %v7106_v43 = vld [vmem:[%s7064_s10 + $0x20] ss:$8 sps:$4 sm:$0xff]  }
  0xb9   : > { %1907 = vmatprep.subr.bf16.mxu1 %v7086_v37  ;;  %v7111_v44 = vld [vmem:[%s7064_s10 + $0x134] ss:$8 sps:$4 sm:$0xff]   ;;  %v7119_v46 = vld [vmem:[%s7064_s10 + $0x130] ss:$8 sps:$4 sm:$0xff]   ;;  %v7127_v48 = vld [vmem:[%s7064_s10 + $0x144] ss:$8 sps:$4 sm:$0xff]  }
  0xba   : > { %v7116_v45 = vld [vmem:[%s7064_s10 + $0x34] ss:$8 sps:$4 sm:$0xff]   ;;  %v7124_v47 = vld [vmem:[%s7064_s10 + $0x30] ss:$8 sps:$4 sm:$0xff]   ;;  %v7132_v49 = vld [vmem:[%s7064_s10 + $0x44] ss:$8 sps:$4 sm:$0xff]  }
  0xbb   : > { %1700 = vmatpush1.bf16.msra.mxu0 %v7089_v38  ;;  %v7135_v50 = vld [vmem:[%s7064_s10 + $0x140] ss:$8 sps:$4 sm:$0xff]   ;;  %v7143_v52 = vld [vmem:[%s7064_s10 + $0x154] ss:$8 sps:$4 sm:$0xff]   ;;  %v7151_v54 = vld [vmem:[%s7064_s10 + $0x150] ss:$8 sps:$4 sm:$0xff]  }
  0xbc   : > { %1908 = vmatpush1.bf16.msra.mxu1 %v7093_v39  ;;  %1701 = vmatprep.subr.bf16.mxu0 %v7097_v40  ;;  %v7138_v51 = vld [vmem:[%s7064_s10 + $0x40] ss:$8 sps:$4 sm:$0xff]   ;;  %v7148_v53 = vld [vmem:[%s7064_s10 + $0x54] ss:$8 sps:$4 sm:$0xff]   ;;  %v7156_v55 = vld [vmem:[%s7064_s10 + $0x50] ss:$8 sps:$4 sm:$0xff]  }
  0xbd   : > { %1909 = vmatprep.subr.bf16.mxu1 %v7100_v41  ;;  %v7159_v56 = vld [vmem:[%s7064_s10 + $0x164] ss:$8 sps:$4 sm:$0xff]   ;;  %v7167_v58 = vld [vmem:[%s7064_s10 + $0x160] ss:$8 sps:$4 sm:$0xff]   ;;  %v7175_v60 = vld [vmem:[%s7064_s10 + $0x174] ss:$8 sps:$4 sm:$0xff]  }
  0xbe   : > { %v7164_v57 = vld [vmem:[%s7064_s10 + $0x64] ss:$8 sps:$4 sm:$0xff]   ;;  %v7170_v59 = vld [vmem:[%s7064_s10 + $0x60] ss:$8 sps:$4 sm:$0xff]   ;;  %v7180_v61 = vld [vmem:[%s7064_s10 + $0x74] ss:$8 sps:$4 sm:$0xff]  }
  0xbf   : > { %1702 = vmatpush1.bf16.msra.mxu0 %v7103_v42  ;;  %v7183_v62 = vld [vmem:[%s7064_s10 + $0x170] ss:$8 sps:$4 sm:$0xff]   ;;  %v7192_v0 = vld [vmem:[%s7064_s10 + $0x184] ss:$8 sps:$4 sm:$0xff]   ;;  %v7200_v2 = vld [vmem:[%s7064_s10 + $0x180] ss:$8 sps:$4 sm:$0xff]  }
  0xc0   : > { %1910 = vmatpush1.bf16.msra.mxu1 %v7106_v43  ;;  %1703 = vmatprep.subr.bf16.mxu0 %v7111_v44  ;;  %v7189_v63 = vld [vmem:[%s7064_s10 + $0x70] ss:$8 sps:$4 sm:$0xff]   ;;  %v7197_v1 = vld [vmem:[%s7064_s10 + $0x84] ss:$8 sps:$4 sm:$0xff]   ;;  %v7203_v3 = vld [vmem:[%s7064_s10 + $0x80] ss:$8 sps:$4 sm:$0xff]  }
  0xc1   : > { %1911 = vmatprep.subr.bf16.mxu1 %v7116_v45  ;;  %v7211_v4 = vld [vmem:[%s7064_s10 + $0x194] ss:$8 sps:$4 sm:$0xff]   ;;  %v7219_v6 = vld [vmem:[%s7064_s10 + $0x190] ss:$8 sps:$4 sm:$0xff]   ;;  %v7228_v8 = vld [vmem:[%s7064_s10 + $0x1a4] ss:$8 sps:$4 sm:$0xff]  }
  0xc2   : > { %v7216_v5 = vld [vmem:[%s7064_s10 + $0x94] ss:$8 sps:$4 sm:$0xff]   ;;  %v7225_v7 = vld [vmem:[%s7064_s10 + $0x90] ss:$8 sps:$4 sm:$0xff]   ;;  %v7233_v9 = vld [vmem:[%s7064_s10 + $0xa4] ss:$8 sps:$4 sm:$0xff]  }
  0xc3   : > { %1704 = vmatpush1.bf16.msra.mxu0 %v7119_v46  ;;  %v7236_v10 = vld [vmem:[%s7064_s10 + $0x1a0] ss:$8 sps:$4 sm:$0xff]   ;;  %v7249_v12 = vld [vmem:[%s7064_s10 + $0x1b4] ss:$8 sps:$4 sm:$0xff]   ;;  %v7257_v14 = vld [vmem:[%s7064_s10 + $0x1b0] ss:$8 sps:$4 sm:$0xff]  }
  0xc4   : > { %1912 = vmatpush1.bf16.msra.mxu1 %v7124_v47  ;;  %1705 = vmatprep.subr.bf16.mxu0 %v7127_v48  ;;  %v7239_v11 = vld [vmem:[%s7064_s10 + $0xa0] ss:$8 sps:$4 sm:$0xff]   ;;  %v7254_v13 = vld [vmem:[%s7064_s10 + $0xb4] ss:$8 sps:$4 sm:$0xff]   ;;  %v7260_v15 = vld [vmem:[%s7064_s10 + $0xb0] ss:$8 sps:$4 sm:$0xff]  }
  0xc5   : > { %1913 = vmatprep.subr.bf16.mxu1 %v7132_v49  ;;  %9532 = vst [vmem:[#allocation3_spill] sm:$0xff] %v7260_v15  ;;  %v1492_v16 = vld [vmem:[%s7244_s14] sm:$0x88]  ;;  %v1491_v20 = vld [vmem:[%s7244_s14] sm:$0x11]  ;;  %s9582_s15 = smov (!%p1442_p11, %s5196_s15), 3 }
  0xc6   : > { %v7264_v17 = vld [vmem:[%s7064_s10 + $0x1c4] ss:$8 sps:$4 sm:$0xff]   ;;  %v5232_v19 = vcombine.high %v1492_v16, %v1492_v16  ;;  %v5266_v21 = vcombine.high %v1491_v20, %v1491_v20  ;;  %v7275_v23 = vld [vmem:[%s7064_s10 + $0x1c0] ss:$8 sps:$4 sm:$0xff]   ;;  %v7281_v25 = vld [vmem:[%s7064_s10 + $0x1d4] ss:$8 sps:$4 sm:$0xff]   ;;  %s1444_s27 = scalar_lea.vmem %s9501_s2, %s9582_s15  ;;  %s1449_s30 = scalar_lea.vmem %s9502_s3, %s9582_s15 }
  0xc7   : > { %1706 = vmatpush1.bf16.msra.mxu0 %v7135_v50  ;;  %9533 = vst [vmem:[#allocation4_spill] sm:$0xff] %v7264_v17  ;;  %v7267_v18 = vld [vmem:[%s7064_s10 + $0xc4] ss:$8 sps:$4 sm:$0xff]   ;;  %9535 = vst [vmem:[#allocation6_spill] sm:$0xff] %v7275_v23  ;;  %v7278_v24 = vld [vmem:[%s7064_s10 + $0xc0] ss:$8 sps:$4 sm:$0xff]  }
  0xc8   : > { %1914 = vmatpush1.bf16.msra.mxu1 %v7138_v51  ;;  %1707 = vmatprep.subr.bf16.mxu0 %v7143_v52  ;;  %9534 = vst [vmem:[#allocation5_spill] sm:$0xff] %v7267_v18  ;;  %v1534_v22 = vrot.slane %v5232_v19, 3  ;;  %9536 = vst [vmem:[#allocation7_spill] sm:$0xff] %v7278_v24  ;;  %v7284_v26 = vld [vmem:[%s7064_s10 + $0xd4] ss:$8 sps:$4 sm:$0xff]   ;;  %p1451_p12 = scmp.lt.s32.totalorder %s6384_s18, 1 }
  0xc9   : > { %1915 = vmatprep.subr.bf16.mxu1 %v7148_v53  ;;  %1937 = vmatprep.mubr.bf16.mxu1 %v5266_v21  ;;  %9537 = vst [vmem:[#allocation8_spill] sm:$0xff] %v7281_v25  ;;  %9538 = vst [vmem:[#allocation9_spill] sm:$0xff] %v7284_v26  ;;  %v7291_v27 = vld [vmem:[%s7244_s14] sm:$0x33]  ;;  %v7294_v28 = vld [vmem:[%s7064_s10 + $0x1d0] ss:$8 sps:$4 sm:$0xff]  }
  0xca   : > { %1729 = vmatprep.mubr.bf16.mxu0 %v1534_v22  ;;  %9539 = vst [vmem:[#allocation10_spill] sm:$0xff] %v7291_v27  ;;  %9540 = vst [vmem:[#allocation11_spill] sm:$0xff] %v7294_v28  ;;  %v7297_v29 = vld [vmem:[%s7064_s10 + $0xd0] ss:$8 sps:$4 sm:$0xff]   ;;  %v7300_v30 = vld [vmem:[%s7064_s10 + $0x1e4] ss:$8 sps:$4 sm:$0xff]  }
  0xcb   : > { %1708 = vmatpush1.bf16.msra.mxu0 %v7151_v54  ;;  %9541 = vst [vmem:[#allocation12_spill] sm:$0xff] %v7297_v29  ;;  %9542 = vst [vmem:[#allocation13_spill] sm:$0xff] %v7300_v30  ;;  %v7303_v31 = vld [vmem:[%s7064_s10 + $0xe4] ss:$8 sps:$4 sm:$0xff]   ;;  %v7310_v19 = vld [vmem:[%s7064_s10 + $0x1e0] ss:$8 sps:$4 sm:$0xff]  }
  0xcc   : > { %1916 = vmatpush1.bf16.msra.mxu1 %v7156_v55  ;;  %1709 = vmatprep.subr.bf16.mxu0 %v7159_v56  ;;  %9543 = vst [vmem:[#allocation14_spill] sm:$0xff] %v7310_v19  ;;  %v7313_v21 = vld [vmem:[%s7064_s10 + $0xe0] ss:$8 sps:$4 sm:$0xff]   ;;  %s9584_s18 = smov (!%p1451_p12, %s6384_s18), 1 }
  0xcd   : > { %1917 = vmatprep.subr.bf16.mxu1 %v7164_v57  ;;  %s5198_s5 = sshll.u32 %s9584_s18, 1 }
  0xce   : > { %s1456_s6 = sadd.s32 %s5198_s5, %s9580_s17 }
  0xcf   : > { %1710 = vmatpush1.bf16.msra.mxu0 %v7167_v58  ;;  %s1457_s9 = scalar_lea.vmem %s9503_s4, %s1456_s6 }
  0xd0   : > { %1918 = vmatpush1.bf16.msra.mxu1 %v7170_v59  ;;  %1711 = vmatprep.subr.bf16.mxu0 %v7175_v60 }
  0xd1   : > { %1919 = vmatprep.subr.bf16.mxu1 %v7180_v61 }
  0xd3   : > { %1712 = vmatpush1.bf16.msra.mxu0 %v7183_v62 }
  0xd4   : > { %1920 = vmatpush1.bf16.msra.mxu1 %v7189_v63  ;;  %1713 = vmatprep.subr.bf16.mxu0 %v7192_v0 }
  0xd5   : > { %1921 = vmatprep.subr.bf16.mxu1 %v7197_v1 }
  0xd7   : > { %1714 = vmatpush1.bf16.msra.mxu0 %v7200_v2 }
  0xd8   : > { %1922 = vmatpush1.bf16.msra.mxu1 %v7203_v3  ;;  %1715 = vmatprep.subr.bf16.mxu0 %v7211_v4 }
  0xd9   : > { %1923 = vmatprep.subr.bf16.mxu1 %v7216_v5 }
  0xdb   : > { %1716 = vmatpush1.bf16.msra.mxu0 %v7219_v6 }
  0xdc   : > { %1924 = vmatpush1.bf16.msra.mxu1 %v7225_v7  ;;  %1717 = vmatprep.subr.bf16.mxu0 %v7228_v8 }
  0xdd   : > { %1925 = vmatprep.subr.bf16.mxu1 %v7233_v9 }
  0xdf   : > { %1718 = vmatpush1.bf16.msra.mxu0 %v7236_v10 }
  0xe0   : > { %1926 = vmatpush1.bf16.msra.mxu1 %v7239_v11  ;;  %1719 = vmatprep.subr.bf16.mxu0 %v7249_v12 }
  0xe1   : > { %1927 = vmatprep.subr.bf16.mxu1 %v7254_v13 }
  0xe3   : > { %1720 = vmatpush1.bf16.msra.mxu0 %v7257_v14 }
  0xe4   : > { %1928 = vmatpush1.bf16.msra.mxu1 %v7260_v15  ;;  %1721 = vmatprep.subr.bf16.mxu0 %v7264_v17  ;;  %v7318_v17 = vld [vmem:[%s7064_s10 + $0x1f4] ss:$8 sps:$4 sm:$0xff]  }
  0xe5   : > { %1929 = vmatprep.subr.bf16.mxu1 %v7267_v18  ;;  %v5300_v18 = vcombine.high %v7291_v27, %v7291_v27  ;;  %9544 = vst [vmem:[#allocation15_spill] sm:$0xff] %v7318_v17  ;;  %v7321_v15 = vld [vmem:[%s7064_s10 + $0xf4] ss:$8 sps:$4 sm:$0xff]   ;;  %v5265_v27 = vcombine.low %v1491_v20, %v1491_v20 }
  0xe6   : > { %9545 = vst [vmem:[#allocation16_spill] sm:$0xff] %v7321_v15 }
  0xe7   : > { %1722 = vmatpush1.bf16.msra.mxu0 %v7275_v23  ;;  %v5231_v23 = vcombine.low %v1492_v16, %v1492_v16 }
  0xe8   : > { %1930 = vmatpush1.bf16.msra.mxu1 %v7278_v24  ;;  %1723 = vmatprep.subr.bf16.mxu0 %v7281_v25  ;;  %v7331_v25 = vld [vmem:[%s7064_s10 + $0xf0] ss:$8 sps:$4 sm:$0xff]   ;;  %v1962_v24 = vshll.u32 %v5300_v18, 16 }
  0xe9   : > { %1931 = vmatprep.subr.bf16.mxu1 %v7284_v26  ;;  %v7328_v26 = vld [vmem:[%s7064_s10 + $0x1f0] ss:$8 sps:$4 sm:$0xff]  }
  0xeb   : > { %1724 = vmatpush1.bf16.msra.mxu0 %v7294_v28  ;;  %v1960_v28 = vshrl.u32 %v5300_v18, 16  ;;  %v9550_v18 = vld [vmem:[#allocation10_spill] sm:$0xff] }
  0xec   : > { %1932 = vmatpush1.bf16.msra.mxu1 %v7297_v29  ;;  %1725 = vmatprep.subr.bf16.mxu0 %v7300_v30  ;;  %v1964_v29 = vrot.slane %v1962_v24, 1  ;;  %v7337_v30 = vrot.slane %v5231_v23, 3  ;;  %v5299_v20 = vcombine.low %v9550_v18, %v9550_v18  ;;  %v9552_v23 = vld [vmem:[#allocation7_spill] sm:$0xff]  ;;  %v9553_v24 = vld [vmem:[#allocation8_spill] sm:$0xff] }
  0xed   : > { %1933 = vmatprep.subr.bf16.mxu1 %v7303_v31 }
  0xee   : > { %v7343_v16 = vor.u32 %v1964_v29, %v1960_v28  ;;  %v1955_v28 = vshll.u32 %v5299_v20, 16  ;;  %v9555_v29 = vld [vmem:[#allocation11_spill] sm:$0xff] }
  0xef   : > { %1726 = vmatpush1.bf16.msra.mxu0 %v7310_v19 }
  0xf0   : > { %1934 = vmatpush1.bf16.msra.mxu1 %v7313_v21  ;;  %1727 = vmatprep.subr.bf16.mxu0 %v7318_v17  ;;  %9546 = vst [vmem:[#allocation17_spill] sm:$0xff] %v7343_v16  ;;  %v1957_v18 = vrot.slane %v1955_v28, 1 }
  0xf1   : > { %1935 = vmatprep.subr.bf16.mxu1 %v7321_v15 }
  0xf3   : > { %1728 = vmatpush1.bf16.msra.mxu0 %v7328_v26 }
  0xf4   : > { %1936 = vmatpush1.bf16.msra.mxu1 %v7331_v25  ;;  %1968 = vmatprep.subr.bf16.mxu0 %v7067_v32  ;;  %v9547_v32 = vld [vmem:[#allocation3_spill] sm:$0xff] }
  0xf5   : > { %2009 = vmatprep.subr.bf16.mxu1 %v7070_v33 }
  0xf6   : > { %1730 = vmatmul.mubr.bf16.vlgmr.msra.gmra.mrb[0].mxu0 %v7337_v30 }
  0xf7   : > { %1938 = vmatmul.mubr.bf16.vlgmr.msra.gmra.mrb[0].mxu1 %v5265_v27  ;;  %1969 = vmatpush1.bf16.msra.mxu0 %v7074_v34  ;;  %v9548_v34 = vld [vmem:[#allocation4_spill] sm:$0xff]  ;;  %v9554_v27 = vld [vmem:[#allocation9_spill] sm:$0xff] }
  0xf8   : > { %2010 = vmatpush1.bf16.msra.mxu1 %v7077_v35  ;;  %1970 = vmatprep.subr.bf16.mxu0 %v7081_v36  ;;  %v9549_v35 = vld [vmem:[#allocation5_spill] sm:$0xff] }
  0xf9   : > { %2011 = vmatprep.subr.bf16.mxu1 %v7086_v37  ;;  %2000 = vmatprep.mubr.bf16.mxu0 %v7343_v16  ;;  %v9556_v16 = vld [vmem:[#allocation12_spill] sm:$0xff] }
  0xfa   : > { %2041 = vmatprep.mubr.bf16.mxu1 %v1534_v22  ;;  %v9551_v22 = vld [vmem:[#allocation6_spill] sm:$0xff] }
  0xfb   : > { %1971 = vmatpush1.bf16.msra.mxu0 %v7089_v38 }
  0xfc   : > { %2012 = vmatpush1.bf16.msra.mxu1 %v7093_v39  ;;  %1972 = vmatprep.subr.bf16.mxu0 %v7097_v40 }
  0xfd   : > { %2013 = vmatprep.subr.bf16.mxu1 %v7100_v41 }
  0xff   : > { %1973 = vmatpush1.bf16.msra.mxu0 %v7103_v42 }
 0x100   : > { %2014 = vmatpush1.bf16.msra.mxu1 %v7106_v43  ;;  %1974 = vmatprep.subr.bf16.mxu0 %v7111_v44 }
 0x101   : > { %2015 = vmatprep.subr.bf16.mxu1 %v7116_v45 }
 0x103   : > { %1975 = vmatpush1.bf16.msra.mxu0 %v7119_v46 }
 0x104   : > { %2016 = vmatpush1.bf16.msra.mxu1 %v7124_v47  ;;  %1976 = vmatprep.subr.bf16.mxu0 %v7127_v48 }
 0x105   : > { %2017 = vmatprep.subr.bf16.mxu1 %v7132_v49 }
 0x107   : > { %1977 = vmatpush1.bf16.msra.mxu0 %v7135_v50 }
 0x108   : > { %2018 = vmatpush1.bf16.msra.mxu1 %v7138_v51  ;;  %1978 = vmatprep.subr.bf16.mxu0 %v7143_v52 }
 0x109   : > { %2019 = vmatprep.subr.bf16.mxu1 %v7148_v53 }
 0x10b   : > { %1979 = vmatpush1.bf16.msra.mxu0 %v7151_v54 }
 0x10c   : > { %2020 = vmatpush1.bf16.msra.mxu1 %v7156_v55  ;;  %1980 = vmatprep.subr.bf16.mxu0 %v7159_v56 }
 0x10d   : > { %2021 = vmatprep.subr.bf16.mxu1 %v7164_v57 }
 0x10f   : > { %1981 = vmatpush1.bf16.msra.mxu0 %v7167_v58 }
 0x110   : > { %2022 = vmatpush1.bf16.msra.mxu1 %v7170_v59  ;;  %1982 = vmatprep.subr.bf16.mxu0 %v7175_v60 }
 0x111   : > { %2023 = vmatprep.subr.bf16.mxu1 %v7180_v61 }
 0x113   : > { %1983 = vmatpush1.bf16.msra.mxu0 %v7183_v62 }
 0x114   : > { %2024 = vmatpush1.bf16.msra.mxu1 %v7189_v63  ;;  %1984 = vmatprep.subr.bf16.mxu0 %v7192_v0 }
 0x115   : > { %2025 = vmatprep.subr.bf16.mxu1 %v7197_v1 }
 0x117   : > { %1985 = vmatpush1.bf16.msra.mxu0 %v7200_v2 }
 0x118   : > { %2026 = vmatpush1.bf16.msra.mxu1 %v7203_v3  ;;  %1986 = vmatprep.subr.bf16.mxu0 %v7211_v4 }
 0x119   : > { %2027 = vmatprep.subr.bf16.mxu1 %v7216_v5 }
 0x11b   : > { %1987 = vmatpush1.bf16.msra.mxu0 %v7219_v6 }
 0x11c   : > { %2028 = vmatpush1.bf16.msra.mxu1 %v7225_v7  ;;  %1988 = vmatprep.subr.bf16.mxu0 %v7228_v8 }
 0x11d   : > { %2029 = vmatprep.subr.bf16.mxu1 %v7233_v9 }
 0x11f   : > { %1989 = vmatpush1.bf16.msra.mxu0 %v7236_v10 }
 0x120   : > { %2030 = vmatpush1.bf16.msra.mxu1 %v7239_v11  ;;  %1990 = vmatprep.subr.bf16.mxu0 %v7249_v12 }
 0x121   : > { %2031 = vmatprep.subr.bf16.mxu1 %v7254_v13 }
 0x123   : > { %1991 = vmatpush1.bf16.msra.mxu0 %v7257_v14 }
 0x124   : > { %2032 = vmatpush1.bf16.msra.mxu1 %v9547_v32  ;;  %1992 = vmatprep.subr.bf16.mxu0 %v9548_v34  ;;  %v9557_v32 = vld [vmem:[#allocation13_spill] sm:$0xff] }
 0x125   : > { %2033 = vmatprep.subr.bf16.mxu1 %v9549_v35  ;;  %v1953_v35 = vshrl.u32 %v5299_v20, 16  ;;  %v7406_v34 = vld [vmem:[%s7244_s14 + $0x10] sm:$0x22] }
 0x127   : > { %1993 = vmatpush1.bf16.msra.mxu0 %v9551_v22  ;;  %v7409_v22 = vld [vmem:[%s7244_s14 + $0x8] sm:$0x44]  ;;  %v7419_v28 = vor.u32 %v1957_v18, %v1953_v35 }
 0x128   : > { %2034 = vmatpush1.bf16.msra.mxu1 %v9552_v23  ;;  %1994 = vmatprep.subr.bf16.mxu0 %v9553_v24  ;;  %v5304_v20 = vcombine.high %v7409_v22, %v7409_v22  ;;  %v7435_v35 = vld [vmem:[%s7064_s10 + $0x100] ss:$8 sps:$4 sm:$0xff]  }
 0x129   : > { %2035 = vmatprep.subr.bf16.mxu1 %v9554_v27  ;;  %v7439_v18 = vld [vmem:[%s7064_s10] ss:$8 sps:$4 sm:$0xff]  }
 0x12b   : > { %1995 = vmatpush1.bf16.msra.mxu0 %v9555_v29 }
 0x12c   : > { %2036 = vmatpush1.bf16.msra.mxu1 %v9556_v16  ;;  %1996 = vmatprep.subr.bf16.mxu0 %v9557_v32  ;;  %v5302_v32 = vcombine.high %v7406_v34, %v7406_v34 }
 0x12d   : > { %2037 = vmatprep.subr.bf16.mxu1 %v7303_v31 }
 0x12f   : > { %1997 = vmatpush1.bf16.msra.mxu0 %v7310_v19  ;;  %v7424_v19 = vld [vmem:[%s7064_s10 + $0x104] ss:$8 sps:$4 sm:$0xff]  }
 0x130   : > { %2038 = vmatpush1.bf16.msra.mxu1 %v7313_v21  ;;  %1998 = vmatprep.subr.bf16.mxu0 %v7318_v17  ;;  %v7428_v17 = vrot.slane %v5302_v32, 1  ;;  %v6325_v32 = vld [vmem:[%s7064_s10 + $0x54] ss:$8 sps:$4 sm:$0xff]  }
 0x131   : > { %2039 = vmatprep.subr.bf16.mxu1 %v7321_v15  ;;  %v7430_v15 = vrot.slane %v5304_v20, 2  ;;  %v6328_v20 = vld [vmem:[%s7064_s10 + $0x164] ss:$8 sps:$4 sm:$0xff]  }
 0x133   : > { %1999 = vmatpush1.bf16.msra.mxu0 %v7328_v26 }
 0x134   : > { %2040 = vmatpush1.bf16.msra.mxu1 %v7331_v25  ;;  %2059 = vmatprep.subr.bf16.mxu0 %v7424_v19 }
 0x135   : > { %2109 = vmatprep.subr.bf16.mxu1 %v7070_v33  ;;  %v9558_v33 = vld [vmem:[#allocation3_spill] sm:$0xff] }
 0x136   : > { %2001 = vmatmul.mubr.bf16.vlgmr.msra.gmra.mrb[4].mxu0 %v7419_v28 }
 0x137   : > { %2042 = vmatmul.mubr.bf16.vlgmr.msra.gmra.mrb[4].mxu1 %v7337_v30  ;;  %2060 = vmatpush1.bf16.msra.mxu0 %v7435_v35  ;;  %v6323_v30 = vld [vmem:[%s7064_s10 + $0x40] ss:$8 sps:$4 sm:$0xff]  }
 0x138   : > { %2110 = vmatpush1.bf16.msra.mxu1 %v7439_v18  ;;  %2061 = vmatprep.subr.bf16.mxu0 %v7081_v36  ;;  %v9559_v36 = vld [vmem:[#allocation4_spill] sm:$0xff] }
 0x139   : > { %2111 = vmatprep.subr.bf16.mxu1 %v7086_v37  ;;  %2091 = vmatprep.mubr.bf16.mxu0 %v7428_v17  ;;  %v9560_v37 = vld [vmem:[#allocation5_spill] sm:$0xff] }
 0x13a   : > { %2141 = vmatprep.mubr.bf16.mxu1 %v7430_v15 }
 0x13b   : > { %2062 = vmatpush1.bf16.msra.mxu0 %v7089_v38  ;;  %v7491_v38 = vld [vmem:[%s7244_s14 + $0x8] sm:$0xcc] }
 0x13c   : > { %2112 = vmatpush1.bf16.msra.mxu1 %v7093_v39  ;;  %2063 = vmatprep.subr.bf16.mxu0 %v7097_v40  ;;  %v9561_v39 = vld [vmem:[#allocation6_spill] sm:$0xff]  ;;  %v5306_v40 = vcombine.high %v7491_v38, %v7491_v38 }
 0x13d   : > { %2113 = vmatprep.subr.bf16.mxu1 %v7100_v41  ;;  %v9562_v41 = vld [vmem:[#allocation13_spill] sm:$0xff] }
 0x13f   : > { %2064 = vmatpush1.bf16.msra.mxu0 %v7103_v42  ;;  %v2165_v42 = vshrl.u32 %v5306_v40, 16 }
 0x140   : > { %2114 = vmatpush1.bf16.msra.mxu1 %v7106_v43  ;;  %2065 = vmatprep.subr.bf16.mxu0 %v7111_v44  ;;  %v2168_v43 = vshll.u32 %v5306_v40, 16  ;;  %v5303_v44 = vcombine.low %v7409_v22, %v7409_v22  ;;  %v6327_v22 = vld [vmem:[%s7064_s10 + $0x50] ss:$8 sps:$4 sm:$0xff]   ;;  %v6331_v40 = vld [vmem:[%s7064_s10 + $0x60] ss:$8 sps:$4 sm:$0xff]  }
 0x141   : > { %2115 = vmatprep.subr.bf16.mxu1 %v7116_v45  ;;  %v5301_v45 = vcombine.low %v7406_v34, %v7406_v34  ;;  %v6326_v34 = vld [vmem:[%s7064_s10 + $0x150] ss:$8 sps:$4 sm:$0xff]  }
 0x143   : > { %2066 = vmatpush1.bf16.msra.mxu0 %v7119_v46  ;;  %v9563_v46 = vld [vmem:[#allocation14_spill] sm:$0xff] }
 0x144   : > { %2116 = vmatpush1.bf16.msra.mxu1 %v7124_v47  ;;  %2067 = vmatprep.subr.bf16.mxu0 %v7127_v48  ;;  %v9564_v47 = vld [vmem:[#allocation15_spill] sm:$0xff]  ;;  %v9565_v48 = vld [vmem:[#allocation16_spill] sm:$0xff] }
 0x145   : > { %2117 = vmatprep.subr.bf16.mxu1 %v7132_v49  ;;  %v2167_v49 = vrot.slane %v2165_v42, 2  ;;  %v6332_v42 = vld [vmem:[%s7064_s10 + $0x174] ss:$8 sps:$4 sm:$0xff]  }
 0x147   : > { %2068 = vmatpush1.bf16.msra.mxu0 %v7135_v50  ;;  %v2170_v50 = vrot.slane %v2168_v43, 3  ;;  %v6333_v43 = vld [vmem:[%s7064_s10 + $0x74] ss:$8 sps:$4 sm:$0xff]  }
 0x148   : > { %2118 = vmatpush1.bf16.msra.mxu1 %v7138_v51  ;;  %2069 = vmatprep.subr.bf16.mxu0 %v7143_v52  ;;  %v7511_v51 = vrot.slane %v5303_v44, 2  ;;  %v7513_v52 = vrot.slane %v5301_v45, 1  ;;  %v6334_v44 = vld [vmem:[%s7064_s10 + $0x170] ss:$8 sps:$4 sm:$0xff]  }
 0x149   : > { %2119 = vmatprep.subr.bf16.mxu1 %v7148_v53  ;;  %v6307_v53 = vld [vmem:[%s7064_s10 + $0x4] ss:$8 sps:$4 sm:$0xff]   ;;  %v6335_v45 = vld [vmem:[%s7064_s10 + $0x70] ss:$8 sps:$4 sm:$0xff]  }
 0x14b   : > { %2070 = vmatpush1.bf16.msra.mxu0 %v7151_v54  ;;  %v7519_v54 = vor.u32 %v2170_v50, %v2167_v49  ;;  %v6336_v49 = vld [vmem:[%s7064_s10 + $0x184] ss:$8 sps:$4 sm:$0xff]  }
 0x14c   : > { %2120 = vmatpush1.bf16.msra.mxu1 %v7156_v55  ;;  %2071 = vmatprep.subr.bf16.mxu0 %v7159_v56  ;;  %v6308_v55 = vld [vmem:[%s7064_s10 + $0x114] ss:$8 sps:$4 sm:$0xff]   ;;  %v6337_v50 = vld [vmem:[%s7064_s10 + $0x84] ss:$8 sps:$4 sm:$0xff]  }
 0x14d   : > { %2121 = vmatprep.subr.bf16.mxu1 %v7164_v57  ;;  %v6309_v56 = vld [vmem:[%s7064_s10 + $0x14] ss:$8 sps:$4 sm:$0xff]   ;;  %v6310_v57 = vld [vmem:[%s7064_s10 + $0x110] ss:$8 sps:$4 sm:$0xff]  }
 0x14f   : > { %2072 = vmatpush1.bf16.msra.mxu0 %v7167_v58  ;;  %v6311_v58 = vld [vmem:[%s7064_s10 + $0x10] ss:$8 sps:$4 sm:$0xff]  }
 0x150   : > { %2122 = vmatpush1.bf16.msra.mxu1 %v7170_v59  ;;  %2073 = vmatprep.subr.bf16.mxu0 %v7175_v60  ;;  %v6312_v59 = vld [vmem:[%s7064_s10 + $0x124] ss:$8 sps:$4 sm:$0xff]  }
 0x151   : > { %2123 = vmatprep.subr.bf16.mxu1 %v7180_v61  ;;  %v6313_v60 = vld [vmem:[%s7064_s10 + $0x24] ss:$8 sps:$4 sm:$0xff]   ;;  %v6314_v61 = vld [vmem:[%s7064_s10 + $0x120] ss:$8 sps:$4 sm:$0xff]  }
 0x153   : > { %2074 = vmatpush1.bf16.msra.mxu0 %v7183_v62  ;;  %v6315_v62 = vld [vmem:[%s7064_s10 + $0x20] ss:$8 sps:$4 sm:$0xff]  }
 0x154   : > { %2124 = vmatpush1.bf16.msra.mxu1 %v7189_v63  ;;  %2075 = vmatprep.subr.bf16.mxu0 %v7192_v0  ;;  %v6316_v63 = vld [vmem:[%s7064_s10 + $0x134] ss:$8 sps:$4 sm:$0xff]  }
 0x155   : > { %2125 = vmatprep.subr.bf16.mxu1 %v7197_v1  ;;  %v6317_v0 = vld [vmem:[%s7064_s10 + $0x34] ss:$8 sps:$4 sm:$0xff]   ;;  %v6318_v1 = vld [vmem:[%s7064_s10 + $0x130] ss:$8 sps:$4 sm:$0xff]  }
 0x157   : > { %2076 = vmatpush1.bf16.msra.mxu0 %v7200_v2  ;;  %v6319_v2 = vld [vmem:[%s7064_s10 + $0x30] ss:$8 sps:$4 sm:$0xff]  }
 0x158   : > { %2126 = vmatpush1.bf16.msra.mxu1 %v7203_v3  ;;  %2077 = vmatprep.subr.bf16.mxu0 %v7211_v4  ;;  %v6320_v3 = vld [vmem:[%s7064_s10 + $0x144] ss:$8 sps:$4 sm:$0xff]  }
 0x159   : > { %2127 = vmatprep.subr.bf16.mxu1 %v7216_v5  ;;  %v6321_v4 = vld [vmem:[%s7064_s10 + $0x44] ss:$8 sps:$4 sm:$0xff]   ;;  %v6322_v5 = vld [vmem:[%s7064_s10 + $0x140] ss:$8 sps:$4 sm:$0xff]  }
 0x15b   : > { %2078 = vmatpush1.bf16.msra.mxu0 %v7219_v6 }
 0x15c   : > { %2128 = vmatpush1.bf16.msra.mxu1 %v7225_v7  ;;  %2079 = vmatprep.subr.bf16.mxu0 %v7228_v8 }
 0x15d   : > { %2129 = vmatprep.subr.bf16.mxu1 %v7233_v9 }
 0x15f   : > { %2080 = vmatpush1.bf16.msra.mxu0 %v7236_v10 }
 0x160   : > { %2130 = vmatpush1.bf16.msra.mxu1 %v7239_v11  ;;  %2081 = vmatprep.subr.bf16.mxu0 %v7249_v12 }
 0x161   : > { %2131 = vmatprep.subr.bf16.mxu1 %v7254_v13 }
 0x163   : > { %2082 = vmatpush1.bf16.msra.mxu0 %v7257_v14 }
 0x164   : > { %2132 = vmatpush1.bf16.msra.mxu1 %v9558_v33  ;;  %2083 = vmatprep.subr.bf16.mxu0 %v9559_v36 }
 0x165   : > { %2133 = vmatprep.subr.bf16.mxu1 %v9560_v37 }
 0x167   : > { %2084 = vmatpush1.bf16.msra.mxu0 %v9561_v39 }
 0x168   : > { %2134 = vmatpush1.bf16.msra.mxu1 %v9552_v23  ;;  %2085 = vmatprep.subr.bf16.mxu0 %v9553_v24 }
 0x169   : > { %2135 = vmatprep.subr.bf16.mxu1 %v9554_v27 }
 0x16b   : > { %2086 = vmatpush1.bf16.msra.mxu0 %v9555_v29 }
 0x16c   : > { %2136 = vmatpush1.bf16.msra.mxu1 %v9556_v16  ;;  %2087 = vmatprep.subr.bf16.mxu0 %v9562_v41 }
 0x16d   : > { %2137 = vmatprep.subr.bf16.mxu1 %v7303_v31 }
 0x16f   : > { %2088 = vmatpush1.bf16.msra.mxu0 %v9563_v46 }
 0x170   : > { %2138 = vmatpush1.bf16.msra.mxu1 %v7313_v21  ;;  %2089 = vmatprep.subr.bf16.mxu0 %v9564_v47 }
 0x171   : > { %2139 = vmatprep.subr.bf16.mxu1 %v9565_v48 }
 0x173   : > { %2090 = vmatpush1.bf16.msra.mxu0 %v7328_v26 }
 0x174   : > { %2140 = vmatpush1.bf16.msra.mxu1 %v7331_v25  ;;  %2174 = vmatprep.subr.bf16.mxu0 %v7424_v19  ;;  %v6324_v19 = vld [vmem:[%s7064_s10 + $0x154] ss:$8 sps:$4 sm:$0xff]  }
 0x175   : > { %2215 = vmatprep.subr.bf16.mxu1 %v6307_v53  ;;  %v6338_v53 = vld [vmem:[%s7064_s10 + $0x180] ss:$8 sps:$4 sm:$0xff]  }
 0x176   : > { %2092 = vmatmul.mubr.bf16.vlgmr.msra.gmra.mrb[8].mxu0 %v7513_v52 }
 0x177   : > { %2142 = vmatmul.mubr.bf16.vlgmr.msra.gmra.mrb[8].mxu1 %v7511_v51  ;;  %2175 = vmatpush1.bf16.msra.mxu0 %v7435_v35  ;;  %v6329_v35 = vld [vmem:[%s7064_s10 + $0x64] ss:$8 sps:$4 sm:$0xff]  }
 0x178   : > { %2216 = vmatpush1.bf16.msra.mxu1 %v7439_v18  ;;  %2176 = vmatprep.subr.bf16.mxu0 %v6308_v55  ;;  %v6330_v18 = vld [vmem:[%s7064_s10 + $0x160] ss:$8 sps:$4 sm:$0xff]  }
 0x179   : > { %2217 = vmatprep.subr.bf16.mxu1 %v6309_v56  ;;  %2206 = vmatprep.mubr.bf16.mxu0 %v7519_v54  ;;  %v6339_v55 = vld [vmem:[%s7064_s10 + $0x80] ss:$8 sps:$4 sm:$0xff]   ;;  %v6340_v56 = vld [vmem:[%s7064_s10 + $0x194] ss:$8 sps:$4 sm:$0xff]  }
 0x17a   : > { %2247 = vmatprep.mubr.bf16.mxu1 %v7428_v17 }
 0x17b   : > { %2177 = vmatpush1.bf16.msra.mxu0 %v6310_v57  ;;  %v6341_v57 = vld [vmem:[%s7064_s10 + $0x94] ss:$8 sps:$4 sm:$0xff]  }
 0x17c   : > { %2218 = vmatpush1.bf16.msra.mxu1 %v6311_v58  ;;  %2178 = vmatprep.subr.bf16.mxu0 %v6312_v59  ;;  %v7661_v58 = vld [vmem:[%s7064_s10 + $0x264] ss:$8 sps:$4 sm:$0xff]  }
 0x17d   : > { %2219 = vmatprep.subr.bf16.mxu1 %v6313_v60 }
 0x17f   : > { %2179 = vmatpush1.bf16.msra.mxu0 %v6314_v61 }
 0x180   : > { %2220 = vmatpush1.bf16.msra.mxu1 %v6315_v62  ;;  %2180 = vmatprep.subr.bf16.mxu0 %v6316_v63 }
 0x181   : > { %2221 = vmatprep.subr.bf16.mxu1 %v6317_v0 }
 0x183   : > { %2181 = vmatpush1.bf16.msra.mxu0 %v6318_v1 }
 0x184   : > { %2222 = vmatpush1.bf16.msra.mxu1 %v6319_v2  ;;  %2182 = vmatprep.subr.bf16.mxu0 %v6320_v3  ;;  %v7670_v3 = vld [vmem:[%s7064_s10 + $0x260] ss:$8 sps:$4 sm:$0xff]  }
 0x185   : > { %2223 = vmatprep.subr.bf16.mxu1 %v6321_v4 }
 0x187   : > { %2183 = vmatpush1.bf16.msra.mxu0 %v6322_v5 }
 0x188   : > { %2224 = vmatpush1.bf16.msra.mxu1 %v6323_v30  ;;  %2184 = vmatprep.subr.bf16.mxu0 %v6324_v19  ;;  %v7675_v30 = vld [vmem:[%s7064_s10 + $0x274] ss:$8 sps:$4 sm:$0xff]   ;;  %v7680_v19 = vld [vmem:[%s7064_s10 + $0x270] ss:$8 sps:$4 sm:$0xff]  }
 0x189   : > { %2225 = vmatprep.subr.bf16.mxu1 %v6325_v32  ;;  %v7685_v32 = vld [vmem:[%s7064_s10 + $0x284] ss:$8 sps:$4 sm:$0xff]  }
 0x18b   : > { %2185 = vmatpush1.bf16.msra.mxu0 %v6326_v34  ;;  %v7690_v34 = vld [vmem:[%s7064_s10 + $0x280] ss:$8 sps:$4 sm:$0xff]  }
 0x18c   : > { %2226 = vmatpush1.bf16.msra.mxu1 %v6327_v22  ;;  %2186 = vmatprep.subr.bf16.mxu0 %v6328_v20  ;;  %v7695_v22 = vld [vmem:[%s7064_s10 + $0x294] ss:$8 sps:$4 sm:$0xff]   ;;  %v7700_v20 = vld [vmem:[%s7064_s10 + $0x290] ss:$8 sps:$4 sm:$0xff]  }
 0x18d   : > { %2227 = vmatprep.subr.bf16.mxu1 %v6329_v35  ;;  %v7705_v35 = vld [vmem:[%s7064_s10 + $0x2a4] ss:$8 sps:$4 sm:$0xff]  }
 0x18f   : > { %2187 = vmatpush1.bf16.msra.mxu0 %v6330_v18  ;;  %v7710_v18 = vld [vmem:[%s7064_s10 + $0x2a0] ss:$8 sps:$4 sm:$0xff]  }
 0x190   : > { %2228 = vmatpush1.bf16.msra.mxu1 %v6331_v40  ;;  %2188 = vmatprep.subr.bf16.mxu0 %v6332_v42  ;;  %v7715_v40 = vld [vmem:[%s7064_s10 + $0x2b4] ss:$8 sps:$4 sm:$0xff]   ;;  %v7720_v42 = vld [vmem:[%s7064_s10 + $0x2b0] ss:$8 sps:$4 sm:$0xff]  }
 0x191   : > { %2229 = vmatprep.subr.bf16.mxu1 %v6333_v43  ;;  %v7725_v43 = vld [vmem:[%s7064_s10 + $0x2c4] ss:$8 sps:$4 sm:$0xff]  }
 0x193   : > { %2189 = vmatpush1.bf16.msra.mxu0 %v6334_v44  ;;  %v7730_v44 = vld [vmem:[%s7064_s10 + $0x2c0] ss:$8 sps:$4 sm:$0xff]  }
 0x194   : > { %2230 = vmatpush1.bf16.msra.mxu1 %v6335_v45  ;;  %2190 = vmatprep.subr.bf16.mxu0 %v6336_v49  ;;  %v7735_v45 = vld [vmem:[%s7064_s10 + $0x2d4] ss:$8 sps:$4 sm:$0xff]  }
 0x195   : > { %2231 = vmatprep.subr.bf16.mxu1 %v6337_v50  ;;  %v7740_v50 = vld [vmem:[%s7244_s14 + $0x10] sm:$0x66] }
 0x197   : > { %2191 = vmatpush1.bf16.msra.mxu0 %v6338_v53  ;;  %v7745_v53 = vld [vmem:[%s7064_s10 + $0x2d0] ss:$8 sps:$4 sm:$0xff]  }
 0x198   : > { %2232 = vmatpush1.bf16.msra.mxu1 %v6339_v55  ;;  %2192 = vmatprep.subr.bf16.mxu0 %v6340_v56  ;;  %v7750_v55 = vld [vmem:[%s7064_s10 + $0x2e4] ss:$8 sps:$4 sm:$0xff]   ;;  %v5374_v56 = vcombine.high %v7740_v50, %v7740_v50 }
 0x199   : > { %2233 = vmatprep.subr.bf16.mxu1 %v6341_v57 }
 0x19b   : > { %2193 = vmatpush1.bf16.msra.mxu0 %v7219_v6  ;;  %v5305_v6 = vcombine.low %v7491_v38, %v7491_v38  ;;  %v7631_v38 = vld [vmem:[%s7064_s10 + $0x234] ss:$8 sps:$4 sm:$0xff]  }
 0x19c   : > { %2234 = vmatpush1.bf16.msra.mxu1 %v7225_v7  ;;  %2194 = vmatprep.subr.bf16.mxu0 %v7228_v8  ;;  %v7576_v7 = vld [vmem:[%s7244_s14] sm:$0x88]  ;;  %v7579_v8 = vld [vmem:[%s7244_s14 + $0x8] sm:$0x11] }
 0x19d   : > { %2235 = vmatprep.subr.bf16.mxu1 %v7233_v9  ;;  %v5372_v9 = vcombine.high %v7576_v7, %v7579_v8  ;;  %v5371_v49 = vcombine.low %v7576_v7, %v7579_v8  ;;  %v7757_v7 = vld [vmem:[%s7064_s10 + $0x2e0] ss:$8 sps:$4 sm:$0xff]  }
 0x19f   : > { %2195 = vmatpush1.bf16.msra.mxu0 %v7236_v10  ;;  %v2157_v10 = vshrl.u32 %v5305_v6, 16  ;;  %v2503_v57 = vshrl.u32 %v5371_v49, 16 }
 0x1a0   : > { %2236 = vmatpush1.bf16.msra.mxu1 %v7239_v11  ;;  %2196 = vmatprep.subr.bf16.mxu0 %v7249_v12  ;;  %v2160_v11 = vshll.u32 %v5305_v6, 16  ;;  %v2511_v12 = vshrl.u32 %v5372_v9, 16  ;;  %v2506_v6 = vshll.u32 %v5371_v49, 16 }
 0x1a1   : > { %2237 = vmatprep.subr.bf16.mxu1 %v7254_v13  ;;  %v2514_v13 = vshll.u32 %v5372_v9, 16  ;;  %v7762_v9 = vld [vmem:[%s7064_s10 + $0x2f4] ss:$8 sps:$4 sm:$0xff]  }
 0x1a3   : > { %2197 = vmatpush1.bf16.msra.mxu0 %v7257_v14  ;;  %v2159_v14 = vrot.slane %v2157_v10, 2  ;;  %v2621_v10 = vshrl.u32 %v5374_v56, 16 }
 0x1a4   : > { %2238 = vmatpush1.bf16.msra.mxu1 %v9558_v33  ;;  %2198 = vmatprep.subr.bf16.mxu0 %v9559_v36  ;;  %v9566_v36 = vld [vmem:[#allocation17_spill] sm:$0xff] }
 0x1a5   : > { %2239 = vmatprep.subr.bf16.mxu1 %v9560_v37  ;;  %v7626_v37 = vld [vmem:[%s7064_s10 + $0x220] ss:$8 sps:$4 sm:$0xff]  }
 0x1a7   : > { %2199 = vmatpush1.bf16.msra.mxu0 %v9561_v39  ;;  %v7636_v39 = vld [vmem:[%s7064_s10 + $0x230] ss:$8 sps:$4 sm:$0xff]  }
 0x1a8   : > { %2240 = vmatpush1.bf16.msra.mxu1 %v9552_v23  ;;  %2200 = vmatprep.subr.bf16.mxu0 %v9553_v24  ;;  %v2162_v23 = vrot.slane %v2160_v11, 3  ;;  %v2513_v24 = vrot.slane %v2511_v12, 3  ;;  %v2624_v11 = vshll.u32 %v5374_v56, 16  ;;  %v2505_v12 = vrot.slane %v2503_v57, 3  ;;  %v7937_v56 = vld [vmem:[%s7064_s10 + $0x384] ss:$8 sps:$4 sm:$0xff]  }
 0x1a9   : > { %2241 = vmatprep.subr.bf16.mxu1 %v9554_v27  ;;  %v2516_v27 = vrot.slane %v2514_v13, 4  ;;  %v2508_v13 = vrot.slane %v2506_v6, 4  ;;  %v7942_v57 = vld [vmem:[%s7064_s10 + $0x380] ss:$8 sps:$4 sm:$0xff]   ;;  %v7947_v6 = vld [vmem:[%s7064_s10 + $0x394] ss:$8 sps:$4 sm:$0xff]  }
 0x1ab   : > { %2201 = vmatpush1.bf16.msra.mxu0 %v9555_v29  ;;  %v7603_v29 = vld [vmem:[%s7064_s10 + $0x200] ss:$8 sps:$4 sm:$0xff]   ;;  %v2517_v33 = vor.u32 %v2516_v27, %v2513_v24  ;;  %v2626_v24 = vrot.slane %v2624_v11, 2  ;;  %v2509_v27 = vor.u32 %v2508_v13, %v2505_v12  ;;  %v7967_v11 = vld [vmem:[%s7064_s10 + $0x3b4] ss:$8 sps:$4 sm:$0xff]  }
 0x1ac   : > { %2242 = vmatpush1.bf16.msra.mxu1 %v9556_v16  ;;  %2202 = vmatprep.subr.bf16.mxu0 %v9562_v41  ;;  %v7596_v16 = vld [vmem:[%s7064_s10 + $0x204] ss:$8 sps:$4 sm:$0xff]   ;;  %v7972_v12 = vld [vmem:[%s7064_s10 + $0x3b0] ss:$8 sps:$4 sm:$0xff]  }
 0x1ad   : > { %2243 = vmatprep.subr.bf16.mxu1 %v7303_v31  ;;  %v7598_v31 = vor.u32 %v2162_v23, %v2159_v14  ;;  %v7641_v41 = vld [vmem:[%s7064_s10 + $0x244] ss:$8 sps:$4 sm:$0xff]   ;;  %v7767_v14 = vld [vmem:[%s7064_s10 + $0x2f0] ss:$8 sps:$4 sm:$0xff]   ;;  %v2623_v23 = vrot.slane %v2621_v10, 1 }
 0x1ae   : > { %v7962_v10 = vld [vmem:[%s7064_s10 + $0x3a0] ss:$8 sps:$4 sm:$0xff]   ;;  %v7977_v13 = vld [vmem:[%s7064_s10 + $0x3c4] ss:$8 sps:$4 sm:$0xff]  }
 0x1af   : > { %2203 = vmatpush1.bf16.msra.mxu0 %v9563_v46  ;;  %v7646_v46 = vld [vmem:[%s7064_s10 + $0x240] ss:$8 sps:$4 sm:$0xff]  }
 0x1b0   : > { %2244 = vmatpush1.bf16.msra.mxu1 %v7313_v21  ;;  %2204 = vmatprep.subr.bf16.mxu0 %v9564_v47  ;;  %v7608_v21 = vld [vmem:[%s7064_s10 + $0x214] ss:$8 sps:$4 sm:$0xff]  }
 0x1b1   : > { %2245 = vmatprep.subr.bf16.mxu1 %v9565_v48  ;;  %v7651_v47 = vld [vmem:[%s7064_s10 + $0x254] ss:$8 sps:$4 sm:$0xff]   ;;  %v7656_v48 = vld [vmem:[%s7064_s10 + $0x250] ss:$8 sps:$4 sm:$0xff]  }
 0x1b3   : > { %2205 = vmatpush1.bf16.msra.mxu0 %v7328_v26  ;;  %v7620_v26 = vld [vmem:[%s7064_s10 + $0x224] ss:$8 sps:$4 sm:$0xff]  }
 0x1b4   : > { %2246 = vmatpush1.bf16.msra.mxu1 %v7331_v25  ;;  %2449 = vmatprep.subr.bf16.mxu0 %v7596_v16  ;;  %v7615_v25 = vld [vmem:[%s7064_s10 + $0x210] ss:$8 sps:$4 sm:$0xff]  }
 0x1b5   : > { %2520 = vmatprep.subr.bf16.mxu1 %v7596_v16 }
 0x1b6   : > { %2207 = vmatmul.mubr.bf16.vlgmr.msra.gmra.mrb[12].mxu0 %v7598_v31 }
 0x1b7   : > { %2248 = vmatmul.mubr.bf16.vlgmr.msra.gmra.mrb[12].mxu1 %v7513_v52  ;;  %2450 = vmatpush1.bf16.msra.mxu0 %v7603_v29 }
 0x1b8   : > { %2521 = vmatpush1.bf16.msra.mxu1 %v7603_v29  ;;  %2451 = vmatprep.subr.bf16.mxu0 %v7608_v21 }
 0x1b9   : > { %2522 = vmatprep.subr.bf16.mxu1 %v7608_v21  ;;  %2481 = vmatprep.mubr.bf16.mxu0 %v9566_v36 }
 0x1ba   : > { %2552 = vmatprep.mubr.bf16.mxu1 %v2517_v33  ;;  %v7775_v33 = vor.u32 %v2626_v24, %v2623_v23  ;;  %v7987_v23 = vld [vmem:[%s7064_s10 + $0x3d4] ss:$8 sps:$4 sm:$0xff]   ;;  %v7992_v24 = vld [vmem:[%s7064_s10 + $0x3d0] ss:$8 sps:$4 sm:$0xff]  }
 0x1bb   : > { %2452 = vmatpush1.bf16.msra.mxu0 %v7615_v25 }
 0x1bc   : > { %2523 = vmatpush1.bf16.msra.mxu1 %v7615_v25  ;;  %2453 = vmatprep.subr.bf16.mxu0 %v7620_v26 }
 0x1bd   : > { %2524 = vmatprep.subr.bf16.mxu1 %v7620_v26 }
 0x1bf   : > { %2454 = vmatpush1.bf16.msra.mxu0 %v7626_v37 }
 0x1c0   : > { %2525 = vmatpush1.bf16.msra.mxu1 %v7626_v37  ;;  %2455 = vmatprep.subr.bf16.mxu0 %v7631_v38 }
 0x1c1   : > { %2526 = vmatprep.subr.bf16.mxu1 %v7631_v38 }
 0x1c3   : > { %2456 = vmatpush1.bf16.msra.mxu0 %v7636_v39 }
 0x1c4   : > { %2527 = vmatpush1.bf16.msra.mxu1 %v7636_v39  ;;  %2457 = vmatprep.subr.bf16.mxu0 %v7641_v41 }
 0x1c5   : > { %2528 = vmatprep.subr.bf16.mxu1 %v7641_v41 }
 0x1c7   : > { %2458 = vmatpush1.bf16.msra.mxu0 %v7646_v46 }
 0x1c8   : > { %2529 = vmatpush1.bf16.msra.mxu1 %v7646_v46  ;;  %2459 = vmatprep.subr.bf16.mxu0 %v7651_v47 }
 0x1c9   : > { %2530 = vmatprep.subr.bf16.mxu1 %v7651_v47  ;;  %v1731_v59 = vpop.f32.mrb[0].mxu0 }
 0x1ca   : > { %v1939_v60 = vpop.f32.mrb[0].mxu1  ;;  %v1733_v62 = vpop.f32.mrb[1].mxu0 }
 0x1cb   : > { %v7663_v61 = vadd.f32 %v1939_v60, %v1731_v59  ;;  %v1941_v63 = vpop.f32.mrb[1].mxu1  ;;  %v1735_v1 = vpop.f32.mrb[2].mxu0  ;;  %2460 = vmatpush1.bf16.msra.mxu0 %v7656_v48  ;;  %v7847_v59 = vld [vmem:[%s7064_s10 + $0x304] ss:$8 sps:$4 sm:$0xff]  }
 0x1cc   : > { %v7665_v0 = vadd.f32 %v1941_v63, %v1733_v62  ;;  %v1943_v2 = vpop.f32.mrb[2].mxu1  ;;  %2531 = vmatpush1.bf16.msra.mxu1 %v7656_v48  ;;  %v1736_v4 = vpop.f32.mrb[3].mxu0  ;;  %2461 = vmatprep.subr.bf16.mxu0 %v7661_v58  ;;  %v7854_v62 = vld [vmem:[%s7064_s10 + $0x300] ss:$8 sps:$4 sm:$0xff]   ;;  %v7859_v63 = vld [vmem:[%s7064_s10 + $0x314] ss:$8 sps:$4 sm:$0xff]  }
 0x1cd   : > { %v1944_v5 = vpop.f32.mrb[3].mxu1  ;;  %2532 = vmatprep.subr.bf16.mxu1 %v7661_v58  ;;  %v7866_v1 = vld [vmem:[%s7064_s10 + $0x310] ss:$8 sps:$4 sm:$0xff]   ;;  %v7871_v2 = vld [vmem:[%s7064_s10 + $0x324] ss:$8 sps:$4 sm:$0xff]  }
 0x1ce   : > { %v7883_v4 = vld [vmem:[%s7064_s10 + $0x334] ss:$8 sps:$4 sm:$0xff]   ;;  %v7893_v5 = vld [vmem:[%s7064_s10 + $0x344] ss:$8 sps:$4 sm:$0xff]  }
 0x1cf   : > { %2462 = vmatpush1.bf16.msra.mxu0 %v7670_v3 }
 0x1d0   : > { %2533 = vmatpush1.bf16.msra.mxu1 %v7670_v3  ;;  %2463 = vmatprep.subr.bf16.mxu0 %v7675_v30 }
 0x1d1   : > { %2534 = vmatprep.subr.bf16.mxu1 %v7675_v30 }
 0x1d3   : > { %2464 = vmatpush1.bf16.msra.mxu0 %v7680_v19 }
 0x1d4   : > { %2535 = vmatpush1.bf16.msra.mxu1 %v7680_v19  ;;  %2465 = vmatprep.subr.bf16.mxu0 %v7685_v32 }
 0x1d5   : > { %2536 = vmatprep.subr.bf16.mxu1 %v7685_v32 }
 0x1d7   : > { %2466 = vmatpush1.bf16.msra.mxu0 %v7690_v34 }
 0x1d8   : > { %2537 = vmatpush1.bf16.msra.mxu1 %v7690_v34  ;;  %2467 = vmatprep.subr.bf16.mxu0 %v7695_v22 }
 0x1d9   : > { %2538 = vmatprep.subr.bf16.mxu1 %v7695_v22 }
 0x1db   : > { %2468 = vmatpush1.bf16.msra.mxu0 %v7700_v20 }
 0x1dc   : > { %2539 = vmatpush1.bf16.msra.mxu1 %v7700_v20  ;;  %2469 = vmatprep.subr.bf16.mxu0 %v7705_v35 }
 0x1dd   : > { %2540 = vmatprep.subr.bf16.mxu1 %v7705_v35 }
 0x1df   : > { %2470 = vmatpush1.bf16.msra.mxu0 %v7710_v18 }
 0x1e0   : > { %2541 = vmatpush1.bf16.msra.mxu1 %v7710_v18  ;;  %2471 = vmatprep.subr.bf16.mxu0 %v7715_v40 }
 0x1e1   : > { %2542 = vmatprep.subr.bf16.mxu1 %v7715_v40 }
 0x1e3   : > { %2472 = vmatpush1.bf16.msra.mxu0 %v7720_v42 }
 0x1e4   : > { %2543 = vmatpush1.bf16.msra.mxu1 %v7720_v42  ;;  %2473 = vmatprep.subr.bf16.mxu0 %v7725_v43 }
 0x1e5   : > { %2544 = vmatprep.subr.bf16.mxu1 %v7725_v43 }
 0x1e7   : > { %2474 = vmatpush1.bf16.msra.mxu0 %v7730_v44 }
 0x1e8   : > { %2545 = vmatpush1.bf16.msra.mxu1 %v7730_v44  ;;  %2475 = vmatprep.subr.bf16.mxu0 %v7735_v45 }
 0x1e9   : > { %2546 = vmatprep.subr.bf16.mxu1 %v7735_v45 }
 0x1eb   : > { %2476 = vmatpush1.bf16.msra.mxu0 %v7745_v53 }
 0x1ec   : > { %2547 = vmatpush1.bf16.msra.mxu1 %v7745_v53  ;;  %2477 = vmatprep.subr.bf16.mxu0 %v7750_v55 }
 0x1ed   : > { %2548 = vmatprep.subr.bf16.mxu1 %v7750_v55 }
 0x1ef   : > { %2478 = vmatpush1.bf16.msra.mxu0 %v7757_v7 }
 0x1f0   : > { %2549 = vmatpush1.bf16.msra.mxu1 %v7757_v7  ;;  %2479 = vmatprep.subr.bf16.mxu0 %v7762_v9 }
 0x1f1   : > { %2550 = vmatprep.subr.bf16.mxu1 %v7762_v9 }
 0x1f3   : > { %2480 = vmatpush1.bf16.msra.mxu0 %v7767_v14 }
 0x1f4   : > { %2551 = vmatpush1.bf16.msra.mxu1 %v7767_v14  ;;  %2563 = vmatprep.subr.bf16.mxu0 %v7596_v16 }
 0x1f5   : > { %2630 = vmatprep.subr.bf16.mxu1 %v7596_v16 }
 0x1f6   : > { %2482 = vmatmul.mubr.bf16.vlgmr.msra.gmra.mrb[16].mxu0 %v7419_v28 }
 0x1f7   : > { %2553 = vmatmul.mubr.bf16.vlgmr.msra.gmra.mrb[16].mxu1 %v2509_v27  ;;  %2564 = vmatpush1.bf16.msra.mxu0 %v7603_v29  ;;  %v7997_v27 = vld [vmem:[%s7064_s10 + $0x3e4] ss:$8 sps:$4 sm:$0xff]  }
 0x1f8   : > { %2631 = vmatpush1.bf16.msra.mxu1 %v7603_v29  ;;  %2565 = vmatprep.subr.bf16.mxu0 %v7608_v21 }
 0x1f9   : > { %2632 = vmatprep.subr.bf16.mxu1 %v7608_v21  ;;  %2595 = vmatprep.mubr.bf16.mxu0 %v7519_v54 }
 0x1fa   : > { %2662 = vmatprep.mubr.bf16.mxu1 %v7775_v33 }
 0x1fb   : > { %2566 = vmatpush1.bf16.msra.mxu0 %v7615_v25 }
 0x1fc   : > { %2633 = vmatpush1.bf16.msra.mxu1 %v7615_v25  ;;  %2567 = vmatprep.subr.bf16.mxu0 %v7620_v26 }
 0x1fd   : > { %2634 = vmatprep.subr.bf16.mxu1 %v7620_v26 }
 0x1ff   : > { %2568 = vmatpush1.bf16.msra.mxu0 %v7626_v37 }
 0x200   : > { %2635 = vmatpush1.bf16.msra.mxu1 %v7626_v37  ;;  %2569 = vmatprep.subr.bf16.mxu0 %v7631_v38 }
 0x201   : > { %2636 = vmatprep.subr.bf16.mxu1 %v7631_v38 }
 0x203   : > { %2570 = vmatpush1.bf16.msra.mxu0 %v7636_v39 }
 0x204   : > { %2637 = vmatpush1.bf16.msra.mxu1 %v7636_v39  ;;  %2571 = vmatprep.subr.bf16.mxu0 %v7641_v41 }
 0x205   : > { %2638 = vmatprep.subr.bf16.mxu1 %v7641_v41  ;;  %v5373_v41 = vcombine.low %v7740_v50, %v7740_v50 }
 0x207   : > { %2572 = vmatpush1.bf16.msra.mxu0 %v7646_v46 }
 0x208   : > { %2639 = vmatpush1.bf16.msra.mxu1 %v7646_v46  ;;  %2573 = vmatprep.subr.bf16.mxu0 %v7651_v47  ;;  %v2613_v46 = vshrl.u32 %v5373_v41, 16 }
 0x209   : > { %2640 = vmatprep.subr.bf16.mxu1 %v7651_v47  ;;  %v2002_v28 = vpop.f32.mrb[4].mxu0  ;;  %v2616_v47 = vshll.u32 %v5373_v41, 16 }
 0x20a   : > { %v2043_v16 = vpop.f32.mrb[4].mxu1  ;;  %v2004_v21 = vpop.f32.mrb[5].mxu0 }
 0x20b   : > { %v7800_v29 = vadd.f32 %v2043_v16, %v2002_v28  ;;  %v2045_v25 = vpop.f32.mrb[5].mxu1  ;;  %v2006_v36 = vpop.f32.mrb[6].mxu0  ;;  %2574 = vmatpush1.bf16.msra.mxu0 %v7656_v48  ;;  %v8002_v28 = vld [vmem:[%s7064_s10 + $0x3e0] ss:$8 sps:$4 sm:$0xff]   ;;  %v8007_v16 = vld [vmem:[%s7064_s10 + $0x3f4] ss:$8 sps:$4 sm:$0xff]  }
 0x20c   : > { %v7802_v26 = vadd.f32 %v2045_v25, %v2004_v21  ;;  %v2047_v37 = vpop.f32.mrb[6].mxu1  ;;  %2641 = vmatpush1.bf16.msra.mxu1 %v7656_v48  ;;  %v2007_v38 = vpop.f32.mrb[7].mxu0  ;;  %2575 = vmatprep.subr.bf16.mxu0 %v7661_v58  ;;  %v2615_v48 = vrot.slane %v2613_v46, 1  ;;  %v8010_v21 = vld [vmem:[%s7244_s14] sm:$0x22] }
 0x20d   : > { %v2048_v39 = vpop.f32.mrb[7].mxu1  ;;  %2642 = vmatprep.subr.bf16.mxu1 %v7661_v58  ;;  %v2618_v58 = vrot.slane %v2616_v47, 2  ;;  %v8015_v25 = vld [vmem:[%s7064_s10 + $0x3f0] ss:$8 sps:$4 sm:$0xff]   ;;  %v5440_v36 = vcombine.high %v8010_v21, %v8010_v21  ;;  %v8029_v38 = vcombine.high %v7579_v8, %v7579_v8 }
 0x20f   : > { %2576 = vmatpush1.bf16.msra.mxu0 %v7670_v3  ;;  %v7849_v60 = vor.u32 %v2618_v58, %v2615_v48  ;;  %v8025_v37 = vrot.slane %v5440_v36, 1  ;;  %v8267_v36 = vld [vmem:[%s7064_s10 + $0x4e4] ss:$8 sps:$4 sm:$0xff]  }
 0x210   : > { %2643 = vmatpush1.bf16.msra.mxu1 %v7670_v3  ;;  %2577 = vmatprep.subr.bf16.mxu0 %v7675_v30  ;;  %v7878_v3 = vld [vmem:[%s7064_s10 + $0x320] ss:$8 sps:$4 sm:$0xff]  }
 0x211   : > { %2644 = vmatprep.subr.bf16.mxu1 %v7675_v30  ;;  %v7898_v30 = vld [vmem:[%s7064_s10 + $0x340] ss:$8 sps:$4 sm:$0xff]  }
 0x213   : > { %2578 = vmatpush1.bf16.msra.mxu0 %v7680_v19 }
 0x214   : > { %2645 = vmatpush1.bf16.msra.mxu1 %v7680_v19  ;;  %2579 = vmatprep.subr.bf16.mxu0 %v7685_v32  ;;  %v7903_v19 = vld [vmem:[%s7064_s10 + $0x354] ss:$8 sps:$4 sm:$0xff]  }
 0x215   : > { %2646 = vmatprep.subr.bf16.mxu1 %v7685_v32  ;;  %v7908_v32 = vld [vmem:[%s7064_s10 + $0x350] ss:$8 sps:$4 sm:$0xff]  }
 0x217   : > { %2580 = vmatpush1.bf16.msra.mxu0 %v7690_v34 }
 0x218   : > { %2647 = vmatpush1.bf16.msra.mxu1 %v7690_v34  ;;  %2581 = vmatprep.subr.bf16.mxu0 %v7695_v22  ;;  %v7913_v34 = vld [vmem:[%s7064_s10 + $0x364] ss:$8 sps:$4 sm:$0xff]  }
 0x219   : > { %2648 = vmatprep.subr.bf16.mxu1 %v7695_v22 }
 0x21b   : > { %2582 = vmatpush1.bf16.msra.mxu0 %v7700_v20 }
 0x21c   : > { %2649 = vmatpush1.bf16.msra.mxu1 %v7700_v20  ;;  %2583 = vmatprep.subr.bf16.mxu0 %v7705_v35 }
 0x21d   : > { %2650 = vmatprep.subr.bf16.mxu1 %v7705_v35 }
 0x21f   : > { %2584 = vmatpush1.bf16.msra.mxu0 %v7710_v18 }
 0x220   : > { %2651 = vmatpush1.bf16.msra.mxu1 %v7710_v18  ;;  %2585 = vmatprep.subr.bf16.mxu0 %v7715_v40 }
 0x221   : > { %2652 = vmatprep.subr.bf16.mxu1 %v7715_v40 }
 0x223   : > { %2586 = vmatpush1.bf16.msra.mxu0 %v7720_v42 }
 0x224   : > { %2653 = vmatpush1.bf16.msra.mxu1 %v7720_v42  ;;  %2587 = vmatprep.subr.bf16.mxu0 %v7725_v43 }
 0x225   : > { %2654 = vmatprep.subr.bf16.mxu1 %v7725_v43 }
 0x227   : > { %2588 = vmatpush1.bf16.msra.mxu0 %v7730_v44 }
 0x228   : > { %2655 = vmatpush1.bf16.msra.mxu1 %v7730_v44  ;;  %2589 = vmatprep.subr.bf16.mxu0 %v7735_v45 }
 0x229   : > { %2656 = vmatprep.subr.bf16.mxu1 %v7735_v45  ;;  %v7922_v45 = vld [vmem:[%s7064_s10 + $0x360] ss:$8 sps:$4 sm:$0xff]  }
 0x22b   : > { %2590 = vmatpush1.bf16.msra.mxu0 %v7745_v53 }
 0x22c   : > { %2657 = vmatpush1.bf16.msra.mxu1 %v7745_v53  ;;  %2591 = vmatprep.subr.bf16.mxu0 %v7750_v55  ;;  %v7927_v53 = vld [vmem:[%s7064_s10 + $0x374] ss:$8 sps:$4 sm:$0xff]  }
 0x22d   : > { %2658 = vmatprep.subr.bf16.mxu1 %v7750_v55  ;;  %v7932_v55 = vld [vmem:[%s7064_s10 + $0x370] ss:$8 sps:$4 sm:$0xff]  }
 0x22f   : > { %2592 = vmatpush1.bf16.msra.mxu0 %v7757_v7 }
 0x230   : > { %2659 = vmatpush1.bf16.msra.mxu1 %v7757_v7  ;;  %2593 = vmatprep.subr.bf16.mxu0 %v7762_v9  ;;  %v7952_v7 = vld [vmem:[%s7064_s10 + $0x390] ss:$8 sps:$4 sm:$0xff]  }
 0x231   : > { %2660 = vmatprep.subr.bf16.mxu1 %v7762_v9  ;;  %v7957_v9 = vld [vmem:[%s7064_s10 + $0x3a4] ss:$8 sps:$4 sm:$0xff]  }
 0x233   : > { %2594 = vmatpush1.bf16.msra.mxu0 %v7767_v14 }
 0x234   : > { %2661 = vmatpush1.bf16.msra.mxu1 %v7767_v14  ;;  %2866 = vmatprep.subr.bf16.mxu0 %v7847_v59  ;;  %v7982_v14 = vld [vmem:[%s7064_s10 + $0x3c0] ss:$8 sps:$4 sm:$0xff]  }
 0x235   : > { %2909 = vmatprep.subr.bf16.mxu1 %v7847_v59 }
 0x236   : > { %2596 = vmatmul.mubr.bf16.vlgmr.msra.gmra.mrb[20].mxu0 %v7598_v31 }
 0x237   : > { %2663 = vmatmul.mubr.bf16.vlgmr.msra.gmra.mrb[20].mxu1 %v7849_v60  ;;  %2867 = vmatpush1.bf16.msra.mxu0 %v7854_v62 }
 0x238   : > { %2910 = vmatpush1.bf16.msra.mxu1 %v7854_v62  ;;  %2868 = vmatprep.subr.bf16.mxu0 %v7859_v63 }
 0x239   : > { %2911 = vmatprep.subr.bf16.mxu1 %v7859_v63  ;;  %2898 = vmatprep.mubr.bf16.mxu0 %v7430_v15  ;;  %v7888_v15 = vld [vmem:[%s7064_s10 + $0x330] ss:$8 sps:$4 sm:$0xff]  }
 0x23a   : > { %2941 = vmatprep.mubr.bf16.mxu1 %v7428_v17 }
 0x23b   : > { %2869 = vmatpush1.bf16.msra.mxu0 %v7866_v1 }
 0x23c   : > { %2912 = vmatpush1.bf16.msra.mxu1 %v7866_v1  ;;  %2870 = vmatprep.subr.bf16.mxu0 %v7871_v2 }
 0x23d   : > { %2913 = vmatprep.subr.bf16.mxu1 %v7871_v2 }
 0x23f   : > { %2871 = vmatpush1.bf16.msra.mxu0 %v7878_v3 }
 0x240   : > { %2914 = vmatpush1.bf16.msra.mxu1 %v7878_v3  ;;  %2872 = vmatprep.subr.bf16.mxu0 %v7883_v4 }
 0x241   : > { %2915 = vmatprep.subr.bf16.mxu1 %v7883_v4 }
 0x243   : > { %2873 = vmatpush1.bf16.msra.mxu0 %v7888_v15 }
 0x244   : > { %2916 = vmatpush1.bf16.msra.mxu1 %v7888_v15  ;;  %2874 = vmatprep.subr.bf16.mxu0 %v7893_v5 }
 0x245   : > { %2917 = vmatprep.subr.bf16.mxu1 %v7893_v5 }
 0x247   : > { %2875 = vmatpush1.bf16.msra.mxu0 %v7898_v30 }
 0x248   : > { %2918 = vmatpush1.bf16.msra.mxu1 %v7898_v30  ;;  %2876 = vmatprep.subr.bf16.mxu0 %v7903_v19 }
 0x249   : > { %2919 = vmatprep.subr.bf16.mxu1 %v7903_v19  ;;  %v2093_v22 = vpop.f32.mrb[8].mxu0 }
 0x24a   : > { %v2143_v20 = vpop.f32.mrb[8].mxu1  ;;  %v2095_v18 = vpop.f32.mrb[9].mxu0 }
 0x24b   : > { %v7915_v35 = vadd.f32 %v2143_v20, %v2093_v22  ;;  %v2145_v40 = vpop.f32.mrb[9].mxu1  ;;  %v2097_v43 = vpop.f32.mrb[10].mxu0  ;;  %2877 = vmatpush1.bf16.msra.mxu0 %v7908_v32  ;;  %v8157_v22 = vld [vmem:[%s7064_s10 + $0x440] ss:$8 sps:$4 sm:$0xff]   ;;  %v8162_v20 = vld [vmem:[%s7064_s10 + $0x454] ss:$8 sps:$4 sm:$0xff]  }
 0x24c   : > { %v7917_v42 = vadd.f32 %v2145_v40, %v2095_v18  ;;  %v2147_v44 = vpop.f32.mrb[10].mxu1  ;;  %2920 = vmatpush1.bf16.msra.mxu1 %v7908_v32  ;;  %v2098_v49 = vpop.f32.mrb[11].mxu0  ;;  %2878 = vmatprep.subr.bf16.mxu0 %v7913_v34  ;;  %v8167_v18 = vld [vmem:[%s7064_s10 + $0x450] ss:$8 sps:$4 sm:$0xff]   ;;  %v8172_v40 = vld [vmem:[%s7064_s10 + $0x464] ss:$8 sps:$4 sm:$0xff]  }
 0x24d   : > { %v2148_v50 = vpop.f32.mrb[11].mxu1  ;;  %2921 = vmatprep.subr.bf16.mxu1 %v7913_v34 }
 0x24f   : > { %2879 = vmatpush1.bf16.msra.mxu0 %v7922_v45 }
 0x250   : > { %2922 = vmatpush1.bf16.msra.mxu1 %v7922_v45  ;;  %2880 = vmatprep.subr.bf16.mxu0 %v7927_v53 }
 0x251   : > { %2923 = vmatprep.subr.bf16.mxu1 %v7927_v53 }
 0x253   : > { %2881 = vmatpush1.bf16.msra.mxu0 %v7932_v55 }
 0x254   : > { %2924 = vmatpush1.bf16.msra.mxu1 %v7932_v55  ;;  %2882 = vmatprep.subr.bf16.mxu0 %v7937_v56 }
 0x255   : > { %2925 = vmatprep.subr.bf16.mxu1 %v7937_v56 }
 0x257   : > { %2883 = vmatpush1.bf16.msra.mxu0 %v7942_v57 }
 0x258   : > { %2926 = vmatpush1.bf16.msra.mxu1 %v7942_v57  ;;  %2884 = vmatprep.subr.bf16.mxu0 %v7947_v6 }
 0x259   : > { %2927 = vmatprep.subr.bf16.mxu1 %v7947_v6 }
 0x25b   : > { %2885 = vmatpush1.bf16.msra.mxu0 %v7952_v7 }
 0x25c   : > { %2928 = vmatpush1.bf16.msra.mxu1 %v7952_v7  ;;  %2886 = vmatprep.subr.bf16.mxu0 %v7957_v9 }
 0x25d   : > { %2929 = vmatprep.subr.bf16.mxu1 %v7957_v9 }
 0x25f   : > { %2887 = vmatpush1.bf16.msra.mxu0 %v7962_v10 }
 0x260   : > { %2930 = vmatpush1.bf16.msra.mxu1 %v7962_v10  ;;  %2888 = vmatprep.subr.bf16.mxu0 %v7967_v11 }
 0x261   : > { %2931 = vmatprep.subr.bf16.mxu1 %v7967_v11 }
 0x263   : > { %2889 = vmatpush1.bf16.msra.mxu0 %v7972_v12 }
 0x264   : > { %2932 = vmatpush1.bf16.msra.mxu1 %v7972_v12  ;;  %2890 = vmatprep.subr.bf16.mxu0 %v7977_v13 }
 0x265   : > { %2933 = vmatprep.subr.bf16.mxu1 %v7977_v13 }
 0x267   : > { %2891 = vmatpush1.bf16.msra.mxu0 %v7982_v14 }
 0x268   : > { %2934 = vmatpush1.bf16.msra.mxu1 %v7982_v14  ;;  %2892 = vmatprep.subr.bf16.mxu0 %v7987_v23 }
 0x269   : > { %2935 = vmatprep.subr.bf16.mxu1 %v7987_v23 }
 0x26b   : > { %2893 = vmatpush1.bf16.msra.mxu0 %v7992_v24 }
 0x26c   : > { %2936 = vmatpush1.bf16.msra.mxu1 %v7992_v24  ;;  %2894 = vmatprep.subr.bf16.mxu0 %v7997_v27 }
 0x26d   : > { %2937 = vmatprep.subr.bf16.mxu1 %v7997_v27 }
 0x26f   : > { %2895 = vmatpush1.bf16.msra.mxu0 %v8002_v28 }
 0x270   : > { %2938 = vmatpush1.bf16.msra.mxu1 %v8002_v28  ;;  %2896 = vmatprep.subr.bf16.mxu0 %v8007_v16 }
 0x271   : > { %2939 = vmatprep.subr.bf16.mxu1 %v8007_v16 }
 0x273   : > { %2897 = vmatpush1.bf16.msra.mxu0 %v8015_v25 }
 0x274   : > { %2940 = vmatpush1.bf16.msra.mxu1 %v8015_v25  ;;  %2962 = vmatprep.subr.bf16.mxu0 %v7847_v59 }
 0x275   : > { %3009 = vmatprep.subr.bf16.mxu1 %v7847_v59 }
 0x276   : > { %2899 = vmatmul.mubr.bf16.vlgmr.msra.gmra.mrb[24].mxu0 %v7511_v51 }
 0x277   : > { %2942 = vmatmul.mubr.bf16.vlgmr.msra.gmra.mrb[24].mxu1 %v7513_v52  ;;  %2963 = vmatpush1.bf16.msra.mxu0 %v7854_v62 }
 0x278   : > { %3010 = vmatpush1.bf16.msra.mxu1 %v7854_v62  ;;  %2964 = vmatprep.subr.bf16.mxu0 %v7859_v63 }
 0x279   : > { %3011 = vmatprep.subr.bf16.mxu1 %v7859_v63  ;;  %2994 = vmatprep.mubr.bf16.mxu0 %v8025_v37 }
 0x27a   : > { %3041 = vmatprep.mubr.bf16.mxu1 %v8029_v38 }
 0x27b   : > { %2965 = vmatpush1.bf16.msra.mxu0 %v7866_v1 }
 0x27c   : > { %3012 = vmatpush1.bf16.msra.mxu1 %v7866_v1  ;;  %2966 = vmatprep.subr.bf16.mxu0 %v7871_v2  ;;  %v5439_v1 = vcombine.low %v8010_v21, %v8010_v21  ;;  %v8257_v21 = vld [vmem:[%s7244_s14] sm:$0x66] }
 0x27d   : > { %3013 = vmatprep.subr.bf16.mxu1 %v7871_v2  ;;  %v8102_v2 = vld [vmem:[%s7064_s10 + $0x404] ss:$8 sps:$4 sm:$0xff]  }
 0x27f   : > { %2967 = vmatpush1.bf16.msra.mxu0 %v7878_v3 }
 0x280   : > { %3014 = vmatpush1.bf16.msra.mxu1 %v7878_v3  ;;  %2968 = vmatprep.subr.bf16.mxu0 %v7883_v4  ;;  %v8104_v3 = vrot.slane %v5439_v1, 1 }
 0x281   : > { %3015 = vmatprep.subr.bf16.mxu1 %v7883_v4  ;;  %v8108_v4 = vcombine.low %v7579_v8, %v7579_v8  ;;  %v8125_v8 = vld [vmem:[%s7064_s10 + $0x410] ss:$8 sps:$4 sm:$0xff]  }
 0x283   : > { %2969 = vmatpush1.bf16.msra.mxu0 %v7888_v15 }
 0x284   : > { %3016 = vmatpush1.bf16.msra.mxu1 %v7888_v15  ;;  %2970 = vmatprep.subr.bf16.mxu0 %v7893_v5  ;;  %v8113_v15 = vld [vmem:[%s7064_s10 + $0x400] ss:$8 sps:$4 sm:$0xff]  }
 0x285   : > { %3017 = vmatprep.subr.bf16.mxu1 %v7893_v5  ;;  %v8118_v5 = vld [vmem:[%s7064_s10 + $0x414] ss:$8 sps:$4 sm:$0xff]  }
 0x287   : > { %2971 = vmatpush1.bf16.msra.mxu0 %v7898_v30 }
 0x288   : > { %3018 = vmatpush1.bf16.msra.mxu1 %v7898_v30  ;;  %2972 = vmatprep.subr.bf16.mxu0 %v7903_v19  ;;  %v8130_v30 = vld [vmem:[%s7064_s10 + $0x424] ss:$8 sps:$4 sm:$0xff]  }
 0x289   : > { %3019 = vmatprep.subr.bf16.mxu1 %v7903_v19  ;;  %v2208_v51 = vpop.f32.mrb[12].mxu0  ;;  %v8137_v19 = vld [vmem:[%s7064_s10 + $0x420] ss:$8 sps:$4 sm:$0xff]  }
 0x28a   : > { %v2249_v39 = vpop.f32.mrb[12].mxu1  ;;  %v2210_v46 = vpop.f32.mrb[13].mxu0 }
 0x28b   : > { %v8055_v41 = vadd.f32 %v2249_v39, %v2208_v51  ;;  %v2251_v47 = vpop.f32.mrb[13].mxu1  ;;  %v2212_v58 = vpop.f32.mrb[14].mxu0  ;;  %2973 = vmatpush1.bf16.msra.mxu0 %v7908_v32  ;;  %v5508_v51 = vcombine.high %v8257_v21, %v8257_v21  ;;  %v8274_v39 = vld [vmem:[%s7064_s10 + $0x4e0] ss:$8 sps:$4 sm:$0xff]  }
 0x28c   : > { %v8057_v48 = vadd.f32 %v2251_v47, %v2210_v46  ;;  %v2253_v59 = vpop.f32.mrb[14].mxu1  ;;  %3020 = vmatpush1.bf16.msra.mxu1 %v7908_v32  ;;  %v2213_v62 = vpop.f32.mrb[15].mxu0  ;;  %2974 = vmatprep.subr.bf16.mxu0 %v7913_v34  ;;  %v8142_v32 = vld [vmem:[%s7064_s10 + $0x434] ss:$8 sps:$4 sm:$0xff]  }
 0x28d   : > { %v2254_v63 = vpop.f32.mrb[15].mxu1  ;;  %3021 = vmatprep.subr.bf16.mxu1 %v7913_v34  ;;  %v8152_v34 = vld [vmem:[%s7064_s10 + $0x444] ss:$8 sps:$4 sm:$0xff]   ;;  %v8279_v46 = vld [vmem:[%s7064_s10 + $0x4f4] ss:$8 sps:$4 sm:$0xff]   ;;  %v3389_v47 = vshrl.u32 %v5508_v51, 16 }
 0x28e   : > { %v3392_v58 = vshll.u32 %v5508_v51, 16  ;;  %v8284_v59 = vld [vmem:[%s7064_s10 + $0x4f0] ss:$8 sps:$4 sm:$0xff]  }
 0x28f   : > { %2975 = vmatpush1.bf16.msra.mxu0 %v7922_v45  ;;  %v3391_v62 = vrot.slane %v3389_v47, 1  ;;  %v8486_v51 = vld [vmem:[%s7064_s10 + $0x590] ss:$8 sps:$4 sm:$0xff]   ;;  %v8501_v47 = vld [vmem:[%s7064_s10 + $0x5b4] ss:$8 sps:$4 sm:$0xff]  }
 0x290   : > { %3022 = vmatpush1.bf16.msra.mxu1 %v7922_v45  ;;  %2976 = vmatprep.subr.bf16.mxu0 %v7927_v53  ;;  %v3394_v63 = vrot.slane %v3392_v58, 2  ;;  %v8506_v58 = vld [vmem:[%s7064_s10 + $0x5b0] ss:$8 sps:$4 sm:$0xff]  }
 0x291   : > { %3023 = vmatprep.subr.bf16.mxu1 %v7927_v53 }
 0x292   : > { %v8292_v1 = vor.u32 %v3394_v63, %v3391_v62  ;;  %v8516_v62 = vld [vmem:[%s7064_s10 + $0x5c0] ss:$8 sps:$4 sm:$0xff]   ;;  %v8521_v63 = vld [vmem:[%s7064_s10 + $0x5d4] ss:$8 sps:$4 sm:$0xff]  }
 0x293   : > { %2977 = vmatpush1.bf16.msra.mxu0 %v7932_v55 }
 0x294   : > { %3024 = vmatpush1.bf16.msra.mxu1 %v7932_v55  ;;  %2978 = vmatprep.subr.bf16.mxu0 %v7937_v56 }
 0x295   : > { %3025 = vmatprep.subr.bf16.mxu1 %v7937_v56 }
 0x297   : > { %2979 = vmatpush1.bf16.msra.mxu0 %v7942_v57 }
 0x298   : > { %3026 = vmatpush1.bf16.msra.mxu1 %v7942_v57  ;;  %2980 = vmatprep.subr.bf16.mxu0 %v7947_v6 }
 0x299   : > { %3027 = vmatprep.subr.bf16.mxu1 %v7947_v6 }
 0x29b   : > { %2981 = vmatpush1.bf16.msra.mxu0 %v7952_v7 }
 0x29c   : > { %3028 = vmatpush1.bf16.msra.mxu1 %v7952_v7  ;;  %2982 = vmatprep.subr.bf16.mxu0 %v7957_v9 }
 0x29d   : > { %3029 = vmatprep.subr.bf16.mxu1 %v7957_v9  ;;  %v8204_v9 = vld [vmem:[%s7064_s10 + $0x484] ss:$8 sps:$4 sm:$0xff]  }
 0x29f   : > { %2983 = vmatpush1.bf16.msra.mxu0 %v7962_v10 }
 0x2a0   : > { %3030 = vmatpush1.bf16.msra.mxu1 %v7962_v10  ;;  %2984 = vmatprep.subr.bf16.mxu0 %v7967_v11  ;;  %v8209_v10 = vld [vmem:[%s7064_s10 + $0x480] ss:$8 sps:$4 sm:$0xff]  }
 0x2a1   : > { %3031 = vmatprep.subr.bf16.mxu1 %v7967_v11  ;;  %v8214_v11 = vld [vmem:[%s7064_s10 + $0x494] ss:$8 sps:$4 sm:$0xff]  }
 0x2a3   : > { %2985 = vmatpush1.bf16.msra.mxu0 %v7972_v12 }
 0x2a4   : > { %3032 = vmatpush1.bf16.msra.mxu1 %v7972_v12  ;;  %2986 = vmatprep.subr.bf16.mxu0 %v7977_v13  ;;  %v8219_v12 = vld [vmem:[%s7064_s10 + $0x490] ss:$8 sps:$4 sm:$0xff]  }
 0x2a5   : > { %3033 = vmatprep.subr.bf16.mxu1 %v7977_v13  ;;  %v8224_v13 = vld [vmem:[%s7064_s10 + $0x4a4] ss:$8 sps:$4 sm:$0xff]  }
 0x2a7   : > { %2987 = vmatpush1.bf16.msra.mxu0 %v7982_v14 }
 0x2a8   : > { %3034 = vmatpush1.bf16.msra.mxu1 %v7982_v14  ;;  %2988 = vmatprep.subr.bf16.mxu0 %v7987_v23  ;;  %v8229_v14 = vld [vmem:[%s7064_s10 + $0x4a0] ss:$8 sps:$4 sm:$0xff]  }
 0x2a9   : > { %3035 = vmatprep.subr.bf16.mxu1 %v7987_v23  ;;  %v8234_v23 = vld [vmem:[%s7064_s10 + $0x4b4] ss:$8 sps:$4 sm:$0xff]  }
 0x2ab   : > { %2989 = vmatpush1.bf16.msra.mxu0 %v7992_v24 }
 0x2ac   : > { %3036 = vmatpush1.bf16.msra.mxu1 %v7992_v24  ;;  %2990 = vmatprep.subr.bf16.mxu0 %v7997_v27  ;;  %v8239_v24 = vld [vmem:[%s7064_s10 + $0x4b0] ss:$8 sps:$4 sm:$0xff]  }
 0x2ad   : > { %3037 = vmatprep.subr.bf16.mxu1 %v7997_v27  ;;  %v8244_v27 = vld [vmem:[%s7064_s10 + $0x4c4] ss:$8 sps:$4 sm:$0xff]  }
 0x2af   : > { %2991 = vmatpush1.bf16.msra.mxu0 %v8002_v28 }
 0x2b0   : > { %3038 = vmatpush1.bf16.msra.mxu1 %v8002_v28  ;;  %2992 = vmatprep.subr.bf16.mxu0 %v8007_v16  ;;  %v8249_v28 = vld [vmem:[%s7064_s10 + $0x4c0] ss:$8 sps:$4 sm:$0xff]  }
 0x2b1   : > { %3039 = vmatprep.subr.bf16.mxu1 %v8007_v16  ;;  %v8254_v16 = vld [vmem:[%s7064_s10 + $0x4d4] ss:$8 sps:$4 sm:$0xff]  }
 0x2b3   : > { %2993 = vmatpush1.bf16.msra.mxu0 %v8015_v25 }
 0x2b4   : > { %3040 = vmatpush1.bf16.msra.mxu1 %v8015_v25  ;;  %3245 = vmatprep.subr.bf16.mxu0 %v8102_v2  ;;  %v8262_v25 = vld [vmem:[%s7064_s10 + $0x4d0] ss:$8 sps:$4 sm:$0xff]  }
 0x2b5   : > { %3288 = vmatprep.subr.bf16.mxu1 %v8102_v2 }
 0x2b6   : > { %2995 = vmatmul.mubr.bf16.vlgmr.msra.gmra.mrb[28].mxu0 %v8104_v3 }
 0x2b7   : > { %3042 = vmatmul.mubr.bf16.vlgmr.msra.gmra.mrb[28].mxu1 %v8108_v4  ;;  %3246 = vmatpush1.bf16.msra.mxu0 %v8113_v15 }
 0x2b8   : > { %3289 = vmatpush1.bf16.msra.mxu1 %v8113_v15  ;;  %3247 = vmatprep.subr.bf16.mxu0 %v8118_v5 }
 0x2b9   : > { %3290 = vmatprep.subr.bf16.mxu1 %v8118_v5  ;;  %3277 = vmatprep.mubr.bf16.mxu0 %v7428_v17  ;;  %v8147_v17 = vld [vmem:[%s7064_s10 + $0x430] ss:$8 sps:$4 sm:$0xff]  }
 0x2ba   : > { %3320 = vmatprep.mubr.bf16.mxu1 %v7519_v54 }
 0x2bb   : > { %3248 = vmatpush1.bf16.msra.mxu0 %v8125_v8 }
 0x2bc   : > { %3291 = vmatpush1.bf16.msra.mxu1 %v8125_v8  ;;  %3249 = vmatprep.subr.bf16.mxu0 %v8130_v30 }
 0x2bd   : > { %3292 = vmatprep.subr.bf16.mxu1 %v8130_v30 }
 0x2bf   : > { %3250 = vmatpush1.bf16.msra.mxu0 %v8137_v19 }
 0x2c0   : > { %3293 = vmatpush1.bf16.msra.mxu1 %v8137_v19  ;;  %3251 = vmatprep.subr.bf16.mxu0 %v8142_v32 }
 0x2c1   : > { %3294 = vmatprep.subr.bf16.mxu1 %v8142_v32 }
 0x2c3   : > { %3252 = vmatpush1.bf16.msra.mxu0 %v8147_v17 }
 0x2c4   : > { %3295 = vmatpush1.bf16.msra.mxu1 %v8147_v17  ;;  %3253 = vmatprep.subr.bf16.mxu0 %v8152_v34 }
 0x2c5   : > { %3296 = vmatprep.subr.bf16.mxu1 %v8152_v34 }
 0x2c7   : > { %3254 = vmatpush1.bf16.msra.mxu0 %v8157_v22 }
 0x2c8   : > { %3297 = vmatpush1.bf16.msra.mxu1 %v8157_v22  ;;  %3255 = vmatprep.subr.bf16.mxu0 %v8162_v20 }
 0x2c9   : > { %3298 = vmatprep.subr.bf16.mxu1 %v8162_v20  ;;  %v2483_v43 = vpop.f32.mrb[16].mxu0 }
 0x2ca   : > { %v2554_v44 = vpop.f32.mrb[16].mxu1  ;;  %v8175_v45 = vadd.f32 %v2483_v43, %v7663_v61  ;;  %v2485_v50 = vpop.f32.mrb[17].mxu0  ;;  %v8189_v61 = vld [vmem:[%s7064_s10 + $0x460] ss:$8 sps:$4 sm:$0xff]  }
 0x2cb   : > { %v8178_v49 = vadd.f32 %v2554_v44, %v7800_v29  ;;  %v2556_v53 = vpop.f32.mrb[17].mxu1  ;;  %v8181_v55 = vadd.f32 %v2485_v50, %v7665_v0  ;;  %v2487_v57 = vpop.f32.mrb[18].mxu0  ;;  %3256 = vmatpush1.bf16.msra.mxu0 %v8167_v18  ;;  %v8194_v0 = vld [vmem:[%s7064_s10 + $0x474] ss:$8 sps:$4 sm:$0xff]   ;;  %v8380_v44 = vld [vmem:[%s7064_s10 + $0x500] ss:$8 sps:$4 sm:$0xff]  }
 0x2cc   : > { %v8184_v56 = vadd.f32 %v2556_v53, %v7802_v26  ;;  %v2558_v6 = vpop.f32.mrb[18].mxu1  ;;  %3299 = vmatpush1.bf16.msra.mxu1 %v8167_v18  ;;  %v2488_v29 = vpop.f32.mrb[19].mxu0  ;;  %3257 = vmatprep.subr.bf16.mxu0 %v8172_v40  ;;  %v8199_v26 = vld [vmem:[%s7064_s10 + $0x470] ss:$8 sps:$4 sm:$0xff]   ;;  %v8385_v50 = vld [vmem:[%s7064_s10 + $0x514] ss:$8 sps:$4 sm:$0xff]  }
 0x2cd   : > { %v2559_v7 = vpop.f32.mrb[19].mxu1  ;;  %3300 = vmatprep.subr.bf16.mxu1 %v8172_v40  ;;  %v8392_v53 = vld [vmem:[%s7064_s10 + $0x510] ss:$8 sps:$4 sm:$0xff]   ;;  %v8397_v57 = vld [vmem:[%s7064_s10 + $0x524] ss:$8 sps:$4 sm:$0xff]  }
 0x2ce   : > { %v8404_v6 = vld [vmem:[%s7064_s10 + $0x520] ss:$8 sps:$4 sm:$0xff]   ;;  %v8429_v7 = vld [vmem:[%s7064_s10 + $0x554] ss:$8 sps:$4 sm:$0xff]  }
 0x2cf   : > { %3258 = vmatpush1.bf16.msra.mxu0 %v8189_v61  ;;  %v8424_v29 = vld [vmem:[%s7064_s10 + $0x540] ss:$8 sps:$4 sm:$0xff]  }
 0x2d0   : > { %3301 = vmatpush1.bf16.msra.mxu1 %v8189_v61  ;;  %3259 = vmatprep.subr.bf16.mxu0 %v8194_v0 }
 0x2d1   : > { %3302 = vmatprep.subr.bf16.mxu1 %v8194_v0 }
 0x2d3   : > { %3260 = vmatpush1.bf16.msra.mxu0 %v8199_v26 }
 0x2d4   : > { %3303 = vmatpush1.bf16.msra.mxu1 %v8199_v26  ;;  %3261 = vmatprep.subr.bf16.mxu0 %v8204_v9 }
 0x2d5   : > { %3304 = vmatprep.subr.bf16.mxu1 %v8204_v9 }
 0x2d7   : > { %3262 = vmatpush1.bf16.msra.mxu0 %v8209_v10 }
 0x2d8   : > { %3305 = vmatpush1.bf16.msra.mxu1 %v8209_v10  ;;  %3263 = vmatprep.subr.bf16.mxu0 %v8214_v11 }
 0x2d9   : > { %3306 = vmatprep.subr.bf16.mxu1 %v8214_v11 }
 0x2db   : > { %3264 = vmatpush1.bf16.msra.mxu0 %v8219_v12 }
 0x2dc   : > { %3307 = vmatpush1.bf16.msra.mxu1 %v8219_v12  ;;  %3265 = vmatprep.subr.bf16.mxu0 %v8224_v13 }
 0x2dd   : > { %3308 = vmatprep.subr.bf16.mxu1 %v8224_v13 }
 0x2df   : > { %3266 = vmatpush1.bf16.msra.mxu0 %v8229_v14 }
 0x2e0   : > { %3309 = vmatpush1.bf16.msra.mxu1 %v8229_v14  ;;  %3267 = vmatprep.subr.bf16.mxu0 %v8234_v23 }
 0x2e1   : > { %3310 = vmatprep.subr.bf16.mxu1 %v8234_v23 }
 0x2e3   : > { %3268 = vmatpush1.bf16.msra.mxu0 %v8239_v24 }
 0x2e4   : > { %3311 = vmatpush1.bf16.msra.mxu1 %v8239_v24  ;;  %3269 = vmatprep.subr.bf16.mxu0 %v8244_v27 }
 0x2e5   : > { %3312 = vmatprep.subr.bf16.mxu1 %v8244_v27 }
 0x2e7   : > { %3270 = vmatpush1.bf16.msra.mxu0 %v8249_v28 }
 0x2e8   : > { %3313 = vmatpush1.bf16.msra.mxu1 %v8249_v28  ;;  %3271 = vmatprep.subr.bf16.mxu0 %v8254_v16 }
 0x2e9   : > { %3314 = vmatprep.subr.bf16.mxu1 %v8254_v16 }
 0x2eb   : > { %3272 = vmatpush1.bf16.msra.mxu0 %v8262_v25 }
 0x2ec   : > { %3315 = vmatpush1.bf16.msra.mxu1 %v8262_v25  ;;  %3273 = vmatprep.subr.bf16.mxu0 %v8267_v36 }
 0x2ed   : > { %3316 = vmatprep.subr.bf16.mxu1 %v8267_v36 }
 0x2ef   : > { %3274 = vmatpush1.bf16.msra.mxu0 %v8274_v39 }
 0x2f0   : > { %3317 = vmatpush1.bf16.msra.mxu1 %v8274_v39  ;;  %3275 = vmatprep.subr.bf16.mxu0 %v8279_v46 }
 0x2f1   : > { %3318 = vmatprep.subr.bf16.mxu1 %v8279_v46 }
 0x2f3   : > { %3276 = vmatpush1.bf16.msra.mxu0 %v8284_v59 }
 0x2f4   : > { %3319 = vmatpush1.bf16.msra.mxu1 %v8284_v59  ;;  %3331 = vmatprep.subr.bf16.mxu0 %v8102_v2 }
 0x2f5   : > { %3398 = vmatprep.subr.bf16.mxu1 %v8102_v2 }
 0x2f6   : > { %3278 = vmatmul.mubr.bf16.vlgmr.msra.gmra.mrb[32].mxu0 %v7513_v52 }
 0x2f7   : > { %3321 = vmatmul.mubr.bf16.vlgmr.msra.gmra.mrb[32].mxu1 %v7598_v31  ;;  %3332 = vmatpush1.bf16.msra.mxu0 %v8113_v15 }
 0x2f8   : > { %3399 = vmatpush1.bf16.msra.mxu1 %v8113_v15  ;;  %3333 = vmatprep.subr.bf16.mxu0 %v8118_v5 }
 0x2f9   : > { %3400 = vmatprep.subr.bf16.mxu1 %v8118_v5  ;;  %3363 = vmatprep.mubr.bf16.mxu0 %v8029_v38 }
 0x2fa   : > { %3430 = vmatprep.mubr.bf16.mxu1 %v8292_v1 }
 0x2fb   : > { %3334 = vmatpush1.bf16.msra.mxu0 %v8125_v8 }
 0x2fc   : > { %3401 = vmatpush1.bf16.msra.mxu1 %v8125_v8  ;;  %3335 = vmatprep.subr.bf16.mxu0 %v8130_v30 }
 0x2fd   : > { %3402 = vmatprep.subr.bf16.mxu1 %v8130_v30 }
 0x2ff   : > { %3336 = vmatpush1.bf16.msra.mxu0 %v8137_v19 }
 0x300   : > { %3403 = vmatpush1.bf16.msra.mxu1 %v8137_v19  ;;  %3337 = vmatprep.subr.bf16.mxu0 %v8142_v32 }
 0x301   : > { %3404 = vmatprep.subr.bf16.mxu1 %v8142_v32 }
 0x303   : > { %3338 = vmatpush1.bf16.msra.mxu0 %v8147_v17 }
 0x304   : > { %3405 = vmatpush1.bf16.msra.mxu1 %v8147_v17  ;;  %3339 = vmatprep.subr.bf16.mxu0 %v8152_v34 }
 0x305   : > { %3406 = vmatprep.subr.bf16.mxu1 %v8152_v34 }
 0x307   : > { %3340 = vmatpush1.bf16.msra.mxu0 %v8157_v22 }
 0x308   : > { %3407 = vmatpush1.bf16.msra.mxu1 %v8157_v22  ;;  %3341 = vmatprep.subr.bf16.mxu0 %v8162_v20 }
 0x309   : > { %3408 = vmatprep.subr.bf16.mxu1 %v8162_v20  ;;  %v2597_v52 = vpop.f32.mrb[20].mxu0 }
 0x30a   : > { %v2664_v2 = vpop.f32.mrb[20].mxu1  ;;  %v8319_v15 = vadd.f32 %v2597_v52, %v7915_v35  ;;  %v2599_v8 = vpop.f32.mrb[21].mxu0  ;;  %v8524_v52 = vld [vmem:[%s7244_s14 + $0x8] sm:$0x33] }
 0x30b   : > { %v8322_v5 = vadd.f32 %v2664_v2, %v8055_v41  ;;  %v2666_v30 = vpop.f32.mrb[21].mxu1  ;;  %v8325_v19 = vadd.f32 %v2599_v8, %v7917_v42  ;;  %v2601_v17 = vpop.f32.mrb[22].mxu0  ;;  %3342 = vmatpush1.bf16.msra.mxu0 %v8167_v18  ;;  %v5507_v42 = vcombine.low %v8257_v21, %v8257_v21  ;;  %v8471_v21 = vld [vmem:[%s7064_s10 + $0x584] ss:$8 sps:$4 sm:$0xff]   ;;  %v8529_v2 = vld [vmem:[%s7064_s10 + $0x5d0] ss:$8 sps:$4 sm:$0xff]  }
 0x30c   : > { %v8328_v32 = vadd.f32 %v2666_v30, %v8057_v48  ;;  %v2668_v34 = vpop.f32.mrb[22].mxu1  ;;  %3409 = vmatpush1.bf16.msra.mxu1 %v8167_v18  ;;  %v2602_v22 = vpop.f32.mrb[23].mxu0  ;;  %3343 = vmatprep.subr.bf16.mxu0 %v8172_v40  ;;  %v8534_v8 = vld [vmem:[%s7064_s10 + $0x5e4] ss:$8 sps:$4 sm:$0xff]   ;;  %v5574_v30 = vcombine.high %v8524_v52, %v8524_v52  ;;  %v8541_v17 = vld [vmem:[%s7064_s10 + $0x5e0] ss:$8 sps:$4 sm:$0xff]  }
 0x30d   : > { %v2669_v35 = vpop.f32.mrb[23].mxu1  ;;  %3410 = vmatprep.subr.bf16.mxu1 %v8172_v40  ;;  %v3381_v41 = vshrl.u32 %v5507_v42, 16  ;;  %v3384_v48 = vshll.u32 %v5507_v42, 16  ;;  %v8373_v40 = vld [vmem:[%s7064_s10 + $0x504] ss:$8 sps:$4 sm:$0xff]  }
 0x30e   : > { %v8546_v34 = vld [vmem:[%s7064_s10 + $0x5f4] ss:$8 sps:$4 sm:$0xff]   ;;  %v3779_v22 = vshll.u32 %v5574_v30, 16  ;;  %v8551_v35 = vld [vmem:[%s7064_s10 + $0x5f0] ss:$8 sps:$4 sm:$0xff]   ;;  %v3777_v42 = vshrl.u32 %v5574_v30, 16 }
 0x30f   : > { %3344 = vmatpush1.bf16.msra.mxu0 %v8189_v61  ;;  %v3383_v20 = vrot.slane %v3381_v41, 1  ;;  %v3386_v18 = vrot.slane %v3384_v48, 2  ;;  %v8768_v30 = vld [vmem:[%s7064_s10 + $0x6b4] ss:$8 sps:$4 sm:$0xff]  }
 0x310   : > { %3411 = vmatpush1.bf16.msra.mxu1 %v8189_v61  ;;  %3345 = vmatprep.subr.bf16.mxu0 %v8194_v0  ;;  %v8409_v61 = vld [vmem:[%s7064_s10 + $0x534] ss:$8 sps:$4 sm:$0xff]   ;;  %v3781_v41 = vrot.slane %v3779_v22, 1  ;;  %v8783_v22 = vld [vmem:[%s7064_s10 + $0x6c0] ss:$8 sps:$4 sm:$0xff]  }
 0x311   : > { %3412 = vmatprep.subr.bf16.mxu1 %v8194_v0  ;;  %v8375_v43 = vor.u32 %v3386_v18, %v3383_v20  ;;  %v8434_v0 = vld [vmem:[%s7064_s10 + $0x550] ss:$8 sps:$4 sm:$0xff]  }
 0x312   : > { %v8559_v48 = vor.u32 %v3781_v41, %v3777_v42  ;;  %v8793_v42 = vld [vmem:[%s7064_s10 + $0x6d0] ss:$8 sps:$4 sm:$0xff]   ;;  %v8798_v41 = vld [vmem:[%s7064_s10 + $0x6e4] ss:$8 sps:$4 sm:$0xff]  }
 0x313   : > { %3346 = vmatpush1.bf16.msra.mxu0 %v8199_v26 }
 0x314   : > { %3413 = vmatpush1.bf16.msra.mxu1 %v8199_v26  ;;  %3347 = vmatprep.subr.bf16.mxu0 %v8204_v9  ;;  %v8439_v26 = vld [vmem:[%s7064_s10 + $0x564] ss:$8 sps:$4 sm:$0xff]  }
 0x315   : > { %3414 = vmatprep.subr.bf16.mxu1 %v8204_v9 }
 0x317   : > { %3348 = vmatpush1.bf16.msra.mxu0 %v8209_v10 }
 0x318   : > { %3415 = vmatpush1.bf16.msra.mxu1 %v8209_v10  ;;  %3349 = vmatprep.subr.bf16.mxu0 %v8214_v11 }
 0x319   : > { %3416 = vmatprep.subr.bf16.mxu1 %v8214_v11 }
 0x31b   : > { %3350 = vmatpush1.bf16.msra.mxu0 %v8219_v12 }
 0x31c   : > { %3417 = vmatpush1.bf16.msra.mxu1 %v8219_v12  ;;  %3351 = vmatprep.subr.bf16.mxu0 %v8224_v13 }
 0x31d   : > { %3418 = vmatprep.subr.bf16.mxu1 %v8224_v13 }
 0x31f   : > { %3352 = vmatpush1.bf16.msra.mxu0 %v8229_v14 }
 0x320   : > { %3419 = vmatpush1.bf16.msra.mxu1 %v8229_v14  ;;  %3353 = vmatprep.subr.bf16.mxu0 %v8234_v23 }
 0x321   : > { %3420 = vmatprep.subr.bf16.mxu1 %v8234_v23 }
 0x323   : > { %3354 = vmatpush1.bf16.msra.mxu0 %v8239_v24 }
 0x324   : > { %3421 = vmatpush1.bf16.msra.mxu1 %v8239_v24  ;;  %3355 = vmatprep.subr.bf16.mxu0 %v8244_v27 }
 0x325   : > { %3422 = vmatprep.subr.bf16.mxu1 %v8244_v27 }
 0x327   : > { %3356 = vmatpush1.bf16.msra.mxu0 %v8249_v28 }
 0x328   : > { %3423 = vmatpush1.bf16.msra.mxu1 %v8249_v28  ;;  %3357 = vmatprep.subr.bf16.mxu0 %v8254_v16 }
 0x329   : > { %3424 = vmatprep.subr.bf16.mxu1 %v8254_v16 }
 0x32b   : > { %3358 = vmatpush1.bf16.msra.mxu0 %v8262_v25 }
 0x32c   : > { %3425 = vmatpush1.bf16.msra.mxu1 %v8262_v25  ;;  %3359 = vmatprep.subr.bf16.mxu0 %v8267_v36  ;;  %v8476_v25 = vld [vmem:[%s7064_s10 + $0x580] ss:$8 sps:$4 sm:$0xff]  }
 0x32d   : > { %3426 = vmatprep.subr.bf16.mxu1 %v8267_v36  ;;  %v8481_v36 = vld [vmem:[%s7064_s10 + $0x594] ss:$8 sps:$4 sm:$0xff]  }
 0x32f   : > { %3360 = vmatpush1.bf16.msra.mxu0 %v8274_v39 }
 0x330   : > { %3427 = vmatpush1.bf16.msra.mxu1 %v8274_v39  ;;  %3361 = vmatprep.subr.bf16.mxu0 %v8279_v46  ;;  %v8491_v39 = vld [vmem:[%s7064_s10 + $0x5a4] ss:$8 sps:$4 sm:$0xff]  }
 0x331   : > { %3428 = vmatprep.subr.bf16.mxu1 %v8279_v46  ;;  %v8496_v46 = vld [vmem:[%s7064_s10 + $0x5a0] ss:$8 sps:$4 sm:$0xff]  }
 0x333   : > { %3362 = vmatpush1.bf16.msra.mxu0 %v8284_v59 }
 0x334   : > { %3429 = vmatpush1.bf16.msra.mxu1 %v8284_v59  ;;  %3634 = vmatprep.subr.bf16.mxu0 %v8373_v40  ;;  %v8511_v59 = vld [vmem:[%s7064_s10 + $0x5c4] ss:$8 sps:$4 sm:$0xff]  }
 0x335   : > { %3677 = vmatprep.subr.bf16.mxu1 %v8373_v40 }
 0x336   : > { %3364 = vmatmul.mubr.bf16.vlgmr.msra.gmra.mrb[36].mxu0 %v8108_v4 }
 0x337   : > { %3431 = vmatmul.mubr.bf16.vlgmr.msra.gmra.mrb[36].mxu1 %v8375_v43  ;;  %3635 = vmatpush1.bf16.msra.mxu0 %v8380_v44 }
 0x338   : > { %3678 = vmatpush1.bf16.msra.mxu1 %v8380_v44  ;;  %3636 = vmatprep.subr.bf16.mxu0 %v8385_v50 }
 0x339   : > { %3679 = vmatprep.subr.bf16.mxu1 %v8385_v50  ;;  %3666 = vmatprep.mubr.bf16.mxu0 %v7519_v54  ;;  %v8414_v54 = vld [vmem:[%s7064_s10 + $0x530] ss:$8 sps:$4 sm:$0xff]  }
 0x33a   : > { %3709 = vmatprep.mubr.bf16.mxu1 %v7775_v33  ;;  %v8419_v33 = vld [vmem:[%s7064_s10 + $0x544] ss:$8 sps:$4 sm:$0xff]  }
 0x33b   : > { %3637 = vmatpush1.bf16.msra.mxu0 %v8392_v53 }
 0x33c   : > { %3680 = vmatpush1.bf16.msra.mxu1 %v8392_v53  ;;  %3638 = vmatprep.subr.bf16.mxu0 %v8397_v57 }
 0x33d   : > { %3681 = vmatprep.subr.bf16.mxu1 %v8397_v57 }
 0x33f   : > { %3639 = vmatpush1.bf16.msra.mxu0 %v8404_v6 }
 0x340   : > { %3682 = vmatpush1.bf16.msra.mxu1 %v8404_v6  ;;  %3640 = vmatprep.subr.bf16.mxu0 %v8409_v61 }
 0x341   : > { %3683 = vmatprep.subr.bf16.mxu1 %v8409_v61 }
 0x343   : > { %3641 = vmatpush1.bf16.msra.mxu0 %v8414_v54 }
 0x344   : > { %3684 = vmatpush1.bf16.msra.mxu1 %v8414_v54  ;;  %3642 = vmatprep.subr.bf16.mxu0 %v8419_v33 }
 0x345   : > { %3685 = vmatprep.subr.bf16.mxu1 %v8419_v33 }
 0x347   : > { %3643 = vmatpush1.bf16.msra.mxu0 %v8424_v29 }
 0x348   : > { %3686 = vmatpush1.bf16.msra.mxu1 %v8424_v29  ;;  %3644 = vmatprep.subr.bf16.mxu0 %v8429_v7 }
 0x349   : > { %3687 = vmatprep.subr.bf16.mxu1 %v8429_v7  ;;  %v2900_v9 = vpop.f32.mrb[24].mxu0 }
 0x34a   : > { %v2943_v10 = vpop.f32.mrb[24].mxu1  ;;  %v8442_v11 = vadd.f32 %v2900_v9, %v8175_v45  ;;  %v2902_v13 = vpop.f32.mrb[25].mxu0  ;;  %v8456_v45 = vld [vmem:[%s7064_s10 + $0x560] ss:$8 sps:$4 sm:$0xff]   ;;  %v8664_v9 = vld [vmem:[%s7064_s10 + $0x624] ss:$8 sps:$4 sm:$0xff]  }
 0x34b   : > { %v8445_v12 = vadd.f32 %v2943_v10, %v8178_v49  ;;  %v2945_v14 = vpop.f32.mrb[25].mxu1  ;;  %v8448_v23 = vadd.f32 %v2902_v13, %v8181_v55  ;;  %v2904_v27 = vpop.f32.mrb[26].mxu0  ;;  %3645 = vmatpush1.bf16.msra.mxu0 %v8434_v0  ;;  %v8461_v55 = vld [vmem:[%s7064_s10 + $0x574] ss:$8 sps:$4 sm:$0xff]   ;;  %v8671_v10 = vld [vmem:[%s7064_s10 + $0x620] ss:$8 sps:$4 sm:$0xff]  }
 0x34c   : > { %v8451_v24 = vadd.f32 %v2945_v14, %v8184_v56  ;;  %v2947_v28 = vpop.f32.mrb[26].mxu1  ;;  %3688 = vmatpush1.bf16.msra.mxu1 %v8434_v0  ;;  %v2905_v49 = vpop.f32.mrb[27].mxu0  ;;  %3646 = vmatprep.subr.bf16.mxu0 %v8439_v26  ;;  %v8466_v56 = vld [vmem:[%s7064_s10 + $0x570] ss:$8 sps:$4 sm:$0xff]   ;;  %v8676_v13 = vld [vmem:[%s7064_s10 + $0x634] ss:$8 sps:$4 sm:$0xff]  }
 0x34d   : > { %v2948_v16 = vpop.f32.mrb[27].mxu1  ;;  %3689 = vmatprep.subr.bf16.mxu1 %v8439_v26  ;;  %v8686_v14 = vld [vmem:[%s7064_s10 + $0x644] ss:$8 sps:$4 sm:$0xff]   ;;  %v8691_v27 = vld [vmem:[%s7064_s10 + $0x640] ss:$8 sps:$4 sm:$0xff]  }
 0x34e   : > { %v8696_v28 = vld [vmem:[%s7064_s10 + $0x654] ss:$8 sps:$4 sm:$0xff]   ;;  %v8706_v49 = vld [vmem:[%s7064_s10 + $0x664] ss:$8 sps:$4 sm:$0xff]  }
 0x34f   : > { %3647 = vmatpush1.bf16.msra.mxu0 %v8456_v45 }
 0x350   : > { %3690 = vmatpush1.bf16.msra.mxu1 %v8456_v45  ;;  %3648 = vmatprep.subr.bf16.mxu0 %v8461_v55 }
 0x351   : > { %3691 = vmatprep.subr.bf16.mxu1 %v8461_v55 }
 0x353   : > { %3649 = vmatpush1.bf16.msra.mxu0 %v8466_v56 }
 0x354   : > { %3692 = vmatpush1.bf16.msra.mxu1 %v8466_v56  ;;  %3650 = vmatprep.subr.bf16.mxu0 %v8471_v21 }
 0x355   : > { %3693 = vmatprep.subr.bf16.mxu1 %v8471_v21 }
 0x357   : > { %3651 = vmatpush1.bf16.msra.mxu0 %v8476_v25 }
 0x358   : > { %3694 = vmatpush1.bf16.msra.mxu1 %v8476_v25  ;;  %3652 = vmatprep.subr.bf16.mxu0 %v8481_v36 }
 0x359   : > { %3695 = vmatprep.subr.bf16.mxu1 %v8481_v36 }
 0x35b   : > { %3653 = vmatpush1.bf16.msra.mxu0 %v8486_v51 }
 0x35c   : > { %3696 = vmatpush1.bf16.msra.mxu1 %v8486_v51  ;;  %3654 = vmatprep.subr.bf16.mxu0 %v8491_v39 }
 0x35d   : > { %3697 = vmatprep.subr.bf16.mxu1 %v8491_v39 }
 0x35f   : > { %3655 = vmatpush1.bf16.msra.mxu0 %v8496_v46 }
 0x360   : > { %3698 = vmatpush1.bf16.msra.mxu1 %v8496_v46  ;;  %3656 = vmatprep.subr.bf16.mxu0 %v8501_v47 }
 0x361   : > { %3699 = vmatprep.subr.bf16.mxu1 %v8501_v47 }
 0x363   : > { %3657 = vmatpush1.bf16.msra.mxu0 %v8506_v58 }
 0x364   : > { %3700 = vmatpush1.bf16.msra.mxu1 %v8506_v58  ;;  %3658 = vmatprep.subr.bf16.mxu0 %v8511_v59 }
 0x365   : > { %3701 = vmatprep.subr.bf16.mxu1 %v8511_v59 }
 0x367   : > { %3659 = vmatpush1.bf16.msra.mxu0 %v8516_v62 }
 0x368   : > { %3702 = vmatpush1.bf16.msra.mxu1 %v8516_v62  ;;  %3660 = vmatprep.subr.bf16.mxu0 %v8521_v63 }
 0x369   : > { %3703 = vmatprep.subr.bf16.mxu1 %v8521_v63 }
 0x36b   : > { %3661 = vmatpush1.bf16.msra.mxu0 %v8529_v2 }
 0x36c   : > { %3704 = vmatpush1.bf16.msra.mxu1 %v8529_v2  ;;  %3662 = vmatprep.subr.bf16.mxu0 %v8534_v8 }
 0x36d   : > { %3705 = vmatprep.subr.bf16.mxu1 %v8534_v8 }
 0x36f   : > { %3663 = vmatpush1.bf16.msra.mxu0 %v8541_v17 }
 0x370   : > { %3706 = vmatpush1.bf16.msra.mxu1 %v8541_v17  ;;  %3664 = vmatprep.subr.bf16.mxu0 %v8546_v34 }
 0x371   : > { %3707 = vmatprep.subr.bf16.mxu1 %v8546_v34 }
 0x373   : > { %3665 = vmatpush1.bf16.msra.mxu0 %v8551_v35 }
 0x374   : > { %3708 = vmatpush1.bf16.msra.mxu1 %v8551_v35  ;;  %3720 = vmatprep.subr.bf16.mxu0 %v8373_v40 }
 0x375   : > { %3785 = vmatprep.subr.bf16.mxu1 %v8373_v40 }
 0x376   : > { %3667 = vmatmul.mubr.bf16.vlgmr.msra.gmra.mrb[40].mxu0 %v7598_v31 }
 0x377   : > { %3710 = vmatmul.mubr.bf16.vlgmr.msra.gmra.mrb[40].mxu1 %v7849_v60  ;;  %3721 = vmatpush1.bf16.msra.mxu0 %v8380_v44 }
 0x378   : > { %3786 = vmatpush1.bf16.msra.mxu1 %v8380_v44  ;;  %3722 = vmatprep.subr.bf16.mxu0 %v8385_v50 }
 0x379   : > { %3787 = vmatprep.subr.bf16.mxu1 %v8385_v50  ;;  %3752 = vmatprep.mubr.bf16.mxu0 %v8292_v1 }
 0x37a   : > { %3817 = vmatprep.mubr.bf16.mxu1 %v8559_v48 }
 0x37b   : > { %3723 = vmatpush1.bf16.msra.mxu0 %v8392_v53 }
 0x37c   : > { %3788 = vmatpush1.bf16.msra.mxu1 %v8392_v53  ;;  %3724 = vmatprep.subr.bf16.mxu0 %v8397_v57 }
 0x37d   : > { %3789 = vmatprep.subr.bf16.mxu1 %v8397_v57 }
 0x37f   : > { %3725 = vmatpush1.bf16.msra.mxu0 %v8404_v6 }
 0x380   : > { %3790 = vmatpush1.bf16.msra.mxu1 %v8404_v6  ;;  %3726 = vmatprep.subr.bf16.mxu0 %v8409_v61 }
 0x381   : > { %3791 = vmatprep.subr.bf16.mxu1 %v8409_v61 }
 0x383   : > { %3727 = vmatpush1.bf16.msra.mxu0 %v8414_v54 }
 0x384   : > { %3792 = vmatpush1.bf16.msra.mxu1 %v8414_v54  ;;  %3728 = vmatprep.subr.bf16.mxu0 %v8419_v33 }
 0x385   : > { %3793 = vmatprep.subr.bf16.mxu1 %v8419_v33  ;;  %v8640_v33 = vld [vmem:[%s7064_s10 + $0x604] ss:$8 sps:$4 sm:$0xff]  }
 0x387   : > { %3729 = vmatpush1.bf16.msra.mxu0 %v8424_v29 }
 0x388   : > { %3794 = vmatpush1.bf16.msra.mxu1 %v8424_v29  ;;  %3730 = vmatprep.subr.bf16.mxu0 %v8429_v7 }
 0x389   : > { %3795 = vmatprep.subr.bf16.mxu1 %v8429_v7  ;;  %v2996_v31 = vpop.f32.mrb[28].mxu0  ;;  %v8647_v7 = vld [vmem:[%s7064_s10 + $0x600] ss:$8 sps:$4 sm:$0xff]  }
 0x38a   : > { %v3043_v60 = vpop.f32.mrb[28].mxu1  ;;  %v8586_v20 = vadd.f32 %v2996_v31, %v8319_v15  ;;  %v2998_v40 = vpop.f32.mrb[29].mxu0  ;;  %v8803_v31 = vld [vmem:[%s7064_s10 + $0x6e0] ss:$8 sps:$4 sm:$0xff]  }
 0x38b   : > { %v8589_v18 = vadd.f32 %v3043_v60, %v8322_v5  ;;  %v3045_v44 = vpop.f32.mrb[29].mxu1  ;;  %v8592_v50 = vadd.f32 %v2998_v40, %v8325_v19  ;;  %v3000_v57 = vpop.f32.mrb[30].mxu0  ;;  %3731 = vmatpush1.bf16.msra.mxu0 %v8434_v0  ;;  %v5573_v5 = vcombine.low %v8524_v52, %v8524_v52  ;;  %v8753_v52 = vld [vmem:[%s7064_s10 + $0x690] ss:$8 sps:$4 sm:$0xff]   ;;  %v8808_v60 = vld [vmem:[%s7064_s10 + $0x6f4] ss:$8 sps:$4 sm:$0xff]  }
 0x38c   : > { %v8595_v53 = vadd.f32 %v3045_v44, %v8328_v32  ;;  %v3047_v6 = vpop.f32.mrb[30].mxu1  ;;  %3796 = vmatpush1.bf16.msra.mxu1 %v8434_v0  ;;  %v3001_v61 = vpop.f32.mrb[31].mxu0  ;;  %3732 = vmatprep.subr.bf16.mxu0 %v8439_v26  ;;  %v8652_v0 = vld [vmem:[%s7064_s10 + $0x614] ss:$8 sps:$4 sm:$0xff]   ;;  %v8811_v40 = vld [vmem:[%s7244_s14 + $0x8] sm:$0x88] }
 0x38d   : > { %v3048_v15 = vpop.f32.mrb[31].mxu1  ;;  %3797 = vmatprep.subr.bf16.mxu1 %v8439_v26  ;;  %v3772_v19 = vshll.u32 %v5573_v5, 16  ;;  %v3770_v32 = vshrl.u32 %v5573_v5, 16  ;;  %v8659_v26 = vld [vmem:[%s7064_s10 + $0x610] ss:$8 sps:$4 sm:$0xff]   ;;  %v5640_v6 = vcombine.high %v8811_v40, %v8811_v40 }
 0x38e   : > { %v8814_v44 = vld [vmem:[%s7244_s14 + $0x10] sm:$0x44] }
 0x38f   : > { %3733 = vmatpush1.bf16.msra.mxu0 %v8456_v45  ;;  %v3774_v54 = vrot.slane %v3772_v19, 1  ;;  %v8819_v57 = vld [vmem:[%s7064_s10 + $0x6f0] ss:$8 sps:$4 sm:$0xff]   ;;  %v5642_v61 = vcombine.high %v8814_v44, %v8814_v44  ;;  %v4114_v15 = vrot.slane %v5640_v6, 3 }
 0x390   : > { %3798 = vmatpush1.bf16.msra.mxu1 %v8456_v45  ;;  %3734 = vmatprep.subr.bf16.mxu0 %v8461_v55  ;;  %v8701_v45 = vld [vmem:[%s7064_s10 + $0x650] ss:$8 sps:$4 sm:$0xff]  }
 0x391   : > { %3799 = vmatprep.subr.bf16.mxu1 %v8461_v55  ;;  %v8642_v29 = vor.u32 %v3774_v54, %v3770_v32  ;;  %v8831_v5 = vrot.slane %v5642_v61, 2  ;;  %v9065_v6 = vld [vmem:[%s7064_s10 + $0x7d0] ss:$8 sps:$4 sm:$0xff]   ;;  %v9070_v61 = vld [vmem:[%s7064_s10 + $0x7e4] ss:$8 sps:$4 sm:$0xff]  }
 0x393   : > { %3735 = vmatpush1.bf16.msra.mxu0 %v8466_v56 }
 0x394   : > { %3800 = vmatpush1.bf16.msra.mxu1 %v8466_v56  ;;  %3736 = vmatprep.subr.bf16.mxu0 %v8471_v21 }
 0x395   : > { %3801 = vmatprep.subr.bf16.mxu1 %v8471_v21 }
 0x397   : > { %3737 = vmatpush1.bf16.msra.mxu0 %v8476_v25 }
 0x398   : > { %3802 = vmatpush1.bf16.msra.mxu1 %v8476_v25  ;;  %3738 = vmatprep.subr.bf16.mxu0 %v8481_v36 }
 0x399   : > { %3803 = vmatprep.subr.bf16.mxu1 %v8481_v36 }
 0x39b   : > { %3739 = vmatpush1.bf16.msra.mxu0 %v8486_v51 }
 0x39c   : > { %3804 = vmatpush1.bf16.msra.mxu1 %v8486_v51  ;;  %3740 = vmatprep.subr.bf16.mxu0 %v8491_v39 }
 0x39d   : > { %3805 = vmatprep.subr.bf16.mxu1 %v8491_v39 }
 0x39f   : > { %3741 = vmatpush1.bf16.msra.mxu0 %v8496_v46 }
 0x3a0   : > { %3806 = vmatpush1.bf16.msra.mxu1 %v8496_v46  ;;  %3742 = vmatprep.subr.bf16.mxu0 %v8501_v47 }
 0x3a1   : > { %3807 = vmatprep.subr.bf16.mxu1 %v8501_v47 }
 0x3a3   : > { %3743 = vmatpush1.bf16.msra.mxu0 %v8506_v58 }
 0x3a4   : > { %3808 = vmatpush1.bf16.msra.mxu1 %v8506_v58  ;;  %3744 = vmatprep.subr.bf16.mxu0 %v8511_v59 }
 0x3a5   : > { %3809 = vmatprep.subr.bf16.mxu1 %v8511_v59  ;;  %v8738_v59 = vld [vmem:[%s7064_s10 + $0x684] ss:$8 sps:$4 sm:$0xff]  }
 0x3a7   : > { %3745 = vmatpush1.bf16.msra.mxu0 %v8516_v62 }
 0x3a8   : > { %3810 = vmatpush1.bf16.msra.mxu1 %v8516_v62  ;;  %3746 = vmatprep.subr.bf16.mxu0 %v8521_v63  ;;  %v8743_v62 = vld [vmem:[%s7064_s10 + $0x680] ss:$8 sps:$4 sm:$0xff]  }
 0x3a9   : > { %3811 = vmatprep.subr.bf16.mxu1 %v8521_v63  ;;  %v8748_v63 = vld [vmem:[%s7064_s10 + $0x694] ss:$8 sps:$4 sm:$0xff]  }
 0x3ab   : > { %3747 = vmatpush1.bf16.msra.mxu0 %v8529_v2 }
 0x3ac   : > { %3812 = vmatpush1.bf16.msra.mxu1 %v8529_v2  ;;  %3748 = vmatprep.subr.bf16.mxu0 %v8534_v8  ;;  %v8758_v2 = vld [vmem:[%s7064_s10 + $0x6a4] ss:$8 sps:$4 sm:$0xff]  }
 0x3ad   : > { %3813 = vmatprep.subr.bf16.mxu1 %v8534_v8  ;;  %v8763_v8 = vld [vmem:[%s7064_s10 + $0x6a0] ss:$8 sps:$4 sm:$0xff]  }
 0x3af   : > { %3749 = vmatpush1.bf16.msra.mxu0 %v8541_v17 }
 0x3b0   : > { %3814 = vmatpush1.bf16.msra.mxu1 %v8541_v17  ;;  %3750 = vmatprep.subr.bf16.mxu0 %v8546_v34  ;;  %v8773_v17 = vld [vmem:[%s7064_s10 + $0x6b0] ss:$8 sps:$4 sm:$0xff]  }
 0x3b1   : > { %3815 = vmatprep.subr.bf16.mxu1 %v8546_v34  ;;  %v8778_v34 = vld [vmem:[%s7064_s10 + $0x6c4] ss:$8 sps:$4 sm:$0xff]  }
 0x3b3   : > { %3751 = vmatpush1.bf16.msra.mxu0 %v8551_v35 }
 0x3b4   : > { %3816 = vmatpush1.bf16.msra.mxu1 %v8551_v35  ;;  %4021 = vmatprep.subr.bf16.mxu0 %v8640_v33  ;;  %v8788_v35 = vld [vmem:[%s7064_s10 + $0x6d4] ss:$8 sps:$4 sm:$0xff]  }
 0x3b5   : > { %4064 = vmatprep.subr.bf16.mxu1 %v8640_v33 }
 0x3b6   : > { %3753 = vmatmul.mubr.bf16.vlgmr.msra.gmra.mrb[44].mxu0 %v8375_v43 }
 0x3b7   : > { %3818 = vmatmul.mubr.bf16.vlgmr.msra.gmra.mrb[44].mxu1 %v8642_v29  ;;  %4022 = vmatpush1.bf16.msra.mxu0 %v8647_v7 }
 0x3b8   : > { %4065 = vmatpush1.bf16.msra.mxu1 %v8647_v7  ;;  %4023 = vmatprep.subr.bf16.mxu0 %v8652_v0 }
 0x3b9   : > { %4066 = vmatprep.subr.bf16.mxu1 %v8652_v0  ;;  %4053 = vmatprep.mubr.bf16.mxu0 %v8025_v37  ;;  %v8681_v37 = vld [vmem:[%s7064_s10 + $0x630] ss:$8 sps:$4 sm:$0xff]  }
 0x3ba   : > { %4096 = vmatprep.mubr.bf16.mxu1 %v8029_v38 }
 0x3bb   : > { %4024 = vmatpush1.bf16.msra.mxu0 %v8659_v26 }
 0x3bc   : > { %4067 = vmatpush1.bf16.msra.mxu1 %v8659_v26  ;;  %4025 = vmatprep.subr.bf16.mxu0 %v8664_v9 }
 0x3bd   : > { %4068 = vmatprep.subr.bf16.mxu1 %v8664_v9 }
 0x3bf   : > { %4026 = vmatpush1.bf16.msra.mxu0 %v8671_v10 }
 0x3c0   : > { %4069 = vmatpush1.bf16.msra.mxu1 %v8671_v10  ;;  %4027 = vmatprep.subr.bf16.mxu0 %v8676_v13 }
 0x3c1   : > { %4070 = vmatprep.subr.bf16.mxu1 %v8676_v13 }
 0x3c3   : > { %4028 = vmatpush1.bf16.msra.mxu0 %v8681_v37 }
 0x3c4   : > { %4071 = vmatpush1.bf16.msra.mxu1 %v8681_v37  ;;  %4029 = vmatprep.subr.bf16.mxu0 %v8686_v14 }
 0x3c5   : > { %4072 = vmatprep.subr.bf16.mxu1 %v8686_v14 }
 0x3c7   : > { %4030 = vmatpush1.bf16.msra.mxu0 %v8691_v27 }
 0x3c8   : > { %4073 = vmatpush1.bf16.msra.mxu1 %v8691_v27  ;;  %4031 = vmatprep.subr.bf16.mxu0 %v8696_v28 }
 0x3c9   : > { %4074 = vmatprep.subr.bf16.mxu1 %v8696_v28  ;;  %v3279_v16 = vpop.f32.mrb[32].mxu0 }
 0x3ca   : > { %v3322_v55 = vpop.f32.mrb[32].mxu1  ;;  %v8709_v56 = vadd.f32 %v3279_v16, %v8442_v11  ;;  %v3281_v25 = vpop.f32.mrb[33].mxu0  ;;  %v8723_v11 = vld [vmem:[%s7064_s10 + $0x660] ss:$8 sps:$4 sm:$0xff]  }
 0x3cb   : > { %v8712_v21 = vadd.f32 %v3322_v55, %v8445_v12  ;;  %v3324_v36 = vpop.f32.mrb[33].mxu1  ;;  %v8715_v51 = vadd.f32 %v3281_v25, %v8448_v23  ;;  %v3283_v46 = vpop.f32.mrb[34].mxu0  ;;  %4032 = vmatpush1.bf16.msra.mxu0 %v8701_v45  ;;  %v8728_v23 = vld [vmem:[%s7064_s10 + $0x674] ss:$8 sps:$4 sm:$0xff]   ;;  %v8943_v16 = vld [vmem:[%s7064_s10 + $0x720] ss:$8 sps:$4 sm:$0xff]  }
 0x3cc   : > { %v8718_v39 = vadd.f32 %v3324_v36, %v8451_v24  ;;  %v3326_v47 = vpop.f32.mrb[34].mxu1  ;;  %4075 = vmatpush1.bf16.msra.mxu1 %v8701_v45  ;;  %v3284_v12 = vpop.f32.mrb[35].mxu0  ;;  %4033 = vmatprep.subr.bf16.mxu0 %v8706_v49  ;;  %v8733_v24 = vld [vmem:[%s7064_s10 + $0x670] ss:$8 sps:$4 sm:$0xff]   ;;  %v8948_v55 = vld [vmem:[%s7064_s10 + $0x734] ss:$8 sps:$4 sm:$0xff]  }
 0x3cd   : > { %v3327_v58 = vpop.f32.mrb[35].mxu1  ;;  %4076 = vmatprep.subr.bf16.mxu1 %v8706_v49  ;;  %v8958_v25 = vld [vmem:[%s7064_s10 + $0x744] ss:$8 sps:$4 sm:$0xff]   ;;  %v8963_v36 = vld [vmem:[%s7064_s10 + $0x740] ss:$8 sps:$4 sm:$0xff]  }
 0x3ce   : > { %v8968_v46 = vld [vmem:[%s7064_s10 + $0x754] ss:$8 sps:$4 sm:$0xff]   ;;  %v8973_v47 = vld [vmem:[%s7064_s10 + $0x750] ss:$8 sps:$4 sm:$0xff]  }
 0x3cf   : > { %4034 = vmatpush1.bf16.msra.mxu0 %v8723_v11 }
 0x3d0   : > { %4077 = vmatpush1.bf16.msra.mxu1 %v8723_v11  ;;  %4035 = vmatprep.subr.bf16.mxu0 %v8728_v23 }
 0x3d1   : > { %4078 = vmatprep.subr.bf16.mxu1 %v8728_v23 }
 0x3d3   : > { %4036 = vmatpush1.bf16.msra.mxu0 %v8733_v24 }
 0x3d4   : > { %4079 = vmatpush1.bf16.msra.mxu1 %v8733_v24  ;;  %4037 = vmatprep.subr.bf16.mxu0 %v8738_v59 }
 0x3d5   : > { %4080 = vmatprep.subr.bf16.mxu1 %v8738_v59 }
 0x3d7   : > { %4038 = vmatpush1.bf16.msra.mxu0 %v8743_v62 }
 0x3d8   : > { %4081 = vmatpush1.bf16.msra.mxu1 %v8743_v62  ;;  %4039 = vmatprep.subr.bf16.mxu0 %v8748_v63 }
 0x3d9   : > { %4082 = vmatprep.subr.bf16.mxu1 %v8748_v63 }
 0x3db   : > { %4040 = vmatpush1.bf16.msra.mxu0 %v8753_v52 }
 0x3dc   : > { %4083 = vmatpush1.bf16.msra.mxu1 %v8753_v52  ;;  %4041 = vmatprep.subr.bf16.mxu0 %v8758_v2 }
 0x3dd   : > { %4084 = vmatprep.subr.bf16.mxu1 %v8758_v2 }
 0x3df   : > { %4042 = vmatpush1.bf16.msra.mxu0 %v8763_v8 }
 0x3e0   : > { %4085 = vmatpush1.bf16.msra.mxu1 %v8763_v8  ;;  %4043 = vmatprep.subr.bf16.mxu0 %v8768_v30 }
 0x3e1   : > { %4086 = vmatprep.subr.bf16.mxu1 %v8768_v30 }
 0x3e3   : > { %4044 = vmatpush1.bf16.msra.mxu0 %v8773_v17 }
 0x3e4   : > { %4087 = vmatpush1.bf16.msra.mxu1 %v8773_v17  ;;  %4045 = vmatprep.subr.bf16.mxu0 %v8778_v34 }
 0x3e5   : > { %4088 = vmatprep.subr.bf16.mxu1 %v8778_v34 }
 0x3e7   : > { %4046 = vmatpush1.bf16.msra.mxu0 %v8783_v22 }
 0x3e8   : > { %4089 = vmatpush1.bf16.msra.mxu1 %v8783_v22  ;;  %4047 = vmatprep.subr.bf16.mxu0 %v8788_v35 }
 0x3e9   : > { %4090 = vmatprep.subr.bf16.mxu1 %v8788_v35 }
 0x3eb   : > { %4048 = vmatpush1.bf16.msra.mxu0 %v8793_v42 }
 0x3ec   : > { %4091 = vmatpush1.bf16.msra.mxu1 %v8793_v42  ;;  %4049 = vmatprep.subr.bf16.mxu0 %v8798_v41 }
 0x3ed   : > { %4092 = vmatprep.subr.bf16.mxu1 %v8798_v41 }
 0x3ef   : > { %4050 = vmatpush1.bf16.msra.mxu0 %v8803_v31 }
 0x3f0   : > { %4093 = vmatpush1.bf16.msra.mxu1 %v8803_v31  ;;  %4051 = vmatprep.subr.bf16.mxu0 %v8808_v60 }
 0x3f1   : > { %4094 = vmatprep.subr.bf16.mxu1 %v8808_v60 }
 0x3f3   : > { %4052 = vmatpush1.bf16.msra.mxu0 %v8819_v57 }
 0x3f4   : > { %4095 = vmatpush1.bf16.msra.mxu1 %v8819_v57  ;;  %4117 = vmatprep.subr.bf16.mxu0 %v8640_v33 }
 0x3f5   : > { %4170 = vmatprep.subr.bf16.mxu1 %v8640_v33 }
 0x3f6   : > { %4054 = vmatmul.mubr.bf16.vlgmr.msra.gmra.mrb[48].mxu0 %v8104_v3 }
 0x3f7   : > { %4097 = vmatmul.mubr.bf16.vlgmr.msra.gmra.mrb[48].mxu1 %v8108_v4  ;;  %4118 = vmatpush1.bf16.msra.mxu0 %v8647_v7 }
 0x3f8   : > { %4171 = vmatpush1.bf16.msra.mxu1 %v8647_v7  ;;  %4119 = vmatprep.subr.bf16.mxu0 %v8652_v0 }
 0x3f9   : > { %4172 = vmatprep.subr.bf16.mxu1 %v8652_v0  ;;  %4149 = vmatprep.mubr.bf16.mxu0 %v4114_v15  ;;  %v6253_v15 = vld [vmem:[%s7244_s14 + $0xc] ss:$8 sps:$4 sm:$0x18]  }
 0x3fa   : > { %4202 = vmatprep.mubr.bf16.mxu1 %v8831_v5 }
 0x3fb   : > { %4120 = vmatpush1.bf16.msra.mxu0 %v8659_v26 }
 0x3fc   : > { %4173 = vmatpush1.bf16.msra.mxu1 %v8659_v26  ;;  %4121 = vmatprep.subr.bf16.mxu0 %v8664_v9 }
 0x3fd   : > { %4174 = vmatprep.subr.bf16.mxu1 %v8664_v9 }
 0x3ff   : > { %4122 = vmatpush1.bf16.msra.mxu0 %v8671_v10 }
 0x400   : > { %4175 = vmatpush1.bf16.msra.mxu1 %v8671_v10  ;;  %4123 = vmatprep.subr.bf16.mxu0 %v8676_v13 }
 0x401   : > { %4176 = vmatprep.subr.bf16.mxu1 %v8676_v13 }
 0x403   : > { %4124 = vmatpush1.bf16.msra.mxu0 %v8681_v37 }
 0x404   : > { %4177 = vmatpush1.bf16.msra.mxu1 %v8681_v37  ;;  %4125 = vmatprep.subr.bf16.mxu0 %v8686_v14 }
 0x405   : > { %4178 = vmatprep.subr.bf16.mxu1 %v8686_v14 }
 0x407   : > { %4126 = vmatpush1.bf16.msra.mxu0 %v8691_v27 }
 0x408   : > { %4179 = vmatpush1.bf16.msra.mxu1 %v8691_v27  ;;  %4127 = vmatprep.subr.bf16.mxu0 %v8696_v28  ;;  %v8920_v27 = vld [vmem:[%s7064_s10 + $0x700] ss:$8 sps:$4 sm:$0xff]  }
 0x409   : > { %4180 = vmatprep.subr.bf16.mxu1 %v8696_v28  ;;  %v3365_v3 = vpop.f32.mrb[36].mxu0  ;;  %v8925_v28 = vld [vmem:[%s7064_s10 + $0x714] ss:$8 sps:$4 sm:$0xff]  }
 0x40a   : > { %v3432_v19 = vpop.f32.mrb[36].mxu1  ;;  %v8857_v32 = vadd.f32 %v3365_v3, %v8586_v20  ;;  %v3367_v33 = vpop.f32.mrb[37].mxu0  ;;  %v9076_v3 = vld [vmem:[%s7064_s10 + $0x7e0] ss:$8 sps:$4 sm:$0xff]  }
 0x40b   : > { %v8860_v54 = vadd.f32 %v3432_v19, %v8589_v18  ;;  %v3434_v7 = vpop.f32.mrb[37].mxu1  ;;  %v8863_v0 = vadd.f32 %v3367_v33, %v8592_v50  ;;  %v3369_v9 = vpop.f32.mrb[38].mxu0  ;;  %4128 = vmatpush1.bf16.msra.mxu0 %v8701_v45  ;;  %v5639_v18 = vcombine.low %v8811_v40, %v8811_v40  ;;  %v5641_v50 = vcombine.low %v8814_v44, %v8814_v44  ;;  %v9050_v40 = vld [vmem:[%s7064_s10 + $0x7c4] ss:$8 sps:$4 sm:$0xff]   ;;  %v9055_v44 = vld [vmem:[%s7064_s10 + $0x7c0] ss:$8 sps:$4 sm:$0xff]  }
 0x40c   : > { %v8866_v26 = vadd.f32 %v3434_v7, %v8595_v53  ;;  %v3436_v10 = vpop.f32.mrb[38].mxu1  ;;  %4181 = vmatpush1.bf16.msra.mxu1 %v8701_v45  ;;  %v3370_v13 = vpop.f32.mrb[39].mxu0  ;;  %4129 = vmatprep.subr.bf16.mxu0 %v8706_v49  ;;  %v8913_v53 = vld [vmem:[%s7064_s10 + $0x704] ss:$8 sps:$4 sm:$0xff]   ;;  %v8931_v45 = vld [vmem:[%s7064_s10 + $0x710] ss:$8 sps:$4 sm:$0xff]  }
 0x40d   : > { %v3437_v20 = vpop.f32.mrb[39].mxu1  ;;  %4182 = vmatprep.subr.bf16.mxu1 %v8706_v49  ;;  %v4113_v37 = vrot.slane %v5639_v18, 3  ;;  %v8915_v14 = vrot.slane %v5641_v50, 2  ;;  %v8936_v49 = vld [vmem:[%s7064_s10 + $0x724] ss:$8 sps:$4 sm:$0xff]   ;;  %v4554_v33 = vshrl.u32 %v6253_v15, 16 }
 0x40e   : > { %v9081_v19 = vld [vmem:[%s7064_s10 + $0x7f4] ss:$8 sps:$4 sm:$0xff]   ;;  %v4557_v7 = vshll.u32 %v6253_v15, 16  ;;  %v9086_v9 = vld [vmem:[%s7064_s10 + $0x7f0] ss:$8 sps:$4 sm:$0xff]  }
 0x40f   : > { %4130 = vmatpush1.bf16.msra.mxu0 %v8723_v11  ;;  %v4556_v10 = vrot.slane %v4554_v33, 3  ;;  %v9307_v15 = vld [vmem:[%s7064_s10 + $0x8b0] ss:$8 sps:$4 sm:$0xff]   ;;  %v9322_v33 = vld [vmem:[%s7064_s10 + $0x8d4] ss:$8 sps:$4 sm:$0xff]  }
 0x410   : > { %4183 = vmatpush1.bf16.msra.mxu1 %v8723_v11  ;;  %4131 = vmatprep.subr.bf16.mxu0 %v8728_v23  ;;  %v8978_v11 = vld [vmem:[%s7064_s10 + $0x764] ss:$8 sps:$4 sm:$0xff]   ;;  %v4559_v13 = vrot.slane %v4557_v7, 4  ;;  %v9325_v7 = vld [vmem:[%s7244_s14 + $0x10] sm:$0xcc] }
 0x411   : > { %4184 = vmatprep.subr.bf16.mxu1 %v8728_v23 }
 0x412   : > { %v9094_v20 = vor.u32 %v4559_v13, %v4556_v10  ;;  %v9335_v10 = vld [vmem:[%s7064_s10 + $0x8e4] ss:$8 sps:$4 sm:$0xff]   ;;  %v5774_v13 = vcombine.high %v9325_v7, %v9325_v7 }
 0x413   : > { %4132 = vmatpush1.bf16.msra.mxu0 %v8733_v24 }
 0x414   : > { %4185 = vmatpush1.bf16.msra.mxu1 %v8733_v24  ;;  %4133 = vmatprep.subr.bf16.mxu0 %v8738_v59 }
 0x415   : > { %4186 = vmatprep.subr.bf16.mxu1 %v8738_v59 }
 0x417   : > { %4134 = vmatpush1.bf16.msra.mxu0 %v8743_v62 }
 0x418   : > { %4187 = vmatpush1.bf16.msra.mxu1 %v8743_v62  ;;  %4135 = vmatprep.subr.bf16.mxu0 %v8748_v63 }
 0x419   : > { %4188 = vmatprep.subr.bf16.mxu1 %v8748_v63 }
 0x41b   : > { %4136 = vmatpush1.bf16.msra.mxu0 %v8753_v52 }
 0x41c   : > { %4189 = vmatpush1.bf16.msra.mxu1 %v8753_v52  ;;  %4137 = vmatprep.subr.bf16.mxu0 %v8758_v2 }
 0x41d   : > { %4190 = vmatprep.subr.bf16.mxu1 %v8758_v2 }
 0x41f   : > { %4138 = vmatpush1.bf16.msra.mxu0 %v8763_v8 }
 0x420   : > { %4191 = vmatpush1.bf16.msra.mxu1 %v8763_v8  ;;  %4139 = vmatprep.subr.bf16.mxu0 %v8768_v30 }
 0x421   : > { %4192 = vmatprep.subr.bf16.mxu1 %v8768_v30 }
 0x423   : > { %4140 = vmatpush1.bf16.msra.mxu0 %v8773_v17 }
 0x424   : > { %4193 = vmatpush1.bf16.msra.mxu1 %v8773_v17  ;;  %4141 = vmatprep.subr.bf16.mxu0 %v8778_v34  ;;  %v9010_v17 = vld [vmem:[%s7064_s10 + $0x784] ss:$8 sps:$4 sm:$0xff]  }
 0x425   : > { %4194 = vmatprep.subr.bf16.mxu1 %v8778_v34  ;;  %v9015_v34 = vld [vmem:[%s7064_s10 + $0x780] ss:$8 sps:$4 sm:$0xff]  }
 0x427   : > { %4142 = vmatpush1.bf16.msra.mxu0 %v8783_v22 }
 0x428   : > { %4195 = vmatpush1.bf16.msra.mxu1 %v8783_v22  ;;  %4143 = vmatprep.subr.bf16.mxu0 %v8788_v35  ;;  %v9020_v22 = vld [vmem:[%s7064_s10 + $0x794] ss:$8 sps:$4 sm:$0xff]  }
 0x429   : > { %4196 = vmatprep.subr.bf16.mxu1 %v8788_v35  ;;  %v9025_v35 = vld [vmem:[%s7064_s10 + $0x790] ss:$8 sps:$4 sm:$0xff]  }
 0x42b   : > { %4144 = vmatpush1.bf16.msra.mxu0 %v8793_v42 }
 0x42c   : > { %4197 = vmatpush1.bf16.msra.mxu1 %v8793_v42  ;;  %4145 = vmatprep.subr.bf16.mxu0 %v8798_v41  ;;  %v9030_v42 = vld [vmem:[%s7064_s10 + $0x7a4] ss:$8 sps:$4 sm:$0xff]  }
 0x42d   : > { %4198 = vmatprep.subr.bf16.mxu1 %v8798_v41  ;;  %v9035_v41 = vld [vmem:[%s7064_s10 + $0x7a0] ss:$8 sps:$4 sm:$0xff]  }
 0x42f   : > { %4146 = vmatpush1.bf16.msra.mxu0 %v8803_v31 }
 0x430   : > { %4199 = vmatpush1.bf16.msra.mxu1 %v8803_v31  ;;  %4147 = vmatprep.subr.bf16.mxu0 %v8808_v60  ;;  %v9040_v31 = vld [vmem:[%s7064_s10 + $0x7b4] ss:$8 sps:$4 sm:$0xff]  }
 0x431   : > { %4200 = vmatprep.subr.bf16.mxu1 %v8808_v60  ;;  %v9045_v60 = vld [vmem:[%s7064_s10 + $0x7b0] ss:$8 sps:$4 sm:$0xff]  }
 0x433   : > { %4148 = vmatpush1.bf16.msra.mxu0 %v8819_v57 }
 0x434   : > { %4201 = vmatpush1.bf16.msra.mxu1 %v8819_v57  ;;  %4406 = vmatprep.subr.bf16.mxu0 %v8913_v53  ;;  %v9060_v57 = vld [vmem:[%s7064_s10 + $0x7d4] ss:$8 sps:$4 sm:$0xff]  }
 0x435   : > { %4449 = vmatprep.subr.bf16.mxu1 %v8913_v53 }
 0x436   : > { %4150 = vmatmul.mubr.bf16.vlgmr.msra.gmra.mrb[52].mxu0 %v4113_v37 }
 0x437   : > { %4203 = vmatmul.mubr.bf16.vlgmr.msra.gmra.mrb[52].mxu1 %v8915_v14  ;;  %4407 = vmatpush1.bf16.msra.mxu0 %v8920_v27 }
 0x438   : > { %4450 = vmatpush1.bf16.msra.mxu1 %v8920_v27  ;;  %4408 = vmatprep.subr.bf16.mxu0 %v8925_v28 }
 0x439   : > { %4451 = vmatprep.subr.bf16.mxu1 %v8925_v28  ;;  %4438 = vmatprep.mubr.bf16.mxu0 %v8029_v38  ;;  %v8953_v38 = vld [vmem:[%s7064_s10 + $0x730] ss:$8 sps:$4 sm:$0xff]  }
 0x43a   : > { %4481 = vmatprep.mubr.bf16.mxu1 %v8292_v1 }
 0x43b   : > { %4409 = vmatpush1.bf16.msra.mxu0 %v8931_v45 }
 0x43c   : > { %4452 = vmatpush1.bf16.msra.mxu1 %v8931_v45  ;;  %4410 = vmatprep.subr.bf16.mxu0 %v8936_v49 }
 0x43d   : > { %4453 = vmatprep.subr.bf16.mxu1 %v8936_v49 }
 0x43f   : > { %4411 = vmatpush1.bf16.msra.mxu0 %v8943_v16 }
 0x440   : > { %4454 = vmatpush1.bf16.msra.mxu1 %v8943_v16  ;;  %4412 = vmatprep.subr.bf16.mxu0 %v8948_v55 }
 0x441   : > { %4455 = vmatprep.subr.bf16.mxu1 %v8948_v55 }
 0x443   : > { %4413 = vmatpush1.bf16.msra.mxu0 %v8953_v38 }
 0x444   : > { %4456 = vmatpush1.bf16.msra.mxu1 %v8953_v38  ;;  %4414 = vmatprep.subr.bf16.mxu0 %v8958_v25 }
 0x445   : > { %4457 = vmatprep.subr.bf16.mxu1 %v8958_v25 }
 0x447   : > { %4415 = vmatpush1.bf16.msra.mxu0 %v8963_v36 }
 0x448   : > { %4458 = vmatpush1.bf16.msra.mxu1 %v8963_v36  ;;  %4416 = vmatprep.subr.bf16.mxu0 %v8968_v46 }
 0x449   : > { %4459 = vmatprep.subr.bf16.mxu1 %v8968_v46  ;;  %v3668_v12 = vpop.f32.mrb[40].mxu0 }
 0x44a   : > { %v3711_v58 = vpop.f32.mrb[40].mxu1  ;;  %v8981_v23 = vadd.f32 %v3668_v12, %v8709_v56  ;;  %v3670_v59 = vpop.f32.mrb[41].mxu0  ;;  %v8995_v56 = vld [vmem:[%s7064_s10 + $0x760] ss:$8 sps:$4 sm:$0xff]   ;;  %v9198_v12 = vld [vmem:[%s7064_s10 + $0x824] ss:$8 sps:$4 sm:$0xff]  }
 0x44b   : > { %v8984_v24 = vadd.f32 %v3711_v58, %v8712_v21  ;;  %v3713_v62 = vpop.f32.mrb[41].mxu1  ;;  %v8987_v63 = vadd.f32 %v3670_v59, %v8715_v51  ;;  %v3672_v2 = vpop.f32.mrb[42].mxu0  ;;  %4417 = vmatpush1.bf16.msra.mxu0 %v8973_v47  ;;  %v9000_v51 = vld [vmem:[%s7064_s10 + $0x774] ss:$8 sps:$4 sm:$0xff]   ;;  %v9225_v59 = vld [vmem:[%s7064_s10 + $0x840] ss:$8 sps:$4 sm:$0xff]  }
 0x44c   : > { %v8990_v52 = vadd.f32 %v3713_v62, %v8718_v39  ;;  %v3715_v8 = vpop.f32.mrb[42].mxu1  ;;  %4460 = vmatpush1.bf16.msra.mxu1 %v8973_v47  ;;  %v3673_v21 = vpop.f32.mrb[43].mxu0  ;;  %4418 = vmatprep.subr.bf16.mxu0 %v8978_v11  ;;  %v9005_v39 = vld [vmem:[%s7064_s10 + $0x770] ss:$8 sps:$4 sm:$0xff]   ;;  %v9210_v58 = vld [vmem:[%s7064_s10 + $0x834] ss:$8 sps:$4 sm:$0xff]  }
 0x44d   : > { %v3716_v30 = vpop.f32.mrb[43].mxu1  ;;  %4461 = vmatprep.subr.bf16.mxu1 %v8978_v11  ;;  %v9230_v62 = vld [vmem:[%s7064_s10 + $0x854] ss:$8 sps:$4 sm:$0xff]   ;;  %v9235_v2 = vld [vmem:[%s7064_s10 + $0x850] ss:$8 sps:$4 sm:$0xff]  }
 0x44e   : > { %v9240_v8 = vld [vmem:[%s7064_s10 + $0x864] ss:$8 sps:$4 sm:$0xff]  }
 0x44f   : > { %4419 = vmatpush1.bf16.msra.mxu0 %v8995_v56 }
 0x450   : > { %4462 = vmatpush1.bf16.msra.mxu1 %v8995_v56  ;;  %4420 = vmatprep.subr.bf16.mxu0 %v9000_v51 }
 0x451   : > { %4463 = vmatprep.subr.bf16.mxu1 %v9000_v51 }
 0x453   : > { %4421 = vmatpush1.bf16.msra.mxu0 %v9005_v39 }
 0x454   : > { %4464 = vmatpush1.bf16.msra.mxu1 %v9005_v39  ;;  %4422 = vmatprep.subr.bf16.mxu0 %v9010_v17 }
 0x455   : > { %4465 = vmatprep.subr.bf16.mxu1 %v9010_v17 }
 0x457   : > { %4423 = vmatpush1.bf16.msra.mxu0 %v9015_v34 }
 0x458   : > { %4466 = vmatpush1.bf16.msra.mxu1 %v9015_v34  ;;  %4424 = vmatprep.subr.bf16.mxu0 %v9020_v22 }
 0x459   : > { %4467 = vmatprep.subr.bf16.mxu1 %v9020_v22 }
 0x45b   : > { %4425 = vmatpush1.bf16.msra.mxu0 %v9025_v35 }
 0x45c   : > { %4468 = vmatpush1.bf16.msra.mxu1 %v9025_v35  ;;  %4426 = vmatprep.subr.bf16.mxu0 %v9030_v42 }
 0x45d   : > { %4469 = vmatprep.subr.bf16.mxu1 %v9030_v42 }
 0x45f   : > { %4427 = vmatpush1.bf16.msra.mxu0 %v9035_v41 }
 0x460   : > { %4470 = vmatpush1.bf16.msra.mxu1 %v9035_v41  ;;  %4428 = vmatprep.subr.bf16.mxu0 %v9040_v31 }
 0x461   : > { %4471 = vmatprep.subr.bf16.mxu1 %v9040_v31 }
 0x463   : > { %4429 = vmatpush1.bf16.msra.mxu0 %v9045_v60 }
 0x464   : > { %4472 = vmatpush1.bf16.msra.mxu1 %v9045_v60  ;;  %4430 = vmatprep.subr.bf16.mxu0 %v9050_v40 }
 0x465   : > { %4473 = vmatprep.subr.bf16.mxu1 %v9050_v40 }
 0x467   : > { %4431 = vmatpush1.bf16.msra.mxu0 %v9055_v44 }
 0x468   : > { %4474 = vmatpush1.bf16.msra.mxu1 %v9055_v44  ;;  %4432 = vmatprep.subr.bf16.mxu0 %v9060_v57 }
 0x469   : > { %4475 = vmatprep.subr.bf16.mxu1 %v9060_v57 }
 0x46b   : > { %4433 = vmatpush1.bf16.msra.mxu0 %v9065_v6 }
 0x46c   : > { %4476 = vmatpush1.bf16.msra.mxu1 %v9065_v6  ;;  %4434 = vmatprep.subr.bf16.mxu0 %v9070_v61 }
 0x46d   : > { %4477 = vmatprep.subr.bf16.mxu1 %v9070_v61 }
 0x46f   : > { %4435 = vmatpush1.bf16.msra.mxu0 %v9076_v3 }
 0x470   : > { %4478 = vmatpush1.bf16.msra.mxu1 %v9076_v3  ;;  %4436 = vmatprep.subr.bf16.mxu0 %v9081_v19 }
 0x471   : > { %4479 = vmatprep.subr.bf16.mxu1 %v9081_v19 }
 0x473   : > { %4437 = vmatpush1.bf16.msra.mxu0 %v9086_v9 }
 0x474   : > { %4480 = vmatpush1.bf16.msra.mxu1 %v9086_v9  ;;  %4492 = vmatprep.subr.bf16.mxu0 %v8913_v53 }
 0x475   : > { %4563 = vmatprep.subr.bf16.mxu1 %v8913_v53 }
 0x476   : > { %4439 = vmatmul.mubr.bf16.vlgmr.msra.gmra.mrb[56].mxu0 %v8108_v4 }
 0x477   : > { %4482 = vmatmul.mubr.bf16.vlgmr.msra.gmra.mrb[56].mxu1 %v8375_v43  ;;  %4493 = vmatpush1.bf16.msra.mxu0 %v8920_v27 }
 0x478   : > { %4564 = vmatpush1.bf16.msra.mxu1 %v8920_v27  ;;  %4494 = vmatprep.subr.bf16.mxu0 %v8925_v28 }
 0x479   : > { %4565 = vmatprep.subr.bf16.mxu1 %v8925_v28  ;;  %4524 = vmatprep.mubr.bf16.mxu0 %v8831_v5 }
 0x47a   : > { %4595 = vmatprep.mubr.bf16.mxu1 %v9094_v20 }
 0x47b   : > { %4495 = vmatpush1.bf16.msra.mxu0 %v8931_v45 }
 0x47c   : > { %4566 = vmatpush1.bf16.msra.mxu1 %v8931_v45  ;;  %4496 = vmatprep.subr.bf16.mxu0 %v8936_v49 }
 0x47d   : > { %4567 = vmatprep.subr.bf16.mxu1 %v8936_v49 }
 0x47f   : > { %4497 = vmatpush1.bf16.msra.mxu0 %v8943_v16 }
 0x480   : > { %4568 = vmatpush1.bf16.msra.mxu1 %v8943_v16  ;;  %4498 = vmatprep.subr.bf16.mxu0 %v8948_v55 }
 0x481   : > { %4569 = vmatprep.subr.bf16.mxu1 %v8948_v55 }
 0x483   : > { %4499 = vmatpush1.bf16.msra.mxu0 %v8953_v38 }
 0x484   : > { %4570 = vmatpush1.bf16.msra.mxu1 %v8953_v38  ;;  %4500 = vmatprep.subr.bf16.mxu0 %v8958_v25 }
 0x485   : > { %4571 = vmatprep.subr.bf16.mxu1 %v8958_v25  ;;  %v9174_v25 = vld [vmem:[%s7064_s10 + $0x804] ss:$8 sps:$4 sm:$0xff]  }
 0x487   : > { %4501 = vmatpush1.bf16.msra.mxu0 %v8963_v36 }
 0x488   : > { %4572 = vmatpush1.bf16.msra.mxu1 %v8963_v36  ;;  %4502 = vmatprep.subr.bf16.mxu0 %v8968_v46 }
 0x489   : > { %4573 = vmatprep.subr.bf16.mxu1 %v8968_v46  ;;  %v3754_v4 = vpop.f32.mrb[44].mxu0  ;;  %v9181_v46 = vld [vmem:[%s7064_s10 + $0x800] ss:$8 sps:$4 sm:$0xff]  }
 0x48a   : > { %v3819_v5 = vpop.f32.mrb[44].mxu1  ;;  %v9121_v18 = vadd.f32 %v3754_v4, %v8857_v32  ;;  %v3756_v53 = vpop.f32.mrb[45].mxu0  ;;  %v9342_v4 = vld [vmem:[%s7064_s10 + $0x8e0] ss:$8 sps:$4 sm:$0xff]  }
 0x48b   : > { %v9124_v50 = vadd.f32 %v3819_v5, %v8860_v54  ;;  %v3821_v37 = vpop.f32.mrb[45].mxu1  ;;  %v9127_v27 = vadd.f32 %v3756_v53, %v8863_v0  ;;  %v3758_v45 = vpop.f32.mrb[46].mxu0  ;;  %4503 = vmatpush1.bf16.msra.mxu0 %v8973_v47  ;;  %v6251_v54 = vld [vmem:[%s7244_s14 + $0x8] ss:$8 sps:$4 sm:$0x18]   ;;  %v4943_v53 = vshrl.u32 %v5774_v13, 16 }
 0x48c   : > { %v9130_v28 = vadd.f32 %v3821_v37, %v8866_v26  ;;  %v3823_v49 = vpop.f32.mrb[46].mxu1  ;;  %4574 = vmatpush1.bf16.msra.mxu1 %v8973_v47  ;;  %v3759_v16 = vpop.f32.mrb[47].mxu0  ;;  %4504 = vmatprep.subr.bf16.mxu0 %v8978_v11  ;;  %v4546_v0 = vshrl.u32 %v6251_v54, 16  ;;  %v4549_v26 = vshll.u32 %v6251_v54, 16  ;;  %v9186_v47 = vld [vmem:[%s7064_s10 + $0x814] ss:$8 sps:$4 sm:$0xff]  }
 0x48d   : > { %v3824_v32 = vpop.f32.mrb[47].mxu1  ;;  %4575 = vmatprep.subr.bf16.mxu1 %v8978_v11  ;;  %v9193_v11 = vld [vmem:[%s7064_s10 + $0x810] ss:$8 sps:$4 sm:$0xff]   ;;  %v9347_v5 = vld [vmem:[%s7064_s10 + $0x8f4] ss:$8 sps:$4 sm:$0xff]   ;;  %v4946_v37 = vshll.u32 %v5774_v13, 16 }
 0x48e   : > { %v4548_v55 = vrot.slane %v4546_v0, 3  ;;  %v4551_v38 = vrot.slane %v4549_v26, 4  ;;  %v9352_v45 = vld [vmem:[%s7064_s10 + $0x8f0] ss:$8 sps:$4 sm:$0xff]   ;;  %v4945_v49 = vrot.slane %v4943_v53, 2 }
 0x48f   : > { %4505 = vmatpush1.bf16.msra.mxu0 %v8995_v56  ;;  %v4948_v16 = vrot.slane %v4946_v37, 3 }
 0x490   : > { %4576 = vmatpush1.bf16.msra.mxu1 %v8995_v56  ;;  %4506 = vmatprep.subr.bf16.mxu0 %v9000_v51  ;;  %v9176_v36 = vor.u32 %v4551_v38, %v4548_v55 }
 0x491   : > { %4577 = vmatprep.subr.bf16.mxu1 %v9000_v51  ;;  %v4949_v32 = vor.u32 %v4948_v16, %v4945_v49 }
 0x493   : > { %4507 = vmatpush1.bf16.msra.mxu0 %v9005_v39 }
 0x494   : > { %4578 = vmatpush1.bf16.msra.mxu1 %v9005_v39  ;;  %4508 = vmatprep.subr.bf16.mxu0 %v9010_v17 }
 0x495   : > { %4579 = vmatprep.subr.bf16.mxu1 %v9010_v17 }
 0x497   : > { %4509 = vmatpush1.bf16.msra.mxu0 %v9015_v34 }
 0x498   : > { %4580 = vmatpush1.bf16.msra.mxu1 %v9015_v34  ;;  %4510 = vmatprep.subr.bf16.mxu0 %v9020_v22 }
 0x499   : > { %4581 = vmatprep.subr.bf16.mxu1 %v9020_v22 }
 0x49b   : > { %4511 = vmatpush1.bf16.msra.mxu0 %v9025_v35 }
 0x49c   : > { %4582 = vmatpush1.bf16.msra.mxu1 %v9025_v35  ;;  %4512 = vmatprep.subr.bf16.mxu0 %v9030_v42 }
 0x49d   : > { %4583 = vmatprep.subr.bf16.mxu1 %v9030_v42 }
 0x49f   : > { %4513 = vmatpush1.bf16.msra.mxu0 %v9035_v41 }
 0x4a0   : > { %4584 = vmatpush1.bf16.msra.mxu1 %v9035_v41  ;;  %4514 = vmatprep.subr.bf16.mxu0 %v9040_v31 }
 0x4a1   : > { %4585 = vmatprep.subr.bf16.mxu1 %v9040_v31  ;;  %v9272_v31 = vld [vmem:[%s7064_s10 + $0x884] ss:$8 sps:$4 sm:$0xff]  }
 0x4a3   : > { %4515 = vmatpush1.bf16.msra.mxu0 %v9045_v60 }
 0x4a4   : > { %4586 = vmatpush1.bf16.msra.mxu1 %v9045_v60  ;;  %4516 = vmatprep.subr.bf16.mxu0 %v9050_v40  ;;  %v9277_v60 = vld [vmem:[%s7064_s10 + $0x880] ss:$8 sps:$4 sm:$0xff]  }
 0x4a5   : > { %4587 = vmatprep.subr.bf16.mxu1 %v9050_v40  ;;  %v9282_v40 = vld [vmem:[%s7064_s10 + $0x894] ss:$8 sps:$4 sm:$0xff]  }
 0x4a7   : > { %4517 = vmatpush1.bf16.msra.mxu0 %v9055_v44 }
 0x4a8   : > { %4588 = vmatpush1.bf16.msra.mxu1 %v9055_v44  ;;  %4518 = vmatprep.subr.bf16.mxu0 %v9060_v57  ;;  %v9287_v44 = vld [vmem:[%s7064_s10 + $0x890] ss:$8 sps:$4 sm:$0xff]  }
 0x4a9   : > { %4589 = vmatprep.subr.bf16.mxu1 %v9060_v57  ;;  %v9292_v57 = vld [vmem:[%s7064_s10 + $0x8a4] ss:$8 sps:$4 sm:$0xff]  }
 0x4ab   : > { %4519 = vmatpush1.bf16.msra.mxu0 %v9065_v6 }
 0x4ac   : > { %4590 = vmatpush1.bf16.msra.mxu1 %v9065_v6  ;;  %4520 = vmatprep.subr.bf16.mxu0 %v9070_v61  ;;  %v9297_v6 = vld [vmem:[%s7064_s10 + $0x8a0] ss:$8 sps:$4 sm:$0xff]  }
 0x4ad   : > { %4591 = vmatprep.subr.bf16.mxu1 %v9070_v61  ;;  %v9302_v61 = vld [vmem:[%s7064_s10 + $0x8b4] ss:$8 sps:$4 sm:$0xff]  }
 0x4af   : > { %4521 = vmatpush1.bf16.msra.mxu0 %v9076_v3 }
 0x4b0   : > { %4592 = vmatpush1.bf16.msra.mxu1 %v9076_v3  ;;  %4522 = vmatprep.subr.bf16.mxu0 %v9081_v19  ;;  %v9312_v3 = vld [vmem:[%s7064_s10 + $0x8c4] ss:$8 sps:$4 sm:$0xff]  }
 0x4b1   : > { %4593 = vmatprep.subr.bf16.mxu1 %v9081_v19  ;;  %v9317_v19 = vld [vmem:[%s7064_s10 + $0x8c0] ss:$8 sps:$4 sm:$0xff]  }
 0x4b3   : > { %4523 = vmatpush1.bf16.msra.mxu0 %v9086_v9 }
 0x4b4   : > { %4594 = vmatpush1.bf16.msra.mxu1 %v9086_v9  ;;  %4799 = vmatprep.subr.bf16.mxu0 %v9174_v25  ;;  %v9330_v9 = vld [vmem:[%s7064_s10 + $0x8d0] ss:$8 sps:$4 sm:$0xff]  }
 0x4b5   : > { %4842 = vmatprep.subr.bf16.mxu1 %v9174_v25 }
 0x4b6   : > { %4525 = vmatmul.mubr.bf16.vlgmr.msra.gmra.mrb[60].mxu0 %v8915_v14  ;;  %v9205_v14 = vld [vmem:[%s7064_s10 + $0x820] ss:$8 sps:$4 sm:$0xff]  }
 0x4b7   : > { %4596 = vmatmul.mubr.bf16.vlgmr.msra.gmra.mrb[60].mxu1 %v9176_v36  ;;  %4800 = vmatpush1.bf16.msra.mxu0 %v9181_v46 }
 0x4b8   : > { %4843 = vmatpush1.bf16.msra.mxu1 %v9181_v46  ;;  %4801 = vmatprep.subr.bf16.mxu0 %v9186_v47 }
 0x4b9   : > { %4844 = vmatprep.subr.bf16.mxu1 %v9186_v47  ;;  %4831 = vmatprep.mubr.bf16.mxu0 %v8292_v1  ;;  %v9215_v1 = vld [vmem:[%s7064_s10 + $0x830] ss:$8 sps:$4 sm:$0xff]  }
 0x4ba   : > { %4874 = vmatprep.mubr.bf16.mxu1 %v8559_v48  ;;  %v9220_v48 = vld [vmem:[%s7064_s10 + $0x844] ss:$8 sps:$4 sm:$0xff]  }
 0x4bb   : > { %4802 = vmatpush1.bf16.msra.mxu0 %v9193_v11 }
 0x4bc   : > { %4845 = vmatpush1.bf16.msra.mxu1 %v9193_v11  ;;  %4803 = vmatprep.subr.bf16.mxu0 %v9198_v12 }
 0x4bd   : > { %4846 = vmatprep.subr.bf16.mxu1 %v9198_v12 }
 0x4bf   : > { %4804 = vmatpush1.bf16.msra.mxu0 %v9205_v14 }
 0x4c0   : > { %4847 = vmatpush1.bf16.msra.mxu1 %v9205_v14  ;;  %4805 = vmatprep.subr.bf16.mxu0 %v9210_v58 }
 0x4c1   : > { %4848 = vmatprep.subr.bf16.mxu1 %v9210_v58 }
 0x4c3   : > { %4806 = vmatpush1.bf16.msra.mxu0 %v9215_v1 }
 0x4c4   : > { %4849 = vmatpush1.bf16.msra.mxu1 %v9215_v1  ;;  %4807 = vmatprep.subr.bf16.mxu0 %v9220_v48 }
 0x4c5   : > { %4850 = vmatprep.subr.bf16.mxu1 %v9220_v48 }
 0x4c7   : > { %4808 = vmatpush1.bf16.msra.mxu0 %v9225_v59 }
 0x4c8   : > { %4851 = vmatpush1.bf16.msra.mxu1 %v9225_v59  ;;  %4809 = vmatprep.subr.bf16.mxu0 %v9230_v62 }
 0x4c9   : > { %4852 = vmatprep.subr.bf16.mxu1 %v9230_v62  ;;  %v4055_v56 = vpop.f32.mrb[48].mxu0 }
 0x4ca   : > { %v4098_v21 = vpop.f32.mrb[48].mxu1  ;;  %v9243_v30 = vadd.f32 %v4055_v56, %v8981_v23  ;;  %v4057_v39 = vpop.f32.mrb[49].mxu0  ;;  %v9257_v23 = vld [vmem:[%s7064_s10 + $0x860] ss:$8 sps:$4 sm:$0xff]  }
 0x4cb   : > { %v9246_v51 = vadd.f32 %v4098_v21, %v8984_v24  ;;  %v4100_v17 = vpop.f32.mrb[49].mxu1  ;;  %v9249_v34 = vadd.f32 %v4057_v39, %v8987_v63  ;;  %v4059_v35 = vpop.f32.mrb[50].mxu0  ;;  %4810 = vmatpush1.bf16.msra.mxu0 %v9235_v2  ;;  %v9262_v63 = vld [vmem:[%s7064_s10 + $0x874] ss:$8 sps:$4 sm:$0xff]  }
 0x4cc   : > { %v9252_v22 = vadd.f32 %v4100_v17, %v8990_v52  ;;  %v4102_v42 = vpop.f32.mrb[50].mxu1  ;;  %4853 = vmatpush1.bf16.msra.mxu1 %v9235_v2  ;;  %v4060_v24 = vpop.f32.mrb[51].mxu0  ;;  %4811 = vmatprep.subr.bf16.mxu0 %v9240_v8  ;;  %v9267_v52 = vld [vmem:[%s7064_s10 + $0x870] ss:$8 sps:$4 sm:$0xff]  }
 0x4cd   : > { %v4103_v41 = vpop.f32.mrb[51].mxu1  ;;  %4854 = vmatprep.subr.bf16.mxu1 %v9240_v8 }
 0x4cf   : > { %4812 = vmatpush1.bf16.msra.mxu0 %v9257_v23 }
 0x4d0   : > { %4855 = vmatpush1.bf16.msra.mxu1 %v9257_v23  ;;  %4813 = vmatprep.subr.bf16.mxu0 %v9262_v63 }
 0x4d1   : > { %4856 = vmatprep.subr.bf16.mxu1 %v9262_v63 }
 0x4d3   : > { %4814 = vmatpush1.bf16.msra.mxu0 %v9267_v52 }
 0x4d4   : > { %4857 = vmatpush1.bf16.msra.mxu1 %v9267_v52  ;;  %4815 = vmatprep.subr.bf16.mxu0 %v9272_v31 }
 0x4d5   : > { %4858 = vmatprep.subr.bf16.mxu1 %v9272_v31 }
 0x4d7   : > { %4816 = vmatpush1.bf16.msra.mxu0 %v9277_v60 }
 0x4d8   : > { %4859 = vmatpush1.bf16.msra.mxu1 %v9277_v60  ;;  %4817 = vmatprep.subr.bf16.mxu0 %v9282_v40 }
 0x4d9   : > { %4860 = vmatprep.subr.bf16.mxu1 %v9282_v40 }
 0x4db   : > { %4818 = vmatpush1.bf16.msra.mxu0 %v9287_v44 }
 0x4dc   : > { %4861 = vmatpush1.bf16.msra.mxu1 %v9287_v44  ;;  %4819 = vmatprep.subr.bf16.mxu0 %v9292_v57 }
 0x4dd   : > { %4862 = vmatprep.subr.bf16.mxu1 %v9292_v57 }
 0x4df   : > { %4820 = vmatpush1.bf16.msra.mxu0 %v9297_v6 }
 0x4e0   : > { %4863 = vmatpush1.bf16.msra.mxu1 %v9297_v6  ;;  %4821 = vmatprep.subr.bf16.mxu0 %v9302_v61 }
 0x4e1   : > { %4864 = vmatprep.subr.bf16.mxu1 %v9302_v61 }
 0x4e3   : > { %4822 = vmatpush1.bf16.msra.mxu0 %v9307_v15 }
 0x4e4   : > { %4865 = vmatpush1.bf16.msra.mxu1 %v9307_v15  ;;  %4823 = vmatprep.subr.bf16.mxu0 %v9312_v3 }
 0x4e5   : > { %4866 = vmatprep.subr.bf16.mxu1 %v9312_v3 }
 0x4e7   : > { %4824 = vmatpush1.bf16.msra.mxu0 %v9317_v19 }
 0x4e8   : > { %4867 = vmatpush1.bf16.msra.mxu1 %v9317_v19  ;;  %4825 = vmatprep.subr.bf16.mxu0 %v9322_v33 }
 0x4e9   : > { %4868 = vmatprep.subr.bf16.mxu1 %v9322_v33 }
 0x4eb   : > { %4826 = vmatpush1.bf16.msra.mxu0 %v9330_v9 }
 0x4ec   : > { %4869 = vmatpush1.bf16.msra.mxu1 %v9330_v9  ;;  %4827 = vmatprep.subr.bf16.mxu0 %v9335_v10 }
 0x4ed   : > { %4870 = vmatprep.subr.bf16.mxu1 %v9335_v10 }
 0x4ef   : > { %4828 = vmatpush1.bf16.msra.mxu0 %v9342_v4 }
 0x4f0   : > { %4871 = vmatpush1.bf16.msra.mxu1 %v9342_v4  ;;  %4829 = vmatprep.subr.bf16.mxu0 %v9347_v5 }
 0x4f1   : > { %4872 = vmatprep.subr.bf16.mxu1 %v9347_v5 }
 0x4f3   : > { %4830 = vmatpush1.bf16.msra.mxu0 %v9352_v45 }
 0x4f4   : > { %4873 = vmatpush1.bf16.msra.mxu1 %v9352_v45  ;;  %4885 = vmatprep.subr.bf16.mxu0 %v9174_v25 }
 0x4f5   : > { %4952 = vmatprep.subr.bf16.mxu1 %v9174_v25 }
 0x4f6   : > { %4832 = vmatmul.mubr.bf16.vlgmr.msra.gmra.mrb[64].mxu0 %v8375_v43 }
 0x4f7   : > { %4875 = vmatmul.mubr.bf16.vlgmr.msra.gmra.mrb[64].mxu1 %v8642_v29  ;;  %4886 = vmatpush1.bf16.msra.mxu0 %v9181_v46 }
 0x4f8   : > { %4953 = vmatpush1.bf16.msra.mxu1 %v9181_v46  ;;  %4887 = vmatprep.subr.bf16.mxu0 %v9186_v47 }
 0x4f9   : > { %4954 = vmatprep.subr.bf16.mxu1 %v9186_v47  ;;  %4917 = vmatprep.mubr.bf16.mxu0 %v9094_v20 }
 0x4fa   : > { %4984 = vmatprep.mubr.bf16.mxu1 %v4949_v32 }
 0x4fb   : > { %4888 = vmatpush1.bf16.msra.mxu0 %v9193_v11 }
 0x4fc   : > { %4955 = vmatpush1.bf16.msra.mxu1 %v9193_v11  ;;  %4889 = vmatprep.subr.bf16.mxu0 %v9198_v12 }
 0x4fd   : > { %4956 = vmatprep.subr.bf16.mxu1 %v9198_v12 }
 0x4ff   : > { %4890 = vmatpush1.bf16.msra.mxu0 %v9205_v14 }
 0x500   : > { %4957 = vmatpush1.bf16.msra.mxu1 %v9205_v14  ;;  %4891 = vmatprep.subr.bf16.mxu0 %v9210_v58 }
 0x501   : > { %4958 = vmatprep.subr.bf16.mxu1 %v9210_v58 }
 0x503   : > { %4892 = vmatpush1.bf16.msra.mxu0 %v9215_v1 }
 0x504   : > { %4959 = vmatpush1.bf16.msra.mxu1 %v9215_v1  ;;  %4893 = vmatprep.subr.bf16.mxu0 %v9220_v48 }
 0x505   : > { %4960 = vmatprep.subr.bf16.mxu1 %v9220_v48 }
 0x507   : > { %4894 = vmatpush1.bf16.msra.mxu0 %v9225_v59 }
 0x508   : > { %4961 = vmatpush1.bf16.msra.mxu1 %v9225_v59  ;;  %4895 = vmatprep.subr.bf16.mxu0 %v9230_v62 }
 0x509   : > { %4962 = vmatprep.subr.bf16.mxu1 %v9230_v62  ;;  %v4151_v43 = vpop.f32.mrb[52].mxu0 }
 0x50a   : > { %v4204_v29 = vpop.f32.mrb[52].mxu1  ;;  %v9384_v20 = vadd.f32 %v4151_v43, %v9121_v18  ;;  %v4153_v0 = vpop.f32.mrb[53].mxu0 }
 0x50b   : > { %v9387_v54 = vadd.f32 %v4204_v29, %v9124_v50  ;;  %v4206_v26 = vpop.f32.mrb[53].mxu1  ;;  %v9390_v55 = vadd.f32 %v4153_v0, %v9127_v27  ;;  %v4155_v25 = vpop.f32.mrb[54].mxu0  ;;  %4896 = vmatpush1.bf16.msra.mxu0 %v9235_v2  ;;  %v5773_v50 = vcombine.low %v9325_v7, %v9325_v7 }
 0x50c   : > { %v9393_v38 = vadd.f32 %v4206_v26, %v9130_v28  ;;  %v4208_v46 = vpop.f32.mrb[54].mxu1  ;;  %4963 = vmatpush1.bf16.msra.mxu1 %v9235_v2  ;;  %v4156_v47 = vpop.f32.mrb[55].mxu0  ;;  %4897 = vmatprep.subr.bf16.mxu0 %v9240_v8 }
 0x50d   : > { %v4209_v18 = vpop.f32.mrb[55].mxu1  ;;  %4964 = vmatprep.subr.bf16.mxu1 %v9240_v8  ;;  %v4935_v27 = vshrl.u32 %v5773_v50, 16  ;;  %v4938_v28 = vshll.u32 %v5773_v50, 16 }
 0x50f   : > { %4898 = vmatpush1.bf16.msra.mxu0 %v9257_v23  ;;  %v4937_v11 = vrot.slane %v4935_v27, 2  ;;  %v4940_v12 = vrot.slane %v4938_v28, 3 }
 0x510   : > { %4965 = vmatpush1.bf16.msra.mxu1 %v9257_v23  ;;  %4899 = vmatprep.subr.bf16.mxu0 %v9262_v63 }
 0x511   : > { %4966 = vmatprep.subr.bf16.mxu1 %v9262_v63  ;;  %v4941_v14 = vor.u32 %v4940_v12, %v4937_v11 }
 0x513   : > { %4900 = vmatpush1.bf16.msra.mxu0 %v9267_v52 }
 0x514   : > { %4967 = vmatpush1.bf16.msra.mxu1 %v9267_v52  ;;  %4901 = vmatprep.subr.bf16.mxu0 %v9272_v31 }
 0x515   : > { %4968 = vmatprep.subr.bf16.mxu1 %v9272_v31 }
 0x517   : > { %4902 = vmatpush1.bf16.msra.mxu0 %v9277_v60 }
 0x518   : > { %4969 = vmatpush1.bf16.msra.mxu1 %v9277_v60  ;;  %4903 = vmatprep.subr.bf16.mxu0 %v9282_v40  ;;  %v4996_v60 = vlaneseq }
 0x519   : > { %4970 = vmatprep.subr.bf16.mxu1 %v9282_v40 }
 0x51a   : > { %v9451_v40 = vshrl.u32 %v4996_v60, 7 }
 0x51b   : > { %4904 = vmatpush1.bf16.msra.mxu0 %v9287_v44 }
 0x51c   : > { %4971 = vmatpush1.bf16.msra.mxu1 %v9287_v44  ;;  %4905 = vmatprep.subr.bf16.mxu0 %v9292_v57  ;;  %v4998_v44 = vsub.s32 0, %v9451_v40 }
 0x51d   : > { %4972 = vmatprep.subr.bf16.mxu1 %v9292_v57  ;;  %v1458_v57 = vld [vmem:[%s1444_s27] sm:$0x3] }
 0x51f   : > { %4906 = vmatpush1.bf16.msra.mxu0 %v9297_v6 }
 0x520   : > { %4973 = vmatpush1.bf16.msra.mxu1 %v9297_v6  ;;  %4907 = vmatprep.subr.bf16.mxu0 %v9302_v61  ;;  %v5002_v6 = vsub.s32 1, %v9451_v40 }
 0x521   : > { %4974 = vmatprep.subr.bf16.mxu1 %v9302_v61  ;;  %v4999_v61 = vrot.slane %v1458_v57, %v4998_v44 }
 0x523   : > { %4908 = vmatpush1.bf16.msra.mxu0 %v9307_v15 }
 0x524   : > { %4975 = vmatpush1.bf16.msra.mxu1 %v9307_v15  ;;  %4909 = vmatprep.subr.bf16.mxu0 %v9312_v3 }
 0x525   : > { %4976 = vmatprep.subr.bf16.mxu1 %v9312_v3 }
 0x527   : > { %4910 = vmatpush1.bf16.msra.mxu0 %v9317_v19 }
 0x528   : > { %4977 = vmatpush1.bf16.msra.mxu1 %v9317_v19  ;;  %4911 = vmatprep.subr.bf16.mxu0 %v9322_v33  ;;  %v5003_v19 = vrot.slane %v1458_v57, %v5002_v6 }
 0x529   : > { %4978 = vmatprep.subr.bf16.mxu1 %v9322_v33 }
 0x52b   : > { %4912 = vmatpush1.bf16.msra.mxu0 %v9330_v9 }
 0x52c   : > { %4979 = vmatpush1.bf16.msra.mxu1 %v9330_v9  ;;  %4913 = vmatprep.subr.bf16.mxu0 %v9335_v10 }
 0x52d   : > { %4980 = vmatprep.subr.bf16.mxu1 %v9335_v10 }
 0x52f   : > { %4914 = vmatpush1.bf16.msra.mxu0 %v9342_v4 }
 0x530   : > { %4981 = vmatpush1.bf16.msra.mxu1 %v9342_v4  ;;  %4915 = vmatprep.subr.bf16.mxu0 %v9347_v5 }
 0x531   : > { %4982 = vmatprep.subr.bf16.mxu1 %v9347_v5 }
 0x533   : > { %4916 = vmatpush1.bf16.msra.mxu0 %v9352_v45 }
 0x534   : > { %4983 = vmatpush1.bf16.msra.mxu1 %v9352_v45 }
 0x536   : > { %4918 = vmatmul.mubr.bf16.vlgmr.msra.gmra.mrb[68].mxu0 %v9176_v36 }
 0x537   : > { %4985 = vmatmul.mubr.bf16.vlgmr.msra.gmra.mrb[68].mxu1 %v4941_v14 }
 0x549   : > { %v4440_v58 = vpop.f32.mrb[56].mxu0 }
 0x54a   : > { %v4483_v1 = vpop.f32.mrb[56].mxu1  ;;  %v4447_v48 = vadd.f32 %v4440_v58, %v9243_v30  ;;  %v4442_v62 = vpop.f32.mrb[57].mxu0 }
 0x54b   : > { %v4490_v59 = vadd.f32 %v4483_v1, %v9246_v51  ;;  %v4485_v2 = vpop.f32.mrb[57].mxu1  ;;  %v4448_v8 = vadd.f32 %v4442_v62, %v9249_v34  ;;  %v4444_v21 = vpop.f32.mrb[58].mxu0 }
 0x54c   : > { %v4491_v56 = vadd.f32 %v4485_v2, %v9252_v22  ;;  %v4487_v39 = vpop.f32.mrb[58].mxu1  ;;  %v4445_v17 = vpop.f32.mrb[59].mxu0  ;;  %v6398_v2 = vmov 0.0  }
 0x54d   : > { %v4488_v35 = vpop.f32.mrb[59].mxu1 }
 0x589   : > { %v4526_v42 = vpop.f32.mrb[60].mxu0 }
 0x58a   : > { %v4597_v36 = vpop.f32.mrb[60].mxu1  ;;  %v4533_v23 = vadd.f32 %v4526_v42, %v9384_v20  ;;  %v4528_v30 = vpop.f32.mrb[61].mxu0 }
 0x58b   : > { %v4604_v24 = vadd.f32 %v4597_v36, %v9387_v54  ;;  %v4599_v41 = vpop.f32.mrb[61].mxu1  ;;  %v4534_v51 = vadd.f32 %v4528_v30, %v9390_v55  ;;  %v4530_v34 = vpop.f32.mrb[62].mxu0 }
 0x58c   : > { %v4605_v63 = vadd.f32 %v4599_v41, %v9393_v38  ;;  %v4601_v52 = vpop.f32.mrb[62].mxu1  ;;  %v4531_v22 = vpop.f32.mrb[63].mxu0  ;;  %v5028_v38 = vand.u32 1, %v9451_v40  ;;  %v5056_v34 = vld [vmem:[%s1449_s30] sm:$0x3] }
 0x58d   : > { %v4602_v31 = vpop.f32.mrb[63].mxu1  ;;  %v5061_v60 = vrot.slane %v5056_v34, %v4998_v44 }
 0x58e   : > { %vm5036_vm0 = vcmp.lt.s32.totalorder %v5028_v38, 1 }
 0x5c9   : > { %v4833_v15 = vpop.f32.mrb[64].mxu0 }
 0x5ca   : > { %v4876_v3 = vpop.f32.mrb[64].mxu1  ;;  %v4840_v33 = vadd.f32 %v4833_v15, %v4447_v48  ;;  %v4835_v9 = vpop.f32.mrb[65].mxu0 }
 0x5cb   : > { %v4883_v7 = vadd.f32 %v4876_v3, %v4490_v59  ;;  %v4878_v10 = vpop.f32.mrb[65].mxu1  ;;  %v4841_v13 = vadd.f32 %v4835_v9, %v4448_v8  ;;  %v4837_v5 = vpop.f32.mrb[66].mxu0  ;;  %v5775_v8 = vsel %vm5036_vm0, 1.0, %v6398_v2 }
 0x5cc   : > { %v4884_v4 = vadd.f32 %v4878_v10, %v4491_v56  ;;  %v4880_v53 = vpop.f32.mrb[66].mxu1  ;;  %v5006_v37 = vadd.f32 %v4999_v61, %v4840_v33  ;;  %v4838_v49 = vpop.f32.mrb[67].mxu0 }
 0x5cd   : > { %v5008_v45 = vadd.f32 %v4999_v61, %v4883_v7  ;;  %v4881_v16 = vpop.f32.mrb[67].mxu1  ;;  %v5007_v32 = vadd.f32 %v5003_v19, %v4841_v13 }
 0x5ce   : > { %v5009_v43 = vadd.f32 %v5003_v19, %v4884_v4 }
 0x5cf   : > { %v5010_v29 = vmax.f32 %v5006_v37, %v5008_v45 }
 0x5d0   : > { %v5011_v20 = vmax.f32 %v5007_v32, %v5009_v43 }
 0x609   : > { %v4919_v54 = vpop.f32.mrb[68].mxu0 }
 0x60a   : > { %v4986_v0 = vpop.f32.mrb[68].mxu1  ;;  %v4926_v26 = vadd.f32 %v4919_v54, %v4533_v23  ;;  %v4921_v25 = vpop.f32.mrb[69].mxu0 }
 0x60b   : > { %v4993_v55 = vadd.f32 %v4986_v0, %v4604_v24  ;;  %v4988_v46 = vpop.f32.mrb[69].mxu1  ;;  %v4927_v47 = vadd.f32 %v4921_v25, %v4534_v51  ;;  %v4923_v50 = vpop.f32.mrb[70].mxu0 }
 0x60c   : > { %v4994_v18 = vadd.f32 %v4988_v46, %v4605_v63  ;;  %v4990_v27 = vpop.f32.mrb[70].mxu1  ;;  %v5012_v28 = vadd.f32 %v4999_v61, %v4926_v26  ;;  %v4924_v11 = vpop.f32.mrb[71].mxu0 }
 0x60d   : > { %v4991_v12 = vpop.f32.mrb[71].mxu1  ;;  %v5013_v14 = vadd.f32 %v5003_v19, %v4927_v47  ;;  %v5016_v1 = vadd.f32 %v4999_v61, %v4993_v55  ;;  %v5065_v61 = vrot.slane %v5056_v34, %v5002_v6 }
 0x60e   : > { %v5014_v58 = vmax.f32 %v5010_v29, %v5012_v28  ;;  %v5017_v59 = vadd.f32 %v5003_v19, %v4994_v18 }
 0x60f   : > { %v5015_v48 = vmax.f32 %v5011_v20, %v5013_v14 }
 0x610   : > { %v5018_v62 = vmax.f32 %v5014_v58, %v5016_v1 }
 0x611   : > { %v5019_v56 = vmax.f32 %v5015_v48, %v5017_v59 }
 0x612   : > { %v5020_v21 = vmax.f32 %v5018_v62, 0.0 }
 0x613   : > { %v5021_v39 = vmax.f32 %v5019_v56, 0.0 }
 0x614   : > { %v5039_v17 = vmul.f32 %v5775_v8, %v5020_v21 }
 0x615   : > { %v5040_v35 = vmul.f32 %v5775_v8, %v5021_v39 }
 0x616   : > { %v5042_v42 = vsel %vm5041_vm1, %v5039_v17, 0.0 }
 0x617   : > { %v5043_v36 = vrot.slane %v5042_v42, 4  ;;  %v5049_v23 = vsel %vm5041_vm1, %v5040_v35, 0.0 }
 0x618   : > { %v5050_v24 = vrot.slane %v5049_v23, 4 }
 0x619   : > { %v5044_v30 = vadd.f32 %v5043_v36, %v5042_v42 }
 0x61a   : > { %v5051_v41 = vadd.f32 %v5050_v24, %v5049_v23 }
 0x61b   : > { %v5045_v51 = vrot.slane %v5044_v30, 2 }
 0x61c   : > { %v5052_v63 = vrot.slane %v5051_v41, 2 }
 0x61d   : > { %v5046_v52 = vadd.f32 %v5045_v51, %v5044_v30 }
 0x61e   : > { %v5053_v22 = vadd.f32 %v5052_v63, %v5051_v41 }
 0x61f   : > { %v5047_v31 = vrot.slane %v5046_v52, 1 }
 0x620   : > { %v5054_v57 = vrot.slane %v5053_v22, 1 }
 0x621   : > { %v5048_v15 = vadd.f32 %v5047_v31, %v5046_v52 }
 0x622   : > { %v5055_v3 = vadd.f32 %v5054_v57, %v5053_v22 }
 0x623   : > { %v5068_v19 = vmul.f32 %v5061_v60, %v5048_v15 }
 0x624   : > { %v5069_v33 = vmul.f32 %v5065_v61, %v5055_v3 }
 0x625   : > { %v5071_v7 = vsel %vm5070_vm2, %v5068_v19, 0.0 }
 0x626   : > { %v5072_v9 = vsel %vm5070_vm2, %v5069_v33, 0.0 }
 0x627   : > { %v5073_v10 = vadd.f32 %v5072_v9, %v5071_v7 }
 0x629   : > { %5074 = vadd.xlane.f32.xlu0 %v5073_v10 }
 0x6b6   : > { %v5075_v40 = vpop.xlane.xlu0 %5074 }
 0x6b7   : > { %5077 = vst.msk [vmem:[%s1457_s9] sm:$0x1] %vm5076_vm3, %v5075_v40 }
 0x6b8 PF: > { %s14_s21 = sadd.s32 1, %s6396_s21   ;;  %s9567_s15 = smov %s6376_s16 }
 0x6b9   : > { %p11_p13 = scmp.ge.s32.totalorder %s14_s21, 6   ;;  %s9568_s16 = smov %s6473_s26 }
 0x6ba   : > { %s9569_s17 = smov %s6388_s19  ;;  %s9570_s18 = smov %s6392_s20 }
 0x6bb   : > { %s9571_s19 = smov %s9574_s22  ;;  %s9572_s20 = smov %s9578_s23 }
 0x6bc   :  { %13 = sbr.rel (!%p11_p13) target bundleno = 4 (0x4), region = 126 }

</bundles_post_ra>
